<compile_context>
chip_gen: v7x
topology: tpu7x:2x2x1
jax: 0.10.0
libtpu: 0.0.40
codegen_flags: <defaults>
</compile_context>

<pallas_src>
import functools

import numpy as np
import jax
import jax.numpy as jnp
from jax import lax
from jax.experimental import pallas as pl
from jax.experimental.pallas import tpu as pltpu

EXPANSION = 11          # CostVolume_Mono_Pyramid.expansion
NEG_SLOPE = 0.01        # nn.LeakyReLU default negative_slope
EPS = 1e-5              # GroupNorm / BatchNorm default eps


# -----------------------------------------------------------------------------
# Kernel A: derivative features + 3x(grouped conv3x3 + GroupNorm + LeakyReLU)
#           + grouped 1x1 conv.  One grid step per batch element.
# -----------------------------------------------------------------------------
def _cv_feature_kernel(x_ref, masks_ref, w1_ref, w2_ref, w3_ref, w4_ref, a_ref,
                       g1_ref, b1_ref, g2_ref, b2_ref, g3_ref, b3_ref, o_ref,
                       *, width, hw, hw_pad):
    need_pad_mask = (hw_pad != hw)

    # Hoisted once per grid step.
    masks = [masks_ref[pl.ds(t, 1), :] for t in range(9)]     # each (1, HWp)
    offs = [((t // 3) - 1) * width + ((t % 3) - 1) for t in range(9)]
    a_m = a_ref[...]                                          # (C, C) group avg
    w4_m = w4_ref[...]                                        # (D, C)
    valid = masks[4]                                          # 1 on valid lanes

    def mm(a, b):
        return jnp.dot(a, b, preferred_element_type=jnp.float32)

    def lrelu(v):
        return jnp.where(v >= 0.0, v, NEG_SLOPE * v)

    def shift_tap(arr, t):
        # shifted[p] = arr[p + dh*W + dw] with zero padding at image borders.
        off = offs[t]
        if off == 0:
            rolled = arr
            if not need_pad_mask:
                return rolled                       # center tap, no padding
        else:
            rolled = pltpu.roll(arr, shift=(-off) % hw_pad, axis=1)
        return rolled * masks[t]

    def gconv3x3(arr, w_ref):
        # Fold the 9 taps into a single K = 9*C matmul.
        stacked = jnp.concatenate([shift_tap(arr, t) for t in range(9)], axis=0)
        return mm(w_ref[...], stacked)              # (C, 9C) @ (9C, HWp)

    def group_norm(arr, gamma, beta):
        # Lane reduction first (off the MXU), then a tiny group-average matmul.
        s = jnp.sum(arr, axis=1, keepdims=True)             # (C, 1)
        s2 = jnp.sum(arr * arr, axis=1, keepdims=True)      # (C, 1)
        mean = mm(a_m, s)                                   # (C, 1)
        ex2 = mm(a_m, s2)                                   # (C, 1)
        var = jnp.maximum(ex2 - mean * mean, 0.0)           # clamp: no NaN rsqrt
        scale = lax.rsqrt(var + EPS) * gamma
        return (arr - mean) * scale + beta

    x = x_ref[0]                                            # (D, HWp)

    # Fixed depthwise second-derivative stencils (kernel_x along H, kernel_y along W)
    dx = 2.0 * x - shift_tap(x, 1) - shift_tap(x, 7)
    dy = 2.0 * x - shift_tap(x, 3) - shift_tap(x, 5)
    dxx = 2.0 * dx - shift_tap(dx, 1) - shift_tap(dx, 7)
    dyy = 2.0 * dy - shift_tap(dy, 3) - shift_tap(dy, 5)
    dxy = 2.0 * dx - shift_tap(dx, 3) - shift_tap(dx, 5)

    # torch: cat along a new dim then reshape -> channel index = feat*D + disp
    feats = jnp.concatenate(
        [dx, dy, dxx, dyy, dxy,
         dx * dx, dy * dy, dxx * dxx, dyy * dyy, dxy * dxy, dxx * dyy],
        axis=0)                                             # (C, HWp)

    h = lrelu(group_norm(gconv3x3(feats, w1_ref), g1_ref[...], b1_ref[...]))
    if need_pad_mask:
        h = h * valid           # keep padding lanes zero for the next GN sums
    h = lrelu(group_norm(gconv3x3(h, w2_ref), g2_ref[...], b2_ref[...]))
    if need_pad_mask:
        h = h * valid
    h = lrelu(group_norm(gconv3x3(h, w3_ref), g3_ref[...], b3_ref[...]))
    if need_pad_mask:
        h = h * valid

    # grouped 1x1 conv -> un-normalized (pre-BatchNorm) output, (D, HWp)
    o_ref[0] = mm(w4_m, h)


# -----------------------------------------------------------------------------
# Kernel B: BatchNorm (precomputed per-channel scale/shift) + LeakyReLU.
# -----------------------------------------------------------------------------
def _bn_lrelu_kernel(y_ref, sc_ref, sh_ref, o_ref):
    z = y_ref[0] * sc_ref[...] + sh_ref[...]
    o_ref[0] = jnp.where(z >= 0.0, z, NEG_SLOPE * z)


# -----------------------------------------------------------------------------
# Wrapper-side constant construction (pure glue, tiny).
# -----------------------------------------------------------------------------
def _build_masks(h, w, hw_pad):
    # masks[t, p] = 1 iff p is a valid (non-padding) pixel AND its tap-t source
    # (h+dh, w+dw) is inside the image; 0 otherwise.
    hw = h * w
    m = np.zeros((9, hw_pad), np.float32)
    hh = np.arange(hw) // w
    ww = np.arange(hw) % w
    for kh_i in range(3):
        for kw_i in range(3):
            dh, dw = kh_i - 1, kw_i - 1
            t = kh_i * 3 + kw_i
            valid = ((hh + dh >= 0) & (hh + dh < h) &
                     (ww + dw >= 0) & (ww + dw < w))
            m[t, :hw] = valid.astype(np.float32)
    return jnp.asarray(m)


def _fold_taps(wt):
    # wt: (C, EXPANSION, 3, 3) grouped-conv weight -> one dense (C, 9*C) matrix
    # whose column block t*C..(t+1)*C holds the block-diagonal tap-t weights.
    wn = np.asarray(wt)
    c = wn.shape[0]
    out = np.zeros((c, 9 * c), np.float32)
    for o in range(c):
        g = o // EXPANSION
        for kh_i in range(3):
            for kw_i in range(3):
                t = kh_i * 3 + kw_i
                out[o, t * c + g * EXPANSION:t * c + (g + 1) * EXPANSION] = \
                    wn[o, :, kh_i, kw_i]
    return jnp.asarray(out)


def _dense_1x1(wt):
    # wt: (D, EXPANSION, 1, 1) grouped 1x1 conv weight -> dense (D, D*EXPANSION)
    wn = np.asarray(wt)
    d = wn.shape[0]
    out = np.zeros((d, d * EXPANSION), np.float32)
    for o in range(d):
        out[o, o * EXPANSION:(o + 1) * EXPANSION] = wn[o, :, 0, 0]
    return jnp.asarray(out)


def init_params(max_disp, key):
    c = max_disp * EXPANSION
    ks = jax.random.split(key, 12)
    w1 = 0.15 * jax.random.normal(ks[0], (c, EXPANSION, 3, 3), jnp.float32)
    w2 = 0.15 * jax.random.normal(ks[1], (c, EXPANSION, 3, 3), jnp.float32)
    w3 = 0.15 * jax.random.normal(ks[2], (c, EXPANSION, 3, 3), jnp.float32)
    w4 = 0.30 * jax.random.normal(ks[3], (max_disp, EXPANSION, 1, 1), jnp.float32)
    g1 = 1.0 + 0.1 * jax.random.normal(ks[4], (c,), jnp.float32)
    b1 = 0.05 * jax.random.normal(ks[5], (c,), jnp.float32)
    g2 = 1.0 + 0.1 * jax.random.normal(ks[6], (c,), jnp.float32)
    b2 = 0.05 * jax.random.normal(ks[7], (c,), jnp.float32)
    g3 = 1.0 + 0.1 * jax.random.normal(ks[8], (c,), jnp.float32)
    b3 = 0.05 * jax.random.normal(ks[9], (c,), jnp.float32)
    bng = 1.0 + 0.1 * jax.random.normal(ks[10], (max_disp,), jnp.float32)
    bnb = 0.05 * jax.random.normal(ks[11], (max_disp,), jnp.float32)
    # fixed (non-trainable) derivative kernels from __init__
    kx = np.zeros((max_disp, 1, 3, 3), np.float32)
    kx[:, :, 0, 1] = -1.0; kx[:, :, 1, 1] = 2.0; kx[:, :, 2, 1] = -1.0
    ky = np.zeros((max_disp, 1, 3, 3), np.float32)
    ky[:, :, 1, 0] = -1.0; ky[:, :, 1, 1] = 2.0; ky[:, :, 1, 2] = -1.0
    raw = dict(w1=w1, w2=w2, w3=w3, w4=w4, g1=g1, b1=b1, g2=g2, b2=b2,
               g3=g3, b3=b3, bng=bng, bnb=bnb,
               kx=jnp.asarray(kx), ky=jnp.asarray(ky))
    packed = dict(
        w1d=_fold_taps(w1), w2d=_fold_taps(w2), w3d=_fold_taps(w3),
        w4d=_dense_1x1(w4),
        g1=g1.reshape(c, 1), b1=b1.reshape(c, 1),
        g2=g2.reshape(c, 1), b2=b2.reshape(c, 1),
        g3=g3.reshape(c, 1), b3=b3.reshape(c, 1),
        bng=bng, bnb=bnb)
    return raw, packed


# -----------------------------------------------------------------------------
# Per-scale forward.
# -----------------------------------------------------------------------------
def cost_volume_scale(x, packed, max_disp):
    n, d, h, w = x.shape
    assert d == max_disp, "input channel dim must equal max_disp (grouped conv)"
    hw = h * w
    hw_pad = ((hw + 127) // 128) * 128          # lane-dense spatial dim
    c = d * EXPANSION

    masks = _build_masks(h, w, hw_pad)          # (9, HWp)
    idx = np.arange(c)
    a_np = (idx[:, None] // EXPANSION == idx[None, :] // EXPANSION)
    a_mat = jnp.asarray(a_np.astype(np.float32) / float(EXPANSION * hw))

    xf = x.reshape(n, d, hw).astype(jnp.float32)
    if hw_pad != hw:
        xf = jnp.pad(xf, ((0, 0), (0, 0), (0, hw_pad - hw)))

    kern_a = functools.partial(_cv_feature_kernel, width=w, hw=hw, hw_pad=hw_pad)
    in_specs = [
        pl.BlockSpec((1, d, hw_pad), lambda i: (i, 0, 0)),   # x (per batch elem)
        pl.BlockSpec((9, hw_pad), lambda i: (0, 0)),         # shift masks
        pl.BlockSpec((c, 9 * c), lambda i: (0, 0)),          # w1 folded
        pl.BlockSpec((c, 9 * c), lambda i: (0, 0)),          # w2 folded
        pl.BlockSpec((c, 9 * c), lambda i: (0, 0)),          # w3 folded
        pl.BlockSpec((d, c), lambda i: (0, 0)),              # w4 (1x1)
        pl.BlockSpec((c, c), lambda i: (0, 0)),              # group-avg matrix
    ] + [pl.BlockSpec((c, 1), lambda i: (0, 0)) for _ in range(6)]  # GN affine

    y_unnorm = pl.pallas_call(
        kern_a,
        out_shape=jax.ShapeDtypeStruct((n, d, hw_pad), jnp.float32),
        grid=(n,),
        in_specs=in_specs,
        out_specs=pl.BlockSpec((1, d, hw_pad), lambda i: (i, 0, 0)),
        compiler_params=pltpu.CompilerParams(dimension_semantics=("parallel",)),
    )(xf, masks, packed['w1d'], packed['w2d'], packed['w3d'], packed['w4d'],
      a_mat, packed['g1'], packed['b1'], packed['g2'], packed['b2'],
      packed['g3'], packed['b3'])

    # BatchNorm2d with batch statistics (training mode) -- tiny reduction in XLA
    # over the valid lanes; normalization + LeakyReLU applied in kernel B.
    # TODO(synk): running_mean/running_var buffer updates (train-mode side
    # effect) are not modeled.
    yv = y_unnorm[:, :, :hw]
    mean = jnp.mean(yv, axis=(0, 2))
    var = jnp.var(yv, axis=(0, 2))
    inv = lax.rsqrt(var + EPS)
    scale = (packed['bng'] * inv).reshape(d, 1)
    shift = (packed['bnb'] - mean * packed['bng'] * inv).reshape(d, 1)

    out = pl.pallas_call(
        _bn_lrelu_kernel,
        out_shape=jax.ShapeDtypeStruct((n, d, hw_pad), jnp.float32),
        grid=(n,),
        in_specs=[pl.BlockSpec((1, d, hw_pad), lambda i: (i, 0, 0)),
                  pl.BlockSpec((d, 1), lambda i: (0, 0)),
                  pl.BlockSpec((d, 1), lambda i: (0, 0))],
        out_specs=pl.BlockSpec((1, d, hw_pad), lambda i: (i, 0, 0)),
        compiler_params=pltpu.CompilerParams(dimension_semantics=("parallel",)),
    )(y_unnorm, scale, shift)

    return out[:, :, :hw].reshape(n, d, h, w)


def cost_volume_mono_pyramid(xs, packed, max_disp):
    return [cost_volume_scale(x, packed, max_disp) for x in xs]


# -----------------------------------------------------------------------------
# Plain-JAX reference (mirrors the PyTorch module) for a sanity check.
# -----------------------------------------------------------------------------
def _ref_scale(x, raw, max_disp):
    n, d, h, w = x.shape

    def gconv(inp, wt, groups, pad):
        return lax.conv_general_dilated(
            inp, wt, window_strides=(1, 1), padding=[(pad, pad), (pad, pad)],
            dimension_numbers=('NCHW', 'OIHW', 'NCHW'),
            feature_group_count=groups)

    dx = gconv(x, raw['kx'], d, 1)
    dy = gconv(x, raw['ky'], d, 1)
    dxx = gconv(dx, raw['kx'], d, 1)
    dyy = gconv(dy, raw['ky'], d, 1)
    dxy = gconv(dx, raw['ky'], d, 1)
    feats = jnp.stack([dx, dy, dxx, dyy, dxy, dx * dx, dy * dy,
                       dxx * dxx, dyy * dyy, dxy * dxy, dxx * dyy], axis=1)
    feats = feats.reshape(n, EXPANSION * d, h, w)

    def block(hh, wt, gamma, beta):
        hh = gconv(hh, wt, d, 1)
        hg = hh.reshape(n, d, EXPANSION, h, w)
        mean = hg.mean(axis=(2, 3, 4), keepdims=True)
        var = hg.var(axis=(2, 3, 4), keepdims=True)
        hg = (hg - mean) * lax.rsqrt(var + EPS)
        hh = hg.reshape(n, EXPANSION * d, h, w)
        hh = hh * gamma[None, :, None, None] + beta[None, :, None, None]
        return jnp.where(hh >= 0, hh, NEG_SLOPE * hh)

    o = block(feats, raw['w1'], raw['g1'], raw['b1'])
    o = block(o, raw['w2'], raw['g2'], raw['b2'])
    o = block(o, raw['w3'], raw['g3'], raw['b3'])
    y = gconv(o, raw['w4'], d, 0)
    mean = y.mean(axis=(0, 2, 3), keepdims=True)
    var = y.var(axis=(0, 2, 3), keepdims=True)
    y = (y - mean) * lax.rsqrt(var + EPS)
    y = y * raw['bng'][None, :, None, None] + raw['bnb'][None, :, None, None]
    return jnp.where(y >= 0, y, NEG_SLOPE * y)


if __name__ == "__main__":
    max_disp = 8
    n_batch = 2
    key = jax.random.PRNGKey(0)
    k_par, k_x0, k_x1 = jax.random.split(key, 3)

    # two pyramid scales; input channel dim == max_disp (required by the module)
    xs = [jax.random.normal(k_x0, (n_batch, max_disp, 16, 16), jnp.float32),
          jax.random.normal(k_x1, (n_batch, max_disp, 8, 8), jnp.float32)]

    raw, packed = init_params(max_disp, k_par)

    outs = cost_volume_mono_pyramid(xs, packed, max_disp)
    outs = [jax.block_until_ready(o) for o in outs]

    # sanity check against a plain-JAX reference of the PyTorch forward
    for x, o in zip(xs, outs):
        ref = jax.block_until_ready(_ref_scale(x, raw, max_disp))
        np.testing.assert_allclose(np.asarray(o), np.asarray(ref),
                                   rtol=2e-2, atol=2e-2)

    print("KERNEL_OK")
</pallas_src>

<mosaic_0001>
module attributes {stable_mosaic.version = 11 : i64} {
  func.func @_cv_feature_kernel(%arg0: i32, %arg1: memref<1x8x256xf32, #tpu.memory_space<vmem>>, %arg2: memref<9x256xf32, #tpu.memory_space<vmem>>, %arg3: memref<88x792xf32, #tpu.memory_space<vmem>>, %arg4: memref<88x792xf32, #tpu.memory_space<vmem>>, %arg5: memref<88x792xf32, #tpu.memory_space<vmem>>, %arg6: memref<8x88xf32, #tpu.memory_space<vmem>>, %arg7: memref<88x88xf32, #tpu.memory_space<vmem>>, %arg8: memref<88x1xf32, #tpu.memory_space<vmem>>, %arg9: memref<88x1xf32, #tpu.memory_space<vmem>>, %arg10: memref<88x1xf32, #tpu.memory_space<vmem>>, %arg11: memref<88x1xf32, #tpu.memory_space<vmem>>, %arg12: memref<88x1xf32, #tpu.memory_space<vmem>>, %arg13: memref<88x1xf32, #tpu.memory_space<vmem>>, %arg14: memref<1x8x256xf32, #tpu.memory_space<vmem>>) attributes {dimension_semantics = [#tpu.dimension_semantics<parallel>], iteration_bounds = array<i64: 2>, scalar_prefetch = 0 : i64, scratch_operands = 0 : i64, tpu.core_type = #tpu.core_type<tc>, window_params = [{transform_indices = @transform_0, window_bounds = array<i64: 1, 8, 256>}, {pipeline_mode = #tpu.pipeline_mode<synchronous>, transform_indices = @transform_1, window_bounds = array<i64: 9, 256>}, {pipeline_mode = #tpu.pipeline_mode<synchronous>, transform_indices = @transform_2, window_bounds = array<i64: 88, 792>}, {pipeline_mode = #tpu.pipeline_mode<synchronous>, transform_indices = @transform_3, window_bounds = array<i64: 88, 792>}, {pipeline_mode = #tpu.pipeline_mode<synchronous>, transform_indices = @transform_4, window_bounds = array<i64: 88, 792>}, {pipeline_mode = #tpu.pipeline_mode<synchronous>, transform_indices = @transform_5, window_bounds = array<i64: 8, 88>}, {pipeline_mode = #tpu.pipeline_mode<synchronous>, transform_indices = @transform_6, window_bounds = array<i64: 88, 88>}, {pipeline_mode = #tpu.pipeline_mode<synchronous>, transform_indices = @transform_7, window_bounds = array<i64: 88, 1>}, {pipeline_mode = #tpu.pipeline_mode<synchronous>, transform_indices = @transform_8, window_bounds = array<i64: 88, 1>}, {pipeline_mode = #tpu.pipeline_mode<synchronous>, transform_indices = @transform_9, window_bounds = array<i64: 88, 1>}, {pipeline_mode = #tpu.pipeline_mode<synchronous>, transform_indices = @transform_10, window_bounds = array<i64: 88, 1>}, {pipeline_mode = #tpu.pipeline_mode<synchronous>, transform_indices = @transform_11, window_bounds = array<i64: 88, 1>}, {pipeline_mode = #tpu.pipeline_mode<synchronous>, transform_indices = @transform_12, window_bounds = array<i64: 88, 1>}, {transform_indices = @transform_13, window_bounds = array<i64: 1, 8, 256>}]} {
    %c0 = arith.constant 0 : index
    %c0_0 = arith.constant 0 : index
    %0 = vector.load %arg2[%c0, %c0_0] : memref<9x256xf32, #tpu.memory_space<vmem>>, vector<1x256xf32>
    %c1 = arith.constant 1 : index
    %c0_1 = arith.constant 0 : index
    %1 = vector.load %arg2[%c1, %c0_1] : memref<9x256xf32, #tpu.memory_space<vmem>>, vector<1x256xf32>
    %c2 = arith.constant 2 : index
    %c0_2 = arith.constant 0 : index
    %2 = vector.load %arg2[%c2, %c0_2] : memref<9x256xf32, #tpu.memory_space<vmem>>, vector<1x256xf32>
    %c3 = arith.constant 3 : index
    %c0_3 = arith.constant 0 : index
    %3 = vector.load %arg2[%c3, %c0_3] : memref<9x256xf32, #tpu.memory_space<vmem>>, vector<1x256xf32>
    %c5 = arith.constant 5 : index
    %c0_4 = arith.constant 0 : index
    %4 = vector.load %arg2[%c5, %c0_4] : memref<9x256xf32, #tpu.memory_space<vmem>>, vector<1x256xf32>
    %c6 = arith.constant 6 : index
    %c0_5 = arith.constant 0 : index
    %5 = vector.load %arg2[%c6, %c0_5] : memref<9x256xf32, #tpu.memory_space<vmem>>, vector<1x256xf32>
    %c7 = arith.constant 7 : index
    %c0_6 = arith.constant 0 : index
    %6 = vector.load %arg2[%c7, %c0_6] : memref<9x256xf32, #tpu.memory_space<vmem>>, vector<1x256xf32>
    %c8 = arith.constant 8 : index
    %c0_7 = arith.constant 0 : index
    %7 = vector.load %arg2[%c8, %c0_7] : memref<9x256xf32, #tpu.memory_space<vmem>>, vector<1x256xf32>
    %c0_8 = arith.constant 0 : index
    %c0_9 = arith.constant 0 : index
    %8 = vector.load %arg7[%c0_8, %c0_9] : memref<88x88xf32, #tpu.memory_space<vmem>>, vector<88x88xf32>
    %c0_10 = arith.constant 0 : index
    %c0_11 = arith.constant 0 : index
    %9 = vector.load %arg6[%c0_10, %c0_11] : memref<8x88xf32, #tpu.memory_space<vmem>>, vector<8x88xf32>
    %c0_12 = arith.constant 0 : index
    %c0_13 = arith.constant 0 : index
    %c0_14 = arith.constant 0 : index
    %10 = vector.load %arg1[%c0_12, %c0_13, %c0_14] : memref<1x8x256xf32, #tpu.memory_space<vmem>>, vector<1x8x256xf32>
    %11 = vector.shape_cast %10 : vector<1x8x256xf32> to vector<8x256xf32>
    %cst = arith.constant 2.000000e+00 : f32
    %12 = vector.broadcast %cst : f32 to vector<8x256xf32>
    %13 = arith.mulf %12, %11 : vector<8x256xf32>
    %c16_i32 = arith.constant 16 : i32
    %14 = tpu.dynamic_rotate %11 by %c16_i32 dim 1 : vector<8x256xf32>, i32 -> vector<8x256xf32>
    %15 = vector.broadcast %1 : vector<1x256xf32> to vector<8x256xf32>
    %16 = arith.mulf %14, %15 : vector<8x256xf32>
    %17 = arith.subf %13, %16 : vector<8x256xf32>
    %c240_i32 = arith.constant 240 : i32
    %18 = tpu.dynamic_rotate %11 by %c240_i32 dim 1 : vector<8x256xf32>, i32 -> vector<8x256xf32>
    %19 = vector.broadcast %6 : vector<1x256xf32> to vector<8x256xf32>
    %20 = arith.mulf %18, %19 : vector<8x256xf32>
    %21 = arith.subf %17, %20 : vector<8x256xf32>
    %cst_15 = arith.constant 2.000000e+00 : f32
    %22 = vector.broadcast %cst_15 : f32 to vector<8x256xf32>
    %23 = arith.mulf %22, %11 : vector<8x256xf32>
    %c1_i32 = arith.constant 1 : i32
    %24 = tpu.dynamic_rotate %11 by %c1_i32 dim 1 : vector<8x256xf32>, i32 -> vector<8x256xf32>
    %25 = vector.broadcast %3 : vector<1x256xf32> to vector<8x256xf32>
    %26 = arith.mulf %24, %25 : vector<8x256xf32>
    %27 = arith.subf %23, %26 : vector<8x256xf32>
    %c255_i32 = arith.constant 255 : i32
    %28 = tpu.dynamic_rotate %11 by %c255_i32 dim 1 : vector<8x256xf32>, i32 -> vector<8x256xf32>
    %29 = vector.broadcast %4 : vector<1x256xf32> to vector<8x256xf32>
    %30 = arith.mulf %28, %29 : vector<8x256xf32>
    %31 = arith.subf %27, %30 : vector<8x256xf32>
    %cst_16 = arith.constant 2.000000e+00 : f32
    %32 = vector.broadcast %cst_16 : f32 to vector<8x256xf32>
    %33 = arith.mulf %32, %21 : vector<8x256xf32>
    %c16_i32_17 = arith.constant 16 : i32
    %34 = tpu.dynamic_rotate %21 by %c16_i32_17 dim 1 : vector<8x256xf32>, i32 -> vector<8x256xf32>
    %35 = vector.broadcast %1 : vector<1x256xf32> to vector<8x256xf32>
    %36 = arith.mulf %34, %35 : vector<8x256xf32>
    %37 = arith.subf %33, %36 : vector<8x256xf32>
    %c240_i32_18 = arith.constant 240 : i32
    %38 = tpu.dynamic_rotate %21 by %c240_i32_18 dim 1 : vector<8x256xf32>, i32 -> vector<8x256xf32>
    %39 = vector.broadcast %6 : vector<1x256xf32> to vector<8x256xf32>
    %40 = arith.mulf %38, %39 : vector<8x256xf32>
    %41 = arith.subf %37, %40 : vector<8x256xf32>
    %cst_19 = arith.constant 2.000000e+00 : f32
    %42 = vector.broadcast %cst_19 : f32 to vector<8x256xf32>
    %43 = arith.mulf %42, %31 : vector<8x256xf32>
    %c1_i32_20 = arith.constant 1 : i32
    %44 = tpu.dynamic_rotate %31 by %c1_i32_20 dim 1 : vector<8x256xf32>, i32 -> vector<8x256xf32>
    %45 = vector.broadcast %3 : vector<1x256xf32> to vector<8x256xf32>
    %46 = arith.mulf %44, %45 : vector<8x256xf32>
    %47 = arith.subf %43, %46 : vector<8x256xf32>
    %c255_i32_21 = arith.constant 255 : i32
    %48 = tpu.dynamic_rotate %31 by %c255_i32_21 dim 1 : vector<8x256xf32>, i32 -> vector<8x256xf32>
    %49 = vector.broadcast %4 : vector<1x256xf32> to vector<8x256xf32>
    %50 = arith.mulf %48, %49 : vector<8x256xf32>
    %51 = arith.subf %47, %50 : vector<8x256xf32>
    %cst_22 = arith.constant 2.000000e+00 : f32
    %52 = vector.broadcast %cst_22 : f32 to vector<8x256xf32>
    %53 = arith.mulf %52, %21 : vector<8x256xf32>
    %c1_i32_23 = arith.constant 1 : i32
    %54 = tpu.dynamic_rotate %21 by %c1_i32_23 dim 1 : vector<8x256xf32>, i32 -> vector<8x256xf32>
    %55 = vector.broadcast %3 : vector<1x256xf32> to vector<8x256xf32>
    %56 = arith.mulf %54, %55 : vector<8x256xf32>
    %57 = arith.subf %53, %56 : vector<8x256xf32>
    %c255_i32_24 = arith.constant 255 : i32
    %58 = tpu.dynamic_rotate %21 by %c255_i32_24 dim 1 : vector<8x256xf32>, i32 -> vector<8x256xf32>
    %59 = vector.broadcast %4 : vector<1x256xf32> to vector<8x256xf32>
    %60 = arith.mulf %58, %59 : vector<8x256xf32>
    %61 = arith.subf %57, %60 : vector<8x256xf32>
    %62 = arith.mulf %21, %21 : vector<8x256xf32>
    %63 = arith.mulf %31, %31 : vector<8x256xf32>
    %64 = arith.mulf %41, %41 : vector<8x256xf32>
    %65 = arith.mulf %51, %51 : vector<8x256xf32>
    %66 = arith.mulf %61, %61 : vector<8x256xf32>
    %67 = arith.mulf %41, %51 : vector<8x256xf32>
    %68 = tpu.concatenate %21, %31, %41, %51, %61, %62, %63, %64, %65, %66, %67 in 0 : vector<8x256xf32>, vector<8x256xf32>, vector<8x256xf32>, vector<8x256xf32>, vector<8x256xf32>, vector<8x256xf32>, vector<8x256xf32>, vector<8x256xf32>, vector<8x256xf32>, vector<8x256xf32>, vector<8x256xf32> -> vector<88x256xf32>
    %c17_i32 = arith.constant 17 : i32
    %69 = tpu.dynamic_rotate %68 by %c17_i32 dim 1 : vector<88x256xf32>, i32 -> vector<88x256xf32>
    %70 = vector.broadcast %0 : vector<1x256xf32> to vector<88x256xf32>
    %71 = arith.mulf %69, %70 : vector<88x256xf32>
    %c16_i32_25 = arith.constant 16 : i32
    %72 = tpu.dynamic_rotate %68 by %c16_i32_25 dim 1 : vector<88x256xf32>, i32 -> vector<88x256xf32>
    %73 = vector.broadcast %1 : vector<1x256xf32> to vector<88x256xf32>
    %74 = arith.mulf %72, %73 : vector<88x256xf32>
    %c15_i32 = arith.constant 15 : i32
    %75 = tpu.dynamic_rotate %68 by %c15_i32 dim 1 : vector<88x256xf32>, i32 -> vector<88x256xf32>
    %76 = vector.broadcast %2 : vector<1x256xf32> to vector<88x256xf32>
    %77 = arith.mulf %75, %76 : vector<88x256xf32>
    %c1_i32_26 = arith.constant 1 : i32
    %78 = tpu.dynamic_rotate %68 by %c1_i32_26 dim 1 : vector<88x256xf32>, i32 -> vector<88x256xf32>
    %79 = vector.broadcast %3 : vector<1x256xf32> to vector<88x256xf32>
    %80 = arith.mulf %78, %79 : vector<88x256xf32>
    %c255_i32_27 = arith.constant 255 : i32
    %81 = tpu.dynamic_rotate %68 by %c255_i32_27 dim 1 : vector<88x256xf32>, i32 -> vector<88x256xf32>
    %82 = vector.broadcast %4 : vector<1x256xf32> to vector<88x256xf32>
    %83 = arith.mulf %81, %82 : vector<88x256xf32>
    %c241_i32 = arith.constant 241 : i32
    %84 = tpu.dynamic_rotate %68 by %c241_i32 dim 1 : vector<88x256xf32>, i32 -> vector<88x256xf32>
    %85 = vector.broadcast %5 : vector<1x256xf32> to vector<88x256xf32>
    %86 = arith.mulf %84, %85 : vector<88x256xf32>
    %c240_i32_28 = arith.constant 240 : i32
    %87 = tpu.dynamic_rotate %68 by %c240_i32_28 dim 1 : vector<88x256xf32>, i32 -> vector<88x256xf32>
    %88 = vector.broadcast %6 : vector<1x256xf32> to vector<88x256xf32>
    %89 = arith.mulf %87, %88 : vector<88x256xf32>
    %c239_i32 = arith.constant 239 : i32
    %90 = tpu.dynamic_rotate %68 by %c239_i32 dim 1 : vector<88x256xf32>, i32 -> vector<88x256xf32>
    %91 = vector.broadcast %7 : vector<1x256xf32> to vector<88x256xf32>
    %92 = arith.mulf %90, %91 : vector<88x256xf32>
    %93 = tpu.concatenate %71, %74, %77, %80, %68, %83, %86, %89, %92 in 0 : vector<88x256xf32>, vector<88x256xf32>, vector<88x256xf32>, vector<88x256xf32>, vector<88x256xf32>, vector<88x256xf32>, vector<88x256xf32>, vector<88x256xf32>, vector<88x256xf32> -> vector<792x256xf32>
    %c0_29 = arith.constant 0 : index
    %c0_30 = arith.constant 0 : index
    %94 = vector.load %arg3[%c0_29, %c0_30] : memref<88x792xf32, #tpu.memory_space<vmem>>, vector<88x792xf32>
    %cst_31 = arith.constant dense<0.000000e+00> : vector<88x256xf32>
    %95 = tpu.matmul %94, %93, %cst_31 {dimension_numbers = #tpu.dot_dimension_numbers<[1], [0], [0], [1], [0, 0, 1, 1], [], []>} : vector<88x792xf32>, vector<792x256xf32>, vector<88x256xf32> -> vector<88x256xf32>
    %c0_32 = arith.constant 0 : index
    %c0_33 = arith.constant 0 : index
    %96 = vector.load %arg8[%c0_32, %c0_33] : memref<88x1xf32, #tpu.memory_space<vmem>>, vector<88x1xf32>
    %c0_34 = arith.constant 0 : index
    %c0_35 = arith.constant 0 : index
    %97 = vector.load %arg9[%c0_34, %c0_35] : memref<88x1xf32, #tpu.memory_space<vmem>>, vector<88x1xf32>
    %cst_36 = arith.constant dense<0.000000e+00> : vector<88xf32>
    %98 = vector.multi_reduction <add>, %95, %cst_36 [1] : vector<88x256xf32> to vector<88xf32>
    %99 = vector.shape_cast %98 : vector<88xf32> to vector<88x1xf32>
    %100 = arith.mulf %95, %95 : vector<88x256xf32>
    %cst_37 = arith.constant dense<0.000000e+00> : vector<88xf32>
    %101 = vector.multi_reduction <add>, %100, %cst_37 [1] : vector<88x256xf32> to vector<88xf32>
    %102 = vector.shape_cast %101 : vector<88xf32> to vector<88x1xf32>
    %cst_38 = arith.constant dense<0.000000e+00> : vector<88x1xf32>
    %103 = tpu.matmul %8, %99, %cst_38 {dimension_numbers = #tpu.dot_dimension_numbers<[1], [0], [0], [1], [0, 0, 1, 1], [], []>} : vector<88x88xf32>, vector<88x1xf32>, vector<88x1xf32> -> vector<88x1xf32>
    %cst_39 = arith.constant dense<0.000000e+00> : vector<88x1xf32>
    %104 = tpu.matmul %8, %102, %cst_39 {dimension_numbers = #tpu.dot_dimension_numbers<[1], [0], [0], [1], [0, 0, 1, 1], [], []>} : vector<88x88xf32>, vector<88x1xf32>, vector<88x1xf32> -> vector<88x1xf32>
    %105 = arith.mulf %103, %103 : vector<88x1xf32>
    %106 = arith.subf %104, %105 : vector<88x1xf32>
    %cst_40 = arith.constant 0.000000e+00 : f32
    %107 = vector.broadcast %cst_40 : f32 to vector<88x1xf32>
    %108 = arith.maximumf %106, %107 : vector<88x1xf32>
    %cst_41 = arith.constant 9.99999974E-6 : f32
    %109 = vector.broadcast %cst_41 : f32 to vector<88x1xf32>
    %110 = arith.addf %108, %109 : vector<88x1xf32>
    %111 = math.rsqrt %110 : vector<88x1xf32>
    %112 = arith.mulf %111, %96 : vector<88x1xf32>
    %113 = vector.broadcast %103 : vector<88x1xf32> to vector<88x256xf32>
    %114 = arith.subf %95, %113 : vector<88x256xf32>
    %115 = vector.broadcast %112 : vector<88x1xf32> to vector<88x256xf32>
    %116 = arith.mulf %114, %115 : vector<88x256xf32>
    %117 = vector.broadcast %97 : vector<88x1xf32> to vector<88x256xf32>
    %118 = arith.addf %116, %117 : vector<88x256xf32>
    %cst_42 = arith.constant 0.000000e+00 : f32
    %119 = vector.broadcast %cst_42 : f32 to vector<88x256xf32>
    %120 = arith.cmpf oge, %118, %119 : vector<88x256xf32>
    %cst_43 = arith.constant 0.00999999977 : f32
    %121 = vector.broadcast %cst_43 : f32 to vector<88x256xf32>
    %122 = arith.mulf %121, %118 : vector<88x256xf32>
    %123 = arith.select %120, %118, %122 : vector<88x256xi1>, vector<88x256xf32>
    %c17_i32_44 = arith.constant 17 : i32
    %124 = tpu.dynamic_rotate %123 by %c17_i32_44 dim 1 : vector<88x256xf32>, i32 -> vector<88x256xf32>
    %125 = vector.broadcast %0 : vector<1x256xf32> to vector<88x256xf32>
    %126 = arith.mulf %124, %125 : vector<88x256xf32>
    %c16_i32_45 = arith.constant 16 : i32
    %127 = tpu.dynamic_rotate %123 by %c16_i32_45 dim 1 : vector<88x256xf32>, i32 -> vector<88x256xf32>
    %128 = vector.broadcast %1 : vector<1x256xf32> to vector<88x256xf32>
    %129 = arith.mulf %127, %128 : vector<88x256xf32>
    %c15_i32_46 = arith.constant 15 : i32
    %130 = tpu.dynamic_rotate %123 by %c15_i32_46 dim 1 : vector<88x256xf32>, i32 -> vector<88x256xf32>
    %131 = vector.broadcast %2 : vector<1x256xf32> to vector<88x256xf32>
    %132 = arith.mulf %130, %131 : vector<88x256xf32>
    %c1_i32_47 = arith.constant 1 : i32
    %133 = tpu.dynamic_rotate %123 by %c1_i32_47 dim 1 : vector<88x256xf32>, i32 -> vector<88x256xf32>
    %134 = vector.broadcast %3 : vector<1x256xf32> to vector<88x256xf32>
    %135 = arith.mulf %133, %134 : vector<88x256xf32>
    %c255_i32_48 = arith.constant 255 : i32
    %136 = tpu.dynamic_rotate %123 by %c255_i32_48 dim 1 : vector<88x256xf32>, i32 -> vector<88x256xf32>
    %137 = vector.broadcast %4 : vector<1x256xf32> to vector<88x256xf32>
    %138 = arith.mulf %136, %137 : vector<88x256xf32>
    %c241_i32_49 = arith.constant 241 : i32
    %139 = tpu.dynamic_rotate %123 by %c241_i32_49 dim 1 : vector<88x256xf32>, i32 -> vector<88x256xf32>
    %140 = vector.broadcast %5 : vector<1x256xf32> to vector<88x256xf32>
    %141 = arith.mulf %139, %140 : vector<88x256xf32>
    %c240_i32_50 = arith.constant 240 : i32
    %142 = tpu.dynamic_rotate %123 by %c240_i32_50 dim 1 : vector<88x256xf32>, i32 -> vector<88x256xf32>
    %143 = vector.broadcast %6 : vector<1x256xf32> to vector<88x256xf32>
    %144 = arith.mulf %142, %143 : vector<88x256xf32>
    %c239_i32_51 = arith.constant 239 : i32
    %145 = tpu.dynamic_rotate %123 by %c239_i32_51 dim 1 : vector<88x256xf32>, i32 -> vector<88x256xf32>
    %146 = vector.broadcast %7 : vector<1x256xf32> to vector<88x256xf32>
    %147 = arith.mulf %145, %146 : vector<88x256xf32>
    %148 = tpu.concatenate %126, %129, %132, %135, %123, %138, %141, %144, %147 in 0 : vector<88x256xf32>, vector<88x256xf32>, vector<88x256xf32>, vector<88x256xf32>, vector<88x256xf32>, vector<88x256xf32>, vector<88x256xf32>, vector<88x256xf32>, vector<88x256xf32> -> vector<792x256xf32>
    %c0_52 = arith.constant 0 : index
    %c0_53 = arith.constant 0 : index
    %149 = vector.load %arg4[%c0_52, %c0_53] : memref<88x792xf32, #tpu.memory_space<vmem>>, vector<88x792xf32>
    %cst_54 = arith.constant dense<0.000000e+00> : vector<88x256xf32>
    %150 = tpu.matmul %149, %148, %cst_54 {dimension_numbers = #tpu.dot_dimension_numbers<[1], [0], [0], [1], [0, 0, 1, 1], [], []>} : vector<88x792xf32>, vector<792x256xf32>, vector<88x256xf32> -> vector<88x256xf32>
    %c0_55 = arith.constant 0 : index
    %c0_56 = arith.constant 0 : index
    %151 = vector.load %arg10[%c0_55, %c0_56] : memref<88x1xf32, #tpu.memory_space<vmem>>, vector<88x1xf32>
    %c0_57 = arith.constant 0 : index
    %c0_58 = arith.constant 0 : index
    %152 = vector.load %arg11[%c0_57, %c0_58] : memref<88x1xf32, #tpu.memory_space<vmem>>, vector<88x1xf32>
    %cst_59 = arith.constant dense<0.000000e+00> : vector<88xf32>
    %153 = vector.multi_reduction <add>, %150, %cst_59 [1] : vector<88x256xf32> to vector<88xf32>
    %154 = vector.shape_cast %153 : vector<88xf32> to vector<88x1xf32>
    %155 = arith.mulf %150, %150 : vector<88x256xf32>
    %cst_60 = arith.constant dense<0.000000e+00> : vector<88xf32>
    %156 = vector.multi_reduction <add>, %155, %cst_60 [1] : vector<88x256xf32> to vector<88xf32>
    %157 = vector.shape_cast %156 : vector<88xf32> to vector<88x1xf32>
    %cst_61 = arith.constant dense<0.000000e+00> : vector<88x1xf32>
    %158 = tpu.matmul %8, %154, %cst_61 {dimension_numbers = #tpu.dot_dimension_numbers<[1], [0], [0], [1], [0, 0, 1, 1], [], []>} : vector<88x88xf32>, vector<88x1xf32>, vector<88x1xf32> -> vector<88x1xf32>
    %cst_62 = arith.constant dense<0.000000e+00> : vector<88x1xf32>
    %159 = tpu.matmul %8, %157, %cst_62 {dimension_numbers = #tpu.dot_dimension_numbers<[1], [0], [0], [1], [0, 0, 1, 1], [], []>} : vector<88x88xf32>, vector<88x1xf32>, vector<88x1xf32> -> vector<88x1xf32>
    %160 = arith.mulf %158, %158 : vector<88x1xf32>
    %161 = arith.subf %159, %160 : vector<88x1xf32>
    %cst_63 = arith.constant 0.000000e+00 : f32
    %162 = vector.broadcast %cst_63 : f32 to vector<88x1xf32>
    %163 = arith.maximumf %161, %162 : vector<88x1xf32>
    %cst_64 = arith.constant 9.99999974E-6 : f32
    %164 = vector.broadcast %cst_64 : f32 to vector<88x1xf32>
    %165 = arith.addf %163, %164 : vector<88x1xf32>
    %166 = math.rsqrt %165 : vector<88x1xf32>
    %167 = arith.mulf %166, %151 : vector<88x1xf32>
    %168 = vector.broadcast %158 : vector<88x1xf32> to vector<88x256xf32>
    %169 = arith.subf %150, %168 : vector<88x256xf32>
    %170 = vector.broadcast %167 : vector<88x1xf32> to vector<88x256xf32>
    %171 = arith.mulf %169, %170 : vector<88x256xf32>
    %172 = vector.broadcast %152 : vector<88x1xf32> to vector<88x256xf32>
    %173 = arith.addf %171, %172 : vector<88x256xf32>
    %cst_65 = arith.constant 0.000000e+00 : f32
    %174 = vector.broadcast %cst_65 : f32 to vector<88x256xf32>
    %175 = arith.cmpf oge, %173, %174 : vector<88x256xf32>
    %cst_66 = arith.constant 0.00999999977 : f32
    %176 = vector.broadcast %cst_66 : f32 to vector<88x256xf32>
    %177 = arith.mulf %176, %173 : vector<88x256xf32>
    %178 = arith.select %175, %173, %177 : vector<88x256xi1>, vector<88x256xf32>
    %c17_i32_67 = arith.constant 17 : i32
    %179 = tpu.dynamic_rotate %178 by %c17_i32_67 dim 1 : vector<88x256xf32>, i32 -> vector<88x256xf32>
    %180 = vector.broadcast %0 : vector<1x256xf32> to vector<88x256xf32>
    %181 = arith.mulf %179, %180 : vector<88x256xf32>
    %c16_i32_68 = arith.constant 16 : i32
    %182 = tpu.dynamic_rotate %178 by %c16_i32_68 dim 1 : vector<88x256xf32>, i32 -> vector<88x256xf32>
    %183 = vector.broadcast %1 : vector<1x256xf32> to vector<88x256xf32>
    %184 = arith.mulf %182, %183 : vector<88x256xf32>
    %c15_i32_69 = arith.constant 15 : i32
    %185 = tpu.dynamic_rotate %178 by %c15_i32_69 dim 1 : vector<88x256xf32>, i32 -> vector<88x256xf32>
    %186 = vector.broadcast %2 : vector<1x256xf32> to vector<88x256xf32>
    %187 = arith.mulf %185, %186 : vector<88x256xf32>
    %c1_i32_70 = arith.constant 1 : i32
    %188 = tpu.dynamic_rotate %178 by %c1_i32_70 dim 1 : vector<88x256xf32>, i32 -> vector<88x256xf32>
    %189 = vector.broadcast %3 : vector<1x256xf32> to vector<88x256xf32>
    %190 = arith.mulf %188, %189 : vector<88x256xf32>
    %c255_i32_71 = arith.constant 255 : i32
    %191 = tpu.dynamic_rotate %178 by %c255_i32_71 dim 1 : vector<88x256xf32>, i32 -> vector<88x256xf32>
    %192 = vector.broadcast %4 : vector<1x256xf32> to vector<88x256xf32>
    %193 = arith.mulf %191, %192 : vector<88x256xf32>
    %c241_i32_72 = arith.constant 241 : i32
    %194 = tpu.dynamic_rotate %178 by %c241_i32_72 dim 1 : vector<88x256xf32>, i32 -> vector<88x256xf32>
    %195 = vector.broadcast %5 : vector<1x256xf32> to vector<88x256xf32>
    %196 = arith.mulf %194, %195 : vector<88x256xf32>
    %c240_i32_73 = arith.constant 240 : i32
    %197 = tpu.dynamic_rotate %178 by %c240_i32_73 dim 1 : vector<88x256xf32>, i32 -> vector<88x256xf32>
    %198 = vector.broadcast %6 : vector<1x256xf32> to vector<88x256xf32>
    %199 = arith.mulf %197, %198 : vector<88x256xf32>
    %c239_i32_74 = arith.constant 239 : i32
    %200 = tpu.dynamic_rotate %178 by %c239_i32_74 dim 1 : vector<88x256xf32>, i32 -> vector<88x256xf32>
    %201 = vector.broadcast %7 : vector<1x256xf32> to vector<88x256xf32>
    %202 = arith.mulf %200, %201 : vector<88x256xf32>
    %203 = tpu.concatenate %181, %184, %187, %190, %178, %193, %196, %199, %202 in 0 : vector<88x256xf32>, vector<88x256xf32>, vector<88x256xf32>, vector<88x256xf32>, vector<88x256xf32>, vector<88x256xf32>, vector<88x256xf32>, vector<88x256xf32>, vector<88x256xf32> -> vector<792x256xf32>
    %c0_75 = arith.constant 0 : index
    %c0_76 = arith.constant 0 : index
    %204 = vector.load %arg5[%c0_75, %c0_76] : memref<88x792xf32, #tpu.memory_space<vmem>>, vector<88x792xf32>
    %cst_77 = arith.constant dense<0.000000e+00> : vector<88x256xf32>
    %205 = tpu.matmul %204, %203, %cst_77 {dimension_numbers = #tpu.dot_dimension_numbers<[1], [0], [0], [1], [0, 0, 1, 1], [], []>} : vector<88x792xf32>, vector<792x256xf32>, vector<88x256xf32> -> vector<88x256xf32>
    %c0_78 = arith.constant 0 : index
    %c0_79 = arith.constant 0 : index
    %206 = vector.load %arg12[%c0_78, %c0_79] : memref<88x1xf32, #tpu.memory_space<vmem>>, vector<88x1xf32>
    %c0_80 = arith.constant 0 : index
    %c0_81 = arith.constant 0 : index
    %207 = vector.load %arg13[%c0_80, %c0_81] : memref<88x1xf32, #tpu.memory_space<vmem>>, vector<88x1xf32>
    %cst_82 = arith.constant dense<0.000000e+00> : vector<88xf32>
    %208 = vector.multi_reduction <add>, %205, %cst_82 [1] : vector<88x256xf32> to vector<88xf32>
    %209 = vector.shape_cast %208 : vector<88xf32> to vector<88x1xf32>
    %210 = arith.mulf %205, %205 : vector<88x256xf32>
    %cst_83 = arith.constant dense<0.000000e+00> : vector<88xf32>
    %211 = vector.multi_reduction <add>, %210, %cst_83 [1] : vector<88x256xf32> to vector<88xf32>
    %212 = vector.shape_cast %211 : vector<88xf32> to vector<88x1xf32>
    %cst_84 = arith.constant dense<0.000000e+00> : vector<88x1xf32>
    %213 = tpu.matmul %8, %209, %cst_84 {dimension_numbers = #tpu.dot_dimension_numbers<[1], [0], [0], [1], [0, 0, 1, 1], [], []>} : vector<88x88xf32>, vector<88x1xf32>, vector<88x1xf32> -> vector<88x1xf32>
    %cst_85 = arith.constant dense<0.000000e+00> : vector<88x1xf32>
    %214 = tpu.matmul %8, %212, %cst_85 {dimension_numbers = #tpu.dot_dimension_numbers<[1], [0], [0], [1], [0, 0, 1, 1], [], []>} : vector<88x88xf32>, vector<88x1xf32>, vector<88x1xf32> -> vector<88x1xf32>
    %215 = arith.mulf %213, %213 : vector<88x1xf32>
    %216 = arith.subf %214, %215 : vector<88x1xf32>
    %cst_86 = arith.constant 0.000000e+00 : f32
    %217 = vector.broadcast %cst_86 : f32 to vector<88x1xf32>
    %218 = arith.maximumf %216, %217 : vector<88x1xf32>
    %cst_87 = arith.constant 9.99999974E-6 : f32
    %219 = vector.broadcast %cst_87 : f32 to vector<88x1xf32>
    %220 = arith.addf %218, %219 : vector<88x1xf32>
    %221 = math.rsqrt %220 : vector<88x1xf32>
    %222 = arith.mulf %221, %206 : vector<88x1xf32>
    %223 = vector.broadcast %213 : vector<88x1xf32> to vector<88x256xf32>
    %224 = arith.subf %205, %223 : vector<88x256xf32>
    %225 = vector.broadcast %222 : vector<88x1xf32> to vector<88x256xf32>
    %226 = arith.mulf %224, %225 : vector<88x256xf32>
    %227 = vector.broadcast %207 : vector<88x1xf32> to vector<88x256xf32>
    %228 = arith.addf %226, %227 : vector<88x256xf32>
    %cst_88 = arith.constant 0.000000e+00 : f32
    %229 = vector.broadcast %cst_88 : f32 to vector<88x256xf32>
    %230 = arith.cmpf oge, %228, %229 : vector<88x256xf32>
    %cst_89 = arith.constant 0.00999999977 : f32
    %231 = vector.broadcast %cst_89 : f32 to vector<88x256xf32>
    %232 = arith.mulf %231, %228 : vector<88x256xf32>
    %233 = arith.select %230, %228, %232 : vector<88x256xi1>, vector<88x256xf32>
    %cst_90 = arith.constant dense<0.000000e+00> : vector<8x256xf32>
    %234 = tpu.matmul %9, %233, %cst_90 {dimension_numbers = #tpu.dot_dimension_numbers<[1], [0], [0], [1], [0, 0, 1, 1], [], []>} : vector<8x88xf32>, vector<88x256xf32>, vector<8x256xf32> -> vector<8x256xf32>
    %c0_91 = arith.constant 0 : index
    %c0_92 = arith.constant 0 : index
    %c0_93 = arith.constant 0 : index
    %235 = vector.load %arg14[%c0_91, %c0_92, %c0_93] : memref<1x8x256xf32, #tpu.memory_space<vmem>>, vector<1x8x256xf32>
    %236 = vector.shape_cast %235 : vector<1x8x256xf32> to vector<8x256xf32>
    %237 = vector.shape_cast %234 : vector<8x256xf32> to vector<1x8x256xf32>
    tpu.vector_store %arg14[%c0_91, %c0_92, %c0_93], %237 {strides = array<i32>} : memref<1x8x256xf32, #tpu.memory_space<vmem>>, vector<1x8x256xf32>,
    return
  }
  func.func @transform_0(%arg0: i32) -> (i32, i32, i32) {
    %c0_i32 = arith.constant 0 : i32
    %c0_i32_0 = arith.constant 0 : i32
    %c0_i32_1 = arith.constant 0 : i32
    return %arg0, %c0_i32, %c0_i32_0 : i32, i32, i32
  }
  func.func @transform_1(%arg0: i32) -> (i32, i32) {
    %c0_i32 = arith.constant 0 : i32
    %c0_i32_0 = arith.constant 0 : i32
    %c0_i32_1 = arith.constant 0 : i32
    return %c0_i32, %c0_i32_0 : i32, i32
  }
  func.func @transform_2(%arg0: i32) -> (i32, i32) {
    %c0_i32 = arith.constant 0 : i32
    %c0_i32_0 = arith.constant 0 : i32
    %c0_i32_1 = arith.constant 0 : i32
    return %c0_i32, %c0_i32_0 : i32, i32
  }
  func.func @transform_3(%arg0: i32) -> (i32, i32) {
    %c0_i32 = arith.constant 0 : i32
    %c0_i32_0 = arith.constant 0 : i32
    %c0_i32_1 = arith.constant 0 : i32
    return %c0_i32, %c0_i32_0 : i32, i32
  }
  func.func @transform_4(%arg0: i32) -> (i32, i32) {
    %c0_i32 = arith.constant 0 : i32
    %c0_i32_0 = arith.constant 0 : i32
    %c0_i32_1 = arith.constant 0 : i32
    return %c0_i32, %c0_i32_0 : i32, i32
  }
  func.func @transform_5(%arg0: i32) -> (i32, i32) {
    %c0_i32 = arith.constant 0 : i32
    %c0_i32_0 = arith.constant 0 : i32
    %c0_i32_1 = arith.constant 0 : i32
    return %c0_i32, %c0_i32_0 : i32, i32
  }
  func.func @transform_6(%arg0: i32) -> (i32, i32) {
    %c0_i32 = arith.constant 0 : i32
    %c0_i32_0 = arith.constant 0 : i32
    %c0_i32_1 = arith.constant 0 : i32
    return %c0_i32, %c0_i32_0 : i32, i32
  }
  func.func @transform_7(%arg0: i32) -> (i32, i32) {
    %c0_i32 = arith.constant 0 : i32
    %c0_i32_0 = arith.constant 0 : i32
    %c0_i32_1 = arith.constant 0 : i32
    return %c0_i32, %c0_i32_0 : i32, i32
  }
  func.func @transform_8(%arg0: i32) -> (i32, i32) {
    %c0_i32 = arith.constant 0 : i32
    %c0_i32_0 = arith.constant 0 : i32
    %c0_i32_1 = arith.constant 0 : i32
    return %c0_i32, %c0_i32_0 : i32, i32
  }
  func.func @transform_9(%arg0: i32) -> (i32, i32) {
    %c0_i32 = arith.constant 0 : i32
    %c0_i32_0 = arith.constant 0 : i32
    %c0_i32_1 = arith.constant 0 : i32
    return %c0_i32, %c0_i32_0 : i32, i32
  }
  func.func @transform_10(%arg0: i32) -> (i32, i32) {
    %c0_i32 = arith.constant 0 : i32
    %c0_i32_0 = arith.constant 0 : i32
    %c0_i32_1 = arith.constant 0 : i32
    return %c0_i32, %c0_i32_0 : i32, i32
  }
  func.func @transform_11(%arg0: i32) -> (i32, i32) {
    %c0_i32 = arith.constant 0 : i32
    %c0_i32_0 = arith.constant 0 : i32
    %c0_i32_1 = arith.constant 0 : i32
    return %c0_i32, %c0_i32_0 : i32, i32
  }
  func.func @transform_12(%arg0: i32) -> (i32, i32) {
    %c0_i32 = arith.constant 0 : i32
    %c0_i32_0 = arith.constant 0 : i32
    %c0_i32_1 = arith.constant 0 : i32
    return %c0_i32, %c0_i32_0 : i32, i32
  }
  func.func @transform_13(%arg0: i32) -> (i32, i32, i32) {
    %c0_i32 = arith.constant 0 : i32
    %c0_i32_0 = arith.constant 0 : i32
    %c0_i32_1 = arith.constant 0 : i32
    return %arg0, %c0_i32, %c0_i32_0 : i32, i32, i32
  }
}

</mosaic_0001>

<bundles_post_ra>
// kernel: tpu_custom_call.1
= control target key start
LH: loop header
LB: loop body
LE: loop exit
PB: predicated region body
PF: predicated region fallthrough
CT: control target
= control target key end

     0   :  { %s14907_s0 = inlined_call_operand.vmem [shape: f32[2,8,256], index: 0, kind: input, shape index: {}]   ;;  %s14908_s1 = inlined_call_operand.vmem [shape: f32[9,256], index: 1, kind: input, shape index: {}]   ;;  %s14909_s2 = inlined_call_operand.hbm [shape: f32[88,792], index: 2, kind: input, shape index: {}]   ;;  %s14910_s3 = inlined_call_operand.hbm [shape: f32[88,792], index: 3, kind: input, shape index: {}]   ;;  %s14911_s4 = inlined_call_operand.hbm [shape: f32[88,792], index: 4, kind: input, shape index: {}]   ;;  %s14912_s5 = inlined_call_operand.vmem [shape: f32[8,88], index: 5, kind: input, shape index: {}]   ;;  %s14913_s6 = inlined_call_operand.vmem [shape: f32[88,88], index: 6, kind: input, shape index: {}]   ;;  %s14914_s7 = inlined_call_operand.vmem [shape: f32[88,1], index: 7, kind: input, shape index: {}]   ;;  %s14915_s8 = inlined_call_operand.vmem [shape: f32[88,1], index: 8, kind: input, shape index: {}]   ;;  %s14916_s9 = inlined_call_operand.vmem [shape: f32[88,1], index: 9, kind: input, shape index: {}]   ;;  %s14917_s10 = inlined_call_operand.vmem [shape: f32[88,1], index: 10, kind: input, shape index: {}]   ;;  %s14918_s11 = inlined_call_operand.vmem [shape: f32[88,1], index: 11, kind: input, shape index: {}]   ;;  %s14919_s12 = inlined_call_operand.vmem [shape: f32[88,1], index: 12, kind: input, shape index: {}]   ;;  %s14920_s13 = inlined_call_operand.hbm [shape: f32[2,8,256], index: 13, kind: output, shape index: {}]  }
   0x1   :  { %15148 = sst [smem:[#allocation93_spill]] %s14912_s5 }
   0x2   :  { %15149 = sst [smem:[#allocation94_spill]] %s14920_s13 }
   0x3   :  { %18 = vsyncpa [#allocation3], 0 }
   0x4   :  { %19 = vsyncpa [#allocation6], 0 }
   0x5   :  { %20 = vsyncpa [#allocation4], 0 }
   0x6   :  { %22 = vsyncpa [#allocation4 + $0x1], 0  ;;  %s8952_s25 = smov 0   ;;  %s8954_s26 = smov 0  }
   0x7   :  { %s8956_s27 = smov 0   ;;  %s8958_s28 = smov 0  }
   0x8 LB: > { %15150 = sst [smem:[#allocation12_spill]] %s8850_s25  ;;  %s8973_s29 = sadd.s32 4294967295, %s8862_s28   ;;  %s8862_s28 = sphi %s8958_s28, %s15523_s28   ;;  %s8858_s27 = sphi %s8956_s27, %s15528_s27   ;;  %s8854_s26 = sphi %s8954_s26, %s15527_s26   ;;  %s8850_s25 = sphi %s8952_s25, %s15526_s25  }
   0x9   : > { %15151 = sst [smem:[#allocation13_spill]] %s8858_s27  ;;  %s7049_s30 = sadd.s32 4294967294, %s8862_s28  }
   0xa   : > { %15152 = sst [smem:[#allocation14_spill]] %s8862_s28  ;;  %s8977_s14 = sadd.s32 1, %s8862_s28  }
   0xb   : > { %15153 = sst [smem:[#allocation15_spill]] %s8977_s14  ;;  %s313_s15 = sadd.s32 1, %s8858_s27 }
   0xc   : > { %s310_s16 = ssub.s32 %s8862_s28, %s8977_s14  ;;  %p323_p0 = scmp.ne.s32.totalorder %s8858_s27, %s8854_s26 }
   0xd   : > { %p311_p1 = scmp.eq.s32.totalorder %s310_s16, 0  ;;  %p324_p2 = scmp.eq.s32.totalorder %s8973_s29, 1 }
   0xe   : > { %p329_p3 = scmp.ne.s32.totalorder %s8854_s26, %s8850_s25  ;;  %p330_p4 = scmp.eq.s32.totalorder %s7049_s30, 1 }
   0xf   : > { %s8988_s17 = scalar_select %p311_p1, %s8858_s27, %s313_s15  }
  0x10   : > { %p8990_p5 = por %p324_p2, %p323_p0  ;;  %p8994_p6 = por %p330_p4, %p329_p3 }
  0x11   : > { %15154 = sst [smem:[#allocation16_spill]] %s8988_s17  ;;  %p7050_p7 = scmp.ge.s32.totalorder %s8862_s28, 1 }
  0x12   : > { %s15155_s18 = scalar_select %p8990_p5, 1, 0 }
  0x13   : > { %s15157_s19 = scalar_select %p8994_p6, 1, 0 }
  0x14   : > { %15156 = sst [smem:[#allocation17_spill]] %s15155_s18  ;;  %p337_p8 = scmp.lt.s32.totalorder %s8862_s28, 3 }
  0x15   : > { %15158 = sst [smem:[#allocation18_spill]] %s15157_s19  ;;  %p14926_p9 = scmp.eq.s32.totalorder %s8973_s29, 0 }
  0x16   : > { %p9001_p10 = pnand %p7050_p7, %p337_p8  ;;  %s8864_s21 = smov [#allocation5]  }
  0x17   : > { %s365_s22 = sshll.u32 %s8864_s21, 4  ;;  %s8865_s24 = smov [#allocation2]   ;;  %s9007_s22 = int_to_ptr.vmem [resolvable:$true] %s365_s22 }
  0x18   : > { %s15159_s20 = scalar_select %p9001_p10, 1, 0 }
  0x19   : > { %p8548_p11 = pneg %p9001_p10  ;;  %s352_s30 = sshll.u32 %s8865_s24, 4  ;;  %s9015_s30 = int_to_ptr.vmem [resolvable:$true] %s352_s30 }
  0x1a   : > { %s8866_s15 = smov [#allocation7]   ;;  %s8708_s14 = scalar_lea.hbm %s14910_s3, 9856 }
  0x1b   : > { %p9011_p12 = pnand %p14926_p9, %p8548_p11  ;;  %s9017_s16 = sshll.u32 %s8866_s15, 4  ;;  %s379_s16 = int_to_ptr.vmem [resolvable:$true] %s9017_s16 }
  0x1c   : > { %p8709_p13 = scmp.ne.s32.totalorder %s14910_s3, %s8708_s14  ;;  %p8715_p3 = scmp.lt.u32.totalorder %s8708_s14, %s14910_s3 }
  0x1d   : > { %p9027_p0 = pneg %p9011_p12 }
  0x1f   : > { %p8711_p1 = pnand %p9027_p0, %p8709_p13 }
  0x21   : > { %p8712_p2 = pneg %p8711_p1 }
  0x23   : > { %p8717_p4 = pnand %p8715_p3, %p8712_p2 }
  0x25   : > { %8720 = shalt.err (!%p8717_p4)
}
  0x26   : > { %s8721_s27 = scalar_lea.vmem %s9007_s22, 9856  ;;  %p8729_p9 = scmp.lt.s32.totalorder %s9007_s22, %s9007_s22 }
  0x27   : > { %p8722_p7 = scmp.ne.s32.totalorder %s9007_s22, %s8721_s27  ;;  %p8730_p6 = scmp.lt.s32.totalorder %s8721_s27, %s8721_s27 }
  0x29   : > { %p8724_p8 = pnand %p8722_p7, %p9027_p0  ;;  %p8731_p13 = por %p8730_p6, %p8729_p9 }
  0x2b   : > { %p8725_p11 = pneg %p8724_p8 }
  0x2d   : > { %p8732_p1 = pnand %p8731_p13, %p8725_p11 }
  0x2f   : > { %8735 = shalt.err (!%p8732_p1)
}
  0x30   : > { %s8867_s17 = smov 896   ;;  %s8868_s14 = smov 56  }
  0x31   : > { %8554 = dma.hbm_to_vmem [thread:$0]  (!%p9011_p12), %s14910_s3, 9856, %s9007_s22, [#allocation6], %s8867_s17, %s8867_s17, %s8868_s14  }
  0x32   : > { %s8736_s27 = scalar_lea.hbm %s14909_s2, 9856 }
  0x33   : > { %p8737_p6 = scmp.ne.s32.totalorder %s14909_s2, %s8736_s27  ;;  %p8743_p3 = scmp.lt.u32.totalorder %s8736_s27, %s14909_s2 }
  0x35   : > { %p8739_p9 = pnand %p8737_p6, %p9027_p0 }
  0x37   : > { %p8740_p2 = pneg %p8739_p9 }
  0x39   : > { %p8745_p4 = pnand %p8743_p3, %p8740_p2 }
  0x3b   : > { %8748 = shalt.err (!%p8745_p4)
}
  0x3c   : > { %s8749_s22 = scalar_lea.vmem %s9015_s30, 9856  ;;  %p8757_p13 = scmp.lt.s32.totalorder %s9015_s30, %s9015_s30 }
  0x3d   : > { %p8750_p7 = scmp.ne.s32.totalorder %s9015_s30, %s8749_s22  ;;  %p8758_p1 = scmp.lt.s32.totalorder %s8749_s22, %s8749_s22 }
  0x3f   : > { %p8752_p8 = pnand %p8750_p7, %p9027_p0  ;;  %p8759_p6 = por %p8758_p1, %p8757_p13 }
  0x41   : > { %p8753_p11 = pneg %p8752_p8 }
  0x43   : > { %p8760_p9 = pnand %p8759_p6, %p8753_p11 }
  0x45   : > { %8763 = shalt.err (!%p8760_p9)
}
  0x46   : > { %8551 = dma.hbm_to_vmem [thread:$0]  (!%p9011_p12), %s14909_s2, 9856, %s9015_s30, [#allocation3], %s8867_s17, %s8867_s17, %s8868_s14  }
  0x47   : > { %s8764_s19 = scalar_lea.hbm %s14911_s4, 9856 }
  0x48   : > { %p8765_p2 = scmp.ne.s32.totalorder %s14911_s4, %s8764_s19  ;;  %p8771_p7 = scmp.lt.u32.totalorder %s8764_s19, %s14911_s4 }
  0x4a   : > { %p8767_p3 = pnand %p8765_p2, %p9027_p0 }
  0x4c   : > { %p8768_p4 = pneg %p8767_p3 }
  0x4e   : > { %p8773_p8 = pnand %p8771_p7, %p8768_p4 }
  0x50   : > { %8776 = shalt.err (!%p8773_p8)
}
  0x51   : > { %s8777_s22 = scalar_lea.vmem %s379_s16, 9856  ;;  %p8785_p6 = scmp.lt.s32.totalorder %s379_s16, %s379_s16 }
  0x52   : > { %p8778_p11 = scmp.ne.s32.totalorder %s379_s16, %s8777_s22  ;;  %p8786_p9 = scmp.lt.s32.totalorder %s8777_s22, %s8777_s22 }
  0x54   : > { %p8780_p13 = pnand %p8778_p11, %p9027_p0  ;;  %p8787_p5 = por %p8786_p9, %p8785_p6 }
  0x56   : > { %p8781_p1 = pneg %p8780_p13 }
  0x58   : > { %p8788_p10 = pnand %p8787_p5, %p8781_p1 }
  0x5a   : > { %8791 = shalt.err (!%p8788_p10)
}
  0x5b   : > { %8557 = dma.hbm_to_vmem [thread:$0]  (!%p9011_p12), %s14911_s4, 9856, %s379_s16, [#allocation6], %s8867_s17, %s8867_s17, %s8868_s14  }
  0x5c   : > { %p15162_p2 = scmp.ne.s32.totalorder %s15159_s20, 0 }
  0x5e   : > { %426 = sbr.rel (%p15162_p2) target bundleno = 4470 (0x1176), region = 72 }
  0x65   : > { %p15163_p0 = scmp.eq.s32.totalorder %s8973_s29, 0 }
  0x67   : > { %8837 = dma.done.wait (%p15163_p0), [#allocation3], 9856   ;;  %p15164_p3 = pmov %p15163_p0 }
  0x68   : > { %p15165_p5 = pmov %p15163_p0 }
  0x69   : > { %8839 = vsyncadd (%p15164_p3), [#allocation3], 4294957440 }
  0x6a   : > { %8841 = dma.done.wait (%p15165_p5), [#allocation6], 19712   ;;  %p15166_p10 = pmov %p15163_p0 }
  0x6b   : > { %p478_p4 = scmp.lt.s32.totalorder %s8973_s29, 1  ;;  %s8869_s14 = smov 1   ;;  %v518_v2 = vlaneseq  ;;  %v7062_v7 = vld [vmem:[%s14908_s1 + $0x1] ss:$8 sm:$0x3]  ;;  %vm1461_vm8 = vcmask 195584  }
  0x6c   : > { %8843 = vsyncadd (%p15166_p10), [#allocation6], 4294947584  ;;  %s8870_s13 = smov 16   ;;  %s8871_s28 = smov 112   ;;  %vm8879_vm9 = vmmov 0   ;;  %vm2129_vm10 = vcmask 719872  }
  0x6d   : > { %s479_s25 = scalar_select %p478_p4, %s8973_s29, 1  ;;  %v525_v3 = vshrl.u32 %v518_v2, 7  ;;  %v9122_v4 = vand.u32 127, %v518_v2  ;;  %v7064_v10 = vld [vmem:[%s14908_s1 + $0x3] ss:$8 sm:$0x3] }
  0x6e   : > { %s8872_s18 = smov 127   ;;  %v7067_v13 = vld [vmem:[%s14908_s1 + $0x7] ss:$8 sm:$0x3]  ;;  %s8875_s16 = smov 113  }
  0x6f   : > { %s7174_s23 = sshll.u32 %s479_s25, 4  ;;  %v9124_v5 = vsub.s32 0, %v525_v3  ;;  %v9126_v6 = vsub.s32 1, %v525_v3  ;;  %vm520_vm0 = vcmp.lt.s32.totalorder %v9122_v4, 16  ;;  %vm564_vm1 = vcmp.lt.s32.totalorder %v9122_v4, 1  ;;  %s8873_s25 = smov 17  }
  0x70   : > { %s482_s17 = scalar_lea.vmem %s14907_s0, %s7174_s23  ;;  %vm542_vm2 = vcmp.lt.s32.totalorder %v9122_v4, 112  ;;  %v7065_v24 = vld [vmem:[%s14908_s1 + $0x5] ss:$8 sm:$0x3]  ;;  %vm586_vm3 = vcmp.lt.s32.totalorder %v9122_v4, 127  ;;  %s8874_s23 = smov 15  }
  0x71   : > { %v510_v0 = vld [vmem:[%s482_s17] sm:$0xff]  ;;  %v511_v1 = vld [vmem:[%s482_s17 + $0x8] sm:$0xff]  ;;  %v9136_v11 = vrot.slane %v7062_v7, %v9124_v5  ;;  %v9139_v12 = vrot.slane %v7062_v7, %v9126_v6  ;;  %v9147_v17 = vrot.slane %v7064_v10, %v9124_v5  ;;  %v9150_v18 = vrot.slane %v7064_v10, %v9126_v6  ;;  %s15079_s24 = smov 111   ;;  %s7175_s5 = sshll.u32 %s8973_s29, 8 }
  0x72   : > { %560 = vrot.lane.b32.xlu1 %v510_v0, %s8869_s14  ;;  %514 = vrot.lane.b32.xlu0 %v510_v0, %s8870_s13  ;;  %v513_v14 = vmul.f32 2.0, %v511_v1  ;;  %v512_v16 = vmul.f32 2.0, %v510_v0  ;;  %v9157_v22 = vrot.slane %v7067_v13, %v9124_v5  ;;  %v9160_v23 = vrot.slane %v7067_v13, %v9126_v6  ;;  %s15517_s17 = sld [smem:[#allocation94_spill]]  ;;  %s8881_s29 = smov [#allocation8]  }
  0x73   : > { %15167 = vst [vmem:[#allocation19_spill] sm:$0xff] %v9136_v11  ;;  %15168 = vst [vmem:[#allocation20_spill] sm:$0xff] %v9139_v12  ;;  %v9173_v31 = vrot.slane %v7065_v24, %v9124_v5  ;;  %v9176_v32 = vrot.slane %v7065_v24, %v9126_v6  ;;  %vm724_vm4 = vcmp.lt.s32.totalorder %v9122_v4, 17  ;;  %vm904_vm5 = vcmp.lt.s32.totalorder %v9122_v4, 15  ;;  %s8796_s27 = sshll.u32 %s8881_s29, 4  ;;  %s8797_s27 = int_to_ptr.vmem [resolvable:$false] %s8796_s27 }
  0x74   : > { %15169 = vst [vmem:[#allocation21_spill] sm:$0xff] %v9147_v17  ;;  %15170 = vst [vmem:[#allocation22_spill] sm:$0xff] %v9150_v18  ;;  %vm1148_vm6 = vcmp.lt.s32.totalorder %v9122_v4, 113  ;;  %vm1328_vm7 = vcmp.lt.s32.totalorder %v9122_v4, 111  ;;  %v5560_v4 = vld [vmem:[#allocation7 + $0x138] sm:$0xff]  ;;  %s8798_s22 = scalar_lea.vmem %s8797_s27, 512 }
  0x75   : > { %15171 = vst [vmem:[#allocation23_spill] sm:$0xff] %v9157_v22  ;;  %15172 = vst [vmem:[#allocation24_spill] sm:$0xff] %v9160_v23 }
  0x76   : > { %562 = vrot.lane.b32.xlu1 %v511_v1, %s8869_s14  ;;  %516 = vrot.lane.b32.xlu0 %v511_v1, %s8870_s13  ;;  %15173 = vst [vmem:[#allocation25_spill] sm:$0xff] %v9173_v31  ;;  %15174 = vst [vmem:[#allocation26_spill] sm:$0xff] %v9176_v32 }
  0x78   : > { %s14867_s19 = scalar_lea.hbm %s15517_s17, %s7175_s5 }
  0x7a   : > { %540 = vrot.lane.b32.xlu1 %v511_v1, %s8871_s28  ;;  %538 = vrot.lane.b32.xlu0 %v510_v0, %s8871_s28 }
  0x7e   : > { %584 = vrot.lane.b32.xlu1 %v511_v1, %s8872_s18  ;;  %582 = vrot.lane.b32.xlu0 %v510_v0, %s8872_s18 }
  0xe4   : > { %v561_v8 = vpop.permute.xlu1 %560  ;;  %v515_v9 = vpop.permute.xlu0 %514 }
  0xe8   : > { %v563_v15 = vpop.permute.xlu1 %562  ;;  %v517_v19 = vpop.permute.xlu0 %516 }
  0xe9   : > { %v521_v20 = vsel %vm520_vm0, %v515_v9, %v517_v19  ;;  %v522_v21 = vsel %vm520_vm0, %v517_v19, %v515_v9  ;;  %v565_v25 = vsel %vm564_vm1, %v561_v8, %v563_v15  ;;  %v566_v26 = vsel %vm564_vm1, %v563_v15, %v561_v8 }
  0xea   : > { %v534_v27 = vmul.f32 %v9136_v11, %v522_v21  ;;  %v535_v28 = vmul.f32 %v9139_v12, %v521_v20  ;;  %v578_v33 = vmul.f32 %v9147_v17, %v566_v26  ;;  %v579_v34 = vmul.f32 %v9150_v18, %v565_v25 }
  0xec   : > { %v541_v29 = vpop.permute.xlu1 %540  ;;  %v539_v30 = vpop.permute.xlu0 %538  ;;  %v536_v37 = vsub.f32 %v512_v16, %v534_v27  ;;  %v537_v38 = vsub.f32 %v513_v14, %v535_v28  ;;  %v580_v45 = vsub.f32 %v512_v16, %v578_v33  ;;  %v581_v48 = vsub.f32 %v513_v14, %v579_v34 }
  0xed   : > { %v543_v35 = vsel %vm542_vm2, %v539_v30, %v541_v29  ;;  %v544_v36 = vsel %vm542_vm2, %v541_v29, %v539_v30 }
  0xee   : > { %v556_v39 = vmul.f32 %v9157_v22, %v543_v35  ;;  %v557_v40 = vmul.f32 %v9160_v23, %v544_v36 }
  0xf0   : > { %v9186_v41 = vsub.f32 %v536_v37, %v556_v39  ;;  %v9188_v42 = vsub.f32 %v537_v38, %v557_v40  ;;  %v585_v43 = vpop.permute.xlu1 %584  ;;  %v583_v44 = vpop.permute.xlu0 %582 }
  0xf1   : > { %v587_v46 = vsel %vm586_vm3, %v583_v44, %v585_v43  ;;  %v588_v47 = vsel %vm586_vm3, %v585_v43, %v583_v44 }
  0xf2   : > { %15175 = vst [vmem:[#allocation27_spill] sm:$0xff] %v9188_v42  ;;  %v600_v49 = vmul.f32 %v9173_v31, %v587_v46  ;;  %v601_v50 = vmul.f32 %v9176_v32, %v588_v47  ;;  %608 = vrot.lane.b32.xlu1 %v9188_v42, %s8870_s13  ;;  %606 = vrot.lane.b32.xlu0 %v9186_v41, %s8870_s13  ;;  %v604_v1 = vmul.f32 2.0, %v9186_v41  ;;  %v605_v16 = vmul.f32 2.0, %v9188_v42 }
  0xf3   : > { %v9250_v53 = vmul.f32 %v9186_v41, %v9186_v41  ;;  %v9258_v54 = vmul.f32 %v9188_v42, %v9188_v42 }
  0xf4   : > { %v9200_v51 = vsub.f32 %v580_v45, %v600_v49  ;;  %v9202_v52 = vsub.f32 %v581_v48, %v601_v50 }
  0xf6   : > { %15176 = vst [vmem:[#allocation28_spill] sm:$0xff] %v9200_v51  ;;  %630 = vrot.lane.b32.xlu1 %v9202_v52, %s8869_s14  ;;  %628 = vrot.lane.b32.xlu0 %v9200_v51, %s8869_s14  ;;  %v9266_v55 = vmul.f32 %v9200_v51, %v9200_v51  ;;  %v9274_v56 = vmul.f32 %v9202_v52, %v9202_v52  ;;  %v626_v19 = vmul.f32 2.0, %v9200_v51  ;;  %v627_v34 = vmul.f32 2.0, %v9202_v52 }
  0xfa   : > { %618 = vrot.lane.b32.xlu1 %v9188_v42, %s8871_s28  ;;  %616 = vrot.lane.b32.xlu0 %v9186_v41, %s8871_s28 }
  0xfe   : > { %640 = vrot.lane.b32.xlu1 %v9202_v52, %s8872_s18  ;;  %638 = vrot.lane.b32.xlu0 %v9200_v51, %s8872_s18 }
 0x102   : > { %650 = vrot.lane.b32.xlu1 %v9188_v42, %s8869_s14  ;;  %648 = vrot.lane.b32.xlu0 %v9186_v41, %s8869_s14 }
 0x106   : > { %660 = vrot.lane.b32.xlu1 %v9188_v42, %s8872_s18  ;;  %658 = vrot.lane.b32.xlu0 %v9186_v41, %s8872_s18 }
 0x10a   : > { %682 = vrot.lane.b32.xlu1 %v9200_v51, %s8873_s25  ;;  %680 = vrot.lane.b32.xlu0 %v9186_v41, %s8873_s25 }
 0x10e   : > { %704 = vrot.lane.b32.xlu1 %v9202_v52, %s8873_s25  ;;  %702 = vrot.lane.b32.xlu0 %v9188_v42, %s8873_s25 }
 0x112   : > { %862 = vrot.lane.b32.xlu1 %v9200_v51, %s8874_s23  ;;  %780 = vrot.lane.b32.xlu0 %v9200_v51, %s8870_s13 }
 0x116   : > { %884 = vrot.lane.b32.xlu1 %v9202_v52, %s8874_s23  ;;  %800 = vrot.lane.b32.xlu0 %v9202_v52, %s8870_s13 }
 0x11a   : > { %1106 = vrot.lane.b32.xlu1 %v9200_v51, %s8875_s16  ;;  %860 = vrot.lane.b32.xlu0 %v9186_v41, %s8874_s23 }
 0x11e   : > { %1128 = vrot.lane.b32.xlu1 %v9202_v52, %s8875_s16  ;;  %882 = vrot.lane.b32.xlu0 %v9188_v42, %s8874_s23 }
 0x122   : > { %1104 = vrot.lane.b32.xlu0 %v9186_v41, %s8875_s16  ;;  %690 = vrot.lane.b32.xlu1 %v9250_v53, %s8873_s25 }
 0x126   : > { %1126 = vrot.lane.b32.xlu0 %v9188_v42, %s8875_s16  ;;  %712 = vrot.lane.b32.xlu1 %v9258_v54, %s8873_s25 }
 0x12a   : > { %692 = vrot.lane.b32.xlu0 %v9266_v55, %s8873_s25  ;;  %790 = vrot.lane.b32.xlu1 %v9266_v55, %s8870_s13 }
 0x12e   : > { %714 = vrot.lane.b32.xlu0 %v9274_v56, %s8873_s25  ;;  %810 = vrot.lane.b32.xlu1 %v9274_v56, %s8870_s13 }
 0x132   : > { %788 = vrot.lane.b32.xlu0 %v9250_v53, %s8870_s13  ;;  %870 = vrot.lane.b32.xlu1 %v9250_v53, %s8874_s23 }
 0x136   : > { %808 = vrot.lane.b32.xlu0 %v9258_v54, %s8870_s13  ;;  %892 = vrot.lane.b32.xlu1 %v9258_v54, %s8874_s23 }
 0x13a   : > { %872 = vrot.lane.b32.xlu0 %v9266_v55, %s8874_s23  ;;  %968 = vrot.lane.b32.xlu1 %v9266_v55, %s8869_s14 }
 0x13e   : > { %894 = vrot.lane.b32.xlu0 %v9274_v56, %s8874_s23  ;;  %986 = vrot.lane.b32.xlu1 %v9274_v56, %s8869_s14 }
 0x142   : > { %966 = vrot.lane.b32.xlu0 %v9250_v53, %s8869_s14  ;;  %1040 = vrot.lane.b32.xlu1 %v9266_v55, %s8872_s18 }
 0x146   : > { %984 = vrot.lane.b32.xlu0 %v9258_v54, %s8869_s14  ;;  %1058 = vrot.lane.b32.xlu1 %v9274_v56, %s8872_s18 }
 0x14a   : > { %1038 = vrot.lane.b32.xlu0 %v9250_v53, %s8872_s18 }
 0x14e   : > { %1056 = vrot.lane.b32.xlu0 %v9258_v54, %s8872_s18 }
 0x164   : > { %v609_v57 = vpop.permute.xlu1 %608  ;;  %v607_v58 = vpop.permute.xlu0 %606 }
 0x165   : > { %v611_v59 = vsel %vm520_vm0, %v609_v57, %v607_v58  ;;  %v610_v63 = vsel %vm520_vm0, %v607_v58, %v609_v57 }
 0x166   : > { %v9311_v62 = vmul.f32 %v611_v59, %v9136_v11  ;;  %v9323_v9 = vmul.f32 %v610_v63, %v9139_v12 }
 0x168   : > { %v631_v60 = vpop.permute.xlu1 %630  ;;  %v629_v61 = vpop.permute.xlu0 %628  ;;  %v614_v10 = vsub.f32 %v604_v1, %v9311_v62  ;;  %v615_v28 = vsub.f32 %v605_v16, %v9323_v9 }
 0x169   : > { %v633_v0 = vsel %vm564_vm1, %v631_v60, %v629_v61  ;;  %v632_v15 = vsel %vm564_vm1, %v629_v61, %v631_v60  ;;  %v483_v60 = vld [vmem:[%s14908_s1] ss:$8 sm:$0x3] }
 0x16a   : > { %v9327_v13 = vmul.f32 %v633_v0, %v9147_v17  ;;  %v9348_v29 = vmul.f32 %v632_v15, %v9150_v18 }
 0x16c   : > { %v619_v2 = vpop.permute.xlu1 %618  ;;  %v617_v3 = vpop.permute.xlu0 %616  ;;  %15177 = vst [vmem:[#allocation29_spill] sm:$0xff] %v9327_v13  ;;  %15180 = vst [vmem:[#allocation32_spill] sm:$0xff] %v9348_v29  ;;  %v636_v30 = vsub.f32 %v626_v19, %v9327_v13  ;;  %v637_v43 = vsub.f32 %v627_v34, %v9348_v29 }
 0x16d   : > { %v620_v7 = vsel %vm542_vm2, %v617_v3, %v619_v2  ;;  %v621_v8 = vsel %vm542_vm2, %v619_v2, %v617_v3  ;;  %v9410_v3 = vrot.slane %v483_v60, %v9126_v6 }
 0x16e   : > { %v9330_v14 = vmul.f32 %v620_v7, %v9157_v22  ;;  %v9337_v20 = vmul.f32 %v621_v8, %v9160_v23  ;;  %v9413_v7 = vrot.slane %v483_v60, %v9124_v5 }
 0x16f   : > { %15187 = vst [vmem:[#allocation39_spill] sm:$0xff] %v9410_v3 }
 0x170   : > { %15178 = vst [vmem:[#allocation30_spill] sm:$0xff] %v9330_v14  ;;  %15179 = vst [vmem:[#allocation31_spill] sm:$0xff] %v9337_v20  ;;  %v9340_v21 = vsub.f32 %v614_v10, %v9330_v14  ;;  %v641_v24 = vpop.permute.xlu1 %640  ;;  %v639_v25 = vpop.permute.xlu0 %638  ;;  %v9358_v35 = vsub.f32 %v615_v28, %v9337_v20 }
 0x171   : > { %v642_v26 = vsel %vm586_vm3, %v639_v25, %v641_v24  ;;  %v643_v27 = vsel %vm586_vm3, %v641_v24, %v639_v25  ;;  %15188 = vst [vmem:[#allocation40_spill] sm:$0xff] %v9413_v7 }
 0x172   : > { %v9352_v33 = vmul.f32 %v642_v26, %v9173_v31  ;;  %684 = vrot.lane.b32.xlu0 %v9340_v21, %s8873_s25  ;;  %v9361_v36 = vmul.f32 %v643_v27, %v9176_v32 }
 0x174   : > { %15181 = vst [vmem:[#allocation33_spill] sm:$0xff] %v9352_v33  ;;  %15182 = vst [vmem:[#allocation34_spill] sm:$0xff] %v9361_v36  ;;  %v9364_v37 = vsub.f32 %v636_v30, %v9352_v33  ;;  %v651_v38 = vpop.permute.xlu1 %650  ;;  %v649_v39 = vpop.permute.xlu0 %648  ;;  %v9379_v46 = vsub.f32 %v637_v43, %v9361_v36 }
 0x175   : > { %v653_v40 = vsel %vm564_vm1, %v651_v38, %v649_v39  ;;  %v652_v45 = vsel %vm564_vm1, %v649_v39, %v651_v38 }
 0x176   : > { %v9370_v44 = vmul.f32 %v653_v40, %v9147_v17  ;;  %686 = vrot.lane.b32.xlu1 %v9364_v37, %s8873_s25  ;;  %706 = vrot.lane.b32.xlu0 %v9358_v35, %s8873_s25  ;;  %v9386_v57 = vmul.f32 %v652_v45, %v9150_v18  ;;  %v9560_v22 = vmul.f32 %v9379_v46, %v9358_v35 }
 0x178   : > { %15183 = vst [vmem:[#allocation35_spill] sm:$0xff] %v9370_v44  ;;  %v661_v47 = vpop.permute.xlu1 %660  ;;  %v659_v48 = vpop.permute.xlu0 %658  ;;  %15184 = vst [vmem:[#allocation36_spill] sm:$0xff] %v9386_v57  ;;  %v656_v58 = vsub.f32 %v604_v1, %v9370_v44  ;;  %v657_v1 = vsub.f32 %v605_v16, %v9386_v57 }
 0x179   : > { %v662_v49 = vsel %vm586_vm3, %v659_v48, %v661_v47  ;;  %v663_v50 = vsel %vm586_vm3, %v661_v47, %v659_v48 }
 0x17a   : > { %v9390_v59 = vmul.f32 %v662_v49, %v9173_v31  ;;  %708 = vrot.lane.b32.xlu1 %v9379_v46, %s8873_s25  ;;  %v9398_v61 = vmul.f32 %v663_v50, %v9176_v32 }
 0x17c   : > { %15185 = vst [vmem:[#allocation37_spill] sm:$0xff] %v9390_v59  ;;  %15186 = vst [vmem:[#allocation38_spill] sm:$0xff] %v9398_v61  ;;  %v9401_v63 = vsub.f32 %v656_v58, %v9390_v59  ;;  %v683_v0 = vpop.permute.xlu1 %682  ;;  %v681_v2 = vpop.permute.xlu0 %680  ;;  %v9416_v8 = vsub.f32 %v657_v1, %v9398_v61 }
 0x17e   : > { %782 = vrot.lane.b32.xlu1 %v9340_v21, %s8870_s13  ;;  %688 = vrot.lane.b32.xlu0 %v9401_v63, %s8873_s25 }
 0x180   : > { %v705_v10 = vpop.permute.xlu1 %704  ;;  %v703_v15 = vpop.permute.xlu0 %702 }
 0x181   : > { %v737_v16 = vsel %vm724_vm4, %v705_v10, %v683_v0  ;;  %v736_v19 = vsel %vm724_vm4, %v703_v15, %v681_v2  ;;  %v725_v24 = vsel %vm724_vm4, %v681_v2, %v703_v15  ;;  %v726_v25 = vsel %vm724_vm4, %v683_v0, %v705_v10 }
 0x182   : > { %802 = vrot.lane.b32.xlu1 %v9358_v35, %s8870_s13  ;;  %710 = vrot.lane.b32.xlu0 %v9416_v8, %s8873_s25  ;;  %v759_v26 = vmul.f32 %v9410_v3, %v725_v24  ;;  %v761_v27 = vmul.f32 %v9410_v3, %v726_v25  ;;  %v758_v28 = vmul.f32 %v9413_v7, %v736_v19 }
 0x183   : > { %v760_v30 = vmul.f32 %v9413_v7, %v737_v16  ;;  %v9498_v2 = vmul.f32 %v9340_v21, %v9340_v21  ;;  %v9510_v15 = vmul.f32 %v9358_v35, %v9358_v35  ;;  %v9520_v19 = vmul.f32 %v9401_v63, %v9401_v63 }
 0x184   : > { %v7638_v34 = vpack.c.bf16 %v761_v27, %v759_v26  ;;  %v9434_v39 = vpop.permute.xlu0 %780  ;;  %v9456_v45 = vpop.permute.xlu1 %862  ;;  %v9524_v24 = vmul.f32 %v9364_v37, %v9364_v37  ;;  %v9534_v26 = vmul.f32 %v9416_v8, %v9416_v8  ;;  %v9538_v27 = vmul.f32 %v9379_v46, %v9379_v46 }
 0x185   : > { %v7640_v38 = vpack.c.bf16 %v760_v30, %v758_v28 }
 0x186   : > { %786 = vrot.lane.b32.xlu1 %v9401_v63, %s8870_s13  ;;  %784 = vrot.lane.b32.xlu0 %v9364_v37, %s8870_s13 }
 0x187   : > { %7639 = vmatprep.subr.bf16.mxu0 %v7638_v34  ;;  %v9550_v34 = vmul.f32 %v9364_v37, %v9340_v21 }
 0x188   : > { %7641 = vmatpush1.bf16.msra.mxu0 %v7640_v38  ;;  %v9444_v40 = vpop.permute.xlu0 %800  ;;  %v9468_v48 = vpop.permute.xlu1 %884 }
 0x18a   : > { %806 = vrot.lane.b32.xlu1 %v9416_v8, %s8870_s13  ;;  %804 = vrot.lane.b32.xlu0 %v9379_v46, %s8870_s13 }
 0x18c   : > { %v9450_v43 = vpop.permute.xlu0 %860  ;;  %v9476_v50 = vpop.permute.xlu1 %1106 }
 0x18d   : > { %15190 = vst [vmem:[#allocation42_spill] sm:$0xff] %v9476_v50 }
 0x18e   : > { %866 = vrot.lane.b32.xlu1 %v9364_v37, %s8874_s23  ;;  %864 = vrot.lane.b32.xlu0 %v9340_v21, %s8874_s23 }
 0x190   : > { %v9462_v47 = vpop.permute.xlu0 %882  ;;  %v9488_v60 = vpop.permute.xlu1 %1128 }
 0x191   : > { %15192 = vst [vmem:[#allocation44_spill] sm:$0xff] %v9488_v60 }
 0x192   : > { %888 = vrot.lane.b32.xlu1 %v9379_v46, %s8874_s23  ;;  %886 = vrot.lane.b32.xlu0 %v9358_v35, %s8874_s23 }
 0x194   : > { %v9470_v49 = vpop.permute.xlu0 %1104  ;;  %v9500_v1 = vpop.permute.xlu1 %690 }
 0x195   : > { %15189 = vst [vmem:[#allocation41_spill] sm:$0xff] %v9470_v49 }
 0x196   : > { %978 = vrot.lane.b32.xlu1 %v9358_v35, %s8869_s14  ;;  %868 = vrot.lane.b32.xlu0 %v9401_v63, %s8874_s23 }
 0x198   : > { %v9482_v58 = vpop.permute.xlu0 %1126  ;;  %v9516_v16 = vpop.permute.xlu1 %712 }
 0x199   : > { %15191 = vst [vmem:[#allocation43_spill] sm:$0xff] %v9482_v58 }
 0x19a   : > { %964 = vrot.lane.b32.xlu1 %v9401_v63, %s8869_s14  ;;  %890 = vrot.lane.b32.xlu0 %v9416_v8, %s8874_s23 }
 0x19c   : > { %v9490_v0 = vpop.permute.xlu0 %692  ;;  %v9540_v28 = vpop.permute.xlu1 %790 }
 0x19e   : > { %982 = vrot.lane.b32.xlu1 %v9416_v8, %s8869_s14  ;;  %960 = vrot.lane.b32.xlu0 %v9340_v21, %s8869_s14 }
 0x1a0   : > { %v9506_v10 = vpop.permute.xlu0 %714  ;;  %v9556_v38 = vpop.permute.xlu1 %810 }
 0x1a2   : > { %1050 = vrot.lane.b32.xlu1 %v9358_v35, %s8872_s18  ;;  %962 = vrot.lane.b32.xlu0 %v9364_v37, %s8869_s14 }
 0x1a4   : > { %v9526_v25 = vpop.permute.xlu0 %788  ;;  %v9568_v20 = vpop.permute.xlu1 %870 }
 0x1a5   : > { %15194 = vst [vmem:[#allocation46_spill] sm:$0xff] %v9568_v20 }
 0x1a6   : > { %1036 = vrot.lane.b32.xlu1 %v9401_v63, %s8872_s18  ;;  %980 = vrot.lane.b32.xlu0 %v9379_v46, %s8869_s14 }
 0x1a8   : > { %v9546_v30 = vpop.permute.xlu0 %808  ;;  %v9580_v60 = vpop.permute.xlu1 %892 }
 0x1a9   : > { %15196 = vst [vmem:[#allocation48_spill] sm:$0xff] %v9580_v60 }
 0x1aa   : > { %1054 = vrot.lane.b32.xlu1 %v9416_v8, %s8872_s18  ;;  %1032 = vrot.lane.b32.xlu0 %v9340_v21, %s8872_s18 }
 0x1ac   : > { %v9562_v14 = vpop.permute.xlu0 %872  ;;  %v9588_v58 = vpop.permute.xlu1 %968 }
 0x1ad   : > { %15193 = vst [vmem:[#allocation45_spill] sm:$0xff] %v9562_v14  ;;  %15198 = vst [vmem:[#allocation50_spill] sm:$0xff] %v9588_v58 }
 0x1ae   : > { %694 = vrot.lane.b32.xlu1 %v9498_v2, %s8873_s25  ;;  %1034 = vrot.lane.b32.xlu0 %v9364_v37, %s8872_s18 }
 0x1b0   : > { %v9574_v23 = vpop.permute.xlu0 %894  ;;  %v9600_v33 = vpop.permute.xlu1 %986 }
 0x1b1   : > { %15195 = vst [vmem:[#allocation47_spill] sm:$0xff] %v9574_v23  ;;  %15200 = vst [vmem:[#allocation52_spill] sm:$0xff] %v9600_v33 }
 0x1b2   : > { %716 = vrot.lane.b32.xlu1 %v9510_v15, %s8873_s25  ;;  %1052 = vrot.lane.b32.xlu0 %v9379_v46, %s8872_s18 }
 0x1b4   : > { %v9582_v50 = vpop.permute.xlu0 %966  ;;  %v9608_v31 = vpop.permute.xlu1 %1040 }
 0x1b5   : > { %15197 = vst [vmem:[#allocation49_spill] sm:$0xff] %v9582_v50  ;;  %15202 = vst [vmem:[#allocation54_spill] sm:$0xff] %v9608_v31  ;;  %v1385_v31 = vld [vmem:[#allocation2 + $0x8] sm:$0xff] }
 0x1b6   : > { %698 = vrot.lane.b32.xlu1 %v9520_v19, %s8873_s25  ;;  %696 = vrot.lane.b32.xlu0 %v9524_v24, %s8873_s25 }
 0x1b7   : > { %1559 = vmatprep.mubr.f32.mxu0 %v1385_v31 }
 0x1b8   : > { %v9594_v49 = vpop.permute.xlu0 %984 }
 0x1b9   : > { %15199 = vst [vmem:[#allocation51_spill] sm:$0xff] %v9594_v49 }
 0x1ba   : > { %720 = vrot.lane.b32.xlu1 %v9534_v26, %s8873_s25  ;;  %718 = vrot.lane.b32.xlu0 %v9538_v27, %s8873_s25 }
 0x1bc   : > { %v9602_v36 = vpop.permute.xlu0 %1038 }
 0x1bd   : > { %15201 = vst [vmem:[#allocation53_spill] sm:$0xff] %v9602_v36  ;;  %v9620_v36 = vpop.permute.xlu1 %1058 }
 0x1be   : > { %1110 = vrot.lane.b32.xlu1 %v9364_v37, %s8875_s16  ;;  %700 = vrot.lane.b32.xlu0 %v9550_v34, %s8873_s25  ;;  %15204 = vst [vmem:[#allocation56_spill] sm:$0xff] %v9620_v36 }
 0x1c0   : > { %v9614_v59 = vpop.permute.xlu0 %1056 }
 0x1c1   : > { %15203 = vst [vmem:[#allocation55_spill] sm:$0xff] %v9614_v59 }
 0x1c2   : > { %722 = vrot.lane.b32.xlu1 %v9560_v22, %s8873_s25  ;;  %1108 = vrot.lane.b32.xlu0 %v9340_v21, %s8875_s16 }
 0x1c6   : > { %794 = vrot.lane.b32.xlu1 %v9524_v24, %s8870_s13  ;;  %792 = vrot.lane.b32.xlu0 %v9498_v2, %s8870_s13 }
 0x1ca   : > { %814 = vrot.lane.b32.xlu1 %v9538_v27, %s8870_s13  ;;  %812 = vrot.lane.b32.xlu0 %v9510_v15, %s8870_s13 }
 0x1ce   : > { %798 = vrot.lane.b32.xlu1 %v9550_v34, %s8870_s13  ;;  %796 = vrot.lane.b32.xlu0 %v9520_v19, %s8870_s13 }
 0x1d2   : > { %1132 = vrot.lane.b32.xlu1 %v9379_v46, %s8875_s16  ;;  %816 = vrot.lane.b32.xlu0 %v9534_v26, %s8870_s13 }
 0x1d6   : > { %818 = vrot.lane.b32.xlu1 %v9560_v22, %s8870_s13  ;;  %1130 = vrot.lane.b32.xlu0 %v9358_v35, %s8875_s16 }
 0x1da   : > { %874 = vrot.lane.b32.xlu1 %v9498_v2, %s8874_s23  ;;  %876 = vrot.lane.b32.xlu0 %v9524_v24, %s8874_s23 }
 0x1de   : > { %896 = vrot.lane.b32.xlu1 %v9510_v15, %s8874_s23  ;;  %898 = vrot.lane.b32.xlu0 %v9538_v27, %s8874_s23 }
 0x1e2   : > { %878 = vrot.lane.b32.xlu1 %v9520_v19, %s8874_s23  ;;  %880 = vrot.lane.b32.xlu0 %v9550_v34, %s8874_s23 }
 0x1e4   : > { %v685_v61 = vpop.permute.xlu0 %684 }
 0x1e6   : > { %900 = vrot.lane.b32.xlu1 %v9534_v26, %s8874_s23  ;;  %970 = vrot.lane.b32.xlu0 %v9498_v2, %s8869_s14 }
 0x1e8   : > { %v687_v32 = vpop.permute.xlu1 %686  ;;  %v707_v13 = vpop.permute.xlu0 %706 }
 0x1e9   : > { %v727_v59 = vsel %vm724_vm4, %v685_v61, %v707_v13  ;;  %v738_v36 = vsel %vm724_vm4, %v707_v13, %v685_v61 }
 0x1ea   : > { %902 = vrot.lane.b32.xlu1 %v9560_v22, %s8874_s23  ;;  %988 = vrot.lane.b32.xlu0 %v9510_v15, %s8869_s14  ;;  %v762_v50 = vmul.f32 %v9413_v7, %v738_v36  ;;  %v763_v49 = vmul.f32 %v9410_v3, %v727_v59 }
 0x1ec   : > { %v709_v58 = vpop.permute.xlu1 %708 }
 0x1ed   : > { %v728_v33 = vsel %vm724_vm4, %v687_v32, %v709_v58  ;;  %v739_v31 = vsel %vm724_vm4, %v709_v58, %v687_v32  ;;  %v730_v32 = vsel %vm724_vm4, %v9500_v1, %v9516_v16 }
 0x1ee   : > { %v764_v29 = vmul.f32 %v9413_v7, %v739_v31  ;;  %v765_v44 = vmul.f32 %v9410_v3, %v728_v33  ;;  %972 = vrot.lane.b32.xlu1 %v9524_v24, %s8869_s14  ;;  %974 = vrot.lane.b32.xlu0 %v9520_v19, %s8869_s14  ;;  %v741_v33 = vsel %vm724_vm4, %v9516_v16, %v9500_v1 }
 0x1ef   : > { %v768_v59 = vmul.f32 %v9413_v7, %v741_v33 }
 0x1f0   : > { %v9646_v13 = vpop.permute.xlu1 %782  ;;  %v689_v61 = vpop.permute.xlu0 %688  ;;  %v7642_v17 = vpack.c.bf16 %v765_v44, %v763_v49  ;;  %v7644_v18 = vpack.c.bf16 %v764_v29, %v762_v50  ;;  %v769_v49 = vmul.f32 %v9410_v3, %v730_v32 }
 0x1f2   : > { %990 = vrot.lane.b32.xlu1 %v9538_v27, %s8869_s14  ;;  %7643 = vmatprep.subr.bf16.mxu0 %v7642_v17 }
 0x1f3   : > { %992 = vrot.lane.b32.xlu0 %v9534_v26, %s8869_s14  ;;  %7645 = vmatpush1.bf16.msra.mxu0 %v7644_v18 }
 0x1f4   : > { %v9660_v36 = vpop.permute.xlu1 %802  ;;  %v711_v29 = vpop.permute.xlu0 %710 }
 0x1f5   : > { %v729_v17 = vsel %vm724_vm4, %v689_v61, %v711_v29  ;;  %v740_v44 = vsel %vm724_vm4, %v711_v29, %v689_v61 }
 0x1f6   : > { %v766_v50 = vmul.f32 %v9413_v7, %v740_v44  ;;  %v767_v58 = vmul.f32 %v9410_v3, %v729_v17  ;;  %976 = vrot.lane.b32.xlu1 %v9550_v34, %s8869_s14 }
 0x1f7   : > { %1042 = vrot.lane.b32.xlu0 %v9498_v2, %s8872_s18 }
 0x1f8   : > { %v9674_v18 = vpop.permute.xlu1 %786  ;;  %v9676_v1 = vpop.permute.xlu0 %784  ;;  %v7646_v16 = vpack.c.bf16 %v769_v49, %v767_v58  ;;  %v7648_v31 = vpack.c.bf16 %v768_v59, %v766_v50 }
 0x1fa   : > { %994 = vrot.lane.b32.xlu1 %v9560_v22, %s8869_s14  ;;  %7647 = vmatprep.subr.bf16.mxu0 %v7646_v16 }
 0x1fb   : > { %1060 = vrot.lane.b32.xlu0 %v9510_v15, %s8872_s18  ;;  %7649 = vmatpush1.bf16.msra.mxu0 %v7648_v31 }
 0x1fc   : > { %v9682_v61 = vpop.permute.xlu1 %806  ;;  %v9684_v32 = vpop.permute.xlu0 %804 }
 0x1fe   : > { %1044 = vrot.lane.b32.xlu1 %v9524_v24, %s8872_s18 }
 0x1ff   : > { %1046 = vrot.lane.b32.xlu0 %v9520_v19, %s8872_s18 }
 0x200   : > { %v9690_v33 = vpop.permute.xlu1 %866  ;;  %v9692_v29 = vpop.permute.xlu0 %864 }
 0x202   : > { %1062 = vrot.lane.b32.xlu1 %v9538_v27, %s8872_s18 }
 0x203   : > { %1064 = vrot.lane.b32.xlu0 %v9534_v26, %s8872_s18 }
 0x204   : > { %v9698_v17 = vpop.permute.xlu1 %888  ;;  %v9700_v44 = vpop.permute.xlu0 %886 }
 0x206   : > { %1048 = vrot.lane.b32.xlu1 %v9550_v34, %s8872_s18 }
 0x207   : > { %1112 = vrot.lane.b32.xlu0 %v9401_v63, %s8875_s16 }
 0x208   : > { %v9706_v59 = vpop.permute.xlu1 %978  ;;  %v9708_v49 = vpop.permute.xlu0 %868 }
 0x209   : > { %15205 = vst [vmem:[#allocation57_spill] sm:$0xff] %v9706_v59  ;;  %15206 = vst [vmem:[#allocation58_spill] sm:$0xff] %v9708_v49 }
 0x20a   : > { %1066 = vrot.lane.b32.xlu1 %v9560_v22, %s8872_s18 }
 0x20b   : > { %1134 = vrot.lane.b32.xlu0 %v9416_v8, %s8875_s16 }
 0x20c   : > { %v9714_v50 = vpop.permute.xlu1 %964  ;;  %v9716_v58 = vpop.permute.xlu0 %890 }
 0x20d   : > { %15207 = vst [vmem:[#allocation59_spill] sm:$0xff] %v9714_v50 }
 0x20e   : > { %1114 = vrot.lane.b32.xlu1 %v9250_v53, %s8875_s16 }
 0x20f   : > { %1116 = vrot.lane.b32.xlu0 %v9266_v55, %s8875_s16 }
 0x210   : > { %v9722_v16 = vpop.permute.xlu1 %982  ;;  %v9724_v31 = vpop.permute.xlu0 %960 }
 0x211   : > { %15208 = vst [vmem:[#allocation60_spill] sm:$0xff] %v9722_v16  ;;  %15209 = vst [vmem:[#allocation61_spill] sm:$0xff] %v9724_v31 }
 0x212   : > { %1136 = vrot.lane.b32.xlu1 %v9258_v54, %s8875_s16 }
 0x213   : > { %1138 = vrot.lane.b32.xlu0 %v9274_v56, %s8875_s16 }
 0x214   : > { %v9730_v57 = vpop.permute.xlu1 %1050  ;;  %v9732_v50 = vpop.permute.xlu0 %962 }
 0x215   : > { %15210 = vst [vmem:[#allocation62_spill] sm:$0xff] %v9730_v57  ;;  %15211 = vst [vmem:[#allocation63_spill] sm:$0xff] %v9732_v50 }
 0x216   : > { %1118 = vrot.lane.b32.xlu1 %v9498_v2, %s8875_s16 }
 0x217   : > { %1120 = vrot.lane.b32.xlu0 %v9524_v24, %s8875_s16 }
 0x218   : > { %v9738_v59 = vpop.permute.xlu1 %1036  ;;  %v9740_v16 = vpop.permute.xlu0 %980 }
 0x219   : > { %15212 = vst [vmem:[#allocation64_spill] sm:$0xff] %v9738_v59  ;;  %15213 = vst [vmem:[#allocation65_spill] sm:$0xff] %v9740_v16  ;;  %v731_v16 = vsel %vm724_vm4, %v9490_v0, %v9506_v10 }
 0x21a   : > { %1140 = vrot.lane.b32.xlu1 %v9510_v15, %s8875_s16  ;;  %v771_v60 = vmul.f32 %v9410_v3, %v731_v16 }
 0x21b   : > { %1142 = vrot.lane.b32.xlu0 %v9538_v27, %s8875_s16 }
 0x21c   : > { %v9746_v31 = vpop.permute.xlu1 %1054  ;;  %v9748_v57 = vpop.permute.xlu0 %1032 }
 0x21d   : > { %15214 = vst [vmem:[#allocation66_spill] sm:$0xff] %v9746_v31  ;;  %15215 = vst [vmem:[#allocation67_spill] sm:$0xff] %v9748_v57  ;;  %v742_v31 = vsel %vm724_vm4, %v9506_v10, %v9490_v0 }
 0x21e   : > { %1122 = vrot.lane.b32.xlu1 %v9520_v19, %s8875_s16  ;;  %v770_v20 = vmul.f32 %v9413_v7, %v742_v31 }
 0x21f   : > { %1124 = vrot.lane.b32.xlu0 %v9550_v34, %s8875_s16 }
 0x220   : > { %v695_v50 = vpop.permute.xlu1 %694  ;;  %v9754_v59 = vpop.permute.xlu0 %1034 }
 0x221   : > { %15216 = vst [vmem:[#allocation68_spill] sm:$0xff] %v9754_v59 }
 0x222   : > { %1144 = vrot.lane.b32.xlu1 %v9534_v26, %s8875_s16 }
 0x223   : > { %1204 = vrot.lane.b32.xlu0 %v9200_v51, %s8871_s28 }
 0x224   : > { %v717_v57 = vpop.permute.xlu1 %716  ;;  %v9768_v14 = vpop.permute.xlu0 %1052 }
 0x225   : > { %15217 = vst [vmem:[#allocation69_spill] sm:$0xff] %v9768_v14  ;;  %v732_v59 = vsel %vm724_vm4, %v695_v50, %v717_v57  ;;  %v743_v23 = vsel %vm724_vm4, %v717_v57, %v695_v50 }
 0x226   : > { %v772_v42 = vmul.f32 %v9413_v7, %v743_v23  ;;  %v773_v0 = vmul.f32 %v9410_v3, %v732_v59  ;;  %1146 = vrot.lane.b32.xlu1 %v9560_v22, %s8875_s16 }
 0x227   : > { %1224 = vrot.lane.b32.xlu0 %v9202_v52, %s8871_s28 }
 0x228   : > { %v699_v10 = vpop.permute.xlu1 %698  ;;  %v7650_v14 = vpack.c.bf16 %v773_v0, %v771_v60  ;;  %v7652_v51 = vpack.c.bf16 %v772_v42, %v770_v20  ;;  %v697_v49 = vpop.permute.xlu0 %696 }
 0x22a   : > { %1206 = vrot.lane.b32.xlu1 %v9340_v21, %s8871_s28  ;;  %7651 = vmatprep.subr.bf16.mxu0 %v7650_v14 }
 0x22b   : > { %1208 = vrot.lane.b32.xlu0 %v9364_v37, %s8871_s28  ;;  %7653 = vmatpush1.bf16.msra.mxu0 %v7652_v51 }
 0x22c   : > { %v721_v23 = vpop.permute.xlu1 %720  ;;  %v719_v57 = vpop.permute.xlu0 %718 }
 0x22d   : > { %v734_v59 = vsel %vm724_vm4, %v699_v10, %v721_v23  ;;  %v745_v50 = vsel %vm724_vm4, %v721_v23, %v699_v10  ;;  %v733_v42 = vsel %vm724_vm4, %v697_v49, %v719_v57  ;;  %v744_v20 = vsel %vm724_vm4, %v719_v57, %v697_v49 }
 0x22e   : > { %v776_v14 = vmul.f32 %v9413_v7, %v745_v50  ;;  %v777_v60 = vmul.f32 %v9410_v3, %v734_v59  ;;  %1226 = vrot.lane.b32.xlu1 %v9358_v35, %s8871_s28  ;;  %v774_v51 = vmul.f32 %v9413_v7, %v744_v20  ;;  %v775_v16 = vmul.f32 %v9410_v3, %v733_v42 }
 0x22f   : > { %1228 = vrot.lane.b32.xlu0 %v9379_v46, %s8871_s28  ;;  %v821_v49 = vsel %vm520_vm0, %v9646_v13, %v9660_v36  ;;  %v820_v57 = vsel %vm520_vm0, %v9434_v39, %v9444_v40 }
 0x230   : > { %v9802_v31 = vpop.permute.xlu1 %1110  ;;  %v701_v0 = vpop.permute.xlu0 %700  ;;  %v7654_v10 = vpack.c.bf16 %v777_v60, %v775_v16  ;;  %v7656_v23 = vpack.c.bf16 %v776_v14, %v774_v51  ;;  %v843_v50 = vmul.f32 %v821_v49, %v9139_v12  ;;  %v831_v60 = vsel %vm520_vm0, %v9660_v36, %v9646_v13 }
 0x231   : > { %v830_v13 = vsel %vm520_vm0, %v9444_v40, %v9434_v39 }
 0x232   : > { %1210 = vrot.lane.b32.xlu1 %v9401_v63, %s8871_s28  ;;  %7655 = vmatprep.subr.bf16.mxu0 %v7654_v10  ;;  %v841_v10 = vmul.f32 %v820_v57, %v9139_v12  ;;  %v840_v40 = vmul.f32 %v830_v13, %v9136_v11 }
 0x233   : > { %1212 = vrot.lane.b32.xlu0 %v9250_v53, %s8871_s28  ;;  %7657 = vmatpush1.bf16.msra.mxu0 %v7656_v23  ;;  %v823_v23 = vsel %vm520_vm0, %v9674_v18, %v9682_v61 }
 0x234   : > { %v723_v59 = vpop.permute.xlu1 %722  ;;  %v9817_v42 = vpop.permute.xlu0 %1108  ;;  %v847_v39 = vmul.f32 %v823_v23, %v9139_v12 }
 0x235   : > { %v735_v20 = vsel %vm724_vm4, %v701_v0, %v723_v59  ;;  %v746_v14 = vsel %vm724_vm4, %v723_v59, %v701_v0  ;;  %v822_v0 = vsel %vm520_vm0, %v9676_v1, %v9684_v32  ;;  %v824_v59 = vsel %vm520_vm0, %v9526_v25, %v9546_v30 }
 0x236   : > { %v778_v51 = vmul.f32 %v9413_v7, %v746_v14  ;;  %v779_v16 = vmul.f32 %v9410_v3, %v735_v20  ;;  %1230 = vrot.lane.b32.xlu1 %v9416_v8, %s8871_s28  ;;  %v842_v20 = vmul.f32 %v831_v60, %v9136_v11  ;;  %v833_v14 = vsel %vm520_vm0, %v9682_v61, %v9674_v18 }
 0x237   : > { %1232 = vrot.lane.b32.xlu0 %v9258_v54, %s8871_s28  ;;  %v7662_v7 = vpack.c.bf16 %v843_v50, %v841_v10  ;;  %v825_v18 = vsel %vm520_vm0, %v9540_v28, %v9556_v38 }
 0x238   : > { %v795_v36 = vpop.permute.xlu1 %794  ;;  %v7658_v49 = vpack.c.bf16 %v9323_v9, %v779_v16  ;;  %v7660_v57 = vpack.c.bf16 %v9311_v62, %v778_v51  ;;  %v793_v3 = vpop.permute.xlu0 %792  ;;  %v832_v62 = vsel %vm520_vm0, %v9684_v32, %v9676_v1  ;;  %v845_v9 = vmul.f32 %v822_v0, %v9139_v12 }
 0x239   : > { %v849_v1 = vmul.f32 %v824_v59, %v9139_v12  ;;  %v846_v32 = vmul.f32 %v833_v14, %v9136_v11  ;;  %v844_v50 = vmul.f32 %v832_v62, %v9136_v11  ;;  %v7664_v51 = vpack.c.bf16 %v842_v20, %v840_v40 }
 0x23a   : > { %1214 = vrot.lane.b32.xlu1 %v9266_v55, %s8871_s28  ;;  %7659 = vmatprep.subr.bf16.mxu0 %v7658_v49  ;;  %v834_v16 = vsel %vm520_vm0, %v9546_v30, %v9526_v25  ;;  %v7666_v10 = vpack.c.bf16 %v847_v39, %v845_v9  ;;  %v851_v23 = vmul.f32 %v825_v18, %v9139_v12 }
 0x23b   : > { %1216 = vrot.lane.b32.xlu0 %v9498_v2, %s8871_s28  ;;  %7661 = vmatpush1.bf16.msra.mxu0 %v7660_v57  ;;  %v835_v25 = vsel %vm520_vm0, %v9556_v38, %v9540_v28  ;;  %v848_v13 = vmul.f32 %v834_v16, %v9136_v11  ;;  %v7668_v57 = vpack.c.bf16 %v846_v32, %v844_v50 }
 0x23c   : > { %v815_v61 = vpop.permute.xlu1 %814  ;;  %7663 = vmatprep.subr.bf16.mxu0 %v7662_v7  ;;  %v813_v60 = vpop.permute.xlu0 %812  ;;  %v7670_v59 = vpack.c.bf16 %v851_v23, %v849_v1  ;;  %v850_v28 = vmul.f32 %v835_v25, %v9136_v11  ;;  %v906_v16 = vsel %vm904_vm5, %v9456_v45, %v9468_v48 }
 0x23d   : > { %v826_v7 = vsel %vm520_vm0, %v793_v3, %v813_v60  ;;  %v827_v0 = vsel %vm520_vm0, %v795_v36, %v815_v61  ;;  %v836_v20 = vsel %vm520_vm0, %v813_v60, %v793_v3  ;;  %v837_v39 = vsel %vm520_vm0, %v815_v61, %v795_v36  ;;  %v7063_v3 = vld [vmem:[%s14908_s1 + $0x2] ss:$8 sm:$0x3] }
 0x23e   : > { %1234 = vrot.lane.b32.xlu1 %v9274_v56, %s8871_s28  ;;  %v853_v14 = vmul.f32 %v826_v7, %v9139_v12  ;;  %v855_v62 = vmul.f32 %v827_v0, %v9139_v12  ;;  %v852_v36 = vmul.f32 %v836_v20, %v9136_v11  ;;  %v854_v9 = vmul.f32 %v837_v39, %v9136_v11 }
 0x23f   : > { %1236 = vrot.lane.b32.xlu0 %v9510_v15, %s8871_s28  ;;  %7665 = vmatpush1.bf16.msra.mxu0 %v7664_v51  ;;  %v7672_v18 = vpack.c.bf16 %v850_v28, %v848_v13  ;;  %v905_v61 = vsel %vm904_vm5, %v9450_v43, %v9462_v47  ;;  %v9919_v32 = vrot.slane %v7063_v3, %v9126_v6 }
 0x240   : > { %v799_v30 = vpop.permute.xlu1 %798  ;;  %7667 = vmatprep.subr.bf16.mxu0 %v7666_v10  ;;  %v797_v49 = vpop.permute.xlu0 %796  ;;  %v7674_v1 = vpack.c.bf16 %v855_v62, %v853_v14  ;;  %v9928_v51 = vrot.slane %v7063_v3, %v9124_v5  ;;  %v916_v10 = vsel %vm904_vm5, %v9462_v47, %v9450_v43  ;;  %v908_v14 = vsel %vm904_vm5, %v9690_v33, %v9698_v17 }
 0x241   : > { %15218 = vst [vmem:[#allocation70_spill] sm:$0xff] %v9919_v32  ;;  %v939_v7 = vmul.f32 %v9919_v32, %v905_v61  ;;  %v941_v47 = vmul.f32 %v9919_v32, %v906_v16  ;;  %v917_v39 = vsel %vm904_vm5, %v9468_v48, %v9456_v45  ;;  %v945_v61 = vmul.f32 %v9919_v32, %v908_v14  ;;  %v15225_v14 = vld [vmem:[#allocation47_spill] sm:$0xff] }
 0x242   : > { %1218 = vrot.lane.b32.xlu1 %v9524_v24, %s8871_s28  ;;  %15219 = vst [vmem:[#allocation71_spill] sm:$0xff] %v9928_v51  ;;  %v940_v48 = vmul.f32 %v9928_v51, %v917_v39 }
 0x243   : > { %1220 = vrot.lane.b32.xlu0 %v9520_v19, %s8871_s28  ;;  %7669 = vmatpush1.bf16.msra.mxu0 %v7668_v57 }
 0x244   : > { %v9907_v38 = vpop.permute.xlu1 %1132  ;;  %7671 = vmatprep.subr.bf16.mxu0 %v7670_v59  ;;  %v817_v40 = vpop.permute.xlu0 %816 }
 0x245   : > { %v828_v50 = vsel %vm520_vm0, %v797_v49, %v817_v40  ;;  %v838_v60 = vsel %vm520_vm0, %v817_v40, %v797_v49  ;;  %v7676_v49 = vpack.c.bf16 %v854_v9, %v852_v36  ;;  %v938_v36 = vmul.f32 %v9928_v51, %v916_v10 }
 0x246   : > { %1238 = vrot.lane.b32.xlu1 %v9538_v27, %s8871_s28  ;;  %v856_v57 = vmul.f32 %v838_v60, %v9136_v11  ;;  %v857_v59 = vmul.f32 %v828_v50, %v9139_v12  ;;  %v919_v9 = vsel %vm904_vm5, %v9698_v17, %v9690_v33  ;;  %v15220_v50 = vld [vmem:[#allocation58_spill] sm:$0xff]  ;;  %v15221_v17 = vld [vmem:[#allocation27_spill] sm:$0xff] }
 0x247   : > { %1240 = vrot.lane.b32.xlu0 %v9534_v26, %s8871_s28  ;;  %7673 = vmatpush1.bf16.msra.mxu0 %v7672_v18  ;;  %v7682_v18 = vpack.c.bf16 %v941_v47, %v939_v7  ;;  %v909_v33 = vsel %vm904_vm5, %v15220_v50, %v9716_v58  ;;  %v944_v10 = vmul.f32 %v9928_v51, %v919_v9 }
 0x248   : > { %v819_v23 = vpop.permute.xlu1 %818  ;;  %7675 = vmatprep.subr.bf16.mxu0 %v7674_v1  ;;  %v9939_v0 = vpop.permute.xlu0 %1130  ;;  %v918_v1 = vsel %vm904_vm5, %v9700_v44, %v9692_v29 }
 0x249   : > { %v829_v25 = vsel %vm520_vm0, %v799_v30, %v819_v23  ;;  %v839_v13 = vsel %vm520_vm0, %v819_v23, %v799_v30  ;;  %v907_v30 = vsel %vm904_vm5, %v9692_v29, %v9700_v44  ;;  %v15222_v29 = vld [vmem:[#allocation48_spill] sm:$0xff]  ;;  %v15223_v44 = vld [vmem:[#allocation46_spill] sm:$0xff]  ;;  %v942_v23 = vmul.f32 %v9928_v51, %v918_v1 }
 0x24a   : > { %v858_v20 = vmul.f32 %v839_v13, %v9136_v11  ;;  %v859_v43 = vmul.f32 %v829_v25, %v9139_v12  ;;  %1222 = vrot.lane.b32.xlu1 %v9550_v34, %s8871_s28  ;;  %v943_v45 = vmul.f32 %v9919_v32, %v907_v30  ;;  %v910_v16 = vsel %vm904_vm5, %v15223_v44, %v15222_v29  ;;  %v15226_v30 = vld [vmem:[#allocation45_spill] sm:$0xff] }
 0x24b   : > { %1284 = vrot.lane.b32.xlu0 %v9186_v41, %s15079_s24  ;;  %7677 = vmatpush1.bf16.msra.mxu0 %v7676_v49  ;;  %v7684_v25 = vpack.c.bf16 %v940_v48, %v938_v36  ;;  %v920_v13 = vsel %vm904_vm5, %v9716_v58, %v15220_v50  ;;  %v947_v49 = vmul.f32 %v9919_v32, %v909_v33 }
 0x24c   : > { %v875_v62 = vpop.permute.xlu1 %874  ;;  %v7678_v28 = vpack.c.bf16 %v859_v43, %v857_v59  ;;  %v7680_v3 = vpack.c.bf16 %v858_v20, %v856_v57  ;;  %v877_v40 = vpop.permute.xlu0 %876  ;;  %v15224_v57 = vld [vmem:[#allocation28_spill] sm:$0xff]  ;;  %v7686_v59 = vpack.c.bf16 %v945_v61, %v943_v45  ;;  %v921_v43 = vsel %vm904_vm5, %v15222_v29, %v15223_v44 }
 0x24d   : > { %v949_v58 = vmul.f32 %v9919_v32, %v910_v16  ;;  %v911_v39 = vsel %vm904_vm5, %v15226_v30, %v15225_v14  ;;  %v7688_v36 = vpack.c.bf16 %v944_v10, %v942_v23  ;;  %v948_v1 = vmul.f32 %v9928_v51, %v921_v43 }
 0x24e   : > { %1242 = vrot.lane.b32.xlu1 %v9560_v22, %s8871_s28  ;;  %7679 = vmatprep.subr.bf16.mxu0 %v7678_v28  ;;  %v946_v28 = vmul.f32 %v9928_v51, %v920_v13  ;;  %v922_v45 = vsel %vm904_vm5, %v15225_v14, %v15226_v30  ;;  %v951_v48 = vmul.f32 %v9919_v32, %v911_v39  ;;  %v15227_v39 = vld [vmem:[#allocation57_spill] sm:$0xff] }
 0x24f   : > { %1306 = vrot.lane.b32.xlu0 %v15221_v17, %s15079_s24  ;;  %7681 = vmatpush1.bf16.msra.mxu0 %v7680_v3  ;;  %v7690_v61 = vpack.c.bf16 %v949_v58, %v947_v49 }
 0x250   : > { %v897_v60 = vpop.permute.xlu1 %896  ;;  %7683 = vmatprep.subr.bf16.mxu0 %v7682_v18  ;;  %v899_v7 = vpop.permute.xlu0 %898  ;;  %v7692_v44 = vpack.c.bf16 %v948_v1, %v946_v28  ;;  %v15228_v28 = vld [vmem:[#allocation61_spill] sm:$0xff] }
 0x251   : > { %v912_v20 = vsel %vm904_vm5, %v875_v62, %v897_v60  ;;  %v923_v9 = vsel %vm904_vm5, %v897_v60, %v875_v62  ;;  %v913_v50 = vsel %vm904_vm5, %v877_v40, %v899_v7  ;;  %v924_v13 = vsel %vm904_vm5, %v899_v7, %v877_v40 }
 0x252   : > { %1286 = vrot.lane.b32.xlu1 %v15224_v57, %s15079_s24  ;;  %v953_v18 = vmul.f32 %v9919_v32, %v912_v20  ;;  %v952_v33 = vmul.f32 %v9928_v51, %v923_v9  ;;  %v955_v49 = vmul.f32 %v9919_v32, %v913_v50  ;;  %v954_v40 = vmul.f32 %v9928_v51, %v924_v13  ;;  %v15233_v13 = vld [vmem:[#allocation60_spill] sm:$0xff] }
 0x253   : > { %1288 = vrot.lane.b32.xlu0 %v9340_v21, %s15079_s24  ;;  %7685 = vmatpush1.bf16.msra.mxu0 %v7684_v25  ;;  %v950_v25 = vmul.f32 %v9928_v51, %v922_v45 }
 0x254   : > { %v879_v47 = vpop.permute.xlu1 %878  ;;  %7687 = vmatprep.subr.bf16.mxu0 %v7686_v59  ;;  %v881_v3 = vpop.permute.xlu0 %880  ;;  %v7694_v23 = vpack.c.bf16 %v953_v18, %v951_v48  ;;  %v1005_v48 = vsel %vm564_vm1, %v15227_v39, %v15228_v28 }
 0x256   : > { %1308 = vrot.lane.b32.xlu1 %v9202_v52, %s15079_s24 }
 0x257   : > { %1310 = vrot.lane.b32.xlu0 %v9358_v35, %s15079_s24  ;;  %7689 = vmatpush1.bf16.msra.mxu0 %v7688_v36  ;;  %v996_v36 = vsel %vm564_vm1, %v15228_v28, %v15227_v39  ;;  %v15238_v28 = vld [vmem:[#allocation51_spill] sm:$0xff] }
 0x258   : > { %v901_v62 = vpop.permute.xlu1 %900  ;;  %7691 = vmatprep.subr.bf16.mxu0 %v7690_v61  ;;  %v10029_v60 = vpop.permute.xlu0 %970 }
 0x259   : > { %v914_v29 = vsel %vm904_vm5, %v879_v47, %v901_v62  ;;  %v925_v16 = vsel %vm904_vm5, %v901_v62, %v879_v47  ;;  %v7696_v47 = vpack.c.bf16 %v952_v33, %v950_v25  ;;  %v15230_v62 = vld [vmem:[#allocation22_spill] sm:$0xff]  ;;  %v15231_v33 = vld [vmem:[#allocation65_spill] sm:$0xff]  ;;  %v1392_v25 = vld [vmem:[#allocation2 + $0x40] sm:$0xff] }
 0x25a   : > { %v957_v10 = vmul.f32 %v9919_v32, %v914_v29  ;;  %1290 = vrot.lane.b32.xlu1 %v9364_v37, %s15079_s24  ;;  %v956_v20 = vmul.f32 %v9928_v51, %v925_v16  ;;  %v1015_v50 = vmul.f32 %v996_v36, %v15230_v62  ;;  %v15232_v29 = vld [vmem:[#allocation63_spill] sm:$0xff]  ;;  %v15239_v36 = vld [vmem:[#allocation49_spill] sm:$0xff] }
 0x25b   : > { %1292 = vrot.lane.b32.xlu0 %v9401_v63, %s15079_s24  ;;  %7693 = vmatpush1.bf16.msra.mxu0 %v7692_v44  ;;  %v997_v44 = vsel %vm564_vm1, %v15232_v29, %v15231_v33 }
 0x25c   : > { %v903_v59 = vpop.permute.xlu1 %902  ;;  %7695 = vmatprep.subr.bf16.mxu0 %v7694_v23  ;;  %v10045_v43 = vpop.permute.xlu0 %988  ;;  %v7698_v30 = vpack.c.bf16 %v957_v10, %v955_v49  ;;  %v7700_v61 = vpack.c.bf16 %v956_v20, %v954_v40  ;;  %v1384_v10 = vld [vmem:[#allocation2] sm:$0xff]  ;;  %v15234_v49 = vld [vmem:[#allocation59_spill] sm:$0xff]  ;;  %v15235_v20 = vld [vmem:[#allocation21_spill] sm:$0xff]  ;;  %v1017_v40 = vmul.f32 %v997_v44, %v15230_v62 }
 0x25d   : > { %v915_v58 = vsel %vm904_vm5, %v881_v3, %v903_v59  ;;  %v926_v7 = vsel %vm904_vm5, %v903_v59, %v881_v3  ;;  %v15229_v3 = vld [vmem:[#allocation36_spill] sm:$0xff]  ;;  %v998_v59 = vsel %vm564_vm1, %v15234_v49, %v15233_v13  ;;  %v15241_v44 = vld [vmem:[#allocation50_spill] sm:$0xff] }
 0x25e   : > { %v959_v14 = vmul.f32 %v9919_v32, %v915_v58  ;;  %1312 = vrot.lane.b32.xlu1 %v9379_v46, %s15079_s24  ;;  %v958_v1 = vmul.f32 %v9928_v51, %v926_v7  ;;  %v1014_v58 = vmul.f32 %v1005_v48, %v15235_v20  ;;  %v15237_v7 = vld [vmem:[#allocation32_spill] sm:$0xff]  ;;  %v1019_v48 = vmul.f32 %v998_v59, %v15230_v62 }
 0x25f   : > { %1314 = vrot.lane.b32.xlu0 %v9416_v8, %s15079_s24  ;;  %7697 = vmatpush1.bf16.msra.mxu0 %v7696_v47  ;;  %v15236_v47 = vld [vmem:[#allocation35_spill] sm:$0xff]  ;;  %v7706_v39 = vpack.c.bf16 %v1015_v50, %v15237_v7 }
 0x260   : > { %v973_v9 = vpop.permute.xlu1 %972  ;;  %7699 = vmatprep.subr.bf16.mxu0 %v7698_v30  ;;  %v10061_v18 = vpop.permute.xlu0 %974  ;;  %v7702_v45 = vpack.c.bf16 %v15229_v3, %v959_v14  ;;  %v7704_v14 = vpack.c.bf16 %v15236_v47, %v958_v1  ;;  %v1006_v30 = vsel %vm564_vm1, %v15231_v33, %v15232_v29  ;;  %v1391_v3 = vld [vmem:[#allocation2 + $0x38] sm:$0xff]  ;;  %v15240_v29 = vld [vmem:[#allocation52_spill] sm:$0xff]  ;;  %v15242_v47 = vld [vmem:[#allocation29_spill] sm:$0xff]  ;;  %v7710_v59 = vpack.c.bf16 %v1019_v48, %v1017_v40 }
 0x261   : > { %v1399_v50 = vld [vmem:[#allocation2 + $0x78] sm:$0xff]  ;;  %v1406_v40 = vld [vmem:[#allocation2 + $0xb0] sm:$0xff]  ;;  %v1001_v48 = vsel %vm564_vm1, %v10029_v60, %v10045_v43 }
 0x262   : > { %1294 = vrot.lane.b32.xlu1 %v9250_v53, %s15079_s24 }
 0x263   : > { %1296 = vrot.lane.b32.xlu0 %v9266_v55, %s15079_s24  ;;  %7701 = vmatpush1.bf16.msra.mxu0 %v7700_v61  ;;  %v999_v61 = vsel %vm564_vm1, %v15239_v36, %v15238_v28 }
 0x264   : > { %v991_v16 = vpop.permute.xlu1 %990  ;;  %7703 = vmatprep.subr.bf16.mxu0 %v7702_v45  ;;  %v1007_v45 = vsel %vm564_vm1, %v15233_v13, %v15234_v49  ;;  %v1008_v13 = vsel %vm564_vm1, %v15238_v28, %v15239_v36  ;;  %v1021_v49 = vmul.f32 %v999_v61, %v15230_v62  ;;  %v1009_v28 = vsel %vm564_vm1, %v15240_v29, %v15241_v44 }
 0x265   : > { %v10078_v23 = vpop.permute.xlu0 %992  ;;  %v1018_v7 = vmul.f32 %v1007_v45, %v15235_v20 }
 0x266   : > { %1316 = vrot.lane.b32.xlu1 %v9258_v54, %s15079_s24  ;;  %1560 = vmatmul.mubr.f32.vlgmr.msra.gmra.mrb[0].mxu0 %v1384_v10  ;;  %v1000_v10 = vsel %vm564_vm1, %v15241_v44, %v15240_v29 }
 0x267   : > { %1318 = vrot.lane.b32.xlu0 %v9274_v56, %s15079_s24  ;;  %7705 = vmatpush1.bf16.msra.mxu0 %v7704_v14  ;;  %v7708_v14 = vpack.c.bf16 %v1014_v58, %v15242_v47  ;;  %v1002_v58 = vsel %vm564_vm1, %v973_v9, %v991_v16  ;;  %v1023_v36 = vmul.f32 %v1000_v10, %v15230_v62 }
 0x268   : > { %v977_v1 = vpop.permute.xlu1 %976  ;;  %1565 = vmatprep.mubr.f32.mxu0 %v1392_v25  ;;  %7707 = vmatprep.subr.bf16.mxu0 %v7706_v39  ;;  %v1016_v25 = vmul.f32 %v1006_v30, %v15235_v20  ;;  %v1398_v39 = vld [vmem:[#allocation2 + $0x70] sm:$0xff]  ;;  %v1027_v29 = vmul.f32 %v1002_v58, %v15230_v62  ;;  %v1022_v10 = vmul.f32 %v1009_v28, %v15235_v20 }
 0x269   : > { %v10105_v33 = vpop.permute.xlu0 %1042  ;;  %v7714_v44 = vpack.c.bf16 %v1023_v36, %v1021_v49  ;;  %v1413_v49 = vld [vmem:[#allocation2 + $0xe8] sm:$0xff] }
 0x26a   : > { %1298 = vrot.lane.b32.xlu1 %v9498_v2, %s15079_s24  ;;  %1566 = vmatmul.mubr.f32.gmra.mrb[2].mxu0 %v1391_v3  ;;  %v1020_v3 = vmul.f32 %v1008_v13, %v15235_v20  ;;  %v7712_v45 = vpack.c.bf16 %v1018_v7, %v1016_v25  ;;  %v1405_v25 = vld [vmem:[#allocation2 + $0xa8] sm:$0xff]  ;;  %v1003_v7 = vsel %vm564_vm1, %v10061_v18, %v10078_v23 }
 0x26b   : > { %1300 = vrot.lane.b32.xlu0 %v9524_v24, %s15079_s24  ;;  %7709 = vmatpush1.bf16.msra.mxu0 %v7708_v14 }
 0x26c   : > { %v995_v30 = vpop.permute.xlu1 %994  ;;  %1571 = vmatprep.mubr.f32.mxu0 %v1399_v50  ;;  %7711 = vmatprep.subr.bf16.mxu0 %v7710_v59  ;;  %v1011_v50 = vsel %vm564_vm1, %v991_v16, %v973_v9  ;;  %v1010_v9 = vsel %vm564_vm1, %v10045_v43, %v10029_v60  ;;  %v1025_v16 = vmul.f32 %v1001_v48, %v15230_v62 }
 0x26d   : > { %v10130_v61 = vpop.permute.xlu0 %1060  ;;  %v1004_v47 = vsel %vm564_vm1, %v977_v1, %v995_v30  ;;  %v7716_v59 = vpack.c.bf16 %v1022_v10, %v1020_v3  ;;  %v1026_v58 = vmul.f32 %v1011_v50, %v15235_v20  ;;  %v1013_v60 = vsel %vm564_vm1, %v995_v30, %v977_v1 }
 0x26e   : > { %1320 = vrot.lane.b32.xlu1 %v9510_v15, %s15079_s24  ;;  %1572 = vmatmul.mubr.f32.gmra.mrb[4].mxu0 %v1398_v39  ;;  %v1031_v43 = vmul.f32 %v1004_v47, %v15230_v62  ;;  %v7718_v39 = vpack.c.bf16 %v1027_v29, %v1025_v16  ;;  %v1024_v28 = vmul.f32 %v1010_v9, %v15235_v20  ;;  %v1427_v47 = vld [vmem:[#allocation2 + $0x158] sm:$0xff] }
 0x26f   : > { %1322 = vrot.lane.b32.xlu0 %v9538_v27, %s15079_s24  ;;  %7713 = vmatpush1.bf16.msra.mxu0 %v7712_v45  ;;  %v1012_v3 = vsel %vm564_vm1, %v10078_v23, %v10061_v18  ;;  %v1029_v1 = vmul.f32 %v1003_v7, %v15230_v62  ;;  %v1420_v45 = vld [vmem:[#allocation2 + $0x120] sm:$0xff]  ;;  %v1030_v50 = vmul.f32 %v1013_v60, %v15235_v20  ;;  %v1419_v18 = vld [vmem:[#allocation2 + $0x118] sm:$0xff]  ;;  %v1434_v7 = vld [vmem:[#allocation2 + $0x190] sm:$0xff] }
 0x270   : > { %v10147_v14 = vpop.permute.xlu1 %1044  ;;  %1577 = vmatprep.mubr.f32.mxu0 %v1406_v40  ;;  %7715 = vmatprep.subr.bf16.mxu0 %v7714_v44  ;;  %v1412_v40 = vld [vmem:[#allocation2 + $0xe0] sm:$0xff]  ;;  %v7720_v48 = vpack.c.bf16 %v1026_v58, %v1024_v28  ;;  %v1028_v44 = vmul.f32 %v1012_v3, %v15235_v20  ;;  %v7726_v9 = vpack.c.bf16 %v9202_v52, %v15221_v17  ;;  %v1433_v52 = vld [vmem:[#allocation2 + $0x188] sm:$0xff] }
 0x271   : > { %v10154_v13 = vpop.permute.xlu0 %1046  ;;  %v7722_v29 = vpack.c.bf16 %v1031_v43, %v1029_v1  ;;  %v7728_v58 = vpack.c.bf16 %v15224_v57, %v9186_v41  ;;  %v7730_v60 = vpack.c.bf16 %v9379_v46, %v9358_v35  ;;  %v7732_v28 = vpack.c.bf16 %v9364_v37, %v9340_v21  ;;  %v1440_v35 = vld [vmem:[#allocation2 + $0x1c0] sm:$0xff] }
 0x272   : > { %1302 = vrot.lane.b32.xlu1 %v9520_v19, %s15079_s24  ;;  %1578 = vmatmul.mubr.f32.gmra.mrb[6].mxu0 %v1405_v25  ;;  %v7724_v25 = vpack.c.bf16 %v1030_v50, %v1028_v44  ;;  %v1448_v57 = vld [vmem:[#allocation2 + $0x200] sm:$0xff]  ;;  %v7736_v3 = vpack.c.bf16 %v9250_v53, %v9401_v63  ;;  %v7738_v1 = vpack.c.bf16 %v9510_v15, %v9274_v56  ;;  %v15243_v53 = vld [vmem:[#allocation67_spill] sm:$0xff]  ;;  %v15244_v63 = vld [vmem:[#allocation62_spill] sm:$0xff] }
 0x273   : > { %1304 = vrot.lane.b32.xlu0 %v9550_v34, %s15079_s24  ;;  %7717 = vmatpush1.bf16.msra.mxu0 %v7716_v59  ;;  %v1077_v56 = vsel %vm586_vm3, %v15244_v63, %v15243_v53  ;;  %v1454_v50 = vld [vmem:[#allocation2 + $0x230] sm:$0xff]  ;;  %v1387_v44 = vld [vmem:[#allocation2 + $0x18] sm:$0xff] }
 0x274   : > { %v10169_v36 = vpop.permute.xlu1 %1062  ;;  %1583 = vmatprep.mubr.f32.mxu0 %v1413_v49  ;;  %7719 = vmatprep.subr.bf16.mxu0 %v7718_v39  ;;  %v1426_v49 = vld [vmem:[#allocation2 + $0x150] sm:$0xff]  ;;  %v1441_v39 = vld [vmem:[#allocation2 + $0x1c8] sm:$0xff] }
 0x275   : > { %v10176_v30 = vpop.permute.xlu0 %1064 }
 0x276   : > { %1324 = vrot.lane.b32.xlu1 %v9534_v26, %s15079_s24  ;;  %1584 = vmatmul.mubr.f32.gmra.mrb[8].mxu0 %v1412_v40  ;;  %v7734_v40 = vpack.c.bf16 %v9258_v54, %v9416_v8  ;;  %v1447_v54 = vld [vmem:[#allocation2 + $0x1f8] sm:$0xff] }
 0x277   : > { %7721 = vmatpush1.bf16.msra.mxu0 %v7720_v48  ;;  %1589 = vmatprep.mubr.f32.mxu0 %v1420_v45  ;;  %v1455_v8 = vld [vmem:[#allocation2 + $0x238] sm:$0xff]  ;;  %v7740_v45 = vpack.c.bf16 %v9498_v2, %v9266_v55  ;;  %v7742_v48 = vpack.c.bf16 %v9534_v26, %v9538_v27  ;;  %v7744_v55 = vpack.c.bf16 %v9520_v19, %v9524_v24  ;;  %v15245_v26 = vld [vmem:[#allocation26_spill] sm:$0xff]  ;;  %v15249_v24 = vld [vmem:[#allocation37_spill] sm:$0xff] }
 0x278   : > { %v10182_v10 = vpop.permute.xlu1 %1048  ;;  %7723 = vmatprep.subr.bf16.mxu0 %v7722_v29  ;;  %v1068_v2 = vsel %vm586_vm3, %v15243_v53, %v15244_v63  ;;  %v1087_v27 = vmul.f32 %v1077_v56, %v15245_v26  ;;  %v15256_v63 = vld [vmem:[#allocation54_spill] sm:$0xff]  ;;  %v15257_v56 = vld [vmem:[#allocation56_spill] sm:$0xff] }
 0x279   : > { %v10184_v23 = vpop.permute.xlu0 %1112 }
 0x27a   : > { %1326 = vrot.lane.b32.xlu1 %v9560_v22, %s15079_s24  ;;  %1590 = vmatmul.mubr.f32.gmra.mrb[10].mxu0 %v1419_v18  ;;  %v15246_v18 = vld [vmem:[#allocation38_spill] sm:$0xff] }
 0x27b   : > { %7725 = vmatpush1.bf16.msra.mxu0 %v7724_v25  ;;  %1595 = vmatprep.mubr.f32.mxu0 %v1427_v47  ;;  %v7746_v47 = vpack.c.bf16 %v15246_v18, %v9560_v22  ;;  %v15247_v25 = vld [vmem:[#allocation68_spill] sm:$0xff] }
 0x27c   : > { %v10190_v16 = vpop.permute.xlu1 %1066  ;;  %7727 = vmatprep.subr.bf16.mxu0 %v7726_v9  ;;  %v15248_v9 = vld [vmem:[#allocation69_spill] sm:$0xff] }
 0x27d   : > { %v10192_v59 = vpop.permute.xlu0 %1134 }
 0x27e   : > { %1596 = vmatmul.mubr.f32.gmra.mrb[12].mxu0 %v1426_v49  ;;  %v1078_v49 = vsel %vm586_vm3, %v15248_v9, %v15247_v25 }
 0x27f   : > { %7729 = vmatpush1.bf16.msra.mxu0 %v7728_v58  ;;  %1601 = vmatprep.mubr.f32.mxu0 %v1434_v7  ;;  %v7748_v58 = vpack.c.bf16 %v15249_v24, %v9550_v34  ;;  %v1072_v24 = vsel %vm586_vm3, %v15256_v63, %v15257_v56 }
 0x280   : > { %v10198_v43 = vpop.permute.xlu1 %1114  ;;  %7731 = vmatprep.subr.bf16.mxu0 %v7730_v60  ;;  %v15250_v60 = vld [vmem:[#allocation64_spill] sm:$0xff] }
 0x281   : > { %v10200_v17 = vpop.permute.xlu0 %1116 }
 0x282   : > { %1602 = vmatmul.mubr.f32.gmra.mrb[14].mxu0 %v1433_v52  ;;  %v15251_v52 = vld [vmem:[#allocation66_spill] sm:$0xff] }
 0x283   : > { %7733 = vmatpush1.bf16.msra.mxu0 %v7732_v28  ;;  %1607 = vmatprep.mubr.f32.mxu0 %v1441_v39  ;;  %v1079_v22 = vsel %vm586_vm3, %v15251_v52, %v15250_v60  ;;  %v15252_v39 = vld [vmem:[#allocation25_spill] sm:$0xff] }
 0x284   : > { %v10206_v41 = vpop.permute.xlu1 %1136  ;;  %7735 = vmatprep.subr.bf16.mxu0 %v7734_v40  ;;  %v1086_v28 = vmul.f32 %v1068_v2, %v15252_v39  ;;  %v1069_v40 = vsel %vm586_vm3, %v15247_v25, %v15248_v9  ;;  %v1083_v9 = vsel %vm586_vm3, %v10169_v36, %v10147_v14 }
 0x285   : > { %v10208_v46 = vpop.permute.xlu0 %1138  ;;  %v1088_v2 = vmul.f32 %v1069_v40, %v15252_v39  ;;  %v1074_v40 = vsel %vm586_vm3, %v10147_v14, %v10169_v36 }
 0x286   : > { %1608 = vmatmul.mubr.f32.gmra.mrb[16].mxu0 %v1440_v35  ;;  %v1089_v35 = vmul.f32 %v1078_v49, %v15245_v26 }
 0x287   : > { %7737 = vmatpush1.bf16.msra.mxu0 %v7736_v3  ;;  %1613 = vmatprep.mubr.f32.mxu0 %v1448_v57  ;;  %v15253_v57 = vld [vmem:[#allocation34_spill] sm:$0xff] }
 0x288   : > { %v10214_v21 = vpop.permute.xlu1 %1118  ;;  %7739 = vmatprep.subr.bf16.mxu0 %v7738_v1  ;;  %v7750_v3 = vpack.c.bf16 %v1087_v27, %v15253_v57  ;;  %v15254_v1 = vld [vmem:[#allocation53_spill] sm:$0xff] }
 0x289   : > { %v10216_v37 = vpop.permute.xlu0 %1120 }
 0x28a   : > { %1614 = vmatmul.mubr.f32.gmra.mrb[18].mxu0 %v1447_v54  ;;  %v15255_v54 = vld [vmem:[#allocation55_spill] sm:$0xff] }
 0x28b   : > { %7741 = vmatpush1.bf16.msra.mxu0 %v7740_v45  ;;  %1619 = vmatprep.mubr.f32.mxu0 %v1455_v8  ;;  %v1080_v34 = vsel %vm586_vm3, %v15255_v54, %v15254_v1  ;;  %v1070_v45 = vsel %vm586_vm3, %v15250_v60, %v15251_v52  ;;  %v1071_v27 = vsel %vm586_vm3, %v15254_v1, %v15255_v54 }
 0x28c   : > { %v10226_v15 = vpop.permute.xlu1 %1140  ;;  %7743 = vmatprep.subr.bf16.mxu0 %v7742_v48  ;;  %v1091_v48 = vmul.f32 %v1079_v22, %v15245_v26  ;;  %v1093_v18 = vmul.f32 %v1080_v34, %v15245_v26  ;;  %v1090_v25 = vmul.f32 %v1070_v45, %v15252_v39  ;;  %v1092_v52 = vmul.f32 %v1071_v27, %v15252_v39  ;;  %v7066_v45 = vld [vmem:[%s14908_s1 + $0x6] ss:$8 sm:$0x3] }
 0x28d   : > { %v10228_v29 = vpop.permute.xlu0 %1142  ;;  %v1085_v1 = vsel %vm586_vm3, %v10190_v16, %v10182_v10  ;;  %v1073_v34 = vsel %vm586_vm3, %v10105_v33, %v10130_v61 }
 0x28e   : > { %1620 = vmatmul.mubr.f32.gmra.mrb[20].mxu0 %v1454_v50  ;;  %v1081_v50 = vsel %vm586_vm3, %v15257_v56, %v15256_v63  ;;  %v7756_v22 = vpack.c.bf16 %v1090_v25, %v1088_v2  ;;  %v1084_v63 = vsel %vm586_vm3, %v10176_v30, %v10154_v13  ;;  %v1098_v56 = vmul.f32 %v1074_v40, %v15252_v39 }
 0x28f   : > { %7745 = vmatpush1.bf16.msra.mxu0 %v7744_v55  ;;  %1690 = vmatprep.mubr.f32.mxu0 %v1387_v44  ;;  %v15258_v44 = vld [vmem:[#allocation33_spill] sm:$0xff]  ;;  %v1096_v27 = vmul.f32 %v1073_v34, %v15252_v39  ;;  %v10364_v40 = vrot.slane %v7066_v45, %v9124_v5 }
 0x290   : > { %v10243_v7 = vpop.permute.xlu1 %1122  ;;  %7747 = vmatprep.subr.bf16.mxu0 %v7746_v47  ;;  %v7752_v55 = vpack.c.bf16 %v1086_v28, %v15258_v44  ;;  %v7754_v47 = vpack.c.bf16 %v1091_v48, %v1089_v35  ;;  %v1082_v28 = vsel %vm586_vm3, %v10130_v61, %v10105_v33  ;;  %v1099_v35 = vmul.f32 %v1083_v9, %v15245_v26  ;;  %v15259_v44 = vld [vmem:[#allocation41_spill] sm:$0xff]  ;;  %v15262_v9 = vld [vmem:[#allocation42_spill] sm:$0xff] }
 0x291   : > { %v10245_v19 = vpop.permute.xlu0 %1124  ;;  %v1097_v14 = vmul.f32 %v1082_v28, %v15245_v26  ;;  %v1076_v33 = vsel %vm586_vm3, %v10182_v10, %v10190_v16  ;;  %v1103_v61 = vmul.f32 %v1085_v1, %v15245_v26  ;;  %v1075_v10 = vsel %vm586_vm3, %v10154_v13, %v10176_v30  ;;  %15264 = vst [vmem:[#allocation27_spill] sm:$0xff] %v10364_v40  ;;  %v1386_v1 = vld [vmem:[#allocation2 + $0x10] sm:$0xff] }
 0x292   : > { %v1101_v16 = vmul.f32 %v1084_v63, %v15245_v26 }
 0x293   : > { %7749 = vmatpush1.bf16.msra.mxu0 %v7748_v58  ;;  %v1095_v58 = vmul.f32 %v1081_v50, %v15245_v26  ;;  %v7762_v50 = vpack.c.bf16 %v1099_v35, %v1097_v14  ;;  %v1162_v35 = vsel %vm1148_vm6, %v9939_v0, %v9817_v42 }
 0x294   : > { %v10264_v8 = vpop.permute.xlu1 %1144  ;;  %7751 = vmatprep.subr.bf16.mxu0 %v7750_v3  ;;  %v1094_v3 = vmul.f32 %v1072_v24, %v15252_v39  ;;  %v15263_v24 = vld [vmem:[#allocation44_spill] sm:$0xff]  ;;  %v7766_v30 = vpack.c.bf16 %v1103_v61, %v1101_v16  ;;  %v1151_v61 = vsel %vm1148_vm6, %v9817_v42, %v9939_v0  ;;  %v1152_v42 = vsel %vm1148_vm6, %v9802_v31, %v9907_v38 }
 0x295   : > { %v10271_v53 = vpop.permute.xlu0 %1204  ;;  %v7758_v57 = vpack.c.bf16 %v1095_v58, %v1093_v18  ;;  %v1161_v58 = vsel %vm1148_vm6, %v15263_v24, %v15262_v9  ;;  %v1150_v34 = vsel %vm1148_vm6, %v15262_v9, %v15263_v24  ;;  %v1401_v9 = vld [vmem:[#allocation2 + $0x88] sm:$0xff] }
 0x296   : > { %v7760_v48 = vpack.c.bf16 %v1094_v3, %v1092_v52  ;;  %v7764_v52 = vpack.c.bf16 %v1098_v56, %v1096_v27  ;;  %v1163_v56 = vsel %vm1148_vm6, %v9907_v38, %v9802_v31 }
 0x297   : > { %7753 = vmatpush1.bf16.msra.mxu0 %v7752_v55  ;;  %v15260_v55 = vld [vmem:[#allocation43_spill] sm:$0xff] }
 0x298   : > { %v10289_v49 = vpop.permute.xlu1 %1146  ;;  %7755 = vmatprep.subr.bf16.mxu0 %v7754_v47  ;;  %v1160_v2 = vsel %vm1148_vm6, %v15260_v55, %v15259_v44  ;;  %v10344_v47 = vrot.slane %v7066_v45, %v9126_v6  ;;  %v1149_v28 = vsel %vm1148_vm6, %v15259_v44, %v15260_v55  ;;  %v1184_v55 = vmul.f32 %v10364_v40, %v1150_v34 }
 0x299   : > { %v10296_v60 = vpop.permute.xlu0 %1224  ;;  %v1182_v63 = vmul.f32 %v10364_v40, %v1149_v28  ;;  %v1188_v28 = vmul.f32 %v10364_v40, %v1152_v42 }
 0x29a   : > { %15261 = vst [vmem:[#allocation58_spill] sm:$0xff] %v10344_v47  ;;  %v1183_v13 = vmul.f32 %v10344_v47, %v1160_v2  ;;  %v1185_v14 = vmul.f32 %v10344_v47, %v1161_v58  ;;  %v1165_v2 = vsel %vm1148_vm6, %v10206_v41, %v10198_v43  ;;  %v1189_v0 = vmul.f32 %v10344_v47, %v1163_v56 }
 0x29b   : > { %7757 = vmatpush1.bf16.msra.mxu0 %v7756_v22  ;;  %v1102_v22 = vmul.f32 %v1076_v33, %v15252_v39  ;;  %v7772_v24 = vpack.c.bf16 %v1184_v55, %v1182_v63  ;;  %v1186_v58 = vmul.f32 %v10364_v40, %v1151_v61  ;;  %v1193_v31 = vmul.f32 %v10344_v47, %v1165_v2  ;;  %v1415_v55 = vld [vmem:[#allocation2 + $0xf8] sm:$0xff] }
 0x29c   : > { %v10313_v54 = vpop.permute.xlu1 %1206  ;;  %7759 = vmatprep.subr.bf16.mxu0 %v7758_v57  ;;  %v1100_v57 = vmul.f32 %v1075_v10, %v15252_v39  ;;  %v7770_v44 = vpack.c.bf16 %v1185_v14, %v1183_v13  ;;  %v1393_v10 = vld [vmem:[#allocation2 + $0x48] sm:$0xff]  ;;  %v1167_v13 = vsel %vm1148_vm6, %v10226_v15, %v10214_v21  ;;  %v1166_v14 = vsel %vm1148_vm6, %v10208_v46, %v10200_v17 }
 0x29d   : > { %v10320_v36 = vpop.permute.xlu0 %1208  ;;  %v7776_v34 = vpack.c.bf16 %v1188_v28, %v1186_v58  ;;  %v1156_v63 = vsel %vm1148_vm6, %v10214_v21, %v10226_v15  ;;  %v1155_v21 = vsel %vm1148_vm6, %v10200_v17, %v10208_v46  ;;  %v1195_v15 = vmul.f32 %v10344_v47, %v1166_v14 }
 0x29e   : > { %v7768_v33 = vpack.c.bf16 %v1102_v22, %v1100_v57  ;;  %v1154_v22 = vsel %vm1148_vm6, %v10198_v43, %v10206_v41  ;;  %v1153_v43 = vsel %vm1148_vm6, %v10184_v23, %v10192_v59  ;;  %v1196_v42 = vmul.f32 %v10364_v40, %v1156_v63 }
 0x29f   : > { %7761 = vmatpush1.bf16.msra.mxu0 %v7760_v48  ;;  %v1394_v48 = vld [vmem:[#allocation2 + $0x50] sm:$0xff]  ;;  %v1190_v56 = vmul.f32 %v10364_v40, %v1153_v43  ;;  %v1254_v14 = vsel %vm542_vm2, %v10296_v60, %v10271_v53 }
 0x2a0   : > { %v10341_v18 = vpop.permute.xlu1 %1226  ;;  %7763 = vmatprep.subr.bf16.mxu0 %v7762_v50  ;;  %v1187_v50 = vmul.f32 %v10344_v47, %v1162_v35  ;;  %v1400_v35 = vld [vmem:[#allocation2 + $0x80] sm:$0xff] }
 0x2a1   : > { %v10351_v25 = vpop.permute.xlu0 %1228  ;;  %v1245_v63 = vsel %vm542_vm2, %v10313_v54, %v10341_v18 }
 0x2a2   : > { %v7774_v38 = vpack.c.bf16 %v1189_v0, %v1187_v50  ;;  %v1407_v50 = vld [vmem:[#allocation2 + $0xb8] sm:$0xff]  ;;  %v1158_v0 = vsel %vm1148_vm6, %v10243_v7, %v10264_v8 }
 0x2a3   : > { %7765 = vmatpush1.bf16.msra.mxu0 %v7764_v52  ;;  %v1164_v52 = vsel %vm1148_vm6, %v10192_v59, %v10184_v23  ;;  %v1197_v23 = vmul.f32 %v10344_v47, %v1167_v13  ;;  %v1200_v28 = vmul.f32 %v10364_v40, %v1158_v0  ;;  %v1159_v13 = vsel %vm1148_vm6, %v10245_v19, %v10289_v49 }
 0x2a4   : > { %v10371_v3 = vpop.permute.xlu1 %1210  ;;  %7767 = vmatprep.subr.bf16.mxu0 %v7766_v30  ;;  %v1191_v41 = vmul.f32 %v10344_v47, %v1164_v52  ;;  %v1414_v52 = vld [vmem:[#allocation2 + $0xf0] sm:$0xff]  ;;  %v1256_v0 = vsel %vm542_vm2, %v10351_v25, %v10320_v36 }
 0x2a5   : > { %v10378_v45 = vpop.permute.xlu0 %1212  ;;  %v7782_v46 = vpack.c.bf16 %v1197_v23, %v1195_v15  ;;  %v15265_v23 = vld [vmem:[#allocation24_spill] sm:$0xff] }
 0x2a6   : > { %1691 = vmatmul.mubr.f32.vlgmr.msra.gmra.mrb[0].mxu0 %v1386_v1  ;;  %v1408_v1 = vld [vmem:[#allocation2 + $0xc0] sm:$0xff]  ;;  %v7778_v59 = vpack.c.bf16 %v1193_v31, %v1191_v41  ;;  %v1422_v31 = vld [vmem:[#allocation2 + $0x130] sm:$0xff] }
 0x2a7   : > { %7769 = vmatpush1.bf16.msra.mxu0 %v7768_v33  ;;  %1696 = vmatprep.mubr.f32.mxu0 %v1394_v48  ;;  %v1192_v48 = vmul.f32 %v10364_v40, %v1154_v22  ;;  %v1169_v33 = vsel %vm1148_vm6, %v10264_v8, %v10243_v7  ;;  %v1157_v7 = vsel %vm1148_vm6, %v10216_v37, %v10228_v29  ;;  %v1428_v15 = vld [vmem:[#allocation2 + $0x160] sm:$0xff] }
 0x2a8   : > { %v10395_v27 = vpop.permute.xlu1 %1230  ;;  %7771 = vmatprep.subr.bf16.mxu0 %v7770_v44  ;;  %v1201_v17 = vmul.f32 %v10344_v47, %v1169_v33 }
 0x2a9   : > { %v10402_v16 = vpop.permute.xlu0 %1232  ;;  %v7780_v2 = vpack.c.bf16 %v1192_v48, %v1190_v56  ;;  %v1202_v48 = vmul.f32 %v10364_v40, %v1159_v13  ;;  %v15266_v56 = vld [vmem:[#allocation31_spill] sm:$0xff] }
 0x2aa   : > { %1697 = vmatmul.mubr.f32.gmra.mrb[2].mxu0 %v1393_v10  ;;  %v1168_v10 = vsel %vm1148_vm6, %v10228_v29, %v10216_v37  ;;  %v1198_v37 = vmul.f32 %v10364_v40, %v1157_v7  ;;  %v1255_v29 = vsel %vm542_vm2, %v10341_v18, %v10313_v54  ;;  %v1244_v54 = vsel %vm542_vm2, %v10271_v53, %v10296_v60 }
 0x2ab   : > { %7773 = vmatpush1.bf16.msra.mxu0 %v7772_v24  ;;  %1702 = vmatprep.mubr.f32.mxu0 %v1401_v9  ;;  %v1194_v9 = vmul.f32 %v10364_v40, %v1155_v21  ;;  %v1170_v24 = vsel %vm1148_vm6, %v10289_v49, %v10245_v19  ;;  %v1199_v8 = vmul.f32 %v10344_v47, %v1168_v10  ;;  %v1429_v19 = vld [vmem:[#allocation2 + $0x168] sm:$0xff]  ;;  %v15267_v10 = vld [vmem:[#allocation30_spill] sm:$0xff] }
 0x2ac   : > { %v10419_v30 = vpop.permute.xlu1 %1214  ;;  %7775 = vmatprep.subr.bf16.mxu0 %v7774_v38  ;;  %v7788_v49 = vpack.c.bf16 %v1200_v28, %v1198_v37  ;;  %v1265_v18 = vmul.f32 %v1254_v14, %v15265_v23  ;;  %v1247_v53 = vsel %vm542_vm2, %v10371_v3, %v10395_v27  ;;  %v1258_v13 = vsel %vm542_vm2, %v10402_v16, %v10378_v45  ;;  %v1450_v14 = vld [vmem:[#allocation2 + $0x210] sm:$0xff] }
 0x2ad   : > { %v10426_v57 = vpop.permute.xlu0 %1216  ;;  %v7784_v38 = vpack.c.bf16 %v1196_v42, %v1194_v9  ;;  %v7786_v43 = vpack.c.bf16 %v1201_v17, %v1199_v8  ;;  %v7792_v42 = vpack.c.bf16 %v15267_v10, %v1202_v48  ;;  %v15268_v17 = vld [vmem:[#allocation23_spill] sm:$0xff] }
 0x2ae   : > { %1703 = vmatmul.mubr.f32.gmra.mrb[4].mxu0 %v1400_v35  ;;  %v1203_v35 = vmul.f32 %v10344_v47, %v1170_v24  ;;  %v1264_v24 = vmul.f32 %v1244_v54, %v15268_v17  ;;  %v1435_v8 = vld [vmem:[#allocation2 + $0x198] sm:$0xff]  ;;  %v1449_v54 = vld [vmem:[#allocation2 + $0x208] sm:$0xff] }
 0x2af   : > { %7777 = vmatpush1.bf16.msra.mxu0 %v7776_v34  ;;  %1708 = vmatprep.mubr.f32.mxu0 %v1408_v1  ;;  %v1421_v1 = vld [vmem:[#allocation2 + $0x128] sm:$0xff] }
 0x2b0   : > { %v10443_v61 = vpop.permute.xlu1 %1234  ;;  %7779 = vmatprep.subr.bf16.mxu0 %v7778_v59  ;;  %v1267_v59 = vmul.f32 %v1255_v29, %v15265_v23  ;;  %v7790_v33 = vpack.c.bf16 %v15266_v56, %v1203_v35  ;;  %v1270_v35 = vmul.f32 %v1247_v53, %v15268_v17 }
 0x2b1   : > { %v10450_v44 = vpop.permute.xlu0 %1236 }
 0x2b2   : > { %1709 = vmatmul.mubr.f32.gmra.mrb[6].mxu0 %v1407_v50  ;;  %v1257_v50 = vsel %vm542_vm2, %v10395_v27, %v10371_v3  ;;  %v7794_v9 = vpack.c.bf16 %v1267_v59, %v1265_v18  ;;  %v1246_v3 = vsel %vm542_vm2, %v10320_v36, %v10351_v25  ;;  %v1269_v27 = vmul.f32 %v1256_v0, %v15265_v23 }
 0x2b3   : > { %7781 = vmatpush1.bf16.msra.mxu0 %v7780_v2  ;;  %1714 = vmatprep.mubr.f32.mxu0 %v1415_v55  ;;  %v1436_v2 = vld [vmem:[#allocation2 + $0x1a0] sm:$0xff]  ;;  %v1271_v60 = vmul.f32 %v1257_v50, %v15265_v23  ;;  %v1268_v37 = vmul.f32 %v1246_v3, %v15268_v17  ;;  %v1250_v18 = vsel %vm542_vm2, %v10426_v57, %v10450_v44 }
 0x2b4   : > { %v10467_v58 = vpop.permute.xlu1 %1218  ;;  %7783 = vmatprep.subr.bf16.mxu0 %v7782_v46  ;;  %v1266_v46 = vmul.f32 %v1245_v63, %v15268_v17  ;;  %v1260_v63 = vsel %vm542_vm2, %v10450_v44, %v10426_v57 }
 0x2b5   : > { %v10474_v22 = vpop.permute.xlu0 %1220  ;;  %v7798_v25 = vpack.c.bf16 %v1271_v60, %v1269_v27  ;;  %v7800_v48 = vpack.c.bf16 %v1270_v35, %v1268_v37  ;;  %v1276_v60 = vmul.f32 %v1250_v18, %v15268_v17  ;;  %v1389_v27 = vld [vmem:[#allocation2 + $0x28] sm:$0xff] }
 0x2b6   : > { %1715 = vmatmul.mubr.f32.gmra.mrb[8].mxu0 %v1414_v52  ;;  %v1259_v52 = vsel %vm542_vm2, %v10443_v61, %v10419_v30  ;;  %v7796_v28 = vpack.c.bf16 %v1266_v46, %v1264_v24  ;;  %v7068_v46 = vld [vmem:[%s14908_s1 + $0x10] ss:$8 sm:$0x3] }
 0x2b7   : > { %7785 = vmatpush1.bf16.msra.mxu0 %v7784_v38  ;;  %1720 = vmatprep.mubr.f32.mxu0 %v1422_v31  ;;  %v1443_v38 = vld [vmem:[#allocation2 + $0x1d8] sm:$0xff]  ;;  %v1275_v36 = vmul.f32 %v1259_v52, %v15265_v23  ;;  %v1456_v52 = vld [vmem:[#allocation2 + $0x240] sm:$0xff] }
 0x2b8   : > { %v10487_v41 = vpop.permute.xlu1 %1238  ;;  %7787 = vmatprep.subr.bf16.mxu0 %v7786_v43  ;;  %v1249_v43 = vsel %vm542_vm2, %v10419_v30, %v10443_v61  ;;  %v1248_v30 = vsel %vm542_vm2, %v10378_v45, %v10402_v16  ;;  %v1273_v61 = vmul.f32 %v1258_v13, %v15265_v23 }
 0x2b9   : > { %v10489_v34 = vpop.permute.xlu0 %1240  ;;  %v1261_v29 = vsel %vm542_vm2, %v10487_v41, %v10467_v58  ;;  %v1274_v59 = vmul.f32 %v1249_v43, %v15268_v17  ;;  %v1251_v56 = vsel %vm542_vm2, %v10467_v58, %v10487_v41  ;;  %v1277_v58 = vmul.f32 %v1260_v63, %v15265_v23 }
 0x2ba   : > { %1721 = vmatmul.mubr.f32.gmra.mrb[10].mxu0 %v1421_v1  ;;  %v1279_v45 = vmul.f32 %v1261_v29, %v15265_v23  ;;  %v7802_v16 = vpack.c.bf16 %v1275_v36, %v1273_v61  ;;  %v1278_v0 = vmul.f32 %v1251_v56, %v15268_v17  ;;  %v10613_v43 = vrot.slane %v7068_v46, %v9124_v5 }
 0x2bb   : > { %7789 = vmatpush1.bf16.msra.mxu0 %v7788_v49  ;;  %1726 = vmatprep.mubr.f32.mxu0 %v1429_v19  ;;  %v1442_v19 = vld [vmem:[#allocation2 + $0x1d0] sm:$0xff] }
 0x2bc   : > { %v10506_v21 = vpop.permute.xlu1 %1222  ;;  %7791 = vmatprep.subr.bf16.mxu0 %v7790_v33  ;;  %v1272_v33 = vmul.f32 %v1248_v30, %v15268_v17  ;;  %v7806_v53 = vpack.c.bf16 %v1279_v45, %v1277_v58  ;;  %15270 = vst [vmem:[#allocation46_spill] sm:$0xff] %v10613_v43 }
 0x2bd   : > { %v10513_v55 = vpop.permute.xlu0 %1284 }
 0x2be   : > { %1727 = vmatmul.mubr.f32.gmra.mrb[12].mxu0 %v1428_v15  ;;  %v7804_v10 = vpack.c.bf16 %v1274_v59, %v1272_v33 }
 0x2bf   : > { %7793 = vmatpush1.bf16.msra.mxu0 %v7792_v42  ;;  %1732 = vmatprep.mubr.f32.mxu0 %v1436_v2  ;;  %v1457_v2 = vld [vmem:[#allocation2 + $0x248] sm:$0xff]  ;;  %v1262_v42 = vsel %vm542_vm2, %v10489_v34, %v10474_v22 }
 0x2c0   : > { %v1243_v7 = vpop.permute.xlu1 %1242  ;;  %7795 = vmatprep.subr.bf16.mxu0 %v7794_v9 }
 0x2c1   : > { %v10536_v31 = vpop.permute.xlu0 %1306  ;;  %v1263_v50 = vsel %vm542_vm2, %v1243_v7, %v10506_v21  ;;  %v1253_v57 = vsel %vm542_vm2, %v10506_v21, %v1243_v7  ;;  %v1281_v21 = vmul.f32 %v1262_v42, %v15265_v23  ;;  %v10601_v7 = vrot.slane %v7068_v46, %v9126_v6 }
 0x2c2   : > { %1733 = vmatmul.mubr.f32.gmra.mrb[14].mxu0 %v1435_v8  ;;  %v1283_v44 = vmul.f32 %v1263_v50, %v15265_v23  ;;  %v1252_v8 = vsel %vm542_vm2, %v10474_v22, %v10489_v34  ;;  %v1282_v13 = vmul.f32 %v1253_v57, %v15268_v17 }
 0x2c3   : > { %7797 = vmatpush1.bf16.msra.mxu0 %v7796_v28  ;;  %1738 = vmatprep.mubr.f32.mxu0 %v1443_v38  ;;  %15269 = vst [vmem:[#allocation48_spill] sm:$0xff] %v10601_v7  ;;  %v7808_v38 = vpack.c.bf16 %v1278_v0, %v1276_v60  ;;  %v1340_v28 = vsel %vm1328_vm7, %v10536_v31, %v10513_v55 }
 0x2c4   : > { %v1287_v1 = vpop.permute.xlu1 %1286  ;;  %7799 = vmatprep.subr.bf16.mxu0 %v7798_v25  ;;  %v7810_v34 = vpack.c.bf16 %v1283_v44, %v1281_v21  ;;  %v1280_v6 = vmul.f32 %v1252_v8, %v15268_v17  ;;  %v1329_v25 = vsel %vm1328_vm7, %v10513_v55, %v10536_v31  ;;  %v1363_v37 = vmul.f32 %v10601_v7, %v1340_v28 }
 0x2c5   : > { %v10558_v49 = vpop.permute.xlu0 %1288  ;;  %v1362_v31 = vmul.f32 %v10613_v43, %v1329_v25  ;;  %v1388_v25 = vld [vmem:[#allocation2 + $0x20] sm:$0xff] }
 0x2c6   : > { %1739 = vmatmul.mubr.f32.gmra.mrb[16].mxu0 %v1442_v19  ;;  %v7812_v19 = vpack.c.bf16 %v1282_v13, %v1280_v6 }
 0x2c7   : > { %7801 = vmatpush1.bf16.msra.mxu0 %v7800_v48  ;;  %1744 = vmatprep.mubr.f32.mxu0 %v1450_v14 }
 0x2c8   : > { %v1309_v15 = vpop.permute.xlu1 %1308  ;;  %7803 = vmatprep.subr.bf16.mxu0 %v7802_v16 }
 0x2c9   : > { %v1311_v41 = vpop.permute.xlu0 %1310  ;;  %v1341_v9 = vsel %vm1328_vm7, %v1309_v15, %v1287_v1  ;;  %v1330_v35 = vsel %vm1328_vm7, %v1287_v1, %v1309_v15 }
 0x2ca   : > { %1745 = vmatmul.mubr.f32.gmra.mrb[18].mxu0 %v1449_v54  ;;  %v1365_v22 = vmul.f32 %v10601_v7, %v1341_v9  ;;  %v1342_v5 = vsel %vm1328_vm7, %v1311_v41, %v10558_v49  ;;  %v1364_v30 = vmul.f32 %v10613_v43, %v1330_v35  ;;  %v1331_v63 = vsel %vm1328_vm7, %v10558_v49, %v1311_v41 }
 0x2cb   : > { %7805 = vmatpush1.bf16.msra.mxu0 %v7804_v10  ;;  %1750 = vmatprep.mubr.f32.mxu0 %v1457_v2  ;;  %v1367_v59 = vmul.f32 %v10601_v7, %v1342_v5  ;;  %v1366_v54 = vmul.f32 %v10613_v43, %v1331_v63 }
 0x2cc   : > { %v1291_v24 = vpop.permute.xlu1 %1290  ;;  %7807 = vmatprep.subr.bf16.mxu0 %v7806_v53  ;;  %v7814_v55 = vpack.c.bf16 %v1365_v22, %v1363_v37  ;;  %v7816_v45 = vpack.c.bf16 %v1364_v30, %v1362_v31 }
 0x2cd   : > { %v1293_v3 = vpop.permute.xlu0 %1292 }
 0x2ce   : > { %1751 = vmatmul.mubr.f32.gmra.mrb[20].mxu0 %v1456_v52 }
 0x2cf   : > { %7809 = vmatpush1.bf16.msra.mxu0 %v7808_v38  ;;  %1821 = vmatprep.mubr.f32.mxu0 %v1389_v27 }
 0x2d0   : > { %v1313_v36 = vpop.permute.xlu1 %1312  ;;  %7811 = vmatprep.subr.bf16.mxu0 %v7810_v34 }
 0x2d1   : > { %v1315_v29 = vpop.permute.xlu0 %1314  ;;  %v1343_v1 = vsel %vm1328_vm7, %v1313_v36, %v1291_v24  ;;  %v1332_v61 = vsel %vm1328_vm7, %v1291_v24, %v1313_v36 }
 0x2d2   : > { %v1369_v14 = vmul.f32 %v10601_v7, %v1343_v1  ;;  %v1333_v16 = vsel %vm1328_vm7, %v1293_v3, %v1315_v29  ;;  %v1368_v33 = vmul.f32 %v10613_v43, %v1332_v61  ;;  %v1344_v50 = vsel %vm1328_vm7, %v1315_v29, %v1293_v3  ;;  %v1396_v29 = vld [vmem:[#allocation2 + $0x60] sm:$0xff] }
 0x2d3   : > { %7813 = vmatpush1.bf16.msra.mxu0 %v7812_v19  ;;  %v1370_v49 = vmul.f32 %v10613_v43, %v1333_v16  ;;  %v1371_v10 = vmul.f32 %v10601_v7, %v1344_v50  ;;  %v1402_v50 = vld [vmem:[#allocation2 + $0x90] sm:$0xff] }
 0x2d4   : > { %v1295_v48 = vpop.permute.xlu1 %1294  ;;  %7815 = vmatprep.subr.bf16.mxu0 %v7814_v55  ;;  %v7818_v15 = vpack.c.bf16 %v1369_v14, %v1367_v59  ;;  %v7820_v42 = vpack.c.bf16 %v1368_v33, %v1366_v54  ;;  %v1395_v55 = vld [vmem:[#allocation2 + $0x58] sm:$0xff] }
 0x2d5   : > { %v1297_v56 = vpop.permute.xlu0 %1296 }
 0x2d7   : > { %7817 = vmatpush1.bf16.msra.mxu0 %v7816_v45 }
 0x2d8   : > { %v1317_v18 = vpop.permute.xlu1 %1316  ;;  %7819 = vmatprep.subr.bf16.mxu0 %v7818_v15  ;;  %v1410_v15 = vld [vmem:[#allocation2 + $0xd0] sm:$0xff] }
 0x2d9   : > { %v1319_v58 = vpop.permute.xlu0 %1318  ;;  %v1334_v41 = vsel %vm1328_vm7, %v1295_v48, %v1317_v18  ;;  %v1345_v2 = vsel %vm1328_vm7, %v1317_v18, %v1295_v48  ;;  %v1409_v18 = vld [vmem:[#allocation2 + $0xc8] sm:$0xff] }
 0x2da   : > { %v1372_v0 = vmul.f32 %v10613_v43, %v1334_v41  ;;  %v1373_v46 = vmul.f32 %v10601_v7, %v1345_v2  ;;  %v1335_v9 = vsel %vm1328_vm7, %v1297_v56, %v1319_v58  ;;  %v1346_v24 = vsel %vm1328_vm7, %v1319_v58, %v1297_v56  ;;  %v1403_v56 = vld [vmem:[#allocation2 + $0x98] sm:$0xff]  ;;  %v1416_v58 = vld [vmem:[#allocation2 + $0x100] sm:$0xff] }
 0x2db   : > { %7821 = vmatpush1.bf16.msra.mxu0 %v7820_v42  ;;  %v1374_v3 = vmul.f32 %v10613_v43, %v1335_v9  ;;  %v1375_v27 = vmul.f32 %v10601_v7, %v1346_v24  ;;  %v1424_v41 = vld [vmem:[#allocation2 + $0x140] sm:$0xff]  ;;  %v1423_v2 = vld [vmem:[#allocation2 + $0x138] sm:$0xff]  ;;  %v1430_v42 = vld [vmem:[#allocation2 + $0x170] sm:$0xff] }
 0x2dc   : > { %v7824_v57 = vpack.c.bf16 %v1372_v0, %v1370_v49  ;;  %v1299_v44 = vpop.permute.xlu1 %1298  ;;  %v7822_v53 = vpack.c.bf16 %v1373_v46, %v1371_v10  ;;  %v1417_v49 = vld [vmem:[#allocation2 + $0x108] sm:$0xff]  ;;  %v1431_v10 = vld [vmem:[#allocation2 + $0x178] sm:$0xff]  ;;  %v1438_v0 = vld [vmem:[#allocation2 + $0x1b0] sm:$0xff] }
 0x2dd   : > { %v1301_v60 = vpop.permute.xlu0 %1300  ;;  %v1437_v46 = vld [vmem:[#allocation2 + $0x1a8] sm:$0xff]  ;;  %v1459_v9 = vld [vmem:[#allocation2 + $0x258] sm:$0xff]  ;;  %v1458_v24 = vld [vmem:[#allocation2 + $0x250] sm:$0xff] }
 0x2de   : > { %7823 = vmatprep.subr.bf16.mxu0 %v7822_v53  ;;  %v1452_v53 = vld [vmem:[#allocation2 + $0x220] sm:$0xff] }
 0x2df   : > { %7825 = vmatpush1.bf16.msra.mxu0 %v7824_v57  ;;  %v1445_v57 = vld [vmem:[#allocation2 + $0x1e8] sm:$0xff] }
 0x2e0   : > { %v1321_v52 = vpop.permute.xlu1 %1320 }
 0x2e1   : > { %v1336_v8 = vsel %vm1328_vm7, %v1299_v44, %v1321_v52  ;;  %v1347_v21 = vsel %vm1328_vm7, %v1321_v52, %v1299_v44  ;;  %v1323_v13 = vpop.permute.xlu0 %1322  ;;  %v1444_v44 = vld [vmem:[#allocation2 + $0x1e0] sm:$0xff]  ;;  %v14994_v52 = vmov 0.0  }
 0x2e2   : > { %v1376_v38 = vmul.f32 %v10613_v43, %v1336_v8  ;;  %v1377_v28 = vmul.f32 %v10601_v7, %v1347_v21  ;;  %v1337_v6 = vsel %vm1328_vm7, %v1301_v60, %v1323_v13  ;;  %v1348_v36 = vsel %vm1328_vm7, %v1323_v13, %v1301_v60  ;;  %v1451_v60 = vld [vmem:[#allocation2 + $0x218] sm:$0xff]  ;;  %v1390_v8 = vld [vmem:[#allocation2 + $0x30] sm:$0xff]  ;;  %v1397_v21 = vld [vmem:[#allocation2 + $0x68] sm:$0xff]  ;;  %7330 = vmatprep.mubr.msk.f32.mxu1 %vm8879_vm9, %v14994_v52 }
 0x2e3   : > { %v1378_v5 = vmul.f32 %v10613_v43, %v1337_v6  ;;  %v1379_v30 = vmul.f32 %v10601_v7, %v1348_v36  ;;  %v1432_v13 = vld [vmem:[#allocation2 + $0x180] sm:$0xff] }
 0x2e4   : > { %v7828_v35 = vpack.c.bf16 %v1376_v38, %v1374_v3  ;;  %v1303_v22 = vpop.permute.xlu1 %1302  ;;  %v7826_v34 = vpack.c.bf16 %v1377_v28, %v1375_v27  ;;  %v1404_v3 = vld [vmem:[#allocation2 + $0xa0] sm:$0xff]  ;;  %v1411_v27 = vld [vmem:[#allocation2 + $0xd8] sm:$0xff]  ;;  %v1418_v38 = vld [vmem:[#allocation2 + $0x110] sm:$0xff] }
 0x2e5   : > { %v1305_v31 = vpop.permute.xlu0 %1304  ;;  %v1425_v28 = vld [vmem:[#allocation2 + $0x148] sm:$0xff]  ;;  %v1460_v6 = vld [vmem:[#allocation2 + $0x260] sm:$0xff] }
 0x2e6   : > { %7827 = vmatprep.subr.bf16.mxu0 %v7826_v34  ;;  %v1453_v34 = vld [vmem:[#allocation2 + $0x228] sm:$0xff] }
 0x2e7   : > { %7829 = vmatpush1.bf16.msra.mxu0 %v7828_v35  ;;  %v1439_v35 = vld [vmem:[#allocation2 + $0x1b8] sm:$0xff] }
 0x2e8   : > { %v1325_v37 = vpop.permute.xlu1 %1324 }
 0x2e9   : > { %v1338_v1 = vsel %vm1328_vm7, %v1303_v22, %v1325_v37  ;;  %v1349_v19 = vsel %vm1328_vm7, %v1325_v37, %v1303_v22  ;;  %v1446_v22 = vld [vmem:[#allocation2 + $0x1f0] sm:$0xff] }
 0x2ea   : > { %v1380_v61 = vmul.f32 %v10613_v43, %v1338_v1  ;;  %v1381_v14 = vmul.f32 %v10601_v7, %v1349_v19  ;;  %1822 = vmatmul.mubr.f32.vlgmr.msra.gmra.mrb[0].mxu0 %v1388_v25 }
 0x2eb   : > { %1827 = vmatprep.mubr.f32.mxu0 %v1396_v29 }
 0x2ec   : > { %v7832_v48 = vpack.c.bf16 %v1380_v61, %v1378_v5  ;;  %v1327_v63 = vpop.permute.xlu1 %1326  ;;  %v7830_v59 = vpack.c.bf16 %v1381_v14, %v1379_v30 }
 0x2ed   : > { %v1350_v45 = vsel %vm1328_vm7, %v1327_v63, %v1305_v31  ;;  %v1339_v16 = vsel %vm1328_vm7, %v1305_v31, %v1327_v63 }
 0x2ee   : > { %1828 = vmatmul.mubr.f32.gmra.mrb[2].mxu0 %v1395_v55  ;;  %7831 = vmatprep.subr.bf16.mxu0 %v7830_v59  ;;  %v1383_v33 = vmul.f32 %v10601_v7, %v1350_v45  ;;  %v1382_v54 = vmul.f32 %v10613_v43, %v1339_v16 }
 0x2ef   : > { %7833 = vmatpush1.bf16.msra.mxu0 %v7832_v48  ;;  %1833 = vmatprep.mubr.f32.mxu0 %v1403_v56 }
 0x2f0   : > { %1892 = vmatprep.subr.mxu0 %v1383_v33 }
 0x2f2   : > { %1834 = vmatmul.mubr.f32.gmra.mrb[4].mxu0 %v1402_v50 }
 0x2f3   : > { %1893 = vmatpush1.msra.mxu0 %v1382_v54  ;;  %1839 = vmatprep.mubr.f32.mxu0 %v1410_v15 }
 0x2f6   : > { %1840 = vmatmul.mubr.f32.gmra.mrb[6].mxu0 %v1409_v18 }
 0x2f7   : > { %1845 = vmatprep.mubr.f32.mxu0 %v1417_v49 }
 0x2fa   : > { %1846 = vmatmul.mubr.f32.gmra.mrb[8].mxu0 %v1416_v58 }
 0x2fb   : > { %1851 = vmatprep.mubr.f32.mxu0 %v1424_v41 }
 0x2fe   : > { %1852 = vmatmul.mubr.f32.gmra.mrb[10].mxu0 %v1423_v2 }
 0x2ff   : > { %1857 = vmatprep.mubr.f32.mxu0 %v1431_v10 }
 0x302   : > { %1858 = vmatmul.mubr.f32.gmra.mrb[12].mxu0 %v1430_v42 }
 0x303   : > { %1863 = vmatprep.mubr.f32.mxu0 %v1438_v0 }
 0x306   : > { %1864 = vmatmul.mubr.f32.gmra.mrb[14].mxu0 %v1437_v46 }
 0x307   : > { %1869 = vmatprep.mubr.f32.mxu0 %v1445_v57 }
 0x30a   : > { %1870 = vmatmul.mubr.f32.gmra.mrb[16].mxu0 %v1444_v44 }
 0x30b   : > { %1875 = vmatprep.mubr.f32.mxu0 %v1452_v53 }
 0x30e   : > { %1876 = vmatmul.mubr.f32.gmra.mrb[18].mxu0 %v1451_v60 }
 0x30f   : > { %1881 = vmatprep.mubr.f32.mxu0 %v1459_v9  ;;  %v14992_v9 = vmov 0.0|0.0  }
 0x310   : > { %7834 = vmatprep.subr.bf16.mxu1 %v14992_v9 }
 0x312   : > { %1882 = vmatmul.mubr.f32.gmra.mrb[20].mxu0 %v1458_v24 }
 0x313   : > { %1952 = vmatprep.mubr.f32.mxu0 %v14994_v52 }
 0x316   : > { %7069 = vmatmul.mubr.msk.f32.vlgmr.msra.gmra.mrb[0].mxu0 %vm1461_vm8, %v1390_v8 }
 0x317   : > { %1958 = vmatprep.mubr.f32.mxu0 %v14994_v52 }
 0x31a   : > { %7070 = vmatmul.mubr.msk.f32.gmra.mrb[2].mxu0 %vm1461_vm8, %v1397_v21 }
 0x31b   : > { %1964 = vmatprep.mubr.f32.mxu0 %v14994_v52 }
 0x31e   : > { %7071 = vmatmul.mubr.msk.f32.gmra.mrb[4].mxu0 %vm1461_vm8, %v1404_v3 }
 0x31f   : > { %1970 = vmatprep.mubr.f32.mxu0 %v14994_v52 }
 0x322   : > { %7072 = vmatmul.mubr.msk.f32.gmra.mrb[6].mxu0 %vm1461_vm8, %v1411_v27 }
 0x323   : > { %1976 = vmatprep.mubr.f32.mxu0 %v14994_v52 }
 0x326   : > { %7073 = vmatmul.mubr.msk.f32.gmra.mrb[8].mxu0 %vm1461_vm8, %v1418_v38 }
 0x327   : > { %1982 = vmatprep.mubr.f32.mxu0 %v14994_v52 }
 0x32a   : > { %7074 = vmatmul.mubr.msk.f32.gmra.mrb[10].mxu0 %vm1461_vm8, %v1425_v28 }
 0x32b   : > { %1988 = vmatprep.mubr.f32.mxu0 %v14994_v52 }
 0x32e   : > { %7075 = vmatmul.mubr.msk.f32.gmra.mrb[12].mxu0 %vm1461_vm8, %v1432_v13 }
 0x32f   : > { %1994 = vmatprep.mubr.f32.mxu0 %v14994_v52 }
 0x332   : > { %7076 = vmatmul.mubr.msk.f32.gmra.mrb[14].mxu0 %vm1461_vm8, %v1439_v35 }
 0x333   : > { %2000 = vmatprep.mubr.f32.mxu0 %v14994_v52 }
 0x336   : > { %7077 = vmatmul.mubr.msk.f32.gmra.mrb[16].mxu0 %vm1461_vm8, %v1446_v22 }
 0x337   : > { %2006 = vmatprep.mubr.f32.mxu0 %v14994_v52 }
 0x33a   : > { %7078 = vmatmul.mubr.msk.f32.gmra.mrb[18].mxu0 %vm1461_vm8, %v1453_v34 }
 0x33b   : > { %2012 = vmatprep.mubr.f32.mxu0 %v14994_v52 }
 0x33e   : > { %7079 = vmatmul.mubr.msk.f32.gmra.mrb[20].mxu0 %vm1461_vm8, %v1460_v6 }
 0x3e9   : > { %v10700_v36 = vpop.f32.mrb[0].mxu0 }
 0x3ea   : > { %v2074_v25 = vmul.f32 %v10700_v36, %v10700_v36  ;;  %v10704_v37 = vpop.f32.mrb[1].mxu0 }
 0x3eb   : > { %v2041_v29 = vadd.f32 %v10704_v37, %v10700_v36  ;;  %v2075_v1 = vmul.f32 %v10704_v37, %v10704_v37 }
 0x3ed   : > { %2042 = vadd.xlane.f32.xlu0 %v2041_v29  ;;  %v10710_v19 = vpop.f32.mrb[2].mxu0  ;;  %v10712_v5 = vadd.f32 %v2075_v1, %v2074_v25 }
 0x3ee   : > { %v2076_v30 = vmul.f32 %v10710_v19, %v10710_v19  ;;  %v10716_v61 = vpop.f32.mrb[3].mxu0 }
 0x3ef   : > { %v2044_v14 = vadd.f32 %v10716_v61, %v10710_v19  ;;  %v2077_v55 = vmul.f32 %v10716_v61, %v10716_v61 }
 0x3f1   : > { %2045 = vadd.xlane.f32.xlu1 %v2044_v14  ;;  %v10722_v31 = vpop.f32.mrb[4].mxu0  ;;  %v10724_v48 = vadd.f32 %v2077_v55, %v2076_v30 }
 0x3f2   : > { %v2078_v63 = vmul.f32 %v10722_v31, %v10722_v31  ;;  %v10728_v59 = vpop.f32.mrb[5].mxu0 }
 0x3f3   : > { %v2047_v56 = vadd.f32 %v10728_v59, %v10722_v31  ;;  %v2079_v45 = vmul.f32 %v10728_v59, %v10728_v59 }
 0x3f5   : > { %2048 = vadd.xlane.f32.xlu0 %v2047_v56  ;;  %v10734_v16 = vpop.f32.mrb[6].mxu0  ;;  %v2102_v33 = vadd.f32 %v2079_v45, %v2078_v63 }
 0x3f6   : > { %v2080_v50 = vmul.f32 %v10734_v16, %v10734_v16  ;;  %v10738_v15 = vpop.f32.mrb[7].mxu0 }
 0x3f7   : > { %v2050_v54 = vadd.f32 %v10738_v15, %v10734_v16  ;;  %v2081_v18 = vmul.f32 %v10738_v15, %v10738_v15 }
 0x3f9   : > { %2051 = vadd.xlane.f32.xlu0 %v2050_v54  ;;  %v10744_v49 = vpop.f32.mrb[8].mxu0  ;;  %v2105_v58 = vadd.f32 %v2081_v18, %v2080_v50 }
 0x3fa   : > { %v2082_v41 = vmul.f32 %v10744_v49, %v10744_v49  ;;  %v10748_v2 = vpop.f32.mrb[9].mxu0 }
 0x3fb   : > { %v2053_v10 = vadd.f32 %v10748_v2, %v10744_v49  ;;  %v2083_v42 = vmul.f32 %v10748_v2, %v10748_v2 }
 0x3fd   : > { %2054 = vadd.xlane.f32.xlu1 %v2053_v10  ;;  %v10754_v0 = vpop.f32.mrb[10].mxu0  ;;  %v2108_v46 = vadd.f32 %v2083_v42, %v2082_v41 }
 0x3fe   : > { %v2084_v57 = vmul.f32 %v10754_v0, %v10754_v0  ;;  %v10758_v44 = vpop.f32.mrb[11].mxu0 }
 0x3ff   : > { %v2056_v53 = vadd.f32 %v10758_v44, %v10754_v0  ;;  %v2085_v60 = vmul.f32 %v10758_v44, %v10758_v44 }
 0x401   : > { %2057 = vadd.xlane.f32.xlu0 %v2056_v53  ;;  %v10765_v24 = vpop.f32.mrb[12].mxu0  ;;  %v2111_v8 = vadd.f32 %v2085_v60, %v2084_v57 }
 0x402   : > { %v2086_v21 = vmul.f32 %v10765_v24, %v10765_v24  ;;  %v10769_v3 = vpop.f32.mrb[13].mxu0 }
 0x403   : > { %v2059_v27 = vadd.f32 %v10769_v3, %v10765_v24  ;;  %v2087_v38 = vmul.f32 %v10769_v3, %v10769_v3 }
 0x405   : > { %2060 = vadd.xlane.f32.xlu1 %v2059_v27  ;;  %v10775_v28 = vpop.f32.mrb[14].mxu0  ;;  %v2114_v13 = vadd.f32 %v2087_v38, %v2086_v21  ;;  %v8880_v27 = vmov 0  }
 0x406   : > { %v2088_v35 = vmul.f32 %v10775_v28, %v10775_v28  ;;  %v10779_v22 = vpop.f32.mrb[15].mxu0  ;;  %8618 = vset.pattern.permute.xlu1 %v8880_v27  ;;  %8619 = vset.pattern.permute.xlu0 %v8880_v27  ;;  %v498_v27 = vld [vmem:[%s14913_s6] sm:$0xff] }
 0x407   : > { %v2062_v34 = vadd.f32 %v10779_v22, %v10775_v28  ;;  %v2089_v6 = vmul.f32 %v10779_v22, %v10779_v22 }
 0x409   : > { %2063 = vadd.xlane.f32.xlu0 %v2062_v34  ;;  %v10785_v25 = vpop.f32.mrb[16].mxu0  ;;  %v2117_v29 = vadd.f32 %v2089_v6, %v2088_v35  ;;  %v2034_v34 = vld [vmem:[%s14915_s8 + $0x20] sm:$0xff] }
 0x40a   : > { %v2090_v1 = vmul.f32 %v10785_v25, %v10785_v25  ;;  %v10789_v30 = vpop.f32.mrb[17].mxu0 }
 0x40b   : > { %v2065_v14 = vadd.f32 %v10789_v30, %v10785_v25  ;;  %v2091_v55 = vmul.f32 %v10789_v30, %v10789_v30 }
 0x40d   : > { %2066 = vadd.xlane.f32.xlu1 %v2065_v14  ;;  %v10795_v63 = vpop.f32.mrb[18].mxu0  ;;  %v2120_v56 = vadd.f32 %v2091_v55, %v2090_v1  ;;  %v2036_v1 = vld [vmem:[%s14915_s8 + $0x30] sm:$0xff]  ;;  %v2037_v14 = vld [vmem:[%s14915_s8 + $0x38] sm:$0xff] }
 0x40e   : > { %v2092_v45 = vmul.f32 %v10795_v63, %v10795_v63  ;;  %v10799_v50 = vpop.f32.mrb[19].mxu0 }
 0x40f   : > { %v2068_v54 = vadd.f32 %v10799_v50, %v10795_v63  ;;  %v2093_v18 = vmul.f32 %v10799_v50, %v10799_v50 }
 0x411   : > { %2069 = vadd.xlane.f32.xlu0 %v2068_v54  ;;  %v10805_v41 = vpop.f32.mrb[20].mxu0  ;;  %v2123_v10 = vadd.f32 %v2093_v18, %v2092_v45 }
 0x412   : > { %v2094_v42 = vmul.f32 %v10805_v41, %v10805_v41  ;;  %v10809_v57 = vpop.f32.mrb[21].mxu0 }
 0x413   : > { %v2071_v53 = vadd.f32 %v10809_v57, %v10805_v41  ;;  %v2095_v60 = vmul.f32 %v10809_v57, %v10809_v57 }
 0x415   : > { %2097 = vadd.xlane.f32.xlu0 %v10712_v5  ;;  %2072 = vadd.xlane.f32.xlu1 %v2071_v53  ;;  %v2126_v21 = vadd.f32 %v2095_v60, %v2094_v42  ;;  %v2030_v5 = vld [vmem:[%s14915_s8] sm:$0xff] }
 0x419   : > { %2103 = vadd.xlane.f32.xlu0 %v2102_v33  ;;  %2100 = vadd.xlane.f32.xlu1 %v10724_v48  ;;  %v2031_v48 = vld [vmem:[%s14915_s8 + $0x8] sm:$0xff]  ;;  %v2040_v33 = vld [vmem:[%s14915_s8 + $0x50] sm:$0xff] }
 0x41d   : > { %2109 = vadd.xlane.f32.xlu0 %v2108_v46  ;;  %2106 = vadd.xlane.f32.xlu1 %v2105_v58  ;;  %v2033_v58 = vld [vmem:[%s14915_s8 + $0x18] sm:$0xff] }
 0x421   : > { %2115 = vadd.xlane.f32.xlu0 %v2114_v13  ;;  %2112 = vadd.xlane.f32.xlu1 %v2111_v8  ;;  %v2032_v13 = vld [vmem:[%s14915_s8 + $0x10] sm:$0xff] }
 0x425   : > { %2121 = vadd.xlane.f32.xlu0 %v2120_v56  ;;  %2118 = vadd.xlane.f32.xlu1 %v2117_v29 }
 0x429   : > { %2127 = vadd.xlane.f32.xlu0 %v2126_v21  ;;  %2124 = vadd.xlane.f32.xlu1 %v2123_v10 }
 0x43a   : > { %2625 = vperm.xlu1 %8618, %v2030_v5  }
 0x43e   : > { %2675 = vperm.xlu1 %8618, %v2040_v33  }
 0x43f   : > { %2630 = vperm.xlu0 %8619, %v2031_v48  }
 0x442   : > { %2635 = vperm.xlu1 %8618, %v2032_v13  }
 0x443   : > { %2640 = vperm.xlu0 %8619, %v2033_v58  }
 0x446   : > { %2645 = vperm.xlu1 %8618, %v2034_v34  }
 0x44a   : > { %2655 = vperm.xlu1 %8618, %v2036_v1  }
 0x44e   : > { %2660 = vperm.xlu1 %8618, %v2037_v14  }
 0x47a   : > { %v2043_v46 = vpop.xlane.xlu0 %2042 }
 0x47e   : > { %v2046_v8 = vpop.xlane.xlu1 %2045 }
 0x47f   : > { %v7835_v38 = vpack.c.bf16 %v2046_v8, %v2043_v46  ;;  %v499_v46 = vld [vmem:[%s14913_s6 + $0x8] sm:$0xff] }
 0x481   : > { %7836 = vmatpush3.bf16.msra.mxu1 %v7835_v38 }
 0x482   : > { %v2049_v35 = vpop.xlane.xlu0 %2048  ;;  %7837 = vmatprep.subr.bf16.mxu1 %v14992_v9 }
 0x486   : > { %v2052_v6 = vpop.xlane.xlu0 %2051 }
 0x487   : > { %v7838_v29 = vpack.c.bf16 %v2052_v6, %v2049_v35  ;;  %v500_v35 = vld [vmem:[%s14913_s6 + $0x10] sm:$0xff] }
 0x489   : > { %7839 = vmatpush3.bf16.msra.mxu1 %v7838_v29  ;;  %v501_v29 = vld [vmem:[%s14913_s6 + $0x18] sm:$0xff] }
 0x48a   : > { %7840 = vmatprep.subr.bf16.mxu1 %v14992_v9  ;;  %v2055_v55 = vpop.xlane.xlu1 %2054 }
 0x48e   : > { %v2058_v56 = vpop.xlane.xlu0 %2057 }
 0x48f   : > { %v7841_v45 = vpack.c.bf16 %v2058_v56, %v2055_v55  ;;  %v502_v56 = vld [vmem:[%s14913_s6 + $0x20] sm:$0xff] }
 0x491   : > { %7842 = vmatpush3.bf16.msra.mxu1 %v7841_v45 }
 0x492   : > { %7843 = vmatprep.subr.bf16.mxu1 %v14992_v9  ;;  %v2061_v54 = vpop.xlane.xlu1 %2060 }
 0x496   : > { %v2064_v18 = vpop.xlane.xlu0 %2063 }
 0x497   : > { %v7844_v10 = vpack.c.bf16 %v2064_v18, %v2061_v54 }
 0x499   : > { %7845 = vmatpush3.bf16.msra.mxu1 %v7844_v10  ;;  %v503_v10 = vld [vmem:[%s14913_s6 + $0x28] sm:$0xff] }
 0x49a   : > { %7846 = vmatprep.subr.bf16.mxu1 %v14992_v9  ;;  %v2067_v42 = vpop.xlane.xlu1 %2066 }
 0x49e   : > { %v2070_v53 = vpop.xlane.xlu0 %2069 }
 0x49f   : > { %v7847_v60 = vpack.c.bf16 %v2070_v53, %v2067_v42  ;;  %v504_v42 = vld [vmem:[%s14913_s6 + $0x30] sm:$0xff] }
 0x4a1   : > { %7848 = vmatpush3.bf16.msra.mxu1 %v7847_v60  ;;  %v505_v60 = vld [vmem:[%s14913_s6 + $0x38] sm:$0xff] }
 0x4a2   : > { %v2098_v21 = vpop.xlane.xlu0 %2097  ;;  %v2073_v5 = vpop.xlane.xlu1 %2072  ;;  %7328 = vmatprep.subr.mxu1 %v14994_v52 }
 0x4a5   : > { %7329 = vmatpush3.msra.mxu1 %v2073_v5  ;;  %v507_v5 = vld [vmem:[%s14913_s6 + $0x48] sm:$0xff] }
 0x4a6   : > { %v2104_v48 = vpop.xlane.xlu0 %2103  ;;  %7331 = vmatmul.mubr.msk.f32.vlgmr.msra.gmra.mrb[0].mxu1 %vm2129_vm10, %v498_v27  ;;  %v2101_v33 = vpop.xlane.xlu1 %2100  ;;  %7849 = vmatprep.subr.bf16.mxu1 %v14992_v9 }
 0x4a7   : > { %v7850_v58 = vpack.c.bf16 %v2101_v33, %v2098_v21  ;;  %7333 = vmatprep.mubr.msk.f32.mxu1 %vm8879_vm9, %v14994_v52  ;;  %v506_v21 = vld [vmem:[%s14913_s6 + $0x40] sm:$0xff] }
 0x4a8   : > { %v2038_v33 = vld [vmem:[%s14915_s8 + $0x40] sm:$0xff] }
 0x4a9   : > { %7851 = vmatpush3.bf16.msra.mxu1 %v7850_v58  ;;  %v2039_v58 = vld [vmem:[%s14915_s8 + $0x48] sm:$0xff] }
 0x4aa   : > { %v2110_v8 = vpop.xlane.xlu0 %2109  ;;  %7334 = vmatmul.mubr.msk.f32.gmra.mrb[2].mxu1 %vm2129_vm10, %v499_v46  ;;  %v2107_v38 = vpop.xlane.xlu1 %2106  ;;  %7852 = vmatprep.subr.bf16.mxu1 %v14992_v9 }
 0x4ab   : > { %v7853_v13 = vpack.c.bf16 %v2107_v38, %v2104_v48  ;;  %7336 = vmatprep.mubr.msk.f32.mxu1 %vm8879_vm9, %v14994_v52  ;;  %v508_v48 = vld [vmem:[%s14913_s6 + $0x50] sm:$0xff] }
 0x4ad   : > { %7854 = vmatpush3.bf16.msra.mxu1 %v7853_v13 }
 0x4ae   : > { %7337 = vmatmul.mubr.msk.f32.gmra.mrb[4].mxu1 %vm2129_vm10, %v500_v35  ;;  %v2113_v34 = vpop.xlane.xlu1 %2112  ;;  %7855 = vmatprep.subr.bf16.mxu1 %v14992_v9  ;;  %v2116_v1 = vpop.xlane.xlu0 %2115 }
 0x4af   : > { %v7856_v6 = vpack.c.bf16 %v2113_v34, %v2110_v8  ;;  %7339 = vmatprep.mubr.msk.f32.mxu1 %vm8879_vm9, %v14994_v52 }
 0x4b1   : > { %7857 = vmatpush3.bf16.msra.mxu1 %v7856_v6 }
 0x4b2   : > { %7340 = vmatmul.mubr.msk.f32.gmra.mrb[6].mxu1 %vm2129_vm10, %v501_v29  ;;  %v2119_v14 = vpop.xlane.xlu1 %2118  ;;  %7858 = vmatprep.subr.bf16.mxu1 %v14992_v9  ;;  %v2122_v45 = vpop.xlane.xlu0 %2121 }
 0x4b3   : > { %v7859_v55 = vpack.c.bf16 %v2119_v14, %v2116_v1  ;;  %7342 = vmatprep.mubr.msk.f32.mxu1 %vm8879_vm9, %v14994_v52 }
 0x4b5   : > { %7860 = vmatpush3.bf16.msra.mxu1 %v7859_v55 }
 0x4b6   : > { %7343 = vmatmul.mubr.msk.f32.gmra.mrb[8].mxu1 %vm2129_vm10, %v502_v56  ;;  %v2125_v54 = vpop.xlane.xlu1 %2124  ;;  %7861 = vmatprep.subr.bf16.mxu1 %v14992_v9  ;;  %v2128_v53 = vpop.xlane.xlu0 %2127 }
 0x4b7   : > { %v7862_v18 = vpack.c.bf16 %v2125_v54, %v2122_v45  ;;  %7345 = vmatprep.mubr.msk.f32.mxu1 %vm8879_vm9, %v14994_v52 }
 0x4b9   : > { %7863 = vmatpush3.bf16.msra.mxu1 %v7862_v18 }
 0x4ba   : > { %7346 = vmatmul.mubr.msk.f32.gmra.mrb[10].mxu1 %vm2129_vm10, %v503_v10  ;;  %7383 = vmatprep.subr.mxu1 %v14994_v52 }
 0x4bb   : > { %7348 = vmatprep.mubr.msk.f32.mxu1 %vm8879_vm9, %v14994_v52 }
 0x4bd   : > { %7384 = vmatpush3.msra.mxu1 %v2128_v53 }
 0x4be   : > { %7349 = vmatmul.mubr.msk.f32.gmra.mrb[12].mxu1 %vm2129_vm10, %v504_v42 }
 0x4bf   : > { %7351 = vmatprep.mubr.msk.f32.mxu1 %vm8879_vm9, %v14994_v52 }
 0x4c2   : > { %7352 = vmatmul.mubr.msk.f32.gmra.mrb[14].mxu1 %vm2129_vm10, %v505_v60 }
 0x4c3   : > { %7354 = vmatprep.mubr.msk.f32.mxu1 %vm8879_vm9, %v14994_v52 }
 0x4c6   : > { %7355 = vmatmul.mubr.msk.f32.gmra.mrb[16].mxu1 %vm2129_vm10, %v506_v21 }
 0x4c7   : > { %7357 = vmatprep.mubr.msk.f32.mxu1 %vm8879_vm9, %v14994_v52 }
 0x4ca   : > { %7358 = vmatmul.mubr.msk.f32.gmra.mrb[18].mxu1 %vm2129_vm10, %v507_v5 }
 0x4cb   : > { %7360 = vmatprep.mubr.msk.f32.mxu1 %vm8879_vm9, %v14994_v52 }
 0x4ce   : > { %7361 = vmatmul.mubr.msk.f32.gmra.mrb[20].mxu1 %vm2129_vm10, %v508_v48 }
 0x4cf   : > { %7385 = vmatprep.mubr.msk.f32.mxu1 %vm8879_vm9, %v14994_v52 }
 0x4d2   : > { %7386 = vmatmul.mubr.msk.f32.vlgmr.msra.gmra.mrb[22].mxu1 %vm2129_vm10, %v498_v27  ;;  %v2035_v27 = vld [vmem:[%s14915_s8 + $0x28] sm:$0xff] }
 0x4d3   : > { %7388 = vmatprep.mubr.msk.f32.mxu1 %vm8879_vm9, %v14994_v52  ;;  %2650 = vperm.xlu0 %8619, %v2035_v27  }
 0x4d6   : > { %7389 = vmatmul.mubr.msk.f32.gmra.mrb[24].mxu1 %vm2129_vm10, %v499_v46 }
 0x4d7   : > { %7391 = vmatprep.mubr.msk.f32.mxu1 %vm8879_vm9, %v14994_v52  ;;  %2665 = vperm.xlu0 %8619, %v2038_v33  }
 0x4da   : > { %7392 = vmatmul.mubr.msk.f32.gmra.mrb[26].mxu1 %vm2129_vm10, %v500_v35 }
 0x4db   : > { %7394 = vmatprep.mubr.msk.f32.mxu1 %vm8879_vm9, %v14994_v52  ;;  %2670 = vperm.xlu0 %8619, %v2039_v58  }
 0x4de   : > { %7395 = vmatmul.mubr.msk.f32.gmra.mrb[28].mxu1 %vm2129_vm10, %v501_v29 }
 0x4df   : > { %7397 = vmatprep.mubr.msk.f32.mxu1 %vm8879_vm9, %v14994_v52 }
 0x4e2   : > { %7398 = vmatmul.mubr.msk.f32.gmra.mrb[30].mxu1 %vm2129_vm10, %v502_v56 }
 0x4e3   : > { %7400 = vmatprep.mubr.msk.f32.mxu1 %vm8879_vm9, %v14994_v52 }
 0x4e6   : > { %7401 = vmatmul.mubr.msk.f32.gmra.mrb[32].mxu1 %vm2129_vm10, %v503_v10 }
 0x4e7   : > { %7403 = vmatprep.mubr.msk.f32.mxu1 %vm8879_vm9, %v14994_v52 }
 0x4ea   : > { %7404 = vmatmul.mubr.msk.f32.gmra.mrb[34].mxu1 %vm2129_vm10, %v504_v42 }
 0x4eb   : > { %7406 = vmatprep.mubr.msk.f32.mxu1 %vm8879_vm9, %v14994_v52 }
 0x4ee   : > { %7407 = vmatmul.mubr.msk.f32.gmra.mrb[36].mxu1 %vm2129_vm10, %v505_v60 }
 0x4ef   : > { %7409 = vmatprep.mubr.msk.f32.mxu1 %vm8879_vm9, %v14994_v52 }
 0x4f2   : > { %7410 = vmatmul.mubr.msk.f32.gmra.mrb[38].mxu1 %vm2129_vm10, %v506_v21 }
 0x4f3   : > { %7412 = vmatprep.mubr.msk.f32.mxu1 %vm8879_vm9, %v14994_v52 }
 0x4f6   : > { %7413 = vmatmul.mubr.msk.f32.gmra.mrb[40].mxu1 %vm2129_vm10, %v507_v5 }
 0x4f7   : > { %7415 = vmatprep.mubr.msk.f32.mxu1 %vm8879_vm9, %v14994_v52 }
 0x4fa   : > { %7416 = vmatmul.mubr.msk.f32.gmra.mrb[42].mxu1 %vm2129_vm10, %v508_v48 }
 0x579   : > { %v2229_v46 = vpop.f32.mrb[0].mxu1 }
 0x57a   : > { %2471 = vperm.xlu1 %8618, %v2229_v46   ;;  %v7332_v8 = vpop.f32.mrb[1].mxu1  ;;  %v2403_v27 = vmul.f32 %v2229_v46, %v2229_v46 }
 0x57d   : > { %v2234_v38 = vpop.f32.mrb[2].mxu1 }
 0x57e   : > { %2476 = vperm.xlu1 %8618, %v2234_v38   ;;  %v7335_v13 = vpop.f32.mrb[3].mxu1 }
 0x57f   : > { %v2404_v13 = vmul.f32 %v2234_v38, %v2234_v38 }
 0x581   : > { %v2239_v35 = vpop.f32.mrb[4].mxu1 }
 0x582   : > { %2481 = vperm.xlu1 %8618, %v2239_v35   ;;  %v7338_v34 = vpop.f32.mrb[5].mxu1 }
 0x585   : > { %v2244_v6 = vpop.f32.mrb[6].mxu1 }
 0x586   : > { %2486 = vperm.xlu0 %8619, %v2244_v6   ;;  %v7341_v29 = vpop.f32.mrb[7].mxu1  ;;  %v2406_v11 = vmul.f32 %v2244_v6, %v2244_v6 }
 0x589   : > { %v2249_v1 = vpop.f32.mrb[8].mxu1 }
 0x58a   : > { %2491 = vperm.xlu1 %8618, %v2249_v1   ;;  %v7344_v14 = vpop.f32.mrb[9].mxu1  ;;  %v2407_v38 = vmul.f32 %v2249_v1, %v2249_v1 }
 0x58d   : > { %v2254_v55 = vpop.f32.mrb[10].mxu1 }
 0x58e   : > { %2496 = vperm.xlu0 %8619, %v2254_v55   ;;  %v7347_v56 = vpop.f32.mrb[11].mxu1  ;;  %v2408_v6 = vmul.f32 %v2254_v55, %v2254_v55  ;;  %v2021_v55 = vld [vmem:[%s14914_s7 + $0x10] sm:$0xff] }
 0x591   : > { %v2259_v45 = vpop.f32.mrb[12].mxu1 }
 0x592   : > { %2501 = vperm.xlu1 %8618, %v2259_v45   ;;  %v7350_v54 = vpop.f32.mrb[13].mxu1 }
 0x595   : > { %v10960_v18 = vpop.f32.mrb[14].mxu1 }
 0x596   : > { %2506 = vperm.xlu0 %8619, %v10960_v18   ;;  %v7353_v10 = vpop.f32.mrb[15].mxu1 }
 0x597   : > { %v2405_v10 = vmul.f32 %v2239_v35, %v2239_v35  ;;  %v2019_v35 = vld [vmem:[%s14914_s7] sm:$0xff] }
 0x599   : > { %v10963_v42 = vpop.f32.mrb[16].mxu1 }
 0x59a   : > { %2511 = vperm.xlu1 %8618, %v10963_v42   ;;  %v7356_v53 = vpop.f32.mrb[17].mxu1 }
 0x59d   : > { %v10966_v60 = vpop.f32.mrb[18].mxu1 }
 0x59e   : > { %2516 = vperm.xlu0 %8619, %v10966_v60   ;;  %v7359_v21 = vpop.f32.mrb[19].mxu1 }
 0x5a1   : > { %v10969_v5 = vpop.f32.mrb[20].mxu1 }
 0x5a2   : > { %2521 = vperm.xlu0 %8619, %v10969_v5   ;;  %v7362_v48 = vpop.f32.mrb[21].mxu1 }
 0x5a5   : > { %v2349_v33 = vpop.f32.mrb[22].mxu1 }
 0x5a6   : > { %v2414_v58 = vsub.f32 %v2349_v33, %v2403_v27  ;;  %v7387_v8 = vpop.f32.mrb[23].mxu1 }
 0x5a8   : > { %v2425_v34 = vmax.f32 %v2414_v58, 0.0 }
 0x5a9   : > { %v2354_v29 = vpop.f32.mrb[24].mxu1 }
 0x5aa   : > { %v2436_v14 = vadd.f32 1e-05, %v2425_v34  ;;  %v2415_v56 = vsub.f32 %v2354_v29, %v2404_v13  ;;  %v7390_v54 = vpop.f32.mrb[25].mxu1 }
 0x5ac   : > { %8620 = vrsqrt.f32 %v2436_v14  ;;  %v2426_v53 = vmax.f32 %v2415_v56, 0.0 }
 0x5ad   : > { %v2359_v9 = vpop.f32.mrb[26].mxu1 }
 0x5ae   : > { %v2437_v21 = vadd.f32 1e-05, %v2426_v53  ;;  %v2416_v52 = vsub.f32 %v2359_v9, %v2405_v10  ;;  %v7393_v12 = vpop.f32.mrb[27].mxu1  ;;  %v2409_v53 = vmul.f32 %v2259_v45, %v2259_v45  ;;  %v2022_v45 = vld [vmem:[%s14914_s7 + $0x18] sm:$0xff] }
 0x5b0   : > { %8622 = vrsqrt.f32 %v2437_v21  ;;  %v2427_v48 = vmax.f32 %v2416_v52, 0.0 }
 0x5b1   : > { %v2364_v46 = vpop.f32.mrb[28].mxu1 }
 0x5b2   : > { %v2438_v43 = vadd.f32 1e-05, %v2427_v48  ;;  %v2417_v27 = vsub.f32 %v2364_v46, %v2406_v11  ;;  %v7396_v33 = vpop.f32.mrb[29].mxu1  ;;  %v2020_v11 = vld [vmem:[%s14914_s7 + $0x8] sm:$0xff] }
 0x5b4   : > { %8624 = vrsqrt.f32 %v2438_v43  ;;  %v2428_v58 = vmax.f32 %v2417_v27, 0.0 }
 0x5b5   : > { %v2369_v8 = vpop.f32.mrb[30].mxu1 }
 0x5b6   : > { %v8621_v13 = vpop.eup %8620  ;;  %v2439_v34 = vadd.f32 1e-05, %v2428_v58  ;;  %v2418_v29 = vsub.f32 %v2369_v8, %v2407_v38  ;;  %v7399_v9 = vpop.f32.mrb[31].mxu1 }
 0x5b7   : > { %v2458_v12 = vmul.f32 %v8621_v13, %v2019_v35  ;;  %v2410_v35 = vmul.f32 %v10960_v18, %v10960_v18  ;;  %v2023_v18 = vld [vmem:[%s14914_s7 + $0x20] sm:$0xff] }
 0x5b8   : > { %8626 = vrsqrt.f32 %v2439_v34  ;;  %v2429_v52 = vmax.f32 %v2418_v29, 0.0 }
 0x5b9   : > { %2548 = vperm.xlu1 %8618, %v2458_v12   ;;  %v2374_v43 = vpop.f32.mrb[32].mxu1 }
 0x5ba   : > { %v8623_v1 = vpop.eup %8622  ;;  %v2440_v14 = vadd.f32 1e-05, %v2429_v52  ;;  %v2419_v56 = vsub.f32 %v2374_v43, %v2408_v6  ;;  %v7402_v54 = vpop.f32.mrb[33].mxu1  ;;  %v2411_v52 = vmul.f32 %v10963_v42, %v10963_v42  ;;  %v2024_v42 = vld [vmem:[%s14914_s7 + $0x28] sm:$0xff] }
 0x5bb   : > { %v2459_v10 = vmul.f32 %v8623_v1, %v2020_v11 }
 0x5bc   : > { %8628 = vrsqrt.f32 %v2440_v14  ;;  %v2430_v21 = vmax.f32 %v2419_v56, 0.0 }
 0x5bd   : > { %2553 = vperm.xlu1 %8618, %v2459_v10   ;;  %v2379_v48 = vpop.f32.mrb[34].mxu1 }
 0x5be   : > { %v8625_v46 = vpop.eup %8624  ;;  %v2441_v27 = vadd.f32 1e-05, %v2430_v21  ;;  %v2420_v33 = vsub.f32 %v2379_v48, %v2409_v53  ;;  %v7405_v38 = vpop.f32.mrb[35].mxu1  ;;  %v2412_v53 = vmul.f32 %v10966_v60, %v10966_v60  ;;  %v2025_v60 = vld [vmem:[%s14914_s7 + $0x30] sm:$0xff] }
 0x5bf   : > { %v2460_v58 = vmul.f32 %v8625_v46, %v2021_v55 }
 0x5c0   : > { %8630 = vrsqrt.f32 %v2441_v27  ;;  %v2431_v8 = vmax.f32 %v2420_v33, 0.0 }
 0x5c1   : > { %2558 = vperm.xlu1 %8618, %v2460_v58   ;;  %v2384_v13 = vpop.f32.mrb[36].mxu1  ;;  %v2413_v58 = vmul.f32 %v10969_v5, %v10969_v5 }
 0x5c2   : > { %v8627_v34 = vpop.eup %8626  ;;  %v2442_v29 = vadd.f32 1e-05, %v2431_v8  ;;  %v2421_v9 = vsub.f32 %v2384_v13, %v2410_v35  ;;  %v7408_v12 = vpop.f32.mrb[37].mxu1 }
 0x5c3   : > { %v2461_v6 = vmul.f32 %v8627_v34, %v2022_v45 }
 0x5c4   : > { %8632 = vrsqrt.f32 %v2442_v29  ;;  %v2432_v11 = vmax.f32 %v2421_v9, 0.0 }
 0x5c5   : > { %2563 = vperm.xlu0 %8619, %v2461_v6   ;;  %v2389_v43 = vpop.f32.mrb[38].mxu1  ;;  %v2026_v6 = vld [vmem:[%s14914_s7 + $0x38] sm:$0xff] }
 0x5c6   : > { %v8629_v1 = vpop.eup %8628  ;;  %v2443_v14 = vadd.f32 1e-05, %v2432_v11  ;;  %v2422_v56 = vsub.f32 %v2389_v43, %v2411_v52  ;;  %v7411_v54 = vpop.f32.mrb[39].mxu1 }
 0x5c7   : > { %v2462_v10 = vmul.f32 %v8629_v1, %v2023_v18  ;;  %v2027_v18 = vld [vmem:[%s14914_s7 + $0x40] sm:$0xff] }
 0x5c8   : > { %8634 = vrsqrt.f32 %v2443_v14  ;;  %v2433_v21 = vmax.f32 %v2422_v56, 0.0  ;;  %v2028_v14 = vld [vmem:[%s14914_s7 + $0x48] sm:$0xff] }
 0x5c9   : > { %2568 = vperm.xlu1 %8618, %v2462_v10   ;;  %v2394_v55 = vpop.f32.mrb[40].mxu1  ;;  %v2029_v10 = vld [vmem:[%s14914_s7 + $0x50] sm:$0xff] }
 0x5ca   : > { %v8631_v48 = vpop.eup %8630  ;;  %v2444_v46 = vadd.f32 1e-05, %v2433_v21  ;;  %v2423_v27 = vsub.f32 %v2394_v55, %v2412_v53  ;;  %v7414_v33 = vpop.f32.mrb[41].mxu1 }
 0x5cb   : > { %v2463_v38 = vmul.f32 %v8631_v48, %v2024_v42  ;;  %v2626_v42 = vpop.permute.xlu1 %2625 }
 0x5cc   : > { %8636 = vrsqrt.f32 %v2444_v46  ;;  %v2434_v35 = vmax.f32 %v2423_v27, 0.0 }
 0x5cd   : > { %2573 = vperm.xlu0 %8619, %v2463_v38   ;;  %v2399_v8 = vpop.f32.mrb[42].mxu1 }
 0x5ce   : > { %v8633_v45 = vpop.eup %8632  ;;  %v2445_v13 = vadd.f32 1e-05, %v2434_v35  ;;  %v2424_v34 = vsub.f32 %v2399_v8, %v2413_v58  ;;  %v7417_v29 = vpop.f32.mrb[43].mxu1 }
 0x5cf   : > { %v2464_v9 = vmul.f32 %v8633_v45, %v2025_v60  ;;  %v11013_v55 = vpop.permute.xlu1 %2675  ;;  %v2631_v8 = vpop.permute.xlu0 %2630 }
 0x5d0   : > { %8638 = vrsqrt.f32 %v2445_v13  ;;  %v2435_v12 = vmax.f32 %v2424_v34, 0.0 }
 0x5d1   : > { %2578 = vperm.xlu1 %8618, %v2464_v9  }
 0x5d2   : > { %v8635_v5 = vpop.eup %8634  ;;  %v2446_v52 = vadd.f32 1e-05, %v2435_v12 }
 0x5d3   : > { %v2465_v11 = vmul.f32 %v8635_v5, %v2026_v6  ;;  %v2636_v48 = vpop.permute.xlu1 %2635  ;;  %v11027_v34 = vpop.permute.xlu0 %2640 }
 0x5d4   : > { %8640 = vrsqrt.f32 %v2446_v52 }
 0x5d5   : > { %2583 = vperm.xlu0 %8619, %v2465_v11  }
 0x5d6   : > { %v8637_v43 = vpop.eup %8636 }
 0x5d7   : > { %v2466_v1 = vmul.f32 %v8637_v43, %v2027_v18  ;;  %v11015_v46 = vpop.permute.xlu1 %2645  ;;  %v11031_v18 = vpop.permute.xlu0 %2650 }
 0x5d9   : > { %2588 = vperm.xlu1 %8618, %v2466_v1  }
 0x5da   : > { %v8639_v56 = vpop.eup %8638 }
 0x5db   : > { %v2467_v54 = vmul.f32 %v8639_v56, %v2028_v14  ;;  %v11017_v27 = vpop.permute.xlu1 %2655 }
 0x5dd   : > { %2593 = vperm.xlu1 %8618, %v2467_v54  }
 0x5de   : > { %v8641_v53 = vpop.eup %8640 }
 0x5df   : > { %v2468_v21 = vmul.f32 %v8641_v53, %v2029_v10  ;;  %v11019_v33 = vpop.permute.xlu1 %2660  ;;  %v11043_v53 = vpop.permute.xlu0 %2665 }
 0x5e1   : > { %2598 = vperm.xlu1 %8618, %v2468_v21  }
 0x5f9   : > { %v2472_v38 = vpop.permute.xlu1 %2471 }
 0x5fa   : > { %v2524_v29 = vsub.f32 %v10700_v36, %v2472_v38  ;;  %v2525_v9 = vsub.f32 %v10704_v37, %v2472_v38 }
 0x5fd   : > { %v2477_v58 = vpop.permute.xlu1 %2476 }
 0x5fe   : > { %v2526_v43 = vsub.f32 %v10710_v19, %v2477_v58  ;;  %v2527_v37 = vsub.f32 %v10716_v61, %v2477_v58 }
 0x601   : > { %v2482_v35 = vpop.permute.xlu1 %2481 }
 0x609   : > { %v11021_v60 = vpop.permute.xlu1 %2491 }
 0x611   : > { %v11023_v45 = vpop.permute.xlu1 %2501 }
 0x619   : > { %v11025_v13 = vpop.permute.xlu1 %2511 }
 0x638   : > { %v2549_v12 = vpop.permute.xlu1 %2548 }
 0x639   : > { %v2601_v6 = vmul.f32 %v2549_v12, %v2524_v29  ;;  %v2602_v5 = vmul.f32 %v2549_v12, %v2525_v9  ;;  %v11049_v29 = vpop.permute.xlu0 %2670 }
 0x63b   : > { %v2678_v52 = vadd.f32 %v2626_v42, %v2601_v6  ;;  %v2679_v11 = vadd.f32 %v2626_v42, %v2602_v5 }
 0x63c   : > { %v2554_v1 = vpop.permute.xlu1 %2553 }
 0x63d   : > { %vm2700_vm11 = vcmp.ge.f32.partialorder %v2678_v52, 0.0  ;;  %vm2701_vm12 = vcmp.ge.f32.partialorder %v2679_v11, 0.0  ;;  %v2722_v14 = vmul.f32 0.01, %v2678_v52  ;;  %v2723_v56 = vmul.f32 0.01, %v2679_v11  ;;  %v2487_v12 = vpop.permute.xlu0 %2486 }
 0x63e   : > { %v2603_v36 = vmul.f32 %v2554_v1, %v2526_v43  ;;  %v2604_v19 = vmul.f32 %v2554_v1, %v2527_v37 }
 0x63f   : > { %v11034_v54 = vsel %vm2700_vm11, %v2678_v52, %v2722_v14  ;;  %v11036_v10 = vsel %vm2701_vm12, %v2679_v11, %v2723_v56  ;;  %v2529_v52 = vsub.f32 %v10728_v59, %v2482_v35 }
 0x640   : > { %3052 = vrot.lane.b32.xlu0 %v11036_v10, %s8869_s14  ;;  %3030 = vrot.lane.b32.xlu1 %v11034_v54, %s8869_s14  ;;  %v2680_v21 = vadd.f32 %v2631_v8, %v2603_v36  ;;  %v2681_v42 = vadd.f32 %v2631_v8, %v2604_v19  ;;  %v2559_v9 = vpop.permute.xlu1 %2558  ;;  %v2528_v8 = vsub.f32 %v10722_v31, %v2482_v35 }
 0x641   : > { %v11069_v11 = vpop.permute.xlu0 %2496  ;;  %v2606_v43 = vmul.f32 %v2559_v9, %v2529_v52 }
 0x642   : > { %v2724_v38 = vmul.f32 0.01, %v2680_v21  ;;  %vm2702_vm13 = vcmp.ge.f32.partialorder %v2680_v21, 0.0  ;;  %v2725_v61 = vmul.f32 0.01, %v2681_v42  ;;  %vm2703_vm14 = vcmp.ge.f32.partialorder %v2681_v42, 0.0 }
 0x643   : > { %v2605_v5 = vmul.f32 %v2559_v9, %v2528_v8  ;;  %v2683_v14 = vadd.f32 %v2636_v48, %v2606_v43 }
 0x644   : > { %3140 = vrot.lane.b32.xlu0 %v11036_v10, %s8872_s18  ;;  %3118 = vrot.lane.b32.xlu1 %v11034_v54, %s8872_s18  ;;  %v11055_v58 = vsel %vm2702_vm13, %v2680_v21, %v2724_v38  ;;  %v11062_v6 = vsel %vm2703_vm14, %v2681_v42, %v2725_v61  ;;  %v2530_v21 = vsub.f32 %v10734_v16, %v2487_v12 }
 0x645   : > { %v2682_v1 = vadd.f32 %v2636_v48, %v2605_v5  ;;  %v11075_v31 = vpop.permute.xlu0 %2506  ;;  %v2727_v35 = vmul.f32 0.01, %v2683_v14  ;;  %vm2705_vm11 = vcmp.ge.f32.partialorder %v2683_v14, 0.0  ;;  %v2531_v38 = vsub.f32 %v10738_v15, %v2487_v12 }
 0x646   : > { %v2532_v16 = vsub.f32 %v10744_v49, %v11021_v60  ;;  %v2533_v15 = vsub.f32 %v10748_v2, %v11021_v60 }
 0x647   : > { %v2726_v56 = vmul.f32 0.01, %v2682_v1  ;;  %vm2704_vm15 = vcmp.ge.f32.partialorder %v2682_v1, 0.0  ;;  %v11089_v48 = vsel %vm2705_vm11, %v2683_v14, %v2727_v35 }
 0x648   : > { %3316 = vrot.lane.b32.xlu0 %v11036_v10, %s8871_s28  ;;  %3206 = vrot.lane.b32.xlu1 %v11034_v54, %s8875_s16  ;;  %v2569_v8 = vpop.permute.xlu1 %2568 }
 0x649   : > { %v11081_v59 = vpop.permute.xlu0 %2516  ;;  %v11083_v36 = vsel %vm2704_vm15, %v2682_v1, %v2726_v56  ;;  %v2609_v43 = vmul.f32 %v2569_v8, %v2532_v16  ;;  %v2610_v14 = vmul.f32 %v2569_v8, %v2533_v15 }
 0x64b   : > { %v2686_v49 = vadd.f32 %v11015_v46, %v2609_v43  ;;  %v2687_v56 = vadd.f32 %v11015_v46, %v2610_v14 }
 0x64c   : > { %3228 = vrot.lane.b32.xlu1 %v11036_v10, %s8875_s16  ;;  %3208 = vrot.lane.b32.xlu0 %v11055_v58, %s8875_s16 }
 0x64d   : > { %v11091_v37 = vpop.permute.xlu0 %2521  ;;  %v2730_v35 = vmul.f32 0.01, %v2686_v49  ;;  %vm2708_vm14 = vcmp.ge.f32.partialorder %v2686_v49, 0.0  ;;  %v2731_v2 = vmul.f32 0.01, %v2687_v56  ;;  %vm2709_vm15 = vcmp.ge.f32.partialorder %v2687_v56, 0.0 }
 0x64f   : > { %v11135_v60 = vsel %vm2708_vm14, %v2686_v49, %v2730_v35  ;;  %v2538_v35 = vsub.f32 %v10775_v28, %v11075_v31  ;;  %v2540_v28 = vsub.f32 %v10785_v25, %v11025_v13 }
 0x650   : > { %3294 = vrot.lane.b32.xlu1 %v11034_v54, %s8871_s28  ;;  %3230 = vrot.lane.b32.xlu0 %v11062_v6, %s8875_s16  ;;  %v2579_v8 = vpop.permute.xlu1 %2578 }
 0x651   : > { %v2564_v19 = vpop.permute.xlu0 %2563 }
 0x652   : > { %v2607_v42 = vmul.f32 %v2564_v19, %v2530_v21  ;;  %v2608_v61 = vmul.f32 %v2564_v19, %v2531_v38  ;;  %v11141_v19 = vsel %vm2709_vm15, %v2687_v56, %v2731_v2  ;;  %v2534_v21 = vsub.f32 %v10754_v0, %v11069_v11 }
 0x653   : > { %v2535_v38 = vsub.f32 %v10758_v44, %v11069_v11  ;;  %v2536_v0 = vsub.f32 %v10765_v24, %v11023_v45  ;;  %v2537_v44 = vsub.f32 %v10769_v3, %v11023_v45 }
 0x654   : > { %2766 = vrot.lane.b32.xlu1 %v11034_v54, %s8873_s25  ;;  %2768 = vrot.lane.b32.xlu0 %v11055_v58, %s8873_s25  ;;  %v2684_v9 = vadd.f32 %v11027_v34, %v2607_v42  ;;  %v2685_v5 = vadd.f32 %v11027_v34, %v2608_v61 }
 0x655   : > { %v2574_v46 = vpop.permute.xlu0 %2573  ;;  %v2614_v15 = vmul.f32 %v2579_v8, %v2537_v44 }
 0x656   : > { %v2728_v52 = vmul.f32 0.01, %v2684_v9  ;;  %vm2706_vm12 = vcmp.ge.f32.partialorder %v2684_v9, 0.0  ;;  %v2729_v12 = vmul.f32 0.01, %v2685_v5  ;;  %vm2707_vm13 = vcmp.ge.f32.partialorder %v2685_v5, 0.0 }
 0x657   : > { %v2611_v42 = vmul.f32 %v2574_v46, %v2534_v21  ;;  %v2612_v61 = vmul.f32 %v2574_v46, %v2535_v38  ;;  %v2539_v21 = vsub.f32 %v10779_v22, %v11075_v31  ;;  %v2541_v22 = vsub.f32 %v10789_v30, %v11025_v13 }
 0x658   : > { %2788 = vrot.lane.b32.xlu1 %v11036_v10, %s8873_s25  ;;  %2790 = vrot.lane.b32.xlu0 %v11062_v6, %s8873_s25  ;;  %v11121_v1 = vsel %vm2706_vm12, %v2684_v9, %v2728_v52  ;;  %v11128_v34 = vsel %vm2707_vm13, %v2685_v5, %v2729_v12  ;;  %v2613_v52 = vmul.f32 %v2579_v8, %v2536_v0 }
 0x659   : > { %v2688_v9 = vadd.f32 %v11031_v18, %v2611_v42  ;;  %v2689_v16 = vadd.f32 %v11031_v18, %v2612_v61  ;;  %v2691_v12 = vadd.f32 %v11017_v27, %v2614_v15  ;;  %v2584_v56 = vpop.permute.xlu0 %2583 }
 0x65a   : > { %v2690_v24 = vadd.f32 %v11017_v27, %v2613_v52  ;;  %v2589_v27 = vpop.permute.xlu1 %2588  ;;  %v2615_v2 = vmul.f32 %v2584_v56, %v2538_v35  ;;  %v2616_v42 = vmul.f32 %v2584_v56, %v2539_v21  ;;  %v2542_v21 = vsub.f32 %v10795_v63, %v11081_v59 }
 0x65b   : > { %v2732_v5 = vmul.f32 0.01, %v2688_v9  ;;  %vm2710_vm11 = vcmp.ge.f32.partialorder %v2688_v9, 0.0  ;;  %v2733_v11 = vmul.f32 0.01, %v2689_v16  ;;  %vm2711_vm12 = vcmp.ge.f32.partialorder %v2689_v16, 0.0 }
 0x65c   : > { %3032 = vrot.lane.b32.xlu1 %v11055_v58, %s8869_s14  ;;  %3034 = vrot.lane.b32.xlu0 %v11083_v36, %s8869_s14  ;;  %v2734_v14 = vmul.f32 0.01, %v2690_v24  ;;  %vm2712_vm13 = vcmp.ge.f32.partialorder %v2690_v24, 0.0  ;;  %v2735_v3 = vmul.f32 0.01, %v2691_v12  ;;  %vm2713_vm14 = vcmp.ge.f32.partialorder %v2691_v12, 0.0 }
 0x65d   : > { %v11173_v43 = vsel %vm2710_vm11, %v2688_v9, %v2732_v5  ;;  %v11180_v18 = vsel %vm2711_vm12, %v2689_v16, %v2733_v11  ;;  %v2692_v38 = vadd.f32 %v11019_v33, %v2615_v2  ;;  %v2693_v9 = vadd.f32 %v11019_v33, %v2616_v42 }
 0x65e   : > { %v11187_v45 = vsel %vm2712_vm13, %v2690_v24, %v2734_v14  ;;  %v11193_v49 = vsel %vm2713_vm14, %v2691_v12, %v2735_v3  ;;  %v2594_v46 = vpop.permute.xlu1 %2593  ;;  %v2617_v0 = vmul.f32 %v2589_v27, %v2540_v28  ;;  %v2618_v33 = vmul.f32 %v2589_v27, %v2541_v22 }
 0x65f   : > { %v2736_v8 = vmul.f32 0.01, %v2692_v38  ;;  %vm2714_vm15 = vcmp.ge.f32.partialorder %v2692_v38, 0.0  ;;  %v2737_v25 = vmul.f32 0.01, %v2693_v9  ;;  %vm2715_vm11 = vcmp.ge.f32.partialorder %v2693_v9, 0.0 }
 0x660   : > { %3054 = vrot.lane.b32.xlu1 %v11062_v6, %s8869_s14  ;;  %3056 = vrot.lane.b32.xlu0 %v11089_v48, %s8869_s14  ;;  %v2694_v52 = vadd.f32 %v11043_v53, %v2617_v0  ;;  %v2695_v11 = vadd.f32 %v11043_v53, %v2618_v33  ;;  %v2619_v42 = vmul.f32 %v2594_v46, %v2542_v21 }
 0x661   : > { %v11231_v5 = vsel %vm2714_vm15, %v2692_v38, %v2736_v8  ;;  %v11242_v13 = vsel %vm2715_vm11, %v2693_v9, %v2737_v25  ;;  %v2543_v9 = vsub.f32 %v10799_v50, %v11081_v59 }
 0x662   : > { %v11218_v61 = vpop.permute.xlu1 %2598  ;;  %v2738_v15 = vmul.f32 0.01, %v2694_v52  ;;  %vm2716_vm12 = vcmp.ge.f32.partialorder %v2694_v52, 0.0  ;;  %v2739_v14 = vmul.f32 0.01, %v2695_v11  ;;  %vm2717_vm13 = vcmp.ge.f32.partialorder %v2695_v11, 0.0 }
 0x663   : > { %v2620_v8 = vmul.f32 %v2594_v46, %v2543_v9  ;;  %v2696_v63 = vadd.f32 %v11049_v29, %v2619_v42 }
 0x664   : > { %3120 = vrot.lane.b32.xlu1 %v11055_v58, %s8872_s18  ;;  %3122 = vrot.lane.b32.xlu0 %v11083_v36, %s8872_s18  ;;  %v11253_v3 = vsel %vm2716_vm12, %v2694_v52, %v2738_v15  ;;  %v11263_v56 = vsel %vm2717_vm13, %v2695_v11, %v2739_v14  ;;  %v15279_v52 = vld [vmem:[#allocation40_spill] sm:$0xff]  ;;  %v15280_v15 = vld [vmem:[#allocation39_spill] sm:$0xff] }
 0x665   : > { %15273 = vst [vmem:[#allocation45_spill] sm:$0xff] %v11253_v3  ;;  %15276 = vst [vmem:[#allocation36_spill] sm:$0xff] %v11263_v56  ;;  %vm2718_vm14 = vcmp.ge.f32.partialorder %v2696_v63, 0.0 }
 0x668   : > { %3142 = vrot.lane.b32.xlu1 %v11062_v6, %s8872_s18  ;;  %3144 = vrot.lane.b32.xlu0 %v11089_v48, %s8872_s18 }
 0x66c   : > { %3296 = vrot.lane.b32.xlu1 %v11055_v58, %s8871_s28  ;;  %3298 = vrot.lane.b32.xlu0 %v11083_v36, %s8871_s28 }
 0x670   : > { %3318 = vrot.lane.b32.xlu1 %v11062_v6, %s8871_s28  ;;  %3320 = vrot.lane.b32.xlu0 %v11089_v48, %s8871_s28 }
 0x674   : > { %3210 = vrot.lane.b32.xlu1 %v11083_v36, %s8875_s16  ;;  %3212 = vrot.lane.b32.xlu0 %v11121_v1, %s8875_s16 }
 0x678   : > { %3232 = vrot.lane.b32.xlu1 %v11089_v48, %s8875_s16  ;;  %3234 = vrot.lane.b32.xlu0 %v11128_v34, %s8875_s16 }
 0x67c   : > { %3036 = vrot.lane.b32.xlu1 %v11121_v1, %s8869_s14  ;;  %3038 = vrot.lane.b32.xlu0 %v11135_v60, %s8869_s14 }
 0x680   : > { %3058 = vrot.lane.b32.xlu1 %v11128_v34, %s8869_s14  ;;  %3060 = vrot.lane.b32.xlu0 %v11141_v19, %s8869_s14 }
 0x684   : > { %3124 = vrot.lane.b32.xlu1 %v11121_v1, %s8872_s18  ;;  %3126 = vrot.lane.b32.xlu0 %v11135_v60, %s8872_s18 }
 0x688   : > { %3146 = vrot.lane.b32.xlu1 %v11128_v34, %s8872_s18  ;;  %3148 = vrot.lane.b32.xlu0 %v11141_v19, %s8872_s18 }
 0x68c   : > { %3300 = vrot.lane.b32.xlu1 %v11121_v1, %s8871_s28  ;;  %3302 = vrot.lane.b32.xlu0 %v11135_v60, %s8871_s28 }
 0x690   : > { %3322 = vrot.lane.b32.xlu1 %v11128_v34, %s8871_s28  ;;  %3324 = vrot.lane.b32.xlu0 %v11141_v19, %s8871_s28 }
 0x694   : > { %3214 = vrot.lane.b32.xlu1 %v11135_v60, %s8875_s16  ;;  %3216 = vrot.lane.b32.xlu0 %v11173_v43, %s8875_s16 }
 0x698   : > { %3236 = vrot.lane.b32.xlu1 %v11141_v19, %s8875_s16  ;;  %3238 = vrot.lane.b32.xlu0 %v11180_v18, %s8875_s16 }
 0x69c   : > { %3040 = vrot.lane.b32.xlu1 %v11173_v43, %s8869_s14  ;;  %3042 = vrot.lane.b32.xlu0 %v11187_v45, %s8869_s14 }
 0x6a0   : > { %3062 = vrot.lane.b32.xlu1 %v11180_v18, %s8869_s14  ;;  %3064 = vrot.lane.b32.xlu0 %v11193_v49, %s8869_s14 }
 0x6a4   : > { %3128 = vrot.lane.b32.xlu1 %v11173_v43, %s8872_s18  ;;  %3130 = vrot.lane.b32.xlu0 %v11187_v45, %s8872_s18 }
 0x6a8   : > { %3150 = vrot.lane.b32.xlu1 %v11180_v18, %s8872_s18  ;;  %3152 = vrot.lane.b32.xlu0 %v11193_v49, %s8872_s18 }
 0x6ac   : > { %3304 = vrot.lane.b32.xlu1 %v11173_v43, %s8871_s28  ;;  %3306 = vrot.lane.b32.xlu0 %v11187_v45, %s8871_s28 }
 0x6b0   : > { %3326 = vrot.lane.b32.xlu1 %v11180_v18, %s8871_s28  ;;  %3328 = vrot.lane.b32.xlu0 %v11193_v49, %s8871_s28 }
 0x6b2   : > { %v11227_v31 = vpop.permute.xlu0 %3052  ;;  %v11229_v16 = vpop.permute.xlu1 %3030 }
 0x6b4   : > { %3218 = vrot.lane.b32.xlu1 %v11187_v45, %s8875_s16  ;;  %3220 = vrot.lane.b32.xlu0 %v11231_v5, %s8875_s16 }
 0x6b6   : > { %v11238_v44 = vpop.permute.xlu0 %3140  ;;  %v11240_v30 = vpop.permute.xlu1 %3118 }
 0x6b8   : > { %3240 = vrot.lane.b32.xlu1 %v11193_v49, %s8875_s16  ;;  %3242 = vrot.lane.b32.xlu0 %v11242_v13, %s8875_s16 }
 0x6ba   : > { %v11249_v24 = vpop.permute.xlu0 %3316  ;;  %v11251_v12 = vpop.permute.xlu1 %3206 }
 0x6bb   : > { %15271 = vst [vmem:[#allocation28_spill] sm:$0xff] %v11249_v24  ;;  %15272 = vst [vmem:[#allocation47_spill] sm:$0xff] %v11251_v12 }
 0x6bc   : > { %3044 = vrot.lane.b32.xlu1 %v11231_v5, %s8869_s14  ;;  %3046 = vrot.lane.b32.xlu0 %v11253_v3, %s8869_s14 }
 0x6be   : > { %v11259_v53 = vpop.permute.xlu0 %3208  ;;  %v11261_v27 = vpop.permute.xlu1 %3228 }
 0x6bf   : > { %15274 = vst [vmem:[#allocation57_spill] sm:$0xff] %v11259_v53  ;;  %15275 = vst [vmem:[#allocation61_spill] sm:$0xff] %v11261_v27 }
 0x6c0   : > { %3066 = vrot.lane.b32.xlu1 %v11242_v13, %s8869_s14  ;;  %3068 = vrot.lane.b32.xlu0 %v11263_v56, %s8869_s14 }
 0x6c2   : > { %v11269_v35 = vpop.permute.xlu0 %3230  ;;  %v11271_v2 = vpop.permute.xlu1 %3294 }
 0x6c3   : > { %15277 = vst [vmem:[#allocation65_spill] sm:$0xff] %v11269_v35  ;;  %15278 = vst [vmem:[#allocation63_spill] sm:$0xff] %v11271_v2 }
 0x6c4   : > { %3132 = vrot.lane.b32.xlu1 %v11231_v5, %s8872_s18  ;;  %3134 = vrot.lane.b32.xlu0 %v11253_v3, %s8872_s18 }
 0x6c6   : > { %v2769_v38 = vpop.permute.xlu0 %2768  ;;  %v2767_v28 = vpop.permute.xlu1 %2766 }
 0x6c8   : > { %3154 = vrot.lane.b32.xlu1 %v11242_v13, %s8872_s18  ;;  %3156 = vrot.lane.b32.xlu0 %v11263_v56, %s8872_s18 }
 0x6ca   : > { %v2791_v0 = vpop.permute.xlu0 %2790  ;;  %v2789_v22 = vpop.permute.xlu1 %2788 }
 0x6cb   : > { %v2811_v25 = vsel %vm724_vm4, %v2769_v38, %v2791_v0  ;;  %v2822_v33 = vsel %vm724_vm4, %v2791_v0, %v2769_v38  ;;  %v2810_v50 = vsel %vm724_vm4, %v2767_v28, %v2789_v22  ;;  %v2821_v59 = vsel %vm724_vm4, %v2789_v22, %v2767_v28 }
 0x6cc   : > { %v2834_v11 = vmul.f32 %v2822_v33, %v15279_v52  ;;  %v2835_v46 = vmul.f32 %v2811_v25, %v15280_v15  ;;  %v2832_v14 = vmul.f32 %v2821_v59, %v15279_v52  ;;  %v2833_v21 = vmul.f32 %v2810_v50, %v15280_v15  ;;  %3308 = vrot.lane.b32.xlu1 %v11231_v5, %s8871_s28 }
 0x6cd   : > { %3310 = vrot.lane.b32.xlu0 %v11253_v3, %s8871_s28  ;;  %v2697_v0 = vadd.f32 %v11049_v29, %v2620_v8  ;;  %v2740_v22 = vmul.f32 0.01, %v2696_v63 }
 0x6ce   : > { %v7866_v42 = vpack.c.bf16 %v2834_v11, %v2832_v14  ;;  %v11302_v38 = vpop.permute.xlu0 %3034  ;;  %v11304_v9 = vpop.permute.xlu1 %3032  ;;  %v7864_v28 = vpack.c.bf16 %v2835_v46, %v2833_v21 }
 0x6cf   : > { %v2741_v50 = vmul.f32 0.01, %v2697_v0  ;;  %v11315_v59 = vsel %vm2718_vm14, %v2696_v63, %v2740_v22  ;;  %vm2719_vm15 = vcmp.ge.f32.partialorder %v2697_v0, 0.0 }
 0x6d0   : > { %3330 = vrot.lane.b32.xlu1 %v11242_v13, %s8871_s28  ;;  %7865 = vmatprep.subr.bf16.mxu0 %v7864_v28  ;;  %15281 = vst [vmem:[#allocation60_spill] sm:$0xff] %v11315_v59  ;;  %v2545_v28 = vsub.f32 %v10809_v57, %v11091_v37 }
 0x6d1   : > { %3332 = vrot.lane.b32.xlu0 %v11263_v56, %s8871_s28  ;;  %7867 = vmatpush1.bf16.msra.mxu0 %v7866_v42  ;;  %v11325_v11 = vsel %vm2719_vm15, %v2697_v0, %v2741_v50  ;;  %v2544_v42 = vsub.f32 %v10805_v41, %v11091_v37 }
 0x6d2   : > { %v11311_v25 = vpop.permute.xlu0 %3056  ;;  %v11313_v33 = vpop.permute.xlu1 %3054  ;;  %v2622_v7 = vmul.f32 %v11218_v61, %v2545_v28 }
 0x6d3   : > { %v2621_v50 = vmul.f32 %v11218_v61, %v2544_v42  ;;  %v3086_v26 = vsel %vm564_vm1, %v11313_v33, %v11304_v9 }
 0x6d4   : > { %3222 = vrot.lane.b32.xlu1 %v11253_v3, %s8875_s16  ;;  %v2699_v37 = vadd.f32 %v11013_v55, %v2622_v7 }
 0x6d5   : > { %3224 = vrot.lane.b32.xlu0 %v11315_v59, %s8875_s16  ;;  %v2698_v57 = vadd.f32 %v11013_v55, %v2621_v50 }
 0x6d6   : > { %v11321_v29 = vpop.permute.xlu0 %3122  ;;  %v11323_v8 = vpop.permute.xlu1 %3120  ;;  %v2743_v17 = vmul.f32 0.01, %v2699_v37  ;;  %vm2721_vm12 = vcmp.ge.f32.partialorder %v2699_v37, 0.0 }
 0x6d7   : > { %v2742_v28 = vmul.f32 0.01, %v2698_v57  ;;  %vm2720_vm11 = vcmp.ge.f32.partialorder %v2698_v57, 0.0 }
 0x6d8   : > { %3244 = vrot.lane.b32.xlu1 %v11263_v56, %s8875_s16 }
 0x6d9   : > { %3246 = vrot.lane.b32.xlu0 %v11325_v11, %s8875_s16  ;;  %v11383_v50 = vsel %vm2720_vm11, %v2698_v57, %v2742_v28 }
 0x6da   : > { %v11331_v63 = vpop.permute.xlu0 %3144  ;;  %v11333_v46 = vpop.permute.xlu1 %3142 }
 0x6db   : > { %15282 = vst [vmem:[#allocation59_spill] sm:$0xff] %v11333_v46 }
 0x6dc   : > { %3048 = vrot.lane.b32.xlu1 %v11315_v59, %s8869_s14 }
 0x6dd   : > { %2772 = vrot.lane.b32.xlu0 %v11121_v1, %s8873_s25 }
 0x6de   : > { %v11339_v14 = vpop.permute.xlu0 %3298  ;;  %v11341_v21 = vpop.permute.xlu1 %3296 }
 0x6df   : > { %15283 = vst [vmem:[#allocation35_spill] sm:$0xff] %v11339_v14  ;;  %15284 = vst [vmem:[#allocation32_spill] sm:$0xff] %v11341_v21 }
 0x6e0   : > { %3070 = vrot.lane.b32.xlu1 %v11325_v11, %s8869_s14 }
 0x6e1   : > { %2794 = vrot.lane.b32.xlu0 %v11128_v34, %s8873_s25 }
 0x6e2   : > { %v11351_v0 = vpop.permute.xlu0 %3320  ;;  %v11353_v22 = vpop.permute.xlu1 %3318 }
 0x6e3   : > { %15285 = vst [vmem:[#allocation51_spill] sm:$0xff] %v11351_v0  ;;  %15286 = vst [vmem:[#allocation49_spill] sm:$0xff] %v11353_v22  ;;  %v11385_v22 = vsel %vm2721_vm12, %v2699_v37, %v2743_v17 }
 0x6e4   : > { %3136 = vrot.lane.b32.xlu1 %v11315_v59, %s8872_s18 }
 0x6e5   : > { %3384 = vrot.lane.b32.xlu0 %v11055_v58, %s15079_s24 }
 0x6e6   : > { %v11361_v41 = vpop.permute.xlu0 %3212  ;;  %v11363_v23 = vpop.permute.xlu1 %3210 }
 0x6e7   : > { %15287 = vst [vmem:[#allocation52_spill] sm:$0xff] %v11361_v41  ;;  %15288 = vst [vmem:[#allocation50_spill] sm:$0xff] %v11363_v23 }
 0x6e8   : > { %3158 = vrot.lane.b32.xlu1 %v11325_v11, %s8872_s18 }
 0x6e9   : > { %3406 = vrot.lane.b32.xlu0 %v11062_v6, %s15079_s24 }
 0x6ea   : > { %v11371_v61 = vpop.permute.xlu0 %3234  ;;  %v11373_v42 = vpop.permute.xlu1 %3232 }
 0x6eb   : > { %15289 = vst [vmem:[#allocation29_spill] sm:$0xff] %v11371_v61  ;;  %15290 = vst [vmem:[#allocation67_spill] sm:$0xff] %v11373_v42 }
 0x6ec   : > { %3312 = vrot.lane.b32.xlu1 %v11315_v59, %s8871_s28 }
 0x6ed   : > { %2776 = vrot.lane.b32.xlu0 %v11173_v43, %s8873_s25 }
 0x6ee   : > { %v11379_v7 = vpop.permute.xlu0 %3038  ;;  %v11381_v55 = vpop.permute.xlu1 %3036 }
 0x6f0   : > { %2962 = vrot.lane.b32.xlu1 %v11383_v50, %s8874_s23 }
 0x6f1   : > { %2984 = vrot.lane.b32.xlu0 %v11385_v22, %s8874_s23 }
 0x6f2   : > { %v11391_v21 = vpop.permute.xlu0 %3060  ;;  %v11393_v0 = vpop.permute.xlu1 %3058 }
 0x6f4   : > { %3334 = vrot.lane.b32.xlu1 %v11325_v11, %s8871_s28 }
 0x6f5   : > { %2798 = vrot.lane.b32.xlu0 %v11180_v18, %s8873_s25 }
 0x6f6   : > { %v11399_v57 = vpop.permute.xlu0 %3126  ;;  %v11401_v17 = vpop.permute.xlu1 %3124 }
 0x6f7   : > { %15291 = vst [vmem:[#allocation62_spill] sm:$0xff] %v11399_v57  ;;  %15292 = vst [vmem:[#allocation38_spill] sm:$0xff] %v11401_v17 }
 0x6f8   : > { %2770 = vrot.lane.b32.xlu1 %v11083_v36, %s8873_s25 }
 0x6f9   : > { %3388 = vrot.lane.b32.xlu0 %v11121_v1, %s15079_s24 }
 0x6fa   : > { %v11407_v37 = vpop.permute.xlu0 %3148  ;;  %v11409_v28 = vpop.permute.xlu1 %3146 }
 0x6fb   : > { %15293 = vst [vmem:[#allocation68_spill] sm:$0xff] %v11407_v37  ;;  %15294 = vst [vmem:[#allocation69_spill] sm:$0xff] %v11409_v28 }
 0x6fc   : > { %2792 = vrot.lane.b32.xlu1 %v11089_v48, %s8873_s25 }
 0x6fd   : > { %3410 = vrot.lane.b32.xlu0 %v11128_v34, %s15079_s24 }
 0x6fe   : > { %v11415_v14 = vpop.permute.xlu0 %3302  ;;  %v11417_v2 = vpop.permute.xlu1 %3300 }
 0x6ff   : > { %15295 = vst [vmem:[#allocation37_spill] sm:$0xff] %v11415_v14  ;;  %15296 = vst [vmem:[#allocation64_spill] sm:$0xff] %v11417_v2 }
 0x700   : > { %3382 = vrot.lane.b32.xlu1 %v11034_v54, %s15079_s24 }
 0x701   : > { %3050 = vrot.lane.b32.xlu0 %v11383_v50, %s8869_s14 }
 0x702   : > { %v11423_v24 = vpop.permute.xlu0 %3324  ;;  %v11425_v40 = vpop.permute.xlu1 %3322 }
 0x703   : > { %15297 = vst [vmem:[#allocation66_spill] sm:$0xff] %v11423_v24  ;;  %15298 = vst [vmem:[#allocation34_spill] sm:$0xff] %v11425_v40 }
 0x704   : > { %3404 = vrot.lane.b32.xlu1 %v11036_v10, %s15079_s24 }
 0x705   : > { %3072 = vrot.lane.b32.xlu0 %v11385_v22, %s8869_s14 }
 0x706   : > { %v11431_v42 = vpop.permute.xlu0 %3216  ;;  %v11433_v14 = vpop.permute.xlu1 %3214 }
 0x707   : > { %15299 = vst [vmem:[#allocation53_spill] sm:$0xff] %v11431_v42  ;;  %15300 = vst [vmem:[#allocation55_spill] sm:$0xff] %v11433_v14 }
 0x708   : > { %2774 = vrot.lane.b32.xlu1 %v11135_v60, %s8873_s25 }
 0x709   : > { %2780 = vrot.lane.b32.xlu0 %v11231_v5, %s8873_s25 }
 0x70a   : > { %v11439_v2 = vpop.permute.xlu0 %3238  ;;  %v11441_v24 = vpop.permute.xlu1 %3236 }
 0x70b   : > { %15301 = vst [vmem:[#allocation54_spill] sm:$0xff] %v11439_v2  ;;  %15302 = vst [vmem:[#allocation56_spill] sm:$0xff] %v11441_v24 }
 0x70c   : > { %2796 = vrot.lane.b32.xlu1 %v11141_v19, %s8873_s25 }
 0x70d   : > { %2802 = vrot.lane.b32.xlu0 %v11242_v13, %s8873_s25 }
 0x70e   : > { %v11447_v40 = vpop.permute.xlu0 %3042  ;;  %v11449_v42 = vpop.permute.xlu1 %3040 }
 0x710   : > { %3386 = vrot.lane.b32.xlu1 %v11083_v36, %s15079_s24 }
 0x711   : > { %3392 = vrot.lane.b32.xlu0 %v11173_v43, %s15079_s24 }
 0x712   : > { %v11455_v14 = vpop.permute.xlu0 %3064  ;;  %v11457_v2 = vpop.permute.xlu1 %3062 }
 0x714   : > { %3408 = vrot.lane.b32.xlu1 %v11089_v48, %s15079_s24 }
 0x715   : > { %3414 = vrot.lane.b32.xlu0 %v11180_v18, %s15079_s24 }
 0x716   : > { %v11463_v24 = vpop.permute.xlu0 %3130  ;;  %v11465_v23 = vpop.permute.xlu1 %3128 }
 0x717   : > { %15303 = vst [vmem:[#allocation33_spill] sm:$0xff] %v11463_v24  ;;  %15304 = vst [vmem:[#allocation41_spill] sm:$0xff] %v11465_v23 }
 0x718   : > { %2778 = vrot.lane.b32.xlu1 %v11187_v45, %s8873_s25 }
 0x719   : > { %2784 = vrot.lane.b32.xlu0 %v11315_v59, %s8873_s25 }
 0x71a   : > { %v11471_v61 = vpop.permute.xlu0 %3152  ;;  %v11473_v41 = vpop.permute.xlu1 %3150 }
 0x71b   : > { %15305 = vst [vmem:[#allocation43_spill] sm:$0xff] %v11471_v61  ;;  %15306 = vst [vmem:[#allocation42_spill] sm:$0xff] %v11473_v41 }
 0x71c   : > { %2800 = vrot.lane.b32.xlu1 %v11193_v49, %s8873_s25 }
 0x71d   : > { %2806 = vrot.lane.b32.xlu0 %v11325_v11, %s8873_s25 }
 0x71e   : > { %v11479_v47 = vpop.permute.xlu0 %3306  ;;  %v11481_v27 = vpop.permute.xlu1 %3304 }
 0x71f   : > { %15307 = vst [vmem:[#allocation44_spill] sm:$0xff] %v11479_v47  ;;  %15308 = vst [vmem:[#allocation31_spill] sm:$0xff] %v11481_v27  ;;  %v3473_v27 = vld [vmem:[#allocation5 + $0x18] sm:$0xff] }
 0x720   : > { %3390 = vrot.lane.b32.xlu1 %v11135_v60, %s15079_s24  ;;  %3775 = vmatprep.mubr.f32.mxu1 %v3473_v27 }
 0x721   : > { %3396 = vrot.lane.b32.xlu0 %v11231_v5, %s15079_s24 }
 0x722   : > { %v11487_v12 = vpop.permute.xlu0 %3328  ;;  %v11489_v35 = vpop.permute.xlu1 %3326 }
 0x723   : > { %15309 = vst [vmem:[#allocation30_spill] sm:$0xff] %v11487_v12  ;;  %15310 = vst [vmem:[#allocation40_spill] sm:$0xff] %v11489_v35 }
 0x724   : > { %3412 = vrot.lane.b32.xlu1 %v11141_v19, %s15079_s24 }
 0x725   : > { %3418 = vrot.lane.b32.xlu0 %v11242_v13, %s15079_s24 }
 0x726   : > { %v11495_v53 = vpop.permute.xlu0 %3220  ;;  %v11497_v47 = vpop.permute.xlu1 %3218 }
 0x727   : > { %15311 = vst [vmem:[#allocation39_spill] sm:$0xff] %v11495_v53  ;;  %15312 = vst [vmem:[#allocation72_spill] sm:$0xff] %v11497_v47 }
 0x728   : > { %2782 = vrot.lane.b32.xlu1 %v11253_v3, %s8873_s25 }
 0x729   : > { %2876 = vrot.lane.b32.xlu0 %v11036_v10, %s8870_s13 }
 0x72a   : > { %v11503_v12 = vpop.permute.xlu0 %3242  ;;  %v11505_v35 = vpop.permute.xlu1 %3240 }
 0x72b   : > { %15313 = vst [vmem:[#allocation73_spill] sm:$0xff] %v11503_v12  ;;  %15314 = vst [vmem:[#allocation74_spill] sm:$0xff] %v11505_v35 }
 0x72c   : > { %2804 = vrot.lane.b32.xlu1 %v11263_v56, %s8873_s25 }
 0x72d   : > { %3138 = vrot.lane.b32.xlu0 %v11383_v50, %s8872_s18 }
 0x72e   : > { %v11511_v53 = vpop.permute.xlu0 %3046  ;;  %v11513_v47 = vpop.permute.xlu1 %3044 }
 0x730   : > { %3394 = vrot.lane.b32.xlu1 %v11187_v45, %s15079_s24 }
 0x731   : > { %3160 = vrot.lane.b32.xlu0 %v11385_v22, %s8872_s18 }
 0x732   : > { %v11519_v12 = vpop.permute.xlu0 %3068  ;;  %v11521_v35 = vpop.permute.xlu1 %3066 }
 0x734   : > { %3416 = vrot.lane.b32.xlu1 %v11193_v49, %s15079_s24 }
 0x735   : > { %2858 = vrot.lane.b32.xlu0 %v11083_v36, %s8870_s13 }
 0x736   : > { %v11527_v27 = vpop.permute.xlu1 %3132  ;;  %v11529_v41 = vpop.permute.xlu0 %3134 }
 0x737   : > { %15315 = vst [vmem:[#allocation75_spill] sm:$0xff] %v11527_v27  ;;  %15316 = vst [vmem:[#allocation76_spill] sm:$0xff] %v11529_v41 }
 0x738   : > { %2854 = vrot.lane.b32.xlu1 %v11034_v54, %s8870_s13 }
 0x739   : > { %2880 = vrot.lane.b32.xlu0 %v11089_v48, %s8870_s13 }
 0x73a   : > { %v11535_v23 = vpop.permute.xlu1 %3154  ;;  %v11537_v61 = vpop.permute.xlu0 %3156 }
 0x73b   : > { %15317 = vst [vmem:[#allocation77_spill] sm:$0xff] %v11535_v23  ;;  %15318 = vst [vmem:[#allocation78_spill] sm:$0xff] %v11537_v61 }
 0x73c   : > { %2856 = vrot.lane.b32.xlu1 %v11055_v58, %s8870_s13 }
 0x73d   : > { %2862 = vrot.lane.b32.xlu0 %v11135_v60, %s8870_s13 }
 0x73e   : > { %v11543_v24 = vpop.permute.xlu1 %3308 }
 0x73f   : > { %15319 = vst [vmem:[#allocation79_spill] sm:$0xff] %v11543_v24  ;;  %v11545_v27 = vpop.permute.xlu0 %3310 }
 0x740   : > { %15320 = vst [vmem:[#allocation80_spill] sm:$0xff] %v11545_v27  ;;  %2878 = vrot.lane.b32.xlu1 %v11062_v6, %s8870_s13 }
 0x741   : > { %2884 = vrot.lane.b32.xlu0 %v11141_v19, %s8870_s13 }
 0x742   : > { %v11551_v41 = vpop.permute.xlu1 %3330 }
 0x743   : > { %15321 = vst [vmem:[#allocation81_spill] sm:$0xff] %v11551_v41  ;;  %v11553_v23 = vpop.permute.xlu0 %3332 }
 0x744   : > { %15322 = vst [vmem:[#allocation82_spill] sm:$0xff] %v11553_v23  ;;  %2860 = vrot.lane.b32.xlu1 %v11121_v1, %s8870_s13 }
 0x745   : > { %2866 = vrot.lane.b32.xlu0 %v11187_v45, %s8870_s13 }
 0x746   : > { %v11559_v61 = vpop.permute.xlu1 %3222 }
 0x747   : > { %15323 = vst [vmem:[#allocation83_spill] sm:$0xff] %v11559_v61  ;;  %v11561_v24 = vpop.permute.xlu0 %3224 }
 0x748   : > { %15324 = vst [vmem:[#allocation84_spill] sm:$0xff] %v11561_v24  ;;  %3226 = vrot.lane.b32.xlu1 %v11383_v50, %s8875_s16 }
 0x749   : > { %3248 = vrot.lane.b32.xlu0 %v11385_v22, %s8875_s16 }
 0x74a   : > { %v11567_v27 = vpop.permute.xlu1 %3244 }
 0x74b   : > { %15325 = vst [vmem:[#allocation85_spill] sm:$0xff] %v11567_v27  ;;  %v11569_v41 = vpop.permute.xlu0 %3246 }
 0x74c   : > { %15326 = vst [vmem:[#allocation86_spill] sm:$0xff] %v11569_v41  ;;  %2882 = vrot.lane.b32.xlu1 %v11128_v34, %s8870_s13 }
 0x74d   : > { %2888 = vrot.lane.b32.xlu0 %v11193_v49, %s8870_s13 }
 0x74e   : > { %v11575_v23 = vpop.permute.xlu1 %3048 }
 0x74f   : > { %v11577_v61 = vpop.permute.xlu0 %2772 }
 0x750   : > { %2864 = vrot.lane.b32.xlu1 %v11173_v43, %s8870_s13 }
 0x751   : > { %2870 = vrot.lane.b32.xlu0 %v11253_v3, %s8870_s13 }
 0x752   : > { %v11583_v24 = vpop.permute.xlu1 %3070 }
 0x753   : > { %v11585_v27 = vpop.permute.xlu0 %2794 }
 0x754   : > { %2886 = vrot.lane.b32.xlu1 %v11180_v18, %s8870_s13 }
 0x755   : > { %2892 = vrot.lane.b32.xlu0 %v11263_v56, %s8870_s13 }
 0x756   : > { %v11591_v41 = vpop.permute.xlu1 %3136 }
 0x757   : > { %15327 = vst [vmem:[#allocation87_spill] sm:$0xff] %v11591_v41  ;;  %v11593_v28 = vpop.permute.xlu0 %3384 }
 0x758   : > { %15328 = vst [vmem:[#allocation88_spill] sm:$0xff] %v11593_v28  ;;  %2868 = vrot.lane.b32.xlu1 %v11231_v5, %s8870_s13  ;;  %v3074_v28 = vsel %vm564_vm1, %v11229_v16, %v11227_v31 }
 0x759   : > { %3314 = vrot.lane.b32.xlu0 %v11383_v50, %s8871_s28 }
 0x75a   : > { %v11599_v17 = vpop.permute.xlu1 %3158 }
 0x75b   : > { %15329 = vst [vmem:[#allocation89_spill] sm:$0xff] %v11599_v17  ;;  %v11601_v37 = vpop.permute.xlu0 %3406  ;;  %v3075_v17 = vsel %vm564_vm1, %v11304_v9, %v11313_v33  ;;  %v3078_v9 = vsel %vm564_vm1, %v11379_v7, %v11391_v21 }
 0x75c   : > { %15330 = vst [vmem:[#allocation90_spill] sm:$0xff] %v11601_v37  ;;  %2890 = vrot.lane.b32.xlu1 %v11242_v13, %s8870_s13  ;;  %v3085_v37 = vsel %vm564_vm1, %v11227_v31, %v11229_v16  ;;  %v3097_v31 = vmul.f32 %v3074_v28, %v15230_v62  ;;  %v3099_v28 = vmul.f32 %v3075_v17, %v15230_v62 }
 0x75d   : > { %3336 = vrot.lane.b32.xlu0 %v11385_v22, %s8871_s28  ;;  %v3096_v56 = vmul.f32 %v3085_v37, %v15235_v20 }
 0x75e   : > { %v11607_v57 = vpop.permute.xlu1 %3312 }
 0x75f   : > { %15331 = vst [vmem:[#allocation91_spill] sm:$0xff] %v11607_v57  ;;  %v11609_v41 = vpop.permute.xlu0 %2776  ;;  %v3076_v57 = vsel %vm564_vm1, %v11302_v38, %v11311_v25 }
 0x760   : > { %2872 = vrot.lane.b32.xlu1 %v11315_v59, %s8870_s13  ;;  %v3087_v59 = vsel %vm564_vm1, %v11311_v25, %v11302_v38  ;;  %v3101_v37 = vmul.f32 %v3076_v57, %v15230_v62 }
 0x761   : > { %2944 = vrot.lane.b32.xlu0 %v11055_v58, %s8874_s23 }
 0x762   : > { %v2963_v39 = vpop.permute.xlu1 %2962 }
 0x763   : > { %v2985_v16 = vpop.permute.xlu0 %2984 }
 0x764   : > { %v2996_v3 = vsel %vm904_vm5, %v2963_v39, %v2985_v16  ;;  %v3007_v46 = vsel %vm904_vm5, %v2985_v16, %v2963_v39  ;;  %2894 = vrot.lane.b32.xlu1 %v11325_v11, %s8870_s13  ;;  %v3077_v39 = vsel %vm564_vm1, %v11381_v55, %v11393_v0 }
 0x765   : > { %v3028_v38 = vmul.f32 %v3007_v46, %v9928_v51  ;;  %v3029_v25 = vmul.f32 %v2996_v3, %v9919_v32  ;;  %2966 = vrot.lane.b32.xlu0 %v11062_v6, %s8874_s23  ;;  %v3089_v3 = vsel %vm564_vm1, %v11391_v21, %v11379_v7  ;;  %v3088_v46 = vsel %vm564_vm1, %v11393_v0, %v11381_v55 }
 0x766   : > { %v11661_v33 = vpop.permute.xlu1 %3334  ;;  %v3100_v51 = vmul.f32 %v3087_v59, %v15235_v20  ;;  %v3098_v32 = vmul.f32 %v3086_v26, %v15235_v20  ;;  %v3079_v21 = vsel %vm564_vm1, %v11449_v42, %v11457_v2  ;;  %v3103_v0 = vmul.f32 %v3077_v39, %v15230_v62 }
 0x767   : > { %15332 = vst [vmem:[#allocation92_spill] sm:$0xff] %v11661_v33  ;;  %v7930_v57 = vpack.c.bf16 %v3096_v56, %v3028_v38  ;;  %v11671_v17 = vpop.permute.xlu0 %2798  ;;  %v7928_v16 = vpack.c.bf16 %v3097_v31, %v3029_v25  ;;  %v3080_v33 = vsel %vm564_vm1, %v11447_v40, %v11455_v14  ;;  %v3105_v56 = vmul.f32 %v3078_v9, %v15230_v62 }
 0x768   : > { %2942 = vrot.lane.b32.xlu1 %v11034_v54, %s8874_s23  ;;  %v7932_v26 = vpack.c.bf16 %v3101_v37, %v3099_v28  ;;  %v3104_v59 = vmul.f32 %v3089_v3, %v15235_v20  ;;  %v3102_v7 = vmul.f32 %v3088_v46, %v15235_v20  ;;  %v3091_v31 = vsel %vm564_vm1, %v11455_v14, %v11447_v40 }
 0x769   : > { %2948 = vrot.lane.b32.xlu0 %v11121_v1, %s8874_s23  ;;  %7929 = vmatprep.subr.bf16.mxu1 %v7928_v16  ;;  %v3109_v38 = vmul.f32 %v3080_v33, %v15230_v62  ;;  %v3107_v25 = vmul.f32 %v3079_v21, %v15230_v62  ;;  %v7934_v39 = vpack.c.bf16 %v3100_v51, %v3098_v32 }
 0x76a   : > { %7931 = vmatpush1.bf16.msra.mxu1 %v7930_v57  ;;  %v2771_v55 = vpop.permute.xlu1 %2770  ;;  %v3090_v37 = vsel %vm564_vm1, %v11457_v2, %v11449_v42  ;;  %v2813_v40 = vsel %vm724_vm4, %v11577_v61, %v11585_v27  ;;  %v2824_v14 = vsel %vm724_vm4, %v11585_v27, %v11577_v61  ;;  %v7936_v32 = vpack.c.bf16 %v3105_v56, %v3103_v0 }
 0x76b   : > { %v11697_v9 = vpop.permute.xlu0 %3388  ;;  %7933 = vmatprep.subr.bf16.mxu1 %v7932_v26  ;;  %v7938_v51 = vpack.c.bf16 %v3104_v59, %v3102_v7  ;;  %v3108_v2 = vmul.f32 %v3091_v31, %v15235_v20  ;;  %v3082_v42 = vsel %vm564_vm1, %v11511_v53, %v11519_v12  ;;  %v3081_v28 = vsel %vm564_vm1, %v11513_v47, %v11521_v35 }
 0x76c   : > { %2964 = vrot.lane.b32.xlu1 %v11036_v10, %s8874_s23  ;;  %v3106_v61 = vmul.f32 %v3090_v37, %v15235_v20  ;;  %v7940_v57 = vpack.c.bf16 %v3109_v38, %v3107_v25  ;;  %v2838_v16 = vmul.f32 %v2824_v14, %v15279_v52  ;;  %v2839_v21 = vmul.f32 %v2813_v40, %v15280_v15 }
 0x76d   : > { %2970 = vrot.lane.b32.xlu0 %v11128_v34, %s8874_s23  ;;  %v3093_v26 = vsel %vm564_vm1, %v11519_v12, %v11511_v53  ;;  %v3113_v59 = vmul.f32 %v3082_v42, %v15230_v62  ;;  %v3092_v7 = vsel %vm564_vm1, %v11521_v35, %v11513_v47  ;;  %v3083_v35 = vsel %vm564_vm1, %v11575_v23, %v11583_v24 }
 0x76e   : > { %7935 = vmatpush1.bf16.msra.mxu1 %v7934_v39  ;;  %v2793_v33 = vpop.permute.xlu1 %2792  ;;  %v7942_v12 = vpack.c.bf16 %v3108_v2, %v3106_v61  ;;  %v3112_v53 = vmul.f32 %v3093_v26, %v15235_v20  ;;  %v3110_v37 = vmul.f32 %v3092_v7, %v15235_v20  ;;  %v3094_v40 = vsel %vm564_vm1, %v11583_v24, %v11575_v23 }
 0x76f   : > { %v11725_v27 = vpop.permute.xlu0 %3410  ;;  %7937 = vmatprep.subr.bf16.mxu1 %v7936_v32  ;;  %v2812_v3 = vsel %vm724_vm4, %v2771_v55, %v2793_v33  ;;  %v2823_v46 = vsel %vm724_vm4, %v2793_v33, %v2771_v55  ;;  %v3111_v55 = vmul.f32 %v3081_v28, %v15230_v62  ;;  %v3114_v28 = vmul.f32 %v3094_v40, %v15235_v20 }
 0x770   : > { %v2836_v56 = vmul.f32 %v2823_v46, %v15279_v52  ;;  %v2837_v0 = vmul.f32 %v2812_v3, %v15280_v15  ;;  %2786 = vrot.lane.b32.xlu1 %v11383_v50, %s8873_s25  ;;  %v3115_v33 = vmul.f32 %v3083_v35, %v15230_v62  ;;  %v7966_v35 = vpack.c.bf16 %v11231_v5, %v11187_v45 }
 0x771   : > { %2808 = vrot.lane.b32.xlu0 %v11385_v22, %s8873_s25  ;;  %v7944_v47 = vpack.c.bf16 %v3113_v59, %v3111_v55 }
 0x772   : > { %v7870_v31 = vpack.c.bf16 %v2838_v16, %v2836_v56  ;;  %7939 = vmatpush1.bf16.msra.mxu1 %v7938_v51  ;;  %v11749_v38 = vpop.permute.xlu1 %3382  ;;  %v7868_v25 = vpack.c.bf16 %v2839_v21, %v2837_v0  ;;  %v7946_v51 = vpack.c.bf16 %v3112_v53, %v3110_v37  ;;  %v2815_v16 = vsel %vm724_vm4, %v11609_v41, %v11671_v17 }
 0x773   : > { %v3051_v39 = vpop.permute.xlu0 %3050  ;;  %7941 = vmatprep.subr.bf16.mxu1 %v7940_v57  ;;  %v2826_v21 = vsel %vm724_vm4, %v11671_v17, %v11609_v41  ;;  %v7952_v56 = vpack.c.bf16 %v11062_v6, %v11036_v10  ;;  %v7954_v41 = vpack.c.bf16 %v11055_v58, %v11034_v54  ;;  %v2843_v55 = vmul.f32 %v2815_v16, %v15280_v15 }
 0x774   : > { %2946 = vrot.lane.b32.xlu1 %v11083_v36, %s8874_s23  ;;  %7869 = vmatprep.subr.bf16.mxu0 %v7868_v25  ;;  %v2842_v17 = vmul.f32 %v2826_v21, %v15279_v52  ;;  %v7956_v6 = vpack.c.bf16 %v11128_v34, %v11089_v48  ;;  %v7962_v37 = vpack.c.bf16 %v11173_v43, %v11135_v60 }
 0x775   : > { %2952 = vrot.lane.b32.xlu0 %v11173_v43, %s8874_s23  ;;  %7871 = vmatpush1.bf16.msra.mxu0 %v7870_v31  ;;  %v15333_v43 = vld [vmem:[#allocation59_spill] sm:$0xff] }
 0x776   : > { %7943 = vmatpush1.bf16.msra.mxu1 %v7942_v12  ;;  %v11765_v14 = vpop.permute.xlu1 %3404  ;;  %v7958_v12 = vpack.c.bf16 %v11121_v1, %v11083_v36  ;;  %v7964_v36 = vpack.c.bf16 %v11242_v13, %v11193_v49  ;;  %v3173_v1 = vsel %vm586_vm3, %v11238_v44, %v11240_v30 }
 0x777   : > { %v3073_v32 = vpop.permute.xlu0 %3072  ;;  %7945 = vmatprep.subr.bf16.mxu1 %v7944_v47 }
 0x778   : > { %v3084_v2 = vsel %vm564_vm1, %v3051_v39, %v3073_v32  ;;  %v3095_v42 = vsel %vm564_vm1, %v3073_v32, %v3051_v39  ;;  %2968 = vrot.lane.b32.xlu1 %v11089_v48, %s8874_s23  ;;  %v7960_v48 = vpack.c.bf16 %v11180_v18, %v11141_v19 }
 0x779   : > { %v3116_v23 = vmul.f32 %v3095_v42, %v15235_v20  ;;  %v3117_v24 = vmul.f32 %v3084_v2, %v15230_v62  ;;  %2974 = vrot.lane.b32.xlu0 %v11180_v18, %s8874_s23  ;;  %v3162_v18 = vsel %vm586_vm3, %v11240_v30, %v11238_v44  ;;  %v15335_v44 = vld [vmem:[#allocation26_spill] sm:$0xff]  ;;  %v15337_v2 = vld [vmem:[#allocation36_spill] sm:$0xff] }
 0x77a   : > { %7947 = vmatpush1.bf16.msra.mxu1 %v7946_v51  ;;  %v2775_v61 = vpop.permute.xlu1 %2774  ;;  %v3185_v30 = vmul.f32 %v3173_v1, %v15335_v44  ;;  %v15336_v51 = vld [vmem:[#allocation60_spill] sm:$0xff]  ;;  %v7968_v42 = vpack.c.bf16 %v11325_v11, %v15337_v2 }
 0x77b   : > { %v7950_v3 = vpack.c.bf16 %v3116_v23, %v3114_v28  ;;  %v2781_v46 = vpop.permute.xlu0 %2780  ;;  %v7948_v57 = vpack.c.bf16 %v3117_v24, %v3115_v33  ;;  %v15338_v28 = vld [vmem:[#allocation25_spill] sm:$0xff] }
 0x77c   : > { %2950 = vrot.lane.b32.xlu1 %v11135_v60, %s8874_s23  ;;  %v3175_v60 = vsel %vm586_vm3, %v11331_v63, %v11321_v29  ;;  %v3184_v33 = vmul.f32 %v3162_v18, %v15338_v28 }
 0x77d   : > { %2956 = vrot.lane.b32.xlu0 %v11231_v5, %s8874_s23  ;;  %7949 = vmatprep.subr.bf16.mxu1 %v7948_v57  ;;  %v3163_v5 = vsel %vm586_vm3, %v11323_v8, %v15333_v43 }
 0x77e   : > { %7951 = vmatpush1.bf16.msra.mxu1 %v7950_v3  ;;  %v2797_v0 = vpop.permute.xlu1 %2796 }
 0x77f   : > { %v2803_v26 = vpop.permute.xlu0 %2802  ;;  %7953 = vmatprep.subr.bf16.mxu1 %v7952_v56  ;;  %v2814_v59 = vsel %vm724_vm4, %v2775_v61, %v2797_v0  ;;  %v2825_v7 = vsel %vm724_vm4, %v2797_v0, %v2775_v61  ;;  %v3189_v61 = vmul.f32 %v3175_v60, %v15335_v44  ;;  %v15339_v56 = vld [vmem:[#allocation62_spill] sm:$0xff]  ;;  %v15340_v0 = vld [vmem:[#allocation68_spill] sm:$0xff]  ;;  %v15343_v60 = vld [vmem:[#allocation33_spill] sm:$0xff] }
 0x780   : > { %v2840_v31 = vmul.f32 %v2825_v7, %v15279_v52  ;;  %v2841_v10 = vmul.f32 %v2814_v59, %v15280_v15  ;;  %2972 = vrot.lane.b32.xlu1 %v11141_v19, %s8874_s23  ;;  %v2817_v40 = vsel %vm724_vm4, %v2781_v46, %v2803_v26  ;;  %v2828_v32 = vsel %vm724_vm4, %v2803_v26, %v2781_v46  ;;  %v15341_v7 = vld [vmem:[#allocation38_spill] sm:$0xff] }
 0x781   : > { %2874 = vrot.lane.b32.xlu0 %v11383_v50, %s8870_s13  ;;  %v2847_v57 = vmul.f32 %v2817_v40, %v15280_v15  ;;  %v3177_v26 = vsel %vm586_vm3, %v15340_v0, %v15339_v56  ;;  %v7972_v59 = vpack.c.bf16 %v3185_v30, %v11385_v22  ;;  %v15346_v30 = vld [vmem:[#allocation42_spill] sm:$0xff] }
 0x782   : > { %v7874_v25 = vpack.c.bf16 %v2842_v17, %v2840_v31  ;;  %7955 = vmatpush1.bf16.msra.mxu1 %v7954_v41  ;;  %v11809_v54 = vpop.permute.xlu1 %3386  ;;  %v7872_v58 = vpack.c.bf16 %v2843_v55, %v2841_v10  ;;  %v15342_v41 = vld [vmem:[#allocation69_spill] sm:$0xff]  ;;  %v3193_v1 = vmul.f32 %v3177_v26, %v15335_v44 }
 0x783   : > { %v11811_v39 = vpop.permute.xlu0 %3392  ;;  %7957 = vmatprep.subr.bf16.mxu1 %v7956_v6  ;;  %v3176_v17 = vsel %vm586_vm3, %v15342_v41, %v15341_v7  ;;  %v7974_v6 = vpack.c.bf16 %v3184_v33, %v11383_v50 }
 0x784   : > { %2954 = vrot.lane.b32.xlu1 %v11187_v45, %s8874_s23  ;;  %7873 = vmatprep.subr.bf16.mxu0 %v7872_v58  ;;  %v3164_v45 = vsel %vm586_vm3, %v11321_v29, %v11331_v63  ;;  %v3186_v58 = vmul.f32 %v3163_v5, %v15338_v28  ;;  %v3191_v18 = vmul.f32 %v3176_v17, %v15335_v44 }
 0x785   : > { %2896 = vrot.lane.b32.xlu0 %v11385_v22, %s8870_s13  ;;  %7875 = vmatpush1.bf16.msra.mxu0 %v7874_v25  ;;  %v3188_v25 = vmul.f32 %v3164_v45, %v15338_v28 }
 0x786   : > { %7959 = vmatpush1.bf16.msra.mxu1 %v7958_v12  ;;  %v11821_v34 = vpop.permute.xlu1 %3408 }
 0x787   : > { %v11823_v53 = vpop.permute.xlu0 %3414  ;;  %7961 = vmatprep.subr.bf16.mxu1 %v7960_v48 }
 0x788   : > { %2976 = vrot.lane.b32.xlu1 %v11193_v49, %s8874_s23  ;;  %v3174_v49 = vsel %vm586_vm3, %v15333_v43, %v11323_v8  ;;  %v2846_v8 = vmul.f32 %v2828_v32, %v15279_v52  ;;  %v15344_v43 = vld [vmem:[#allocation43_spill] sm:$0xff] }
 0x789   : > { %2978 = vrot.lane.b32.xlu0 %v11242_v13, %s8874_s23  ;;  %v15334_v13 = vld [vmem:[#allocation45_spill] sm:$0xff]  ;;  %v3187_v3 = vmul.f32 %v3174_v49, %v15335_v44  ;;  %v3179_v49 = vsel %vm586_vm3, %v15344_v43, %v15343_v60 }
 0x78a   : > { %7963 = vmatpush1.bf16.msra.mxu1 %v7962_v37  ;;  %v2779_v19 = vpop.permute.xlu1 %2778  ;;  %v7970_v24 = vpack.c.bf16 %v15336_v51, %v15334_v13  ;;  %v3471_v37 = vld [vmem:[#allocation5 + $0x8] sm:$0xff] }
 0x78b   : > { %v11841_v47 = vpop.permute.xlu0 %2784  ;;  %7965 = vmatprep.subr.bf16.mxu1 %v7964_v36  ;;  %v7976_v48 = vpack.c.bf16 %v3189_v61, %v3187_v3  ;;  %v3166_v36 = vsel %vm586_vm3, %v15339_v56, %v15340_v0  ;;  %3644 = vmatprep.mubr.f32.mxu0 %v3471_v37  ;;  %v7980_v61 = vpack.c.bf16 %v3193_v1, %v3191_v18 }
 0x78c   : > { %3398 = vrot.lane.b32.xlu1 %v15334_v13, %s15079_s24 }
 0x78d   : > { %3400 = vrot.lane.b32.xlu0 %v15336_v51, %s15079_s24 }
 0x78e   : > { %7967 = vmatpush1.bf16.msra.mxu1 %v7966_v35  ;;  %v2801_v23 = vpop.permute.xlu1 %2800  ;;  %v15345_v35 = vld [vmem:[#allocation41_spill] sm:$0xff] }
 0x78f   : > { %v11877_v46 = vpop.permute.xlu0 %2806  ;;  %7969 = vmatprep.subr.bf16.mxu1 %v7968_v42  ;;  %v2816_v29 = vsel %vm724_vm4, %v2779_v19, %v2801_v23  ;;  %v2827_v63 = vsel %vm724_vm4, %v2801_v23, %v2779_v19  ;;  %v3165_v19 = vsel %vm586_vm3, %v15341_v7, %v15342_v41  ;;  %v3178_v40 = vsel %vm586_vm3, %v15346_v30, %v15345_v35 }
 0x790   : > { %v2844_v16 = vmul.f32 %v2827_v63, %v15279_v52  ;;  %v2845_v21 = vmul.f32 %v2816_v29, %v15280_v15  ;;  %3420 = vrot.lane.b32.xlu1 %v15337_v2, %s15079_s24  ;;  %v3168_v42 = vsel %vm586_vm3, %v15343_v60, %v15344_v43  ;;  %v3167_v33 = vsel %vm586_vm3, %v15345_v35, %v15346_v30  ;;  %v15347_v63 = vld [vmem:[#allocation76_spill] sm:$0xff]  ;;  %v15354_v35 = vld [vmem:[#allocation87_spill] sm:$0xff] }
 0x791   : > { %3422 = vrot.lane.b32.xlu0 %v11325_v11, %s15079_s24  ;;  %v3190_v5 = vmul.f32 %v3165_v19, %v15338_v28  ;;  %v3197_v23 = vmul.f32 %v3179_v49, %v15335_v44  ;;  %v3196_v3 = vmul.f32 %v3168_v42, %v15338_v28  ;;  %v3194_v29 = vmul.f32 %v3167_v33, %v15338_v28  ;;  %v15353_v49 = vld [vmem:[#allocation89_spill] sm:$0xff] }
 0x792   : > { %v7878_v55 = vpack.c.bf16 %v2846_v8, %v2844_v16  ;;  %7971 = vmatpush1.bf16.msra.mxu1 %v7970_v24  ;;  %v11900_v31 = vpop.permute.xlu1 %3390  ;;  %v7876_v10 = vpack.c.bf16 %v2847_v57, %v2845_v21  ;;  %v3195_v24 = vmul.f32 %v3178_v40, %v15335_v44  ;;  %v15348_v8 = vld [vmem:[#allocation78_spill] sm:$0xff]  ;;  %v15349_v16 = vld [vmem:[#allocation75_spill] sm:$0xff]  ;;  %v15350_v21 = vld [vmem:[#allocation77_spill] sm:$0xff]  ;;  %v3171_v30 = vsel %vm586_vm3, %v15354_v35, %v15353_v49 }
 0x793   : > { %v11905_v12 = vpop.permute.xlu0 %3396  ;;  %7973 = vmatprep.subr.bf16.mxu1 %v7972_v59  ;;  %v3181_v57 = vsel %vm586_vm3, %v15348_v8, %v15347_v63  ;;  %v3180_v56 = vsel %vm586_vm3, %v15350_v21, %v15349_v16  ;;  %v3170_v26 = vsel %vm586_vm3, %v15347_v63, %v15348_v8  ;;  %v3169_v59 = vsel %vm586_vm3, %v15349_v16, %v15350_v21  ;;  %v15359_v63 = vld [vmem:[#allocation29_spill] sm:$0xff]  ;;  %v15360_v16 = vld [vmem:[#allocation50_spill] sm:$0xff]  ;;  %v15361_v21 = vld [vmem:[#allocation67_spill] sm:$0xff] }
 0x794   : > { %2958 = vrot.lane.b32.xlu1 %v15334_v13, %s8874_s23  ;;  %7877 = vmatprep.subr.bf16.mxu0 %v7876_v10  ;;  %v7978_v13 = vpack.c.bf16 %v3188_v25, %v3186_v58  ;;  %v7984_v7 = vpack.c.bf16 %v3197_v23, %v3195_v24  ;;  %v3201_v41 = vmul.f32 %v3181_v57, %v15335_v44 }
 0x795   : > { %2960 = vrot.lane.b32.xlu0 %v15336_v51, %s8874_s23  ;;  %7879 = vmatpush1.bf16.msra.mxu0 %v7878_v55  ;;  %v3192_v51 = vmul.f32 %v3166_v36, %v15338_v28  ;;  %v3199_v17 = vmul.f32 %v3180_v56, %v15335_v44  ;;  %v2819_v55 = vsel %vm724_vm4, %v11841_v47, %v11877_v46 }
 0x796   : > { %7975 = vmatpush1.bf16.msra.mxu1 %v7974_v6  ;;  %v11929_v32 = vpop.permute.xlu1 %3412  ;;  %v2830_v10 = vsel %vm724_vm4, %v11877_v46, %v11841_v47  ;;  %v15351_v6 = vld [vmem:[#allocation57_spill] sm:$0xff]  ;;  %v7986_v58 = vpack.c.bf16 %v3196_v3, %v3194_v29  ;;  %v3200_v37 = vmul.f32 %v3170_v26, %v15338_v28  ;;  %v3198_v36 = vmul.f32 %v3169_v59, %v15338_v28  ;;  %v15358_v29 = vld [vmem:[#allocation52_spill] sm:$0xff] }
 0x797   : > { %v11939_v45 = vpop.permute.xlu0 %3418  ;;  %7977 = vmatprep.subr.bf16.mxu1 %v7976_v48  ;;  %v2850_v46 = vmul.f32 %v2830_v10, %v15279_v52  ;;  %v2851_v19 = vmul.f32 %v2819_v55, %v15280_v15  ;;  %v7988_v43 = vpack.c.bf16 %v3201_v41, %v3199_v17  ;;  %v3182_v40 = vsel %vm586_vm3, %v15353_v49, %v15354_v35  ;;  %v15364_v49 = vld [vmem:[#allocation54_spill] sm:$0xff] }
 0x798   : > { %2980 = vrot.lane.b32.xlu1 %v15337_v2, %s8874_s23  ;;  %v3264_v8 = vsel %vm1148_vm6, %v15359_v63, %v15358_v29  ;;  %v3263_v56 = vsel %vm1148_vm6, %v15361_v21, %v15360_v16  ;;  %v3202_v59 = vmul.f32 %v3171_v30, %v15338_v28  ;;  %v15365_v30 = vld [vmem:[#allocation55_spill] sm:$0xff] }
 0x799   : > { %2982 = vrot.lane.b32.xlu0 %v11325_v11, %s8874_s23  ;;  %v7982_v11 = vpack.c.bf16 %v3192_v51, %v3190_v5  ;;  %v15355_v51 = vld [vmem:[#allocation47_spill] sm:$0xff]  ;;  %v15356_v5 = vld [vmem:[#allocation61_spill] sm:$0xff] }
 0x79a   : > { %7979 = vmatpush1.bf16.msra.mxu1 %v7978_v13  ;;  %v2783_v2 = vpop.permute.xlu1 %2782  ;;  %v3261_v23 = vsel %vm1148_vm6, %v15356_v5, %v15355_v51  ;;  %v3250_v55 = vsel %vm1148_vm6, %v15355_v51, %v15356_v5  ;;  %v3479_v51 = vld [vmem:[#allocation5 + $0x48] sm:$0xff] }
 0x79b   : > { %v11959_v0 = vpop.permute.xlu0 %2876  ;;  %7981 = vmatprep.subr.bf16.mxu1 %v7980_v61  ;;  %v15357_v61 = vld [vmem:[#allocation58_spill] sm:$0xff] }
 0x79c   : > { %3402 = vrot.lane.b32.xlu1 %v11383_v50, %s15079_s24  ;;  %v15352_v50 = vld [vmem:[#allocation65_spill] sm:$0xff] }
 0x79d   : > { %3424 = vrot.lane.b32.xlu0 %v11385_v22, %s15079_s24  ;;  %v3262_v25 = vsel %vm1148_vm6, %v15352_v50, %v15351_v6  ;;  %v3251_v24 = vsel %vm1148_vm6, %v15351_v6, %v15352_v50  ;;  %v3472_v6 = vld [vmem:[#allocation5 + $0x10] sm:$0xff]  ;;  %v3273_v50 = vmul.f32 %v3261_v23, %v15357_v61 }
 0x79e   : > { %7983 = vmatpush1.bf16.msra.mxu1 %v7982_v11  ;;  %v2805_v48 = vpop.permute.xlu1 %2804  ;;  %v3275_v3 = vmul.f32 %v3262_v25, %v15357_v61  ;;  %v15362_v25 = vld [vmem:[#allocation27_spill] sm:$0xff] }
 0x79f   : > { %v3139_v1 = vpop.permute.xlu0 %3138  ;;  %7985 = vmatprep.subr.bf16.mxu1 %v7984_v7  ;;  %v2818_v47 = vsel %vm724_vm4, %v2783_v2, %v2805_v48  ;;  %v2829_v22 = vsel %vm724_vm4, %v2805_v48, %v2783_v2  ;;  %v7990_v2 = vpack.c.bf16 %v3200_v37, %v3198_v36  ;;  %v3203_v7 = vmul.f32 %v3182_v40, %v15335_v44  ;;  %v15366_v40 = vld [vmem:[#allocation56_spill] sm:$0xff] }
 0x7a0   : > { %v2848_v18 = vmul.f32 %v2829_v22, %v15279_v52  ;;  %v2849_v60 = vmul.f32 %v2818_v47, %v15280_v15  ;;  %v3253_v47 = vsel %vm1148_vm6, %v15358_v29, %v15359_v63  ;;  %v3279_v22 = vmul.f32 %v3264_v8, %v15357_v61 }
 0x7a1   : > { %v3278_v5 = vmul.f32 %v3253_v47, %v15362_v25  ;;  %v3254_v8 = vsel %vm1148_vm6, %v15365_v30, %v15366_v40 }
 0x7a2   : > { %v7882_v13 = vpack.c.bf16 %v2850_v46, %v2848_v18  ;;  %7987 = vmatpush1.bf16.msra.mxu1 %v7986_v58  ;;  %v12005_v42 = vpop.permute.xlu1 %3394  ;;  %v7880_v33 = vpack.c.bf16 %v2851_v19, %v2849_v60  ;;  %v3274_v58 = vmul.f32 %v3251_v24, %v15362_v25  ;;  %v3252_v46 = vsel %vm1148_vm6, %v15360_v16, %v15361_v21 }
 0x7a3   : > { %v3161_v57 = vpop.permute.xlu0 %3160  ;;  %7989 = vmatprep.subr.bf16.mxu1 %v7988_v43  ;;  %v3277_v19 = vmul.f32 %v3263_v56, %v15357_v61  ;;  %v7996_v18 = vpack.c.bf16 %v3275_v3, %v3273_v50  ;;  %v3272_v60 = vmul.f32 %v3250_v55, %v15362_v25  ;;  %v15363_v43 = vld [vmem:[#allocation53_spill] sm:$0xff]  ;;  %v3276_v23 = vmul.f32 %v3252_v46, %v15362_v25  ;;  %v3487_v3 = vld [vmem:[#allocation5 + $0x88] sm:$0xff]  ;;  %v15367_v56 = vld [vmem:[#allocation39_spill] sm:$0xff] }
 0x7a4   : > { %v3172_v11 = vsel %vm586_vm3, %v3139_v1, %v3161_v57  ;;  %v3183_v26 = vsel %vm586_vm3, %v3161_v57, %v3139_v1  ;;  %7881 = vmatprep.subr.bf16.mxu0 %v7880_v33  ;;  %v3480_v1 = vld [vmem:[#allocation5 + $0x50] sm:$0xff]  ;;  %v3266_v35 = vsel %vm1148_vm6, %v15364_v49, %v15363_v43  ;;  %v3255_v63 = vsel %vm1148_vm6, %v15363_v43, %v15364_v49  ;;  %v3494_v50 = vld [vmem:[#allocation5 + $0xc0] sm:$0xff] }
 0x7a5   : > { %v3204_v41 = vmul.f32 %v3172_v11, %v15338_v28  ;;  %v3205_v17 = vmul.f32 %v3183_v26, %v15335_v44  ;;  %7883 = vmatpush1.bf16.msra.mxu0 %v7882_v13  ;;  %v3265_v13 = vsel %vm1148_vm6, %v15366_v40, %v15365_v30  ;;  %v7998_v29 = vpack.c.bf16 %v3274_v58, %v3272_v60  ;;  %v15369_v26 = vld [vmem:[#allocation72_spill] sm:$0xff]  ;;  %v15373_v43 = vld [vmem:[#allocation83_spill] sm:$0xff]  ;;  %v15374_v49 = vld [vmem:[#allocation85_spill] sm:$0xff] }
 0x7a6   : > { %7991 = vmatpush1.bf16.msra.mxu1 %v7990_v2  ;;  %v12036_v10 = vpop.permute.xlu1 %3416  ;;  %v8000_v57 = vpack.c.bf16 %v3279_v22, %v3277_v19  ;;  %v3283_v16 = vmul.f32 %v3266_v35, %v15357_v61  ;;  %v3281_v21 = vmul.f32 %v3265_v13, %v15357_v61  ;;  %v15368_v2 = vld [vmem:[#allocation73_spill] sm:$0xff]  ;;  %v8002_v55 = vpack.c.bf16 %v3278_v5, %v3276_v23  ;;  %v15371_v19 = vld [vmem:[#allocation84_spill] sm:$0xff] }
 0x7a7   : > { %v7994_v48 = vpack.c.bf16 %v3204_v41, %v3202_v59  ;;  %v12040_v37 = vpop.permute.xlu0 %2858  ;;  %v7992_v36 = vpack.c.bf16 %v3205_v17, %v3203_v7  ;;  %v3268_v11 = vsel %vm1148_vm6, %v15368_v2, %v15367_v56  ;;  %v15370_v59 = vld [vmem:[#allocation74_spill] sm:$0xff]  ;;  %v3486_v17 = vld [vmem:[#allocation5 + $0x80] sm:$0xff]  ;;  %v3282_v58 = vmul.f32 %v3255_v63, %v15362_v25  ;;  %v3493_v40 = vld [vmem:[#allocation5 + $0xb8] sm:$0xff] }
 0x7a8   : > { %v3267_v7 = vsel %vm1148_vm6, %v15370_v59, %v15369_v26  ;;  %v3257_v47 = vsel %vm1148_vm6, %v15367_v56, %v15368_v2  ;;  %v3256_v22 = vsel %vm1148_vm6, %v15369_v26, %v15370_v59  ;;  %v8004_v46 = vpack.c.bf16 %v3283_v16, %v3281_v21  ;;  %v3500_v56 = vld [vmem:[#allocation5 + $0xf0] sm:$0xff]  ;;  %v15375_v2 = vld [vmem:[#allocation28_spill] sm:$0xff] }
 0x7a9   : > { %7993 = vmatprep.subr.bf16.mxu1 %v7992_v36  ;;  %3776 = vmatmul.mubr.f32.vlgmr.msra.gmra.mrb[44].mxu1 %v3472_v6  ;;  %v3287_v36 = vmul.f32 %v3268_v11, %v15357_v61  ;;  %v3269_v35 = vsel %vm1148_vm6, %v15374_v49, %v15373_v43  ;;  %v3286_v23 = vmul.f32 %v3257_v47, %v15362_v25  ;;  %v15376_v11 = vld [vmem:[#allocation63_spill] sm:$0xff]  ;;  %v15379_v47 = vld [vmem:[#allocation32_spill] sm:$0xff] }
 0x7aa   : > { %7995 = vmatpush1.bf16.msra.mxu1 %v7994_v48  ;;  %v12061_v33 = vpop.permute.xlu1 %2854  ;;  %3781 = vmatprep.mubr.f32.mxu1 %v3480_v1  ;;  %v3280_v48 = vmul.f32 %v3254_v8, %v15362_v25  ;;  %v3285_v1 = vmul.f32 %v3267_v7, %v15357_v61  ;;  %v3289_v16 = vmul.f32 %v3269_v35, %v15357_v61  ;;  %v15382_v35 = vld [vmem:[#allocation24_spill] sm:$0xff] }
 0x7ab   : > { %v12065_v24 = vpop.permute.xlu0 %2880  ;;  %7997 = vmatprep.subr.bf16.mxu1 %v7996_v18  ;;  %v15372_v18 = vld [vmem:[#allocation86_spill] sm:$0xff]  ;;  %v3338_v26 = vsel %vm542_vm2, %v15376_v11, %v15375_v2  ;;  %v3349_v59 = vsel %vm542_vm2, %v15375_v2, %v15376_v11 }
 0x7ac   : > { %v3270_v60 = vsel %vm1148_vm6, %v15372_v18, %v15371_v19  ;;  %v8006_v5 = vpack.c.bf16 %v3282_v58, %v3280_v48  ;;  %v3259_v63 = vsel %vm1148_vm6, %v15371_v19, %v15372_v18  ;;  %v15381_v18 = vld [vmem:[#allocation23_spill] sm:$0xff]  ;;  %v15384_v2 = vld [vmem:[#allocation66_spill] sm:$0xff] }
 0x7ad   : > { %3782 = vmatmul.mubr.f32.gmra.mrb[46].mxu1 %v3479_v51  ;;  %v3501_v51 = vld [vmem:[#allocation5 + $0xf8] sm:$0xff]  ;;  %v3291_v8 = vmul.f32 %v3270_v60, %v15357_v61  ;;  %v3360_v60 = vmul.f32 %v3338_v26, %v15381_v18 }
 0x7ae   : > { %7999 = vmatpush1.bf16.msra.mxu1 %v7998_v29  ;;  %v12085_v41 = vpop.permute.xlu1 %2856  ;;  %3787 = vmatprep.mubr.f32.mxu1 %v3487_v3  ;;  %v3284_v3 = vmul.f32 %v3256_v22, %v15362_v25  ;;  %v8008_v29 = vpack.c.bf16 %v3287_v36, %v3285_v1  ;;  %v3290_v36 = vmul.f32 %v3259_v63, %v15362_v25  ;;  %v15380_v22 = vld [vmem:[#allocation49_spill] sm:$0xff]  ;;  %v15385_v26 = vld [vmem:[#allocation64_spill] sm:$0xff] }
 0x7af   : > { %v12087_v6 = vpop.permute.xlu0 %2862  ;;  %8001 = vmatprep.subr.bf16.mxu1 %v8000_v57  ;;  %v3258_v57 = vsel %vm1148_vm6, %v15373_v43, %v15374_v49  ;;  %v8012_v19 = vpack.c.bf16 %v3291_v8, %v3289_v16  ;;  %v3507_v49 = vld [vmem:[#allocation5 + $0x128] sm:$0xff] }
 0x7b0   : > { %v8010_v48 = vpack.c.bf16 %v3286_v23, %v3284_v3  ;;  %v3288_v1 = vmul.f32 %v3258_v57, %v15362_v25  ;;  %v3339_v23 = vsel %vm542_vm2, %v15379_v47, %v15380_v22 }
 0x7b1   : > { %3788 = vmatmul.mubr.f32.gmra.mrb[48].mxu1 %v3486_v17  ;;  %v3508_v17 = vld [vmem:[#allocation5 + $0x130] sm:$0xff] }
 0x7b2   : > { %8003 = vmatpush1.bf16.msra.mxu1 %v8002_v55  ;;  %v12109_v30 = vpop.permute.xlu1 %2878  ;;  %3793 = vmatprep.mubr.f32.mxu1 %v3494_v50  ;;  %v15377_v55 = vld [vmem:[#allocation35_spill] sm:$0xff]  ;;  %v8014_v8 = vpack.c.bf16 %v3290_v36, %v3288_v1  ;;  %v3362_v1 = vmul.f32 %v3339_v23, %v15381_v18  ;;  %v15387_v23 = vld [vmem:[#allocation44_spill] sm:$0xff] }
 0x7b3   : > { %v12111_v13 = vpop.permute.xlu0 %2884  ;;  %8005 = vmatprep.subr.bf16.mxu1 %v8004_v46  ;;  %v15378_v50 = vld [vmem:[#allocation51_spill] sm:$0xff]  ;;  %v3350_v46 = vsel %vm542_vm2, %v15380_v22, %v15379_v47 }
 0x7b4   : > { %v3351_v58 = vsel %vm542_vm2, %v15378_v50, %v15377_v55  ;;  %v3363_v63 = vmul.f32 %v3350_v46, %v15382_v35 }
 0x7b5   : > { %3794 = vmatmul.mubr.f32.gmra.mrb[50].mxu1 %v3493_v40  ;;  %v3361_v40 = vmul.f32 %v3349_v59, %v15382_v35  ;;  %v15386_v59 = vld [vmem:[#allocation34_spill] sm:$0xff] }
 0x7b6   : > { %8007 = vmatpush1.bf16.msra.mxu1 %v8006_v5  ;;  %v12125_v21 = vpop.permute.xlu1 %2860  ;;  %3799 = vmatprep.mubr.f32.mxu1 %v3501_v51  ;;  %v3340_v51 = vsel %vm542_vm2, %v15377_v55, %v15378_v50  ;;  %v3365_v5 = vmul.f32 %v3351_v58, %v15382_v35 }
 0x7b7   : > { %v12135_v7 = vpop.permute.xlu0 %2866  ;;  %8009 = vmatprep.subr.bf16.mxu1 %v8008_v29  ;;  %v3515_v29 = vld [vmem:[#allocation5 + $0x168] sm:$0xff]  ;;  %v3364_v36 = vmul.f32 %v3340_v51, %v15381_v18 }
 0x7b9   : > { %3800 = vmatmul.mubr.f32.gmra.mrb[52].mxu1 %v3500_v56  ;;  %v15383_v56 = vld [vmem:[#allocation37_spill] sm:$0xff] }
 0x7ba   : > { %8011 = vmatpush1.bf16.msra.mxu1 %v8010_v48  ;;  %v3227_v43 = vpop.permute.xlu1 %3226  ;;  %3805 = vmatprep.mubr.f32.mxu1 %v3508_v17  ;;  %v3353_v11 = vsel %vm542_vm2, %v15384_v2, %v15383_v56  ;;  %v3352_v17 = vsel %vm542_vm2, %v15386_v59, %v15385_v26  ;;  %v3514_v48 = vld [vmem:[#allocation5 + $0x160] sm:$0xff] }
 0x7bb   : > { %v3249_v3 = vpop.permute.xlu0 %3248  ;;  %8013 = vmatprep.subr.bf16.mxu1 %v8012_v19  ;;  %v3522_v19 = vld [vmem:[#allocation5 + $0x1a0] sm:$0xff]  ;;  %v3367_v51 = vmul.f32 %v3352_v17, %v15382_v35 }
 0x7bc   : > { %v3260_v57 = vsel %vm1148_vm6, %v3227_v43, %v3249_v3  ;;  %v3271_v16 = vsel %vm1148_vm6, %v3249_v3, %v3227_v43  ;;  %v3342_v43 = vsel %vm542_vm2, %v15383_v56, %v15384_v2  ;;  %v3341_v3 = vsel %vm542_vm2, %v15385_v26, %v15386_v59  ;;  %v3521_v2 = vld [vmem:[#allocation5 + $0x198] sm:$0xff] }
 0x7bd   : > { %v3292_v55 = vmul.f32 %v3260_v57, %v15362_v25  ;;  %v3293_v50 = vmul.f32 %v3271_v16, %v15357_v61  ;;  %3806 = vmatmul.mubr.f32.gmra.mrb[54].mxu1 %v3507_v49  ;;  %v3369_v49 = vmul.f32 %v3353_v11, %v15382_v35  ;;  %v15390_v57 = vld [vmem:[#allocation40_spill] sm:$0xff]  ;;  %v3368_v11 = vmul.f32 %v3342_v43, %v15381_v18  ;;  %v15394_v43 = vld [vmem:[#allocation81_spill] sm:$0xff] }
 0x7be   : > { %8015 = vmatpush1.bf16.msra.mxu1 %v8014_v8  ;;  %v12173_v58 = vpop.permute.xlu1 %2882  ;;  %3811 = vmatprep.mubr.f32.mxu1 %v3515_v29  ;;  %v15389_v8 = vld [vmem:[#allocation31_spill] sm:$0xff]  ;;  %v3529_v26 = vld [vmem:[#allocation5 + $0x1d8] sm:$0xff]  ;;  %v8022_v59 = vpack.c.bf16 %v3364_v36, %v3362_v1 }
 0x7bf   : > { %v8018_v47 = vpack.c.bf16 %v3360_v60, %v3292_v55  ;;  %v12177_v22 = vpop.permute.xlu0 %2888  ;;  %v8016_v46 = vpack.c.bf16 %v3361_v40, %v3293_v50  ;;  %v8020_v60 = vpack.c.bf16 %v3365_v5, %v3363_v63  ;;  %v15388_v40 = vld [vmem:[#allocation30_spill] sm:$0xff]  ;;  %v3354_v16 = vsel %vm542_vm2, %v15390_v57, %v15389_v8  ;;  %v15393_v1 = vld [vmem:[#allocation79_spill] sm:$0xff] }
 0x7c0   : > { %v3355_v29 = vsel %vm542_vm2, %v15388_v40, %v15387_v23  ;;  %v3366_v5 = vmul.f32 %v3341_v3, %v15381_v18  ;;  %v8024_v17 = vpack.c.bf16 %v3369_v49, %v3367_v51  ;;  %v3344_v55 = vsel %vm542_vm2, %v15387_v23, %v15388_v40  ;;  %v3528_v51 = vld [vmem:[#allocation5 + $0x1d0] sm:$0xff] }
 0x7c1   : > { %8017 = vmatprep.subr.bf16.mxu1 %v8016_v46  ;;  %3812 = vmatmul.mubr.f32.gmra.mrb[56].mxu1 %v3514_v48  ;;  %v3373_v50 = vmul.f32 %v3355_v29, %v15382_v35  ;;  %v3343_v48 = vsel %vm542_vm2, %v15389_v8, %v15390_v57  ;;  %v15391_v46 = vld [vmem:[#allocation80_spill] sm:$0xff]  ;;  %v3356_v49 = vsel %vm542_vm2, %v15394_v43, %v15393_v1  ;;  %v3536_v40 = vld [vmem:[#allocation5 + $0x210] sm:$0xff] }
 0x7c2   : > { %8019 = vmatpush1.bf16.msra.mxu1 %v8018_v47  ;;  %v12197_v56 = vpop.permute.xlu1 %2864  ;;  %3817 = vmatprep.mubr.f32.mxu1 %v3522_v19  ;;  %v3371_v47 = vmul.f32 %v3354_v16, %v15382_v35  ;;  %v15392_v19 = vld [vmem:[#allocation82_spill] sm:$0xff]  ;;  %v3372_v29 = vmul.f32 %v3344_v55, %v15381_v18  ;;  %v3370_v8 = vmul.f32 %v3343_v48, %v15381_v18 }
 0x7c3   : > { %v12201_v63 = vpop.permute.xlu0 %2870  ;;  %8021 = vmatprep.subr.bf16.mxu1 %v8020_v60  ;;  %v3357_v36 = vsel %vm542_vm2, %v15392_v19, %v15391_v46  ;;  %v8026_v60 = vpack.c.bf16 %v3368_v11, %v3366_v5  ;;  %v3346_v57 = vsel %vm542_vm2, %v15391_v46, %v15392_v19  ;;  %v3345_v16 = vsel %vm542_vm2, %v15393_v1, %v15394_v43  ;;  %v3543_v46 = vld [vmem:[#allocation5 + $0x248] sm:$0xff]  ;;  %v15395_v1 = vld [vmem:[#allocation92_spill] sm:$0xff]  ;;  %v15396_v43 = vld [vmem:[#allocation91_spill] sm:$0xff] }
 0x7c4   : > { %v3375_v11 = vmul.f32 %v3356_v49, %v15382_v35  ;;  %v8028_v5 = vpack.c.bf16 %v3373_v50, %v3371_v47  ;;  %v3374_v55 = vmul.f32 %v3345_v16, %v15381_v18  ;;  %v8030_v19 = vpack.c.bf16 %v3372_v29, %v3370_v8  ;;  %v15397_v29 = vld [vmem:[#allocation88_spill] sm:$0xff]  ;;  %v15398_v8 = vld [vmem:[#allocation90_spill] sm:$0xff] }
 0x7c5   : > { %3818 = vmatmul.mubr.f32.gmra.mrb[58].mxu1 %v3521_v2  ;;  %v3377_v2 = vmul.f32 %v3357_v36, %v15382_v35  ;;  %v3347_v36 = vsel %vm542_vm2, %v15396_v43, %v15395_v1  ;;  %v3358_v50 = vsel %vm542_vm2, %v15395_v1, %v15396_v43  ;;  %v3437_v49 = vsel %vm1328_vm7, %v11765_v14, %v11749_v38 }
 0x7c6   : > { %8023 = vmatpush1.bf16.msra.mxu1 %v8022_v59  ;;  %v12221_v3 = vpop.permute.xlu1 %2886  ;;  %3823 = vmatprep.mubr.f32.mxu1 %v3529_v26  ;;  %v3535_v59 = vld [vmem:[#allocation5 + $0x208] sm:$0xff] }
 0x7c7   : > { %v12223_v23 = vpop.permute.xlu0 %2892  ;;  %8025 = vmatprep.subr.bf16.mxu1 %v8024_v17  ;;  %v3376_v17 = vmul.f32 %v3346_v57, %v15381_v18  ;;  %v8032_v47 = vpack.c.bf16 %v3377_v2, %v3375_v11  ;;  %v3438_v57 = vsel %vm1328_vm7, %v15398_v8, %v15397_v29  ;;  %v3475_v2 = vld [vmem:[#allocation5 + $0x28] sm:$0xff]  ;;  %v3378_v11 = vmul.f32 %v3347_v36, %v15381_v18 }
 0x7c8   : > { %v3439_v36 = vsel %vm1328_vm7, %v11821_v34, %v11809_v54 }
 0x7c9   : > { %3824 = vmatmul.mubr.f32.gmra.mrb[60].mxu1 %v3528_v51 }
 0x7ca   : > { %8027 = vmatpush1.bf16.msra.mxu1 %v8026_v60  ;;  %v12237_v26 = vpop.permute.xlu1 %2868  ;;  %3829 = vmatprep.mubr.f32.mxu1 %v3536_v40  ;;  %v3542_v60 = vld [vmem:[#allocation5 + $0x240] sm:$0xff]  ;;  %v8034_v40 = vpack.c.bf16 %v3376_v17, %v3374_v55  ;;  %v3426_v17 = vsel %vm1328_vm7, %v11749_v38, %v11765_v14  ;;  %v15399_v55 = vld [vmem:[#allocation48_spill] sm:$0xff]  ;;  %v3427_v38 = vsel %vm1328_vm7, %v15397_v29, %v15398_v8 }
 0x7cb   : > { %v3315_v48 = vpop.permute.xlu0 %3314  ;;  %8029 = vmatprep.subr.bf16.mxu1 %v8028_v5  ;;  %v3379_v5 = vmul.f32 %v3358_v50, %v15382_v35  ;;  %v3451_v14 = vmul.f32 %v3438_v57, %v15399_v55  ;;  %v3453_v29 = vmul.f32 %v3439_v36, %v15399_v55  ;;  %v3443_v36 = vsel %vm1328_vm7, %v12036_v10, %v12005_v42 }
 0x7cd   : > { %3830 = vmatmul.mubr.f32.gmra.mrb[62].mxu1 %v3535_v59 }
 0x7ce   : > { %8031 = vmatpush1.bf16.msra.mxu1 %v8030_v19  ;;  %v12253_v51 = vpop.permute.xlu1 %2890  ;;  %3835 = vmatprep.mubr.f32.mxu1 %v3543_v46  ;;  %v3449_v19 = vmul.f32 %v3437_v49, %v15399_v55 }
 0x7cf   : > { %v3337_v16 = vpop.permute.xlu0 %3336  ;;  %8033 = vmatprep.subr.bf16.mxu1 %v8032_v47 }
 0x7d0   : > { %v3348_v59 = vsel %vm542_vm2, %v3315_v48, %v3337_v16  ;;  %v3359_v46 = vsel %vm542_vm2, %v3337_v16, %v3315_v48  ;;  %v8040_v8 = vpack.c.bf16 %v3451_v14, %v3449_v19  ;;  %v3431_v14 = vsel %vm1328_vm7, %v11811_v39, %v11823_v53 }
 0x7d1   : > { %v3380_v1 = vmul.f32 %v3348_v59, %v15381_v18  ;;  %v3381_v43 = vmul.f32 %v3359_v46, %v15382_v35  ;;  %3836 = vmatmul.mubr.f32.gmra.mrb[64].mxu1 %v3542_v60  ;;  %v3440_v60 = vsel %vm1328_vm7, %v11725_v27, %v11697_v9  ;;  %v3429_v59 = vsel %vm1328_vm7, %v11697_v9, %v11725_v27 }
 0x7d2   : > { %8035 = vmatpush1.bf16.msra.mxu1 %v8034_v40  ;;  %v12276_v50 = vpop.permute.xlu1 %2872  ;;  %3906 = vmatprep.mubr.f32.mxu1 %v3475_v2  ;;  %v15400_v40 = vld [vmem:[#allocation46_spill] sm:$0xff]  ;;  %v3428_v2 = vsel %vm1328_vm7, %v11809_v54, %v11821_v34  ;;  %v3455_v54 = vmul.f32 %v3440_v60, %v15399_v55 }
 0x7d3   : > { %v8038_v48 = vpack.c.bf16 %v3380_v1, %v3378_v11  ;;  %v12283_v47 = vpop.permute.xlu0 %2944  ;;  %v8036_v49 = vpack.c.bf16 %v3381_v43, %v3379_v5  ;;  %v3448_v16 = vmul.f32 %v3426_v17, %v15400_v40  ;;  %v3450_v57 = vmul.f32 %v3427_v38, %v15400_v40 }
 0x7d4   : > { %v3441_v11 = vsel %vm1328_vm7, %v11929_v32, %v11900_v31  ;;  %v3442_v17 = vsel %vm1328_vm7, %v11823_v53, %v11811_v39  ;;  %v3452_v19 = vmul.f32 %v3428_v2, %v15400_v40  ;;  %v3430_v1 = vsel %vm1328_vm7, %v11900_v31, %v11929_v32 }
 0x7d5   : > { %8037 = vmatprep.subr.bf16.mxu1 %v8036_v49  ;;  %v8042_v46 = vpack.c.bf16 %v3450_v57, %v3448_v16  ;;  %v3457_v9 = vmul.f32 %v3441_v11, %v15399_v55  ;;  %v8044_v27 = vpack.c.bf16 %v3455_v54, %v3453_v29  ;;  %v3454_v43 = vmul.f32 %v3429_v59, %v15400_v40 }
 0x7d6   : > { %8039 = vmatpush1.bf16.msra.mxu1 %v8038_v48  ;;  %v12300_v5 = vpop.permute.xlu1 %2894  ;;  %v3459_v31 = vmul.f32 %v3442_v17, %v15399_v55  ;;  %v3444_v49 = vsel %vm1328_vm7, %v11939_v45, %v11905_v12  ;;  %v3456_v60 = vmul.f32 %v3430_v1, %v15400_v40  ;;  %v3432_v16 = vsel %vm1328_vm7, %v12005_v42, %v12036_v10 }
 0x7d7   : > { %v12307_v34 = vpop.permute.xlu0 %2966  ;;  %8041 = vmatprep.subr.bf16.mxu1 %v8040_v8  ;;  %v8046_v48 = vpack.c.bf16 %v3454_v43, %v3452_v19  ;;  %v3461_v39 = vmul.f32 %v3443_v36, %v15399_v55  ;;  %v3458_v2 = vmul.f32 %v3431_v14, %v15400_v40  ;;  %v3433_v29 = vsel %vm1328_vm7, %v11905_v12, %v11939_v45  ;;  %v15402_v36 = vld [vmem:[#allocation20_spill] sm:$0xff] }
 0x7d8   : > { %v8048_v53 = vpack.c.bf16 %v3459_v31, %v3457_v9  ;;  %v3463_v57 = vmul.f32 %v3444_v49, %v15399_v55  ;;  %v3460_v11 = vmul.f32 %v3432_v16, %v15400_v40  ;;  %v3462_v10 = vmul.f32 %v3433_v29, %v15400_v40 }
 0x7d9   : > { %v8050_v42 = vpack.c.bf16 %v3458_v2, %v3456_v60  ;;  %v2898_v54 = vsel %vm520_vm0, %v12061_v33, %v11959_v0  ;;  %v2909_v12 = vsel %vm520_vm0, %v11959_v0, %v12061_v33  ;;  %v2900_v1 = vsel %vm520_vm0, %v12040_v37, %v12065_v24 }
 0x7da   : > { %8043 = vmatpush1.bf16.msra.mxu1 %v8042_v46  ;;  %v12324_v38 = vpop.permute.xlu1 %2942  ;;  %v8052_v45 = vpack.c.bf16 %v3463_v57, %v3461_v39  ;;  %v2899_v46 = vsel %vm520_vm0, %v12085_v41, %v12109_v30  ;;  %v8054_v19 = vpack.c.bf16 %v3462_v10, %v3460_v11  ;;  %v2921_v0 = vmul.f32 %v2898_v54, %v15402_v36  ;;  %v3482_v11 = vld [vmem:[#allocation5 + $0x60] sm:$0xff] }
 0x7db   : > { %v12331_v32 = vpop.permute.xlu0 %2948  ;;  %8045 = vmatprep.subr.bf16.mxu1 %v8044_v27  ;;  %v15401_v27 = vld [vmem:[#allocation19_spill] sm:$0xff]  ;;  %v2910_v31 = vsel %vm520_vm0, %v12109_v30, %v12085_v41  ;;  %v2901_v16 = vsel %vm520_vm0, %v12125_v21, %v12173_v58  ;;  %v2911_v41 = vsel %vm520_vm0, %v12065_v24, %v12040_v37  ;;  %v2925_v30 = vmul.f32 %v2900_v1, %v15402_v36  ;;  %v3489_v1 = vld [vmem:[#allocation5 + $0x98] sm:$0xff] }
 0x7dc   : > { %v2920_v43 = vmul.f32 %v2909_v12, %v15401_v27  ;;  %v2922_v10 = vmul.f32 %v2910_v31, %v15401_v27  ;;  %v2912_v54 = vsel %vm520_vm0, %v12173_v58, %v12125_v21  ;;  %v2927_v37 = vmul.f32 %v2901_v16, %v15402_v36  ;;  %v3496_v16 = vld [vmem:[#allocation5 + $0xd0] sm:$0xff] }
 0x7dd   : > { %v2924_v12 = vmul.f32 %v2911_v41, %v15401_v27  ;;  %v2913_v21 = vsel %vm520_vm0, %v12111_v13, %v12087_v6  ;;  %v2905_v31 = vsel %vm520_vm0, %v12237_v26, %v12253_v51  ;;  %v2906_v41 = vsel %vm520_vm0, %v12201_v63, %v12223_v23 }
 0x7de   : > { %8047 = vmatpush1.bf16.msra.mxu1 %v8046_v48  ;;  %v12348_v8 = vpop.permute.xlu1 %2964  ;;  %v2923_v48 = vmul.f32 %v2899_v46, %v15402_v36 }
 0x7df   : > { %v12352_v59 = vpop.permute.xlu0 %2970  ;;  %8049 = vmatprep.subr.bf16.mxu1 %v8048_v53  ;;  %v3474_v53 = vld [vmem:[#allocation5 + $0x20] sm:$0xff] }
 0x7e0   : > { %v7888_v24 = vpack.c.bf16 %v2925_v30, %v2923_v48 }
 0x7e2   : > { %8051 = vmatpush1.bf16.msra.mxu1 %v8050_v42  ;;  %v2787_v17 = vpop.permute.xlu1 %2786  ;;  %v2902_v42 = vsel %vm520_vm0, %v12087_v6, %v12111_v13 }
 0x7e3   : > { %v2809_v9 = vpop.permute.xlu0 %2808  ;;  %8053 = vmatprep.subr.bf16.mxu1 %v8052_v45  ;;  %v2903_v45 = vsel %vm520_vm0, %v12197_v56, %v12221_v3  ;;  %v2929_v58 = vmul.f32 %v2902_v42, %v15402_v36 }
 0x7e4   : > { %v2820_v33 = vsel %vm724_vm4, %v2787_v17, %v2809_v9  ;;  %v2831_v14 = vsel %vm724_vm4, %v2809_v9, %v2787_v17  ;;  %v3481_v17 = vld [vmem:[#allocation5 + $0x58] sm:$0xff]  ;;  %v7890_v9 = vpack.c.bf16 %v2924_v12, %v2922_v10  ;;  %v2931_v6 = vmul.f32 %v2903_v45, %v15402_v36  ;;  %v3495_v10 = vld [vmem:[#allocation5 + $0xc8] sm:$0xff] }
 0x7e5   : > { %v2852_v49 = vmul.f32 %v2831_v14, %v15279_v52  ;;  %v2853_v60 = vmul.f32 %v2820_v33, %v15280_v15  ;;  %v2914_v33 = vsel %vm520_vm0, %v12221_v3, %v12197_v56  ;;  %v7892_v13 = vpack.c.bf16 %v2929_v58, %v2927_v37  ;;  %v3502_v58 = vld [vmem:[#allocation5 + $0x100] sm:$0xff] }
 0x7e6   : > { %8055 = vmatpush1.bf16.msra.mxu1 %v8054_v19  ;;  %v12388_v39 = vpop.permute.xlu1 %2946  ;;  %v2928_v14 = vmul.f32 %v2913_v21, %v15401_v27  ;;  %v2915_v56 = vsel %vm520_vm0, %v12177_v22, %v12135_v7  ;;  %v2930_v30 = vmul.f32 %v2914_v33, %v15401_v27  ;;  %v2918_v45 = vsel %vm520_vm0, %v12300_v5, %v12276_v50 }
 0x7e7   : > { %v7886_v2 = vpack.c.bf16 %v2920_v43, %v2852_v49  ;;  %v12395_v29 = vpop.permute.xlu0 %2952  ;;  %v7884_v57 = vpack.c.bf16 %v2921_v0, %v2853_v60  ;;  %v2904_v43 = vsel %vm520_vm0, %v12135_v7, %v12177_v22  ;;  %v2926_v0 = vmul.f32 %v2912_v54, %v15401_v27  ;;  %v3488_v49 = vld [vmem:[#allocation5 + $0x90] sm:$0xff] }
 0x7e8   : > { %v2933_v3 = vmul.f32 %v2904_v43, %v15402_v36  ;;  %v2935_v7 = vmul.f32 %v2905_v31, %v15402_v36  ;;  %v2937_v54 = vmul.f32 %v2906_v41, %v15402_v36  ;;  %v2938_v33 = vmul.f32 %v2918_v45, %v15401_v27 }
 0x7e9   : > { %7885 = vmatprep.subr.bf16.mxu0 %v7884_v57  ;;  %3907 = vmatmul.mubr.f32.vlgmr.msra.gmra.mrb[44].mxu1 %v3474_v53  ;;  %v7894_v53 = vpack.c.bf16 %v2928_v14, %v2926_v0  ;;  %v2932_v57 = vmul.f32 %v2915_v56, %v15401_v27  ;;  %v3510_v0 = vld [vmem:[#allocation5 + $0x140] sm:$0xff]  ;;  %v2997_v31 = vsel %vm904_vm5, %v12348_v8, %v12324_v38 }
 0x7ea   : > { %7887 = vmatpush1.bf16.msra.mxu0 %v7886_v2  ;;  %v12412_v46 = vpop.permute.xlu1 %2968  ;;  %3912 = vmatprep.mubr.f32.mxu1 %v3482_v11  ;;  %v2916_v2 = vsel %vm520_vm0, %v12253_v51, %v12237_v26  ;;  %v7896_v22 = vpack.c.bf16 %v2933_v3, %v2931_v6  ;;  %v2917_v11 = vsel %vm520_vm0, %v12223_v23, %v12201_v63  ;;  %v3503_v51 = vld [vmem:[#allocation5 + $0x108] sm:$0xff] }
 0x7eb   : > { %v12419_v19 = vpop.permute.xlu0 %2974  ;;  %7889 = vmatprep.subr.bf16.mxu0 %v7888_v24  ;;  %v2934_v37 = vmul.f32 %v2916_v2, %v15401_v27  ;;  %v7898_v24 = vpack.c.bf16 %v2932_v57, %v2930_v30  ;;  %v2936_v12 = vmul.f32 %v2917_v11, %v15401_v27  ;;  %v2986_v63 = vsel %vm904_vm5, %v12324_v38, %v12348_v8  ;;  %v15403_v6 = vld [vmem:[#allocation70_spill] sm:$0xff]  ;;  %v3509_v38 = vld [vmem:[#allocation5 + $0x138] sm:$0xff]  ;;  %v15404_v11 = vld [vmem:[#allocation71_spill] sm:$0xff] }
 0x7ec   : > { %v7900_v23 = vpack.c.bf16 %v2937_v54, %v2935_v7  ;;  %v2998_v8 = vsel %vm904_vm5, %v12307_v34, %v12283_v47  ;;  %v3517_v57 = vld [vmem:[#allocation5 + $0x178] sm:$0xff] }
 0x7ed   : > { %3913 = vmatmul.mubr.f32.gmra.mrb[46].mxu1 %v3481_v17  ;;  %v2907_v17 = vsel %vm520_vm0, %v12276_v50, %v12300_v5 }
 0x7ee   : > { %7891 = vmatpush1.bf16.msra.mxu0 %v7890_v9  ;;  %v12436_v48 = vpop.permute.xlu1 %2950  ;;  %3918 = vmatprep.mubr.f32.mxu1 %v3489_v1  ;;  %v7902_v1 = vpack.c.bf16 %v2936_v12, %v2934_v37  ;;  %v2987_v9 = vsel %vm904_vm5, %v12283_v47, %v12307_v34  ;;  %v2939_v14 = vmul.f32 %v2907_v17, %v15402_v36 }
 0x7ef   : > { %v12443_v60 = vpop.permute.xlu0 %2956  ;;  %7893 = vmatprep.subr.bf16.mxu0 %v7892_v13  ;;  %v3009_v13 = vmul.f32 %v2986_v63, %v15403_v6  ;;  %v3011_v3 = vmul.f32 %v2987_v9, %v15403_v6  ;;  %v3008_v47 = vmul.f32 %v2997_v31, %v15404_v11 }
 0x7f1   : > { %3919 = vmatmul.mubr.f32.gmra.mrb[48].mxu1 %v3488_v49  ;;  %v7908_v34 = vpack.c.bf16 %v3011_v3, %v3009_v13  ;;  %v3523_v13 = vld [vmem:[#allocation5 + $0x1a8] sm:$0xff] }
 0x7f2   : > { %7895 = vmatpush1.bf16.msra.mxu0 %v7894_v53  ;;  %v2973_v42 = vpop.permute.xlu1 %2972  ;;  %3924 = vmatprep.mubr.f32.mxu1 %v3496_v16  ;;  %v2988_v16 = vsel %vm904_vm5, %v12388_v39, %v12412_v46  ;;  %v2999_v53 = vsel %vm904_vm5, %v12412_v46, %v12388_v39  ;;  %v2989_v39 = vsel %vm904_vm5, %v12331_v32, %v12352_v59 }
 0x7f3   : > { %v2875_v26 = vpop.permute.xlu0 %2874  ;;  %7897 = vmatprep.subr.bf16.mxu0 %v7896_v22  ;;  %v2990_v30 = vsel %vm904_vm5, %v12436_v48, %v2973_v42  ;;  %v3000_v46 = vsel %vm904_vm5, %v12352_v59, %v12331_v32  ;;  %v3012_v54 = vmul.f32 %v2999_v53, %v15404_v11  ;;  %v3013_v37 = vmul.f32 %v2988_v16, %v15403_v6 }
 0x7f4   : > { %v3001_v32 = vsel %vm904_vm5, %v2973_v42, %v12436_v48  ;;  %v3017_v59 = vmul.f32 %v2990_v30, %v15403_v6  ;;  %v3014_v12 = vmul.f32 %v3000_v46, %v15404_v11  ;;  %v3015_v45 = vmul.f32 %v2989_v39, %v15403_v6 }
 0x7f5   : > { %3925 = vmatmul.mubr.f32.gmra.mrb[50].mxu1 %v3495_v10  ;;  %v2991_v10 = vsel %vm904_vm5, %v12395_v29, %v12419_v19  ;;  %v3002_v48 = vsel %vm904_vm5, %v12419_v19, %v12395_v29 }
 0x7f6   : > { %7899 = vmatpush1.bf16.msra.mxu0 %v7898_v24  ;;  %v12475_v21 = vpop.permute.xlu1 %2954  ;;  %3930 = vmatprep.mubr.f32.mxu1 %v3503_v51  ;;  %v3516_v24 = vld [vmem:[#allocation5 + $0x170] sm:$0xff]  ;;  %v7914_v42 = vpack.c.bf16 %v3014_v12, %v3012_v54  ;;  %v7912_v9 = vpack.c.bf16 %v3015_v45, %v3013_v37  ;;  %v3537_v37 = vld [vmem:[#allocation5 + $0x218] sm:$0xff] }
 0x7f7   : > { %v2897_v43 = vpop.permute.xlu0 %2896  ;;  %7901 = vmatprep.subr.bf16.mxu0 %v7900_v23  ;;  %v3524_v23 = vld [vmem:[#allocation5 + $0x1b0] sm:$0xff] }
 0x7f8   : > { %v2908_v50 = vsel %vm520_vm0, %v2875_v26, %v2897_v43  ;;  %v2919_v5 = vsel %vm520_vm0, %v2897_v43, %v2875_v26  ;;  %v3010_v26 = vmul.f32 %v2998_v8, %v15404_v11  ;;  %v3018_v8 = vmul.f32 %v3002_v48, %v15404_v11 }
 0x7f9   : > { %v2940_v49 = vmul.f32 %v2919_v5, %v15401_v27  ;;  %v2941_v56 = vmul.f32 %v2908_v50, %v15402_v36  ;;  %3931 = vmatmul.mubr.f32.gmra.mrb[52].mxu1 %v3502_v58  ;;  %v3019_v58 = vmul.f32 %v2991_v10, %v15403_v6 }
 0x7fa   : > { %7903 = vmatpush1.bf16.msra.mxu0 %v7902_v1  ;;  %v2977_v41 = vpop.permute.xlu1 %2976  ;;  %3936 = vmatprep.mubr.f32.mxu1 %v3510_v0  ;;  %v7910_v17 = vpack.c.bf16 %v3010_v26, %v3008_v47  ;;  %v3016_v1 = vmul.f32 %v3001_v32, %v15404_v11 }
 0x7fb   : > { %v7906_v2 = vpack.c.bf16 %v2940_v49, %v2938_v33  ;;  %v2979_v7 = vpop.permute.xlu0 %2978  ;;  %v7904_v22 = vpack.c.bf16 %v2941_v56, %v2939_v14  ;;  %v2992_v0 = vsel %vm904_vm5, %v12475_v21, %v2977_v41  ;;  %v7916_v50 = vpack.c.bf16 %v3019_v58, %v3017_v59  ;;  %v3531_v49 = vld [vmem:[#allocation5 + $0x1e8] sm:$0xff] }
 0x7fc   : > { %v2993_v43 = vsel %vm904_vm5, %v12443_v60, %v2979_v7  ;;  %v3004_v29 = vsel %vm904_vm5, %v2979_v7, %v12443_v60  ;;  %v3003_v19 = vsel %vm904_vm5, %v2977_v41, %v12475_v21  ;;  %v3021_v53 = vmul.f32 %v2992_v0, %v15403_v6 }
 0x7fd   : > { %7905 = vmatprep.subr.bf16.mxu0 %v7904_v22  ;;  %3937 = vmatmul.mubr.f32.gmra.mrb[54].mxu1 %v3509_v38  ;;  %v3023_v21 = vmul.f32 %v2993_v43, %v15403_v6  ;;  %v3022_v7 = vmul.f32 %v3004_v29, %v15404_v11  ;;  %v3020_v22 = vmul.f32 %v3003_v19, %v15404_v11  ;;  %v15405_v29 = vmov 0.0   ;;  %v3470_v19 = vld [vmem:[#allocation5] sm:$0xff] }
 0x7fe   : > { %7907 = vmatpush1.bf16.msra.mxu0 %v7906_v2  ;;  %v3399_v51 = vpop.permute.xlu1 %3398  ;;  %3942 = vmatprep.mubr.f32.mxu1 %v3517_v57  ;;  %v3530_v2 = vld [vmem:[#allocation5 + $0x1e0] sm:$0xff]  ;;  %v7918_v47 = vpack.c.bf16 %v3018_v8, %v3016_v1 }
 0x7ff   : > { %v3401_v63 = vpop.permute.xlu0 %3400  ;;  %7909 = vmatprep.subr.bf16.mxu0 %v7908_v34  ;;  %v3538_v34 = vld [vmem:[#allocation5 + $0x220] sm:$0xff]  ;;  %v7920_v10 = vpack.c.bf16 %v3023_v21, %v3021_v53  ;;  %v7922_v26 = vpack.c.bf16 %v3022_v7, %v3020_v22  ;;  %v3492_v21 = vld [vmem:[#allocation5 + $0xb0] sm:$0xff]  ;;  %v3491_v53 = vld [vmem:[#allocation5 + $0xa8] sm:$0xff] }
 0x800   : > { %v3498_v8 = vld [vmem:[#allocation5 + $0xe0] sm:$0xff]  ;;  %v3505_v7 = vld [vmem:[#allocation5 + $0x118] sm:$0xff]  ;;  %v3511_v22 = vld [vmem:[#allocation5 + $0x148] sm:$0xff] }
 0x801   : > { %3943 = vmatmul.mubr.f32.gmra.mrb[56].mxu1 %v3516_v24  ;;  %v3545_v24 = vld [vmem:[#allocation5 + $0x258] sm:$0xff] }
 0x802   : > { %7911 = vmatpush1.bf16.msra.mxu0 %v7910_v17  ;;  %v3421_v33 = vpop.permute.xlu1 %3420  ;;  %3948 = vmatprep.mubr.f32.mxu1 %v3524_v23 }
 0x803   : > { %v3423_v5 = vpop.permute.xlu0 %3422  ;;  %7913 = vmatprep.subr.bf16.mxu0 %v7912_v9  ;;  %v3434_v14 = vsel %vm1328_vm7, %v3399_v51, %v3421_v33  ;;  %v3445_v31 = vsel %vm1328_vm7, %v3421_v33, %v3399_v51 }
 0x804   : > { %v3435_v56 = vsel %vm1328_vm7, %v3401_v63, %v3423_v5  ;;  %v3446_v3 = vsel %vm1328_vm7, %v3423_v5, %v3401_v63  ;;  %v3464_v60 = vmul.f32 %v3434_v14, %v15400_v40  ;;  %v3465_v16 = vmul.f32 %v3445_v31, %v15399_v55  ;;  %v3476_v5 = vld [vmem:[#allocation5 + $0x30] sm:$0xff]  ;;  %v3478_v14 = vld [vmem:[#allocation5 + $0x40] sm:$0xff] }
 0x805   : > { %v3466_v41 = vmul.f32 %v3435_v56, %v15400_v40  ;;  %v3467_v38 = vmul.f32 %v3446_v3, %v15399_v55  ;;  %3949 = vmatmul.mubr.f32.gmra.mrb[58].mxu1 %v3523_v13  ;;  %v15406_v31 = vmov 0.0|0.0   ;;  %v3483_v56 = vld [vmem:[#allocation5 + $0x68] sm:$0xff]  ;;  %v3485_v3 = vld [vmem:[#allocation5 + $0x78] sm:$0xff] }
 0x806   : > { %7915 = vmatpush1.bf16.msra.mxu0 %v7914_v42  ;;  %v2959_v30 = vpop.permute.xlu1 %2958  ;;  %3954 = vmatprep.mubr.f32.mxu1 %v3531_v49  ;;  %v3544_v42 = vld [vmem:[#allocation5 + $0x250] sm:$0xff]  ;;  %v3477_v49 = vld [vmem:[#allocation5 + $0x38] sm:$0xff] }
 0x807   : > { %v8058_v57 = vpack.c.bf16 %v3466_v41, %v3464_v60  ;;  %v2961_v39 = vpop.permute.xlu0 %2960  ;;  %7917 = vmatprep.subr.bf16.mxu0 %v7916_v50  ;;  %v8056_v46 = vpack.c.bf16 %v3467_v38, %v3465_v16  ;;  %v3484_v60 = vld [vmem:[#allocation5 + $0x70] sm:$0xff]  ;;  %v3490_v16 = vld [vmem:[#allocation5 + $0xa0] sm:$0xff]  ;;  %v3497_v41 = vld [vmem:[#allocation5 + $0xd8] sm:$0xff] }
 0x808   : > { %v3499_v38 = vld [vmem:[#allocation5 + $0xe8] sm:$0xff] }
 0x809   : > { %3955 = vmatmul.mubr.f32.gmra.mrb[60].mxu1 %v3530_v2  ;;  %8057 = vmatprep.subr.bf16.mxu1 %v8056_v46  ;;  %v3506_v2 = vld [vmem:[#allocation5 + $0x120] sm:$0xff] }
 0x80a   : > { %7919 = vmatpush1.bf16.msra.mxu0 %v7918_v47  ;;  %8059 = vmatpush1.bf16.msra.mxu1 %v8058_v57  ;;  %v2981_v54 = vpop.permute.xlu1 %2980  ;;  %v3513_v57 = vld [vmem:[#allocation5 + $0x158] sm:$0xff]  ;;  %v3518_v46 = vld [vmem:[#allocation5 + $0x180] sm:$0xff]  ;;  %v3520_v47 = vld [vmem:[#allocation5 + $0x190] sm:$0xff] }
 0x80b   : > { %v2983_v32 = vpop.permute.xlu0 %2982  ;;  %7921 = vmatprep.subr.bf16.mxu0 %v7920_v10  ;;  %v2994_v59 = vsel %vm904_vm5, %v2959_v30, %v2981_v54  ;;  %v3005_v51 = vsel %vm904_vm5, %v2981_v54, %v2959_v30  ;;  %3960 = vmatprep.mubr.f32.mxu1 %v3538_v34  ;;  %v3504_v30 = vld [vmem:[#allocation5 + $0x110] sm:$0xff]  ;;  %v3519_v34 = vld [vmem:[#allocation5 + $0x188] sm:$0xff]  ;;  %v3525_v10 = vld [vmem:[#allocation5 + $0x1b8] sm:$0xff] }
 0x80c   : > { %v2995_v12 = vsel %vm904_vm5, %v2961_v39, %v2983_v32  ;;  %v3006_v45 = vsel %vm904_vm5, %v2983_v32, %v2961_v39  ;;  %v3024_v63 = vmul.f32 %v3005_v51, %v15404_v11  ;;  %v3025_v23 = vmul.f32 %v2994_v59, %v15403_v6  ;;  %v3512_v39 = vld [vmem:[#allocation5 + $0x150] sm:$0xff]  ;;  %v3527_v54 = vld [vmem:[#allocation5 + $0x1c8] sm:$0xff]  ;;  %v3534_v32 = vld [vmem:[#allocation5 + $0x200] sm:$0xff] }
 0x80d   : > { %v3026_v17 = vmul.f32 %v3006_v45, %v15404_v11  ;;  %v3027_v58 = vmul.f32 %v2995_v12, %v15403_v6  ;;  %3961 = vmatmul.mubr.f32.gmra.mrb[62].mxu1 %v3537_v37  ;;  %v3526_v37 = vld [vmem:[#allocation5 + $0x1c0] sm:$0xff]  ;;  %v3533_v59 = vld [vmem:[#allocation5 + $0x1f8] sm:$0xff]  ;;  %v3539_v51 = vld [vmem:[#allocation5 + $0x228] sm:$0xff] }
 0x80e   : > { %7923 = vmatpush1.bf16.msra.mxu0 %v7922_v26  ;;  %v3403_v48 = vpop.permute.xlu1 %3402  ;;  %3966 = vmatprep.mubr.f32.mxu1 %v3545_v24  ;;  %v3532_v26 = vld [vmem:[#allocation5 + $0x1f0] sm:$0xff]  ;;  %v3541_v24 = vld [vmem:[#allocation5 + $0x238] sm:$0xff]  ;;  %v3546_v45 = vld [vmem:[#allocation5 + $0x260] sm:$0xff] }
 0x80f   : > { %v7926_v1 = vpack.c.bf16 %v3026_v17, %v3024_v63  ;;  %v3425_v9 = vpop.permute.xlu0 %3424  ;;  %v7924_v43 = vpack.c.bf16 %v3027_v58, %v3025_v23  ;;  %v3540_v12 = vld [vmem:[#allocation5 + $0x230] sm:$0xff] }
 0x810   : > { %v3436_v0 = vsel %vm1328_vm7, %v3403_v48, %v3425_v9  ;;  %v3447_v33 = vsel %vm1328_vm7, %v3425_v9, %v3403_v48 }
 0x811   : > { %v3468_v13 = vmul.f32 %v3436_v0, %v15400_v40  ;;  %7925 = vmatprep.subr.bf16.mxu0 %v7924_v43  ;;  %3967 = vmatmul.mubr.f32.gmra.mrb[64].mxu1 %v3544_v42  ;;  %v3469_v50 = vmul.f32 %v3447_v33, %v15399_v55 }
 0x812   : > { %7927 = vmatpush1.bf16.msra.mxu0 %v7926_v1  ;;  %4037 = vmatprep.mubr.f32.mxu1 %v15405_v29 }
 0x813   : > { %3977 = vmatprep.subr.mxu1 %v3469_v50  ;;  %8060 = vmatprep.subr.bf16.mxu0 %v15406_v31 }
 0x814   : > { %3978 = vmatpush1.msra.mxu1 %v3468_v13 }
 0x815   : > { %3645 = vmatmul.mubr.f32.vlgmr.msra.gmra.mrb[22].mxu0 %v3470_v19  ;;  %7102 = vmatmul.mubr.msk.f32.vlgmr.msra.gmra.mrb[44].mxu1 %vm1461_vm8, %v3476_v5 }
 0x816   : > { %3650 = vmatprep.mubr.f32.mxu0 %v3478_v14  ;;  %4043 = vmatprep.mubr.f32.mxu1 %v15405_v29 }
 0x819   : > { %3651 = vmatmul.mubr.f32.gmra.mrb[24].mxu0 %v3477_v49  ;;  %7103 = vmatmul.mubr.msk.f32.gmra.mrb[46].mxu1 %vm1461_vm8, %v3483_v56 }
 0x81a   : > { %3656 = vmatprep.mubr.f32.mxu0 %v3485_v3  ;;  %4049 = vmatprep.mubr.f32.mxu1 %v15405_v29 }
 0x81d   : > { %3657 = vmatmul.mubr.f32.gmra.mrb[26].mxu0 %v3484_v60  ;;  %7104 = vmatmul.mubr.msk.f32.gmra.mrb[48].mxu1 %vm1461_vm8, %v3490_v16 }
 0x81e   : > { %3662 = vmatprep.mubr.f32.mxu0 %v3492_v21  ;;  %4055 = vmatprep.mubr.f32.mxu1 %v15405_v29 }
 0x821   : > { %3663 = vmatmul.mubr.f32.gmra.mrb[28].mxu0 %v3491_v53  ;;  %7105 = vmatmul.mubr.msk.f32.gmra.mrb[50].mxu1 %vm1461_vm8, %v3497_v41 }
 0x822   : > { %3668 = vmatprep.mubr.f32.mxu0 %v3499_v38  ;;  %4061 = vmatprep.mubr.f32.mxu1 %v15405_v29 }
 0x825   : > { %3669 = vmatmul.mubr.f32.gmra.mrb[30].mxu0 %v3498_v8  ;;  %7106 = vmatmul.mubr.msk.f32.gmra.mrb[52].mxu1 %vm1461_vm8, %v3504_v30 }
 0x826   : > { %3674 = vmatprep.mubr.f32.mxu0 %v3506_v2  ;;  %4067 = vmatprep.mubr.f32.mxu1 %v15405_v29 }
 0x829   : > { %3675 = vmatmul.mubr.f32.gmra.mrb[32].mxu0 %v3505_v7  ;;  %7107 = vmatmul.mubr.msk.f32.gmra.mrb[54].mxu1 %vm1461_vm8, %v3511_v22 }
 0x82a   : > { %3680 = vmatprep.mubr.f32.mxu0 %v3513_v57  ;;  %4073 = vmatprep.mubr.f32.mxu1 %v15405_v29 }
 0x82d   : > { %3681 = vmatmul.mubr.f32.gmra.mrb[34].mxu0 %v3512_v39  ;;  %7108 = vmatmul.mubr.msk.f32.gmra.mrb[56].mxu1 %vm1461_vm8, %v3518_v46 }
 0x82e   : > { %3686 = vmatprep.mubr.f32.mxu0 %v3520_v47  ;;  %4079 = vmatprep.mubr.f32.mxu1 %v15405_v29 }
 0x831   : > { %3687 = vmatmul.mubr.f32.gmra.mrb[36].mxu0 %v3519_v34  ;;  %7109 = vmatmul.mubr.msk.f32.gmra.mrb[58].mxu1 %vm1461_vm8, %v3525_v10 }
 0x832   : > { %3692 = vmatprep.mubr.f32.mxu0 %v3527_v54  ;;  %4085 = vmatprep.mubr.f32.mxu1 %v15405_v29 }
 0x835   : > { %3693 = vmatmul.mubr.f32.gmra.mrb[38].mxu0 %v3526_v37  ;;  %7110 = vmatmul.mubr.msk.f32.gmra.mrb[60].mxu1 %vm1461_vm8, %v3532_v26 }
 0x836   : > { %3698 = vmatprep.mubr.f32.mxu0 %v3534_v32  ;;  %4091 = vmatprep.mubr.f32.mxu1 %v15405_v29 }
 0x839   : > { %3699 = vmatmul.mubr.f32.gmra.mrb[40].mxu0 %v3533_v59  ;;  %7111 = vmatmul.mubr.msk.f32.gmra.mrb[62].mxu1 %vm1461_vm8, %v3539_v51 }
 0x83a   : > { %3704 = vmatprep.mubr.f32.mxu0 %v3541_v24  ;;  %4097 = vmatprep.mubr.f32.mxu1 %v15405_v29 }
 0x83d   : > { %3705 = vmatmul.mubr.f32.gmra.mrb[42].mxu0 %v3540_v12  ;;  %7112 = vmatmul.mubr.msk.f32.gmra.mrb[64].mxu1 %vm1461_vm8, %v3546_v45 }
 0x83e   : > { %7440 = vmatprep.mubr.msk.f32.mxu0 %vm8879_vm9, %v15405_v29 }
 0x8e8   : > { %v3646_v63 = vpop.f32.mrb[22].mxu0  ;;  %v4039_v23 = vpop.f32.mrb[44].mxu1 }
 0x8e9   : > { %v12610_v17 = vadd.f32 %v4039_v23, %v3646_v63  ;;  %v3648_v58 = vpop.f32.mrb[23].mxu0  ;;  %v4041_v48 = vpop.f32.mrb[45].mxu1 }
 0x8ea   : > { %v12612_v42 = vadd.f32 %v4041_v48, %v3648_v58 }
 0x8ec   : > { %v3652_v1 = vpop.f32.mrb[24].mxu0  ;;  %v4045_v9 = vpop.f32.mrb[46].mxu1  ;;  %v4126_v43 = vadd.f32 %v12612_v42, %v12610_v17 }
 0x8ed   : > { %v12616_v0 = vadd.f32 %v4045_v9, %v3652_v1  ;;  %v3654_v33 = vpop.f32.mrb[25].mxu0  ;;  %v4047_v13 = vpop.f32.mrb[47].mxu1 }
 0x8ee   : > { %v12618_v50 = vadd.f32 %v4047_v13, %v3654_v33  ;;  %4127 = vadd.xlane.f32.xlu1 %v4126_v43 }
 0x8f0   : > { %v3658_v19 = vpop.f32.mrb[26].mxu0  ;;  %v4051_v5 = vpop.f32.mrb[48].mxu1  ;;  %v4129_v14 = vadd.f32 %v12618_v50, %v12616_v0 }
 0x8f1   : > { %v12622_v49 = vadd.f32 %v4051_v5, %v3658_v19  ;;  %v3660_v56 = vpop.f32.mrb[27].mxu0  ;;  %v4053_v3 = vpop.f32.mrb[49].mxu1 }
 0x8f2   : > { %v12624_v60 = vadd.f32 %v4053_v3, %v3660_v56  ;;  %4130 = vadd.xlane.f32.xlu0 %v4129_v14 }
 0x8f4   : > { %v3664_v16 = vpop.f32.mrb[28].mxu0  ;;  %v4057_v21 = vpop.f32.mrb[50].mxu1  ;;  %v4132_v53 = vadd.f32 %v12624_v60, %v12622_v49 }
 0x8f5   : > { %v12628_v41 = vadd.f32 %v4057_v21, %v3664_v16  ;;  %v3666_v38 = vpop.f32.mrb[29].mxu0  ;;  %v4059_v8 = vpop.f32.mrb[51].mxu1 }
 0x8f6   : > { %v12630_v30 = vadd.f32 %v4059_v8, %v3666_v38  ;;  %4133 = vadd.xlane.f32.xlu0 %v4132_v53 }
 0x8f8   : > { %v3670_v2 = vpop.f32.mrb[30].mxu0  ;;  %v4063_v7 = vpop.f32.mrb[52].mxu1  ;;  %v4135_v22 = vadd.f32 %v12630_v30, %v12628_v41 }
 0x8f9   : > { %v12634_v57 = vadd.f32 %v4063_v7, %v3670_v2  ;;  %v3672_v39 = vpop.f32.mrb[31].mxu0  ;;  %v4065_v46 = vpop.f32.mrb[53].mxu1 }
 0x8fa   : > { %v12636_v47 = vadd.f32 %v4065_v46, %v3672_v39  ;;  %4136 = vadd.xlane.f32.xlu1 %v4135_v22 }
 0x8fc   : > { %v3676_v34 = vpop.f32.mrb[32].mxu0  ;;  %v4069_v10 = vpop.f32.mrb[54].mxu1  ;;  %v4138_v54 = vadd.f32 %v12636_v47, %v12634_v57 }
 0x8fd   : > { %v12640_v37 = vadd.f32 %v4069_v10, %v3676_v34  ;;  %v3678_v26 = vpop.f32.mrb[33].mxu0  ;;  %v4071_v32 = vpop.f32.mrb[55].mxu1  ;;  %v4159_v34 = vmul.f32 %v12610_v17, %v12610_v17  ;;  %v4160_v10 = vmul.f32 %v12612_v42, %v12612_v42 }
 0x8fe   : > { %v12642_v59 = vadd.f32 %v4071_v32, %v3678_v26  ;;  %4139 = vadd.xlane.f32.xlu0 %v4138_v54 }
 0x900   : > { %v3682_v51 = vpop.f32.mrb[34].mxu0  ;;  %v4075_v24 = vpop.f32.mrb[56].mxu1  ;;  %v4141_v12 = vadd.f32 %v12642_v59, %v12640_v37 }
 0x901   : > { %v12646_v45 = vadd.f32 %v4075_v24, %v3682_v51  ;;  %v3684_v63 = vpop.f32.mrb[35].mxu0  ;;  %v4077_v23 = vpop.f32.mrb[57].mxu1 }
 0x902   : > { %v12648_v58 = vadd.f32 %v4077_v23, %v3684_v63  ;;  %4142 = vadd.xlane.f32.xlu1 %v4141_v12  ;;  %v4161_v23 = vmul.f32 %v12616_v0, %v12616_v0 }
 0x904   : > { %v3688_v48 = vpop.f32.mrb[36].mxu0  ;;  %v4081_v1 = vpop.f32.mrb[58].mxu1  ;;  %v4144_v9 = vadd.f32 %v12648_v58, %v12646_v45 }
 0x905   : > { %v12652_v43 = vadd.f32 %v4081_v1, %v3688_v48  ;;  %v3690_v33 = vpop.f32.mrb[37].mxu0  ;;  %v4083_v13 = vpop.f32.mrb[59].mxu1  ;;  %v4181_v48 = vadd.f32 %v4160_v10, %v4159_v34  ;;  %v4162_v1 = vmul.f32 %v12618_v50, %v12618_v50  ;;  %v4171_v34 = vmul.f32 %v12646_v45, %v12646_v45 }
 0x906   : > { %v12654_v19 = vadd.f32 %v4083_v13, %v3690_v33  ;;  %4145 = vadd.xlane.f32.xlu0 %v4144_v9  ;;  %v4163_v9 = vmul.f32 %v12622_v49, %v12622_v49  ;;  %v4164_v33 = vmul.f32 %v12624_v60, %v12624_v60  ;;  %v4172_v10 = vmul.f32 %v12648_v58, %v12648_v58 }
 0x908   : > { %v3694_v5 = vpop.f32.mrb[38].mxu0  ;;  %v4087_v14 = vpop.f32.mrb[60].mxu1  ;;  %v4147_v56 = vadd.f32 %v12654_v19, %v12652_v43 }
 0x909   : > { %v12658_v3 = vadd.f32 %v4087_v14, %v3694_v5  ;;  %v3696_v16 = vpop.f32.mrb[39].mxu0  ;;  %v4089_v21 = vpop.f32.mrb[61].mxu1  ;;  %v4165_v5 = vmul.f32 %v12628_v41, %v12628_v41  ;;  %v4166_v14 = vmul.f32 %v12630_v30, %v12630_v30 }
 0x90a   : > { %v12660_v53 = vadd.f32 %v4089_v21, %v3696_v16  ;;  %4148 = vadd.xlane.f32.xlu1 %v4147_v56  ;;  %v4167_v56 = vmul.f32 %v12634_v57, %v12634_v57  ;;  %v4168_v16 = vmul.f32 %v12636_v47, %v12636_v47  ;;  %v4184_v21 = vadd.f32 %v4162_v1, %v4161_v23 }
 0x90b   : > { %v4199_v23 = vadd.f32 %v4172_v10, %v4171_v34  ;;  %v4124_v34 = vld [vmem:[%s14917_s10 + $0x48] sm:$0xff]  ;;  %v4122_v10 = vld [vmem:[%s14917_s10 + $0x38] sm:$0xff] }
 0x90c   : > { %v3700_v38 = vpop.f32.mrb[40].mxu0  ;;  %v4093_v8 = vpop.f32.mrb[62].mxu1  ;;  %v4150_v2 = vadd.f32 %v12660_v53, %v12658_v3 }
 0x90d   : > { %v12664_v7 = vadd.f32 %v4093_v8, %v3700_v38  ;;  %v3702_v22 = vpop.f32.mrb[41].mxu0  ;;  %v4095_v39 = vpop.f32.mrb[63].mxu1  ;;  %v4187_v38 = vadd.f32 %v4164_v33, %v4163_v9  ;;  %v4190_v8 = vadd.f32 %v4166_v14, %v4165_v5 }
 0x90e   : > { %v12666_v46 = vadd.f32 %v4095_v39, %v3702_v22  ;;  %4151 = vadd.xlane.f32.xlu0 %v4150_v2  ;;  %v4193_v2 = vadd.f32 %v4168_v16, %v4167_v56  ;;  %v4169_v22 = vmul.f32 %v12640_v37, %v12640_v37  ;;  %v4170_v39 = vmul.f32 %v12642_v59, %v12642_v59  ;;  %v4115_v16 = vld [vmem:[%s14917_s10] sm:$0xff] }
 0x90f   : > { %v4177_v9 = vmul.f32 %v12664_v7, %v12664_v7 }
 0x910   : > { %v3706_v54 = vpop.f32.mrb[42].mxu0  ;;  %v4099_v26 = vpop.f32.mrb[64].mxu1  ;;  %v4153_v32 = vadd.f32 %v12666_v46, %v12664_v7  ;;  %v4178_v33 = vmul.f32 %v12666_v46, %v12666_v46 }
 0x911   : > { %v12674_v51 = vadd.f32 %v4099_v26, %v3706_v54  ;;  %v3708_v24 = vpop.f32.mrb[43].mxu0  ;;  %v4101_v12 = vpop.f32.mrb[65].mxu1  ;;  %v4173_v54 = vmul.f32 %v12652_v43, %v12652_v43  ;;  %v4174_v26 = vmul.f32 %v12654_v19, %v12654_v19 }
 0x912   : > { %v12676_v63 = vadd.f32 %v4101_v12, %v3708_v24  ;;  %4154 = vadd.xlane.f32.xlu1 %v4153_v32  ;;  %v4175_v32 = vmul.f32 %v12658_v3, %v12658_v3  ;;  %v4176_v24 = vmul.f32 %v12660_v53, %v12660_v53  ;;  %v4196_v12 = vadd.f32 %v4170_v39, %v4169_v22  ;;  %v4121_v22 = vld [vmem:[%s14917_s10 + $0x30] sm:$0xff]  ;;  %v4120_v39 = vld [vmem:[%s14917_s10 + $0x28] sm:$0xff] }
 0x913   : > { %v4208_v14 = vadd.f32 %v4178_v33, %v4177_v9 }
 0x914   : > { %v4156_v13 = vadd.f32 %v12676_v63, %v12674_v51  ;;  %v4205_v1 = vadd.f32 %v4176_v24, %v4175_v32  ;;  %v4180_v5 = vmul.f32 %v12676_v63, %v12676_v63 }
 0x916   : > { %4157 = vadd.xlane.f32.xlu0 %v4156_v13  ;;  %4182 = vadd.xlane.f32.xlu1 %v4181_v48  ;;  %v4202_v48 = vadd.f32 %v4174_v26, %v4173_v54  ;;  %v4179_v13 = vmul.f32 %v12674_v51, %v12674_v51  ;;  %v4125_v54 = vld [vmem:[%s14917_s10 + $0x50] sm:$0xff]  ;;  %v4123_v26 = vld [vmem:[%s14917_s10 + $0x40] sm:$0xff] }
 0x918   : > { %v4211_v56 = vadd.f32 %v4180_v5, %v4179_v13 }
 0x91a   : > { %4185 = vadd.xlane.f32.xlu0 %v4184_v21  ;;  %4188 = vadd.xlane.f32.xlu1 %v4187_v38  ;;  %v4117_v21 = vld [vmem:[%s14917_s10 + $0x10] sm:$0xff]  ;;  %v4116_v38 = vld [vmem:[%s14917_s10 + $0x8] sm:$0xff] }
 0x91e   : > { %4191 = vadd.xlane.f32.xlu0 %v4190_v8  ;;  %4194 = vadd.xlane.f32.xlu1 %v4193_v2  ;;  %v4119_v8 = vld [vmem:[%s14917_s10 + $0x20] sm:$0xff]  ;;  %v4118_v2 = vld [vmem:[%s14917_s10 + $0x18] sm:$0xff] }
 0x922   : > { %4197 = vadd.xlane.f32.xlu0 %v4196_v12  ;;  %4200 = vadd.xlane.f32.xlu1 %v4199_v23 }
 0x926   : > { %4203 = vadd.xlane.f32.xlu0 %v4202_v48  ;;  %4206 = vadd.xlane.f32.xlu1 %v4205_v1 }
 0x92a   : > { %4209 = vadd.xlane.f32.xlu0 %v4208_v14  ;;  %4212 = vadd.xlane.f32.xlu1 %v4211_v56 }
 0x93b   : > { %4676 = vperm.xlu1 %8618, %v4115_v16  }
 0x93f   : > { %4686 = vperm.xlu1 %8618, %v4117_v21  }
 0x940   : > { %4681 = vperm.xlu0 %8619, %v4116_v38  }
 0x943   : > { %4696 = vperm.xlu1 %8618, %v4119_v8  }
 0x944   : > { %4691 = vperm.xlu0 %8619, %v4118_v2  }
 0x947   : > { %4706 = vperm.xlu1 %8618, %v4121_v22  }
 0x948   : > { %4701 = vperm.xlu0 %8619, %v4120_v39   ;;  %v8686_v39 = vld [vmem:[%s14913_s6] sm:$0xff] }
 0x94b   : > { %4721 = vperm.xlu1 %8618, %v4124_v34  }
 0x94c   : > { %4711 = vperm.xlu0 %8619, %v4122_v10  }
 0x94f   : > { %4726 = vperm.xlu1 %8618, %v4125_v54  }
 0x950   : > { %4716 = vperm.xlu0 %8619, %v4123_v26   ;;  %v8687_v26 = vld [vmem:[%s14913_s6 + $0x8] sm:$0xff] }
 0x97b   : > { %v4128_v32 = vpop.xlane.xlu1 %4127 }
 0x97f   : > { %v4131_v24 = vpop.xlane.xlu0 %4130 }
 0x980   : > { %v8061_v12 = vpack.c.bf16 %v4131_v24, %v4128_v32 }
 0x982   : > { %8062 = vmatpush3.bf16.msra.mxu0 %v8061_v12 }
 0x983   : > { %8063 = vmatprep.subr.bf16.mxu0 %v15406_v31  ;;  %v4134_v23 = vpop.xlane.xlu0 %4133 }
 0x987   : > { %v4137_v48 = vpop.xlane.xlu1 %4136 }
 0x988   : > { %v8064_v1 = vpack.c.bf16 %v4137_v48, %v4134_v23  ;;  %v8688_v23 = vld [vmem:[%s14913_s6 + $0x10] sm:$0xff] }
 0x98a   : > { %8065 = vmatpush3.bf16.msra.mxu0 %v8064_v1 }
 0x98b   : > { %8066 = vmatprep.subr.bf16.mxu0 %v15406_v31  ;;  %v4140_v9 = vpop.xlane.xlu0 %4139 }
 0x98f   : > { %v4143_v33 = vpop.xlane.xlu1 %4142 }
 0x990   : > { %v8067_v13 = vpack.c.bf16 %v4143_v33, %v4140_v9  ;;  %v8689_v33 = vld [vmem:[%s14913_s6 + $0x18] sm:$0xff] }
 0x992   : > { %8068 = vmatpush3.bf16.msra.mxu0 %v8067_v13 }
 0x993   : > { %8069 = vmatprep.subr.bf16.mxu0 %v15406_v31  ;;  %v4146_v5 = vpop.xlane.xlu0 %4145 }
 0x997   : > { %v4149_v14 = vpop.xlane.xlu1 %4148 }
 0x998   : > { %v8070_v56 = vpack.c.bf16 %v4149_v14, %v4146_v5 }
 0x99a   : > { %8071 = vmatpush3.bf16.msra.mxu0 %v8070_v56  ;;  %v8690_v56 = vld [vmem:[%s14913_s6 + $0x20] sm:$0xff] }
 0x99b   : > { %8072 = vmatprep.subr.bf16.mxu0 %v15406_v31  ;;  %v4152_v16 = vpop.xlane.xlu0 %4151 }
 0x99f   : > { %v4155_v21 = vpop.xlane.xlu1 %4154 }
 0x9a0   : > { %v8073_v38 = vpack.c.bf16 %v4155_v21, %v4152_v16  ;;  %v8691_v21 = vld [vmem:[%s14913_s6 + $0x28] sm:$0xff] }
 0x9a2   : > { %8074 = vmatpush3.bf16.msra.mxu0 %v8073_v38 }
 0x9a3   : > { %v4158_v8 = vpop.xlane.xlu0 %4157  ;;  %v4183_v2 = vpop.xlane.xlu1 %4182  ;;  %7438 = vmatprep.subr.mxu0 %v15405_v29 }
 0x9a6   : > { %7439 = vmatpush3.msra.mxu0 %v4158_v8  ;;  %v8692_v8 = vld [vmem:[%s14913_s6 + $0x30] sm:$0xff] }
 0x9a7   : > { %v4186_v22 = vpop.xlane.xlu0 %4185  ;;  %7441 = vmatmul.mubr.msk.f32.vlgmr.msra.gmra.mrb[44].mxu0 %vm2129_vm10, %v8686_v39  ;;  %v4189_v34 = vpop.xlane.xlu1 %4188  ;;  %8075 = vmatprep.subr.bf16.mxu0 %v15406_v31 }
 0x9a8   : > { %v8076_v10 = vpack.c.bf16 %v4186_v22, %v4183_v2  ;;  %7443 = vmatprep.mubr.msk.f32.mxu0 %vm8879_vm9, %v15405_v29  ;;  %v8693_v2 = vld [vmem:[%s14913_s6 + $0x38] sm:$0xff]  ;;  %v8694_v22 = vld [vmem:[%s14913_s6 + $0x40] sm:$0xff] }
 0x9aa   : > { %8077 = vmatpush3.bf16.msra.mxu0 %v8076_v10  ;;  %v8696_v10 = vld [vmem:[%s14913_s6 + $0x50] sm:$0xff] }
 0x9ab   : > { %v4192_v54 = vpop.xlane.xlu0 %4191  ;;  %7444 = vmatmul.mubr.msk.f32.gmra.mrb[46].mxu0 %vm2129_vm10, %v8687_v26  ;;  %v4195_v32 = vpop.xlane.xlu1 %4194  ;;  %8078 = vmatprep.subr.bf16.mxu0 %v15406_v31 }
 0x9ac   : > { %v8079_v24 = vpack.c.bf16 %v4192_v54, %v4189_v34  ;;  %7446 = vmatprep.mubr.msk.f32.mxu0 %vm8879_vm9, %v15405_v29  ;;  %v8695_v34 = vld [vmem:[%s14913_s6 + $0x48] sm:$0xff] }
 0x9ae   : > { %8080 = vmatpush3.bf16.msra.mxu0 %v8079_v24 }
 0x9af   : > { %v4198_v12 = vpop.xlane.xlu0 %4197  ;;  %7447 = vmatmul.mubr.msk.f32.gmra.mrb[48].mxu0 %vm2129_vm10, %v8688_v23  ;;  %8081 = vmatprep.subr.bf16.mxu0 %v15406_v31  ;;  %v4201_v1 = vpop.xlane.xlu1 %4200 }
 0x9b0   : > { %v8082_v48 = vpack.c.bf16 %v4198_v12, %v4195_v32  ;;  %7449 = vmatprep.mubr.msk.f32.mxu0 %vm8879_vm9, %v15405_v29 }
 0x9b2   : > { %8083 = vmatpush3.bf16.msra.mxu0 %v8082_v48 }
 0x9b3   : > { %v4204_v9 = vpop.xlane.xlu0 %4203  ;;  %7450 = vmatmul.mubr.msk.f32.gmra.mrb[50].mxu0 %vm2129_vm10, %v8689_v33  ;;  %8084 = vmatprep.subr.bf16.mxu0 %v15406_v31  ;;  %v4207_v5 = vpop.xlane.xlu1 %4206 }
 0x9b4   : > { %v8085_v13 = vpack.c.bf16 %v4204_v9, %v4201_v1  ;;  %7452 = vmatprep.mubr.msk.f32.mxu0 %vm8879_vm9, %v15405_v29 }
 0x9b6   : > { %8086 = vmatpush3.bf16.msra.mxu0 %v8085_v13 }
 0x9b7   : > { %v4210_v14 = vpop.xlane.xlu0 %4209  ;;  %7453 = vmatmul.mubr.msk.f32.gmra.mrb[52].mxu0 %vm2129_vm10, %v8690_v56  ;;  %8087 = vmatprep.subr.bf16.mxu0 %v15406_v31  ;;  %v4213_v38 = vpop.xlane.xlu1 %4212 }
 0x9b8   : > { %v8088_v16 = vpack.c.bf16 %v4210_v14, %v4207_v5  ;;  %7455 = vmatprep.mubr.msk.f32.mxu0 %vm8879_vm9, %v15405_v29 }
 0x9ba   : > { %8089 = vmatpush3.bf16.msra.mxu0 %v8088_v16 }
 0x9bb   : > { %7456 = vmatmul.mubr.msk.f32.gmra.mrb[54].mxu0 %vm2129_vm10, %v8691_v21  ;;  %7493 = vmatprep.subr.mxu0 %v15405_v29 }
 0x9bc   : > { %7458 = vmatprep.mubr.msk.f32.mxu0 %vm8879_vm9, %v15405_v29 }
 0x9be   : > { %7494 = vmatpush3.msra.mxu0 %v4213_v38 }
 0x9bf   : > { %7459 = vmatmul.mubr.msk.f32.gmra.mrb[56].mxu0 %vm2129_vm10, %v8692_v8  ;;  %8286 = vmatprep.subr.bf16.mxu0 %v15406_v31 }
 0x9c0   : > { %7461 = vmatprep.mubr.msk.f32.mxu0 %vm8879_vm9, %v15405_v29 }
 0x9c3   : > { %7462 = vmatmul.mubr.msk.f32.gmra.mrb[58].mxu0 %vm2129_vm10, %v8693_v2 }
 0x9c4   : > { %7464 = vmatprep.mubr.msk.f32.mxu0 %vm8879_vm9, %v15405_v29 }
 0x9c7   : > { %7465 = vmatmul.mubr.msk.f32.gmra.mrb[60].mxu0 %vm2129_vm10, %v8694_v22 }
 0x9c8   : > { %7467 = vmatprep.mubr.msk.f32.mxu0 %vm8879_vm9, %v15405_v29 }
 0x9cb   : > { %7468 = vmatmul.mubr.msk.f32.gmra.mrb[62].mxu0 %vm2129_vm10, %v8695_v34 }
 0x9cc   : > { %7470 = vmatprep.mubr.msk.f32.mxu0 %vm8879_vm9, %v15405_v29 }
 0x9cf   : > { %7471 = vmatmul.mubr.msk.f32.gmra.mrb[64].mxu0 %vm2129_vm10, %v8696_v10 }
 0x9d0   : > { %7495 = vmatprep.mubr.msk.f32.mxu0 %vm8879_vm9, %v15405_v29 }
 0x9d3   : > { %7496 = vmatmul.mubr.msk.f32.vlgmr.msra.gmra.mrb[66].mxu0 %vm2129_vm10, %v8686_v39 }
 0x9d4   : > { %7498 = vmatprep.mubr.msk.f32.mxu0 %vm8879_vm9, %v15405_v29 }
 0x9d7   : > { %7499 = vmatmul.mubr.msk.f32.gmra.mrb[68].mxu0 %vm2129_vm10, %v8687_v26 }
 0x9d8   : > { %7501 = vmatprep.mubr.msk.f32.mxu0 %vm8879_vm9, %v15405_v29 }
 0x9db   : > { %7502 = vmatmul.mubr.msk.f32.gmra.mrb[70].mxu0 %vm2129_vm10, %v8688_v23 }
 0x9dc   : > { %7504 = vmatprep.mubr.msk.f32.mxu0 %vm8879_vm9, %v15405_v29 }
 0x9df   : > { %7505 = vmatmul.mubr.msk.f32.gmra.mrb[72].mxu0 %vm2129_vm10, %v8689_v33 }
 0x9e0   : > { %7507 = vmatprep.mubr.msk.f32.mxu0 %vm8879_vm9, %v15405_v29 }
 0x9e3   : > { %7508 = vmatmul.mubr.msk.f32.gmra.mrb[74].mxu0 %vm2129_vm10, %v8690_v56 }
 0x9e4   : > { %7510 = vmatprep.mubr.msk.f32.mxu0 %vm8879_vm9, %v15405_v29 }
 0x9e7   : > { %7511 = vmatmul.mubr.msk.f32.gmra.mrb[76].mxu0 %vm2129_vm10, %v8691_v21 }
 0x9e8   : > { %7513 = vmatprep.mubr.msk.f32.mxu0 %vm8879_vm9, %v15405_v29 }
 0x9eb   : > { %7514 = vmatmul.mubr.msk.f32.gmra.mrb[78].mxu0 %vm2129_vm10, %v8692_v8 }
 0x9ec   : > { %7516 = vmatprep.mubr.msk.f32.mxu0 %vm8879_vm9, %v15405_v29 }
 0x9ef   : > { %7517 = vmatmul.mubr.msk.f32.gmra.mrb[80].mxu0 %vm2129_vm10, %v8693_v2 }
 0x9f0   : > { %7519 = vmatprep.mubr.msk.f32.mxu0 %vm8879_vm9, %v15405_v29 }
 0x9f3   : > { %7520 = vmatmul.mubr.msk.f32.gmra.mrb[82].mxu0 %vm2129_vm10, %v8694_v22 }
 0x9f4   : > { %7522 = vmatprep.mubr.msk.f32.mxu0 %vm8879_vm9, %v15405_v29 }
 0x9f7   : > { %7523 = vmatmul.mubr.msk.f32.gmra.mrb[84].mxu0 %vm2129_vm10, %v8695_v34 }
 0x9f8   : > { %7525 = vmatprep.mubr.msk.f32.mxu0 %vm8879_vm9, %v15405_v29 }
 0x9fb   : > { %7526 = vmatmul.mubr.msk.f32.gmra.mrb[86].mxu0 %vm2129_vm10, %v8696_v10 }
 0x9fc   : > { %7550 = vmatprep.mubr.msk.f32.mxu0 %vm8879_vm9, %v15405_v29 }
 0xa7a   : > { %v4280_v39 = vpop.f32.mrb[44].mxu0 }
 0xa7b   : > { %4522 = vperm.xlu0 %8619, %v4280_v39   ;;  %v7442_v54 = vpop.f32.mrb[45].mxu0  ;;  %v4454_v10 = vmul.f32 %v4280_v39, %v4280_v39 }
 0xa7e   : > { %v4285_v26 = vpop.f32.mrb[46].mxu0 }
 0xa7f   : > { %4527 = vperm.xlu1 %8618, %v4285_v26   ;;  %v7445_v32 = vpop.f32.mrb[47].mxu0 }
 0xa82   : > { %v4290_v24 = vpop.f32.mrb[48].mxu0 }
 0xa83   : > { %4532 = vperm.xlu1 %8618, %v4290_v24   ;;  %v7448_v12 = vpop.f32.mrb[49].mxu0  ;;  %v4456_v31 = vmul.f32 %v4290_v24, %v4290_v24  ;;  %v4104_v24 = vld [vmem:[%s14916_s9] sm:$0xff] }
 0xa86   : > { %v4295_v23 = vpop.f32.mrb[50].mxu0 }
 0xa87   : > { %4537 = vperm.xlu0 %8619, %v4295_v23   ;;  %v7451_v48 = vpop.f32.mrb[51].mxu0  ;;  %v4457_v18 = vmul.f32 %v4295_v23, %v4295_v23 }
 0xa88   : > { %v4455_v48 = vmul.f32 %v4285_v26, %v4285_v26 }
 0xa8a   : > { %v4300_v1 = vpop.f32.mrb[52].mxu0 }
 0xa8b   : > { %4542 = vperm.xlu1 %8618, %v4300_v1   ;;  %v7454_v9 = vpop.f32.mrb[53].mxu0  ;;  %v4458_v26 = vmul.f32 %v4300_v1, %v4300_v1 }
 0xa8e   : > { %v4305_v33 = vpop.f32.mrb[54].mxu0 }
 0xa8f   : > { %4547 = vperm.xlu0 %8619, %v4305_v33   ;;  %v7457_v13 = vpop.f32.mrb[55].mxu0 }
 0xa92   : > { %v4310_v5 = vpop.f32.mrb[56].mxu0 }
 0xa93   : > { %4552 = vperm.xlu1 %8618, %v4310_v5   ;;  %v7460_v14 = vpop.f32.mrb[57].mxu0 }
 0xa96   : > { %v12864_v56 = vpop.f32.mrb[58].mxu0 }
 0xa97   : > { %4557 = vperm.xlu0 %8619, %v12864_v56   ;;  %v7463_v16 = vpop.f32.mrb[59].mxu0 }
 0xa9a   : > { %v12867_v21 = vpop.f32.mrb[60].mxu0 }
 0xa9b   : > { %4562 = vperm.xlu1 %8618, %v12867_v21   ;;  %v7466_v38 = vpop.f32.mrb[61].mxu0 }
 0xa9e   : > { %v12870_v8 = vpop.f32.mrb[62].mxu0 }
 0xa9f   : > { %4567 = vperm.xlu0 %8619, %v12870_v8   ;;  %v7469_v2 = vpop.f32.mrb[63].mxu0 }
 0xaa2   : > { %v12873_v22 = vpop.f32.mrb[64].mxu0 }
 0xaa3   : > { %4572 = vperm.xlu1 %8618, %v12873_v22   ;;  %v7472_v34 = vpop.f32.mrb[65].mxu0 }
 0xaa6   : > { %v4400_v54 = vpop.f32.mrb[66].mxu0 }
 0xaa7   : > { %v4465_v32 = vsub.f32 %v4400_v54, %v4454_v10  ;;  %v7497_v12 = vpop.f32.mrb[67].mxu0 }
 0xaa9   : > { %v4476_v9 = vmax.f32 %v4465_v32, 0.0 }
 0xaaa   : > { %v4405_v13 = vpop.f32.mrb[68].mxu0 }
 0xaab   : > { %v4487_v14 = vadd.f32 1e-05, %v4476_v9  ;;  %v4466_v16 = vsub.f32 %v4405_v13, %v4455_v48  ;;  %v7500_v38 = vpop.f32.mrb[69].mxu0 }
 0xaac   : > { %v4460_v38 = vmul.f32 %v4310_v5, %v4310_v5  ;;  %v4107_v5 = vld [vmem:[%s14916_s9 + $0x18] sm:$0xff] }
 0xaad   : > { %8642 = vrsqrt.f32 %v4487_v14  ;;  %v4477_v29 = vmax.f32 %v4466_v16, 0.0 }
 0xaae   : > { %v4410_v40 = vpop.f32.mrb[70].mxu0 }
 0xaaf   : > { %v4488_v2 = vadd.f32 1e-05, %v4477_v29  ;;  %v4467_v55 = vsub.f32 %v4410_v40, %v4456_v31  ;;  %v7503_v35 = vpop.f32.mrb[71].mxu0  ;;  %v4459_v31 = vmul.f32 %v4305_v33, %v4305_v33  ;;  %v4106_v33 = vld [vmem:[%s14916_s9 + $0x10] sm:$0xff] }
 0xab1   : > { %8644 = vrsqrt.f32 %v4488_v2  ;;  %v4478_v34 = vmax.f32 %v4467_v55, 0.0 }
 0xab2   : > { %v4415_v39 = vpop.f32.mrb[72].mxu0 }
 0xab3   : > { %v4489_v25 = vadd.f32 1e-05, %v4478_v34  ;;  %v4468_v10 = vsub.f32 %v4415_v39, %v4457_v18  ;;  %v7506_v54 = vpop.f32.mrb[73].mxu0  ;;  %v4105_v18 = vld [vmem:[%s14916_s9 + $0x8] sm:$0xff] }
 0xab5   : > { %8646 = vrsqrt.f32 %v4489_v25  ;;  %v4479_v32 = vmax.f32 %v4468_v10, 0.0 }
 0xab6   : > { %v4420_v12 = vpop.f32.mrb[74].mxu0 }
 0xab7   : > { %v8643_v48 = vpop.eup %8642  ;;  %v4490_v9 = vadd.f32 1e-05, %v4479_v32  ;;  %v4469_v29 = vsub.f32 %v4420_v12, %v4458_v26  ;;  %v7509_v40 = vpop.f32.mrb[75].mxu0 }
 0xab8   : > { %v4509_v35 = vmul.f32 %v8643_v48, %v4104_v24  ;;  %v4461_v24 = vmul.f32 %v12864_v56, %v12864_v56  ;;  %v4108_v56 = vld [vmem:[%s14916_s9 + $0x20] sm:$0xff] }
 0xab9   : > { %8648 = vrsqrt.f32 %v4490_v9  ;;  %v4480_v55 = vmax.f32 %v4469_v29, 0.0 }
 0xaba   : > { %4599 = vperm.xlu1 %8618, %v4509_v35   ;;  %v4425_v25 = vpop.f32.mrb[76].mxu0 }
 0xabb   : > { %v8645_v23 = vpop.eup %8644  ;;  %v4491_v1 = vadd.f32 1e-05, %v4480_v55  ;;  %v4470_v13 = vsub.f32 %v4425_v25, %v4459_v31  ;;  %v7512_v14 = vpop.f32.mrb[77].mxu0  ;;  %v4462_v55 = vmul.f32 %v12867_v21, %v12867_v21  ;;  %v4109_v21 = vld [vmem:[%s14916_s9 + $0x28] sm:$0xff] }
 0xabc   : > { %v4510_v16 = vmul.f32 %v8645_v23, %v4105_v18 }
 0xabd   : > { %8650 = vrsqrt.f32 %v4491_v1  ;;  %v4481_v2 = vmax.f32 %v4470_v13, 0.0 }
 0xabe   : > { %4604 = vperm.xlu0 %8619, %v4510_v16   ;;  %v4430_v34 = vpop.f32.mrb[78].mxu0 }
 0xabf   : > { %v8647_v39 = vpop.eup %8646  ;;  %v4492_v10 = vadd.f32 1e-05, %v4481_v2  ;;  %v4471_v54 = vsub.f32 %v4430_v34, %v4460_v38  ;;  %v7515_v26 = vpop.f32.mrb[79].mxu0  ;;  %v4463_v38 = vmul.f32 %v12870_v8, %v12870_v8  ;;  %v4110_v8 = vld [vmem:[%s14916_s9 + $0x30] sm:$0xff] }
 0xac0   : > { %v4511_v32 = vmul.f32 %v8647_v39, %v4106_v33 }
 0xac1   : > { %8652 = vrsqrt.f32 %v4492_v10  ;;  %v4482_v12 = vmax.f32 %v4471_v54, 0.0 }
 0xac2   : > { %4609 = vperm.xlu1 %8618, %v4511_v32   ;;  %v4435_v48 = vpop.f32.mrb[80].mxu0  ;;  %v4464_v32 = vmul.f32 %v12873_v22, %v12873_v22 }
 0xac3   : > { %v8649_v9 = vpop.eup %8648  ;;  %v4493_v29 = vadd.f32 1e-05, %v4482_v12  ;;  %v4472_v40 = vsub.f32 %v4435_v48, %v4461_v24  ;;  %v7518_v35 = vpop.f32.mrb[81].mxu0 }
 0xac4   : > { %v4512_v31 = vmul.f32 %v8649_v9, %v4107_v5 }
 0xac5   : > { %8654 = vrsqrt.f32 %v4493_v29  ;;  %v4483_v18 = vmax.f32 %v4472_v40, 0.0 }
 0xac6   : > { %4614 = vperm.xlu0 %8619, %v4512_v31   ;;  %v4440_v25 = vpop.f32.mrb[82].mxu0  ;;  %v4111_v31 = vld [vmem:[%s14916_s9 + $0x38] sm:$0xff] }
 0xac7   : > { %v8651_v23 = vpop.eup %8650  ;;  %v4494_v1 = vadd.f32 1e-05, %v4483_v18  ;;  %v4473_v13 = vsub.f32 %v4440_v25, %v4462_v55  ;;  %v7521_v14 = vpop.f32.mrb[83].mxu0 }
 0xac8   : > { %v4513_v16 = vmul.f32 %v8651_v23, %v4108_v56  ;;  %v4112_v56 = vld [vmem:[%s14916_s9 + $0x40] sm:$0xff] }
 0xac9   : > { %8656 = vrsqrt.f32 %v4494_v1  ;;  %v4484_v2 = vmax.f32 %v4473_v13, 0.0  ;;  %v4113_v1 = vld [vmem:[%s14916_s9 + $0x48] sm:$0xff] }
 0xaca   : > { %4619 = vperm.xlu1 %8618, %v4513_v16   ;;  %v4445_v33 = vpop.f32.mrb[84].mxu0  ;;  %v4114_v16 = vld [vmem:[%s14916_s9 + $0x50] sm:$0xff] }
 0xacb   : > { %v8653_v34 = vpop.eup %8652  ;;  %v4495_v39 = vadd.f32 1e-05, %v4484_v2  ;;  %v4474_v10 = vsub.f32 %v4445_v33, %v4463_v38  ;;  %v7524_v54 = vpop.f32.mrb[85].mxu0 }
 0xacc   : > { %v4514_v26 = vmul.f32 %v8653_v34, %v4109_v21  ;;  %v4677_v21 = vpop.permute.xlu1 %4676 }
 0xacd   : > { %8658 = vrsqrt.f32 %v4495_v39  ;;  %v4485_v24 = vmax.f32 %v4474_v10, 0.0  ;;  %v4682_v39 = vpop.permute.xlu0 %4681 }
 0xace   : > { %4624 = vperm.xlu0 %8619, %v4514_v26   ;;  %v4450_v12 = vpop.f32.mrb[86].mxu0 }
 0xacf   : > { %v8655_v5 = vpop.eup %8654  ;;  %v4496_v48 = vadd.f32 1e-05, %v4485_v24  ;;  %v4475_v9 = vsub.f32 %v4450_v12, %v4464_v32  ;;  %v7527_v29 = vpop.f32.mrb[87].mxu0 }
 0xad0   : > { %v4515_v40 = vmul.f32 %v8655_v5, %v4110_v8  ;;  %v12917_v33 = vpop.permute.xlu1 %4686 }
 0xad1   : > { %8660 = vrsqrt.f32 %v4496_v48  ;;  %v4486_v35 = vmax.f32 %v4475_v9, 0.0  ;;  %v12923_v54 = vpop.permute.xlu0 %4691 }
 0xad2   : > { %4629 = vperm.xlu1 %8618, %v4515_v40  }
 0xad3   : > { %v8657_v22 = vpop.eup %8656  ;;  %v4497_v55 = vadd.f32 1e-05, %v4486_v35 }
 0xad4   : > { %v4516_v18 = vmul.f32 %v8657_v22, %v4111_v31  ;;  %v12919_v34 = vpop.permute.xlu1 %4696 }
 0xad5   : > { %8662 = vrsqrt.f32 %v4497_v55  ;;  %v12927_v32 = vpop.permute.xlu0 %4701 }
 0xad6   : > { %4634 = vperm.xlu0 %8619, %v4516_v18  }
 0xad7   : > { %v8659_v25 = vpop.eup %8658 }
 0xad8   : > { %v4517_v23 = vmul.f32 %v8659_v25, %v4112_v56  ;;  %v12921_v10 = vpop.permute.xlu1 %4706 }
 0xad9   : > { %v12931_v8 = vpop.permute.xlu0 %4711 }
 0xada   : > { %4639 = vperm.xlu1 %8618, %v4517_v23  }
 0xadb   : > { %v8661_v13 = vpop.eup %8660 }
 0xadc   : > { %v4518_v14 = vmul.f32 %v8661_v13, %v4113_v1  ;;  %v12925_v26 = vpop.permute.xlu1 %4721 }
 0xadd   : > { %v12933_v5 = vpop.permute.xlu0 %4716 }
 0xade   : > { %4644 = vperm.xlu0 %8619, %v4518_v14  }
 0xadf   : > { %v8663_v38 = vpop.eup %8662 }
 0xae0   : > { %v4519_v2 = vmul.f32 %v8663_v38, %v4114_v16  ;;  %v12929_v24 = vpop.permute.xlu1 %4726 }
 0xae2   : > { %4649 = vperm.xlu0 %8619, %v4519_v2  }
 0xafa   : > { %v4523_v9 = vpop.permute.xlu0 %4522 }
 0xafb   : > { %v4575_v56 = vsub.f32 %v12610_v17, %v4523_v9  ;;  %v4576_v25 = vsub.f32 %v12612_v42, %v4523_v9 }
 0xafe   : > { %v4528_v12 = vpop.permute.xlu1 %4527 }
 0xaff   : > { %v4577_v2 = vsub.f32 %v12616_v0, %v4528_v12  ;;  %v4578_v61 = vsub.f32 %v12618_v50, %v4528_v12 }
 0xb02   : > { %v4533_v48 = vpop.permute.xlu1 %4532 }
 0xb06   : > { %v12937_v40 = vpop.permute.xlu0 %4537 }
 0xb0a   : > { %v12935_v29 = vpop.permute.xlu1 %4542 }
 0xb0e   : > { %v12941_v31 = vpop.permute.xlu0 %4547 }
 0xb12   : > { %v12939_v35 = vpop.permute.xlu1 %4552 }
 0xb16   : > { %v12945_v55 = vpop.permute.xlu0 %4557 }
 0xb1a   : > { %v12943_v22 = vpop.permute.xlu1 %4562 }
 0xb1e   : > { %v12951_v23 = vpop.permute.xlu0 %4567 }
 0xb22   : > { %v12947_v18 = vpop.permute.xlu1 %4572 }
 0xb39   : > { %v4600_v1 = vpop.permute.xlu1 %4599 }
 0xb3a   : > { %v4652_v13 = vmul.f32 %v4600_v1, %v4575_v56  ;;  %v4653_v14 = vmul.f32 %v4600_v1, %v4576_v25 }
 0xb3c   : > { %v4729_v16 = vadd.f32 %v4677_v21, %v4652_v13  ;;  %v4730_v38 = vadd.f32 %v4677_v21, %v4653_v14  ;;  %v4582_v14 = vsub.f32 %v12630_v30, %v12937_v40 }
 0xb3d   : > { %v4605_v28 = vpop.permute.xlu0 %4604 }
 0xb3e   : > { %vm4751_vm13 = vcmp.ge.f32.partialorder %v4729_v16, 0.0  ;;  %vm4752_vm14 = vcmp.ge.f32.partialorder %v4730_v38, 0.0  ;;  %v4773_v44 = vmul.f32 0.01, %v4729_v16  ;;  %v4774_v62 = vmul.f32 0.01, %v4730_v38 }
 0xb3f   : > { %v4654_v20 = vmul.f32 %v4605_v28, %v4577_v2  ;;  %v4655_v9 = vmul.f32 %v4605_v28, %v4578_v61  ;;  %v4579_v28 = vsub.f32 %v12622_v49, %v4533_v48 }
 0xb40   : > { %v12955_v17 = vsel %vm4751_vm13, %v4729_v16, %v4773_v44  ;;  %v12957_v42 = vsel %vm4752_vm14, %v4730_v38, %v4774_v62 }
 0xb41   : > { %15407 = vst [vmem:[#allocation59_spill] sm:$0xff] %v12957_v42  ;;  %v4731_v11 = vadd.f32 %v4682_v39, %v4654_v20  ;;  %4927 = vrot.lane.b32.xlu1 %v12957_v42, %s8870_s13  ;;  %4817 = vrot.lane.b32.xlu0 %v12955_v17, %s8873_s25  ;;  %v4732_v0 = vadd.f32 %v4682_v39, %v4655_v9  ;;  %v4610_v20 = vpop.permute.xlu1 %4609 }
 0xb42   : > { %v4656_v21 = vmul.f32 %v4610_v20, %v4579_v28 }
 0xb43   : > { %v4775_v50 = vmul.f32 0.01, %v4731_v11  ;;  %vm4753_vm15 = vcmp.ge.f32.partialorder %v4731_v11, 0.0  ;;  %v4776_v44 = vmul.f32 0.01, %v4732_v0  ;;  %vm4754_vm11 = vcmp.ge.f32.partialorder %v4732_v0, 0.0 }
 0xb44   : > { %v4733_v12 = vadd.f32 %v12917_v33, %v4656_v21 }
 0xb45   : > { %5103 = vrot.lane.b32.xlu1 %v12957_v42, %s8869_s14  ;;  %4839 = vrot.lane.b32.xlu0 %v12957_v42, %s8873_s25  ;;  %v12967_v62 = vsel %vm4753_vm15, %v4731_v11, %v4775_v50  ;;  %v12974_v61 = vsel %vm4754_vm11, %v4732_v0, %v4776_v44  ;;  %v4580_v11 = vsub.f32 %v12624_v60, %v4533_v48  ;;  %v4615_v25 = vpop.permute.xlu0 %4614 }
 0xb46   : > { %v4777_v56 = vmul.f32 0.01, %v4733_v12  ;;  %vm4755_vm12 = vcmp.ge.f32.partialorder %v4733_v12, 0.0  ;;  %v4659_v16 = vmul.f32 %v4615_v25, %v4582_v14  ;;  %v4584_v44 = vsub.f32 %v12636_v47, %v12935_v29 }
 0xb47   : > { %v4657_v39 = vmul.f32 %v4610_v20, %v4580_v11 }
 0xb48   : > { %v12991_v48 = vsel %vm4755_vm12, %v4733_v12, %v4777_v56 }
 0xb49   : > { %4819 = vrot.lane.b32.xlu1 %v12967_v62, %s8873_s25  ;;  %4905 = vrot.lane.b32.xlu0 %v12955_v17, %s8870_s13  ;;  %v4734_v49 = vadd.f32 %v12917_v33, %v4657_v39  ;;  %v4581_v33 = vsub.f32 %v12628_v41, %v12937_v40  ;;  %v4736_v41 = vadd.f32 %v12923_v54, %v4659_v16  ;;  %v4620_v9 = vpop.permute.xlu1 %4619 }
 0xb4a   : > { %v4661_v20 = vmul.f32 %v4620_v9, %v4584_v44  ;;  %v4588_v16 = vsub.f32 %v12648_v58, %v12939_v35 }
 0xb4b   : > { %v4778_v60 = vmul.f32 0.01, %v4734_v49  ;;  %vm4756_vm13 = vcmp.ge.f32.partialorder %v4734_v49, 0.0  ;;  %v4658_v13 = vmul.f32 %v4615_v25, %v4581_v33  ;;  %v4780_v30 = vmul.f32 0.01, %v4736_v41 }
 0xb4c   : > { %vm4758_vm15 = vcmp.ge.f32.partialorder %v4736_v41, 0.0 }
 0xb4d   : > { %4841 = vrot.lane.b32.xlu1 %v12974_v61, %s8873_s25  ;;  %4993 = vrot.lane.b32.xlu0 %v12955_v17, %s8874_s23  ;;  %v12999_v1 = vsel %vm4756_vm13, %v4734_v49, %v4778_v60  ;;  %v4735_v38 = vadd.f32 %v12923_v54, %v4658_v13  ;;  %v4583_v54 = vsub.f32 %v12634_v57, %v12935_v29  ;;  %v4625_v11 = vpop.permute.xlu0 %4624 }
 0xb4e   : > { %v13025_v0 = vsel %vm4758_vm15, %v4736_v41, %v4780_v30  ;;  %v4738_v57 = vadd.f32 %v12919_v34, %v4661_v20  ;;  %v4586_v49 = vsub.f32 %v12642_v59, %v12941_v31 }
 0xb4f   : > { %v4779_v2 = vmul.f32 0.01, %v4735_v38  ;;  %vm4757_vm14 = vcmp.ge.f32.partialorder %v4735_v38, 0.0  ;;  %v4660_v50 = vmul.f32 %v4620_v9, %v4583_v54 }
 0xb50   : > { %v4782_v47 = vmul.f32 0.01, %v4738_v57  ;;  %vm4760_vm12 = vcmp.ge.f32.partialorder %v4738_v57, 0.0  ;;  %v4663_v56 = vmul.f32 %v4625_v11, %v4586_v49 }
 0xb51   : > { %4995 = vrot.lane.b32.xlu1 %v12967_v62, %s8874_s23  ;;  %5015 = vrot.lane.b32.xlu0 %v12957_v42, %s8874_s23  ;;  %v13017_v40 = vsel %vm4757_vm14, %v4735_v38, %v4779_v2  ;;  %v4737_v28 = vadd.f32 %v12919_v34, %v4660_v50  ;;  %v4585_v34 = vsub.f32 %v12640_v37, %v12941_v31  ;;  %v4630_v33 = vpop.permute.xlu1 %4629 }
 0xb52   : > { %v13051_v39 = vsel %vm4760_vm12, %v4738_v57, %v4782_v47  ;;  %v4740_v37 = vadd.f32 %v12927_v32, %v4663_v56  ;;  %v4665_v38 = vmul.f32 %v4630_v33, %v4588_v16  ;;  %v4590_v50 = vsub.f32 %v12654_v19, %v12945_v55 }
 0xb53   : > { %v4781_v21 = vmul.f32 0.01, %v4737_v28  ;;  %vm4759_vm11 = vcmp.ge.f32.partialorder %v4737_v28, 0.0  ;;  %15409 = vst [vmem:[#allocation60_spill] sm:$0xff] %v13051_v39  ;;  %v4662_v12 = vmul.f32 %v4625_v11, %v4585_v34  ;;  %v4592_v34 = vsub.f32 %v12660_v53, %v12943_v22 }
 0xb54   : > { %v4784_v59 = vmul.f32 0.01, %v4740_v37  ;;  %vm4762_vm14 = vcmp.ge.f32.partialorder %v4740_v37, 0.0 }
 0xb55   : > { %5017 = vrot.lane.b32.xlu1 %v12974_v61, %s8874_s23  ;;  %5081 = vrot.lane.b32.xlu0 %v12955_v17, %s8869_s14  ;;  %v13043_v29 = vsel %vm4759_vm11, %v4737_v28, %v4781_v21  ;;  %v4739_v60 = vadd.f32 %v12927_v32, %v4662_v12  ;;  %v4587_v32 = vsub.f32 %v12646_v45, %v12939_v35  ;;  %v4635_v30 = vpop.permute.xlu0 %4634 }
 0xb56   : > { %15408 = vst [vmem:[#allocation45_spill] sm:$0xff] %v13043_v29  ;;  %v13077_v13 = vsel %vm4762_vm14, %v4740_v37, %v4784_v59  ;;  %v4742_v45 = vadd.f32 %v12921_v10, %v4665_v38  ;;  %v4667_v44 = vmul.f32 %v4635_v30, %v4590_v50 }
 0xb57   : > { %v4783_v25 = vmul.f32 0.01, %v4739_v60  ;;  %vm4761_vm13 = vcmp.ge.f32.partialorder %v4739_v60, 0.0  ;;  %v4664_v14 = vmul.f32 %v4630_v33, %v4587_v32 }
 0xb58   : > { %v4786_v58 = vmul.f32 0.01, %v4742_v45  ;;  %vm4764_vm11 = vcmp.ge.f32.partialorder %v4742_v45, 0.0 }
 0xb59   : > { %4907 = vrot.lane.b32.xlu0 %v12967_v62, %s8870_s13  ;;  %4909 = vrot.lane.b32.xlu1 %v12991_v48, %s8870_s13  ;;  %v13069_v31 = vsel %vm4761_vm13, %v4739_v60, %v4783_v25  ;;  %v4741_v41 = vadd.f32 %v12921_v10, %v4664_v14  ;;  %v4589_v10 = vsub.f32 %v12652_v43, %v12945_v55  ;;  %v4640_v57 = vpop.permute.xlu1 %4639 }
 0xb5a   : > { %15410 = vst [vmem:[#allocation36_spill] sm:$0xff] %v13069_v31  ;;  %v13103_v9 = vsel %vm4764_vm11, %v4742_v45, %v4786_v58  ;;  %v4744_v43 = vadd.f32 %v12931_v8, %v4667_v44  ;;  %v4669_v49 = vmul.f32 %v4640_v57, %v4592_v34 }
 0xb5b   : > { %v4785_v2 = vmul.f32 0.01, %v4741_v41  ;;  %vm4763_vm15 = vcmp.ge.f32.partialorder %v4741_v41, 0.0  ;;  %15412 = vst [vmem:[#allocation68_spill] sm:$0xff] %v13103_v9  ;;  %v4666_v54 = vmul.f32 %v4635_v30, %v4589_v10 }
 0xb5c   : > { %v4788_v19 = vmul.f32 0.01, %v4744_v43  ;;  %vm4766_vm13 = vcmp.ge.f32.partialorder %v4744_v43, 0.0  ;;  %v4746_v37 = vadd.f32 %v12933_v5, %v4669_v49 }
 0xb5d   : > { %4929 = vrot.lane.b32.xlu0 %v12974_v61, %s8870_s13  ;;  %4931 = vrot.lane.b32.xlu1 %v12999_v1, %s8870_s13  ;;  %v13095_v35 = vsel %vm4763_vm15, %v4741_v41, %v4785_v2  ;;  %v4743_v20 = vadd.f32 %v12931_v8, %v4666_v54  ;;  %v4645_v21 = vpop.permute.xlu0 %4644  ;;  %v4591_v8 = vsub.f32 %v12658_v3, %v12943_v22 }
 0xb5e   : > { %15411 = vst [vmem:[#allocation62_spill] sm:$0xff] %v13095_v35  ;;  %v13129_v47 = vsel %vm4766_vm13, %v4744_v43, %v4788_v19  ;;  %v4790_v59 = vmul.f32 0.01, %v4746_v37  ;;  %vm4768_vm15 = vcmp.ge.f32.partialorder %v4746_v37, 0.0  ;;  %v4594_v41 = vsub.f32 %v12666_v46, %v12951_v23 }
 0xb5f   : > { %v4787_v28 = vmul.f32 0.01, %v4743_v20  ;;  %vm4765_vm12 = vcmp.ge.f32.partialorder %v4743_v20, 0.0  ;;  %v4668_v11 = vmul.f32 %v4640_v57, %v4591_v8 }
 0xb60   : > { %v13163_v16 = vsel %vm4768_vm15, %v4746_v37, %v4790_v59  ;;  %v4671_v2 = vmul.f32 %v4645_v21, %v4594_v41  ;;  %v4595_v41 = vsub.f32 %v12674_v51, %v12947_v18 }
 0xb61   : > { %5083 = vrot.lane.b32.xlu0 %v12967_v62, %s8869_s14  ;;  %5085 = vrot.lane.b32.xlu1 %v12991_v48, %s8869_s14  ;;  %v13121_v55 = vsel %vm4765_vm12, %v4743_v20, %v4787_v28  ;;  %v13137_v12 = vpop.permute.xlu0 %4649  ;;  %v4745_v56 = vadd.f32 %v12933_v5, %v4668_v11  ;;  %v4593_v5 = vsub.f32 %v12664_v7, %v12951_v23 }
 0xb63   : > { %v4789_v25 = vmul.f32 0.01, %v4745_v56  ;;  %vm4767_vm14 = vcmp.ge.f32.partialorder %v4745_v56, 0.0  ;;  %v4670_v38 = vmul.f32 %v4645_v21, %v4593_v5  ;;  %v4748_v21 = vadd.f32 %v12925_v26, %v4671_v2 }
 0xb65   : > { %5105 = vrot.lane.b32.xlu0 %v12974_v61, %s8869_s14  ;;  %5107 = vrot.lane.b32.xlu1 %v12999_v1, %s8869_s14  ;;  %v13153_v33 = vsel %vm4767_vm14, %v4745_v56, %v4789_v25  ;;  %v4747_v10 = vadd.f32 %v12925_v26, %v4670_v38  ;;  %v4792_v49 = vmul.f32 0.01, %v4748_v21  ;;  %vm4770_vm12 = vcmp.ge.f32.partialorder %v4748_v21, 0.0 }
 0xb67   : > { %v4791_v8 = vmul.f32 0.01, %v4747_v10  ;;  %vm4769_vm11 = vcmp.ge.f32.partialorder %v4747_v10, 0.0  ;;  %v13213_v37 = vsel %vm4770_vm12, %v4748_v21, %v4792_v49 }
 0xb68   : > { %15415 = vst [vmem:[#allocation33_spill] sm:$0xff] %v13213_v37 }
 0xb69   : > { %4823 = vrot.lane.b32.xlu1 %v13017_v40, %s8873_s25  ;;  %4821 = vrot.lane.b32.xlu0 %v12991_v48, %s8873_s25  ;;  %v13203_v56 = vsel %vm4769_vm11, %v4747_v10, %v4791_v8 }
 0xb6d   : > { %4845 = vrot.lane.b32.xlu1 %v13025_v0, %s8873_s25  ;;  %4843 = vrot.lane.b32.xlu0 %v12999_v1, %s8873_s25 }
 0xb71   : > { %4999 = vrot.lane.b32.xlu1 %v13017_v40, %s8874_s23  ;;  %4997 = vrot.lane.b32.xlu0 %v12991_v48, %s8874_s23 }
 0xb75   : > { %5021 = vrot.lane.b32.xlu1 %v13025_v0, %s8874_s23  ;;  %5019 = vrot.lane.b32.xlu0 %v12999_v1, %s8874_s23 }
 0xb79   : > { %4911 = vrot.lane.b32.xlu0 %v13017_v40, %s8870_s13  ;;  %4913 = vrot.lane.b32.xlu1 %v13043_v29, %s8870_s13 }
 0xb7d   : > { %4933 = vrot.lane.b32.xlu0 %v13025_v0, %s8870_s13  ;;  %4935 = vrot.lane.b32.xlu1 %v13051_v39, %s8870_s13 }
 0xb81   : > { %5087 = vrot.lane.b32.xlu0 %v13017_v40, %s8869_s14  ;;  %5089 = vrot.lane.b32.xlu1 %v13043_v29, %s8869_s14 }
 0xb85   : > { %5109 = vrot.lane.b32.xlu0 %v13025_v0, %s8869_s14  ;;  %5111 = vrot.lane.b32.xlu1 %v13051_v39, %s8869_s14 }
 0xb89   : > { %4827 = vrot.lane.b32.xlu1 %v13069_v31, %s8873_s25  ;;  %4825 = vrot.lane.b32.xlu0 %v13043_v29, %s8873_s25 }
 0xb8d   : > { %4849 = vrot.lane.b32.xlu1 %v13077_v13, %s8873_s25  ;;  %4847 = vrot.lane.b32.xlu0 %v13051_v39, %s8873_s25 }
 0xb91   : > { %5003 = vrot.lane.b32.xlu1 %v13069_v31, %s8874_s23  ;;  %5001 = vrot.lane.b32.xlu0 %v13043_v29, %s8874_s23 }
 0xb95   : > { %5025 = vrot.lane.b32.xlu1 %v13077_v13, %s8874_s23  ;;  %5023 = vrot.lane.b32.xlu0 %v13051_v39, %s8874_s23 }
 0xb99   : > { %4915 = vrot.lane.b32.xlu0 %v13069_v31, %s8870_s13  ;;  %4917 = vrot.lane.b32.xlu1 %v13095_v35, %s8870_s13 }
 0xb9d   : > { %4937 = vrot.lane.b32.xlu0 %v13077_v13, %s8870_s13  ;;  %4939 = vrot.lane.b32.xlu1 %v13103_v9, %s8870_s13 }
 0xba1   : > { %5091 = vrot.lane.b32.xlu0 %v13069_v31, %s8869_s14  ;;  %5093 = vrot.lane.b32.xlu1 %v13095_v35, %s8869_s14 }
 0xba5   : > { %5113 = vrot.lane.b32.xlu0 %v13077_v13, %s8869_s14  ;;  %5115 = vrot.lane.b32.xlu1 %v13103_v9, %s8869_s14 }
 0xba9   : > { %4831 = vrot.lane.b32.xlu1 %v13121_v55, %s8873_s25  ;;  %4829 = vrot.lane.b32.xlu0 %v13095_v35, %s8873_s25 }
 0xbad   : > { %4853 = vrot.lane.b32.xlu1 %v13129_v47, %s8873_s25  ;;  %4851 = vrot.lane.b32.xlu0 %v13103_v9, %s8873_s25 }
 0xbb1   : > { %5007 = vrot.lane.b32.xlu1 %v13121_v55, %s8874_s23  ;;  %5005 = vrot.lane.b32.xlu0 %v13095_v35, %s8874_s23 }
 0xbb3   : > { %v4818_v3 = vpop.permute.xlu0 %4817  ;;  %v13144_v60 = vpop.permute.xlu1 %4927 }
 0xbb5   : > { %5029 = vrot.lane.b32.xlu1 %v13129_v47, %s8874_s23  ;;  %5027 = vrot.lane.b32.xlu0 %v13103_v9, %s8874_s23 }
 0xbb7   : > { %v4840_v53 = vpop.permute.xlu0 %4839  ;;  %v13151_v22 = vpop.permute.xlu1 %5103 }
 0xbb8   : > { %15413 = vst [vmem:[#allocation38_spill] sm:$0xff] %v13151_v22  ;;  %v4872_v45 = vsel %vm724_vm4, %v4840_v53, %v4818_v3  ;;  %v4861_v7 = vsel %vm724_vm4, %v4818_v3, %v4840_v53 }
 0xbb9   : > { %4919 = vrot.lane.b32.xlu0 %v13121_v55, %s8870_s13  ;;  %4921 = vrot.lane.b32.xlu1 %v13153_v33, %s8870_s13  ;;  %v4883_v46 = vmul.f32 %v4872_v45, %v15279_v52  ;;  %v4884_v50 = vmul.f32 %v4861_v7, %v15280_v15  ;;  %v4596_v45 = vsub.f32 %v12676_v63, %v12947_v18 }
 0xbba   : > { %v4672_v7 = vmul.f32 %v13137_v12, %v4595_v41 }
 0xbbb   : > { %v13161_v32 = vpop.permute.xlu0 %4905  ;;  %v4820_v14 = vpop.permute.xlu1 %4819  ;;  %v4673_v2 = vmul.f32 %v13137_v12, %v4596_v45 }
 0xbbc   : > { %v4749_v51 = vadd.f32 %v12929_v24, %v4672_v7 }
 0xbbd   : > { %4941 = vrot.lane.b32.xlu0 %v13129_v47, %s8870_s13  ;;  %4943 = vrot.lane.b32.xlu1 %v13163_v16, %s8870_s13  ;;  %v4750_v63 = vadd.f32 %v12929_v24, %v4673_v2 }
 0xbbe   : > { %v4793_v45 = vmul.f32 0.01, %v4749_v51  ;;  %vm4771_vm14 = vcmp.ge.f32.partialorder %v4749_v51, 0.0 }
 0xbbf   : > { %v13175_v58 = vpop.permute.xlu0 %4993  ;;  %v4842_v30 = vpop.permute.xlu1 %4841  ;;  %v4794_v41 = vmul.f32 0.01, %v4750_v63  ;;  %vm4772_vm13 = vcmp.ge.f32.partialorder %v4750_v63, 0.0 }
 0xbc0   : > { %v4862_v23 = vsel %vm724_vm4, %v4820_v14, %v4842_v30  ;;  %v4873_v54 = vsel %vm724_vm4, %v4842_v30, %v4820_v14 }
 0xbc1   : > { %v4885_v44 = vmul.f32 %v4873_v54, %v15279_v52  ;;  %v4886_v20 = vmul.f32 %v4862_v23, %v15280_v15  ;;  %5095 = vrot.lane.b32.xlu0 %v13121_v55, %s8869_s14  ;;  %5097 = vrot.lane.b32.xlu1 %v13153_v33, %s8869_s14 }
 0xbc3   : > { %v8092_v43 = vpack.c.bf16 %v4885_v44, %v4883_v46  ;;  %v13190_v28 = vpop.permute.xlu0 %5015  ;;  %v13192_v19 = vpop.permute.xlu1 %4995  ;;  %v8090_v57 = vpack.c.bf16 %v4886_v20, %v4884_v50 }
 0xbc5   : > { %5117 = vrot.lane.b32.xlu0 %v13129_v47, %s8869_s14  ;;  %5119 = vrot.lane.b32.xlu1 %v13163_v16, %s8869_s14 }
 0xbc6   : > { %8091 = vmatprep.subr.bf16.mxu1 %v8090_v57 }
 0xbc7   : > { %8093 = vmatpush1.bf16.msra.mxu1 %v8092_v43  ;;  %v13199_v11 = vpop.permute.xlu0 %5081  ;;  %v13201_v34 = vpop.permute.xlu1 %5017 }
 0xbc8   : > { %15414 = vst [vmem:[#allocation69_spill] sm:$0xff] %v13199_v11 }
 0xbc9   : > { %4835 = vrot.lane.b32.xlu1 %v13203_v56, %s8873_s25  ;;  %4833 = vrot.lane.b32.xlu0 %v13153_v33, %s8873_s25 }
 0xbcb   : > { %v13209_v26 = vpop.permute.xlu0 %4907  ;;  %v13211_v3 = vpop.permute.xlu1 %4909 }
 0xbcd   : > { %4857 = vrot.lane.b32.xlu1 %v13213_v37, %s8873_s25  ;;  %4855 = vrot.lane.b32.xlu0 %v13163_v16, %s8873_s25 }
 0xbcf   : > { %v13219_v25 = vpop.permute.xlu0 %4929  ;;  %v13221_v53 = vpop.permute.xlu1 %4931 }
 0xbd1   : > { %5011 = vrot.lane.b32.xlu1 %v13203_v56, %s8874_s23  ;;  %5009 = vrot.lane.b32.xlu0 %v13153_v33, %s8874_s23 }
 0xbd3   : > { %v13227_v59 = vpop.permute.xlu0 %5083  ;;  %v13229_v5 = vpop.permute.xlu1 %5085 }
 0xbd4   : > { %15416 = vst [vmem:[#allocation43_spill] sm:$0xff] %v13227_v59  ;;  %15417 = vst [vmem:[#allocation41_spill] sm:$0xff] %v13229_v5 }
 0xbd5   : > { %5033 = vrot.lane.b32.xlu1 %v13213_v37, %s8874_s23  ;;  %5031 = vrot.lane.b32.xlu0 %v13163_v16, %s8874_s23 }
 0xbd7   : > { %v13235_v14 = vpop.permute.xlu0 %5105  ;;  %v13237_v38 = vpop.permute.xlu1 %5107 }
 0xbd8   : > { %15418 = vst [vmem:[#allocation42_spill] sm:$0xff] %v13235_v14  ;;  %15419 = vst [vmem:[#allocation76_spill] sm:$0xff] %v13237_v38 }
 0xbd9   : > { %5191 = vrot.lane.b32.xlu1 %v12957_v42, %s8872_s18  ;;  %4923 = vrot.lane.b32.xlu0 %v13203_v56, %s8870_s13 }
 0xbdb   : > { %v4822_v30 = vpop.permute.xlu0 %4821  ;;  %v4824_v10 = vpop.permute.xlu1 %4823 }
 0xbdd   : > { %5173 = vrot.lane.b32.xlu1 %v12991_v48, %s8872_s18  ;;  %4945 = vrot.lane.b32.xlu0 %v13213_v37, %s8870_s13 }
 0xbdf   : > { %v4844_v18 = vpop.permute.xlu0 %4843  ;;  %v4846_v46 = vpop.permute.xlu1 %4845 }
 0xbe0   : > { %v4863_v23 = vsel %vm724_vm4, %v4822_v30, %v4844_v18  ;;  %v4874_v12 = vsel %vm724_vm4, %v4844_v18, %v4822_v30  ;;  %v4864_v54 = vsel %vm724_vm4, %v4824_v10, %v4846_v46  ;;  %v4875_v50 = vsel %vm724_vm4, %v4846_v46, %v4824_v10 }
 0xbe1   : > { %v4887_v44 = vmul.f32 %v4874_v12, %v15279_v52  ;;  %v4888_v20 = vmul.f32 %v4863_v23, %v15280_v15  ;;  %v4889_v24 = vmul.f32 %v4875_v50, %v15279_v52  ;;  %v4890_v43 = vmul.f32 %v4864_v54, %v15280_v15  ;;  %5195 = vrot.lane.b32.xlu1 %v12999_v1, %s8872_s18 }
 0xbe2   : > { %5099 = vrot.lane.b32.xlu0 %v13203_v56, %s8869_s14  ;;  %v13283_v30 = vsel %vm4772_vm13, %v4750_v63, %v4794_v41  ;;  %v13285_v10 = vsel %vm4771_vm14, %v4749_v51, %v4793_v45 }
 0xbe3   : > { %v8096_v57 = vpack.c.bf16 %v4889_v24, %v4887_v44  ;;  %v13271_v21 = vpop.permute.xlu0 %4997  ;;  %v13273_v8 = vpop.permute.xlu1 %4999  ;;  %v8094_v49 = vpack.c.bf16 %v4890_v43, %v4888_v20 }
 0xbe4   : > { %15420 = vst [vmem:[#allocation78_spill] sm:$0xff] %v13273_v8 }
 0xbe5   : > { %5177 = vrot.lane.b32.xlu1 %v13043_v29, %s8872_s18  ;;  %8095 = vmatprep.subr.bf16.mxu1 %v8094_v49 }
 0xbe6   : > { %5121 = vrot.lane.b32.xlu0 %v13213_v37, %s8869_s14  ;;  %8097 = vmatpush1.bf16.msra.mxu1 %v8096_v57 }
 0xbe7   : > { %v13279_v7 = vpop.permute.xlu0 %5019  ;;  %v13281_v2 = vpop.permute.xlu1 %5021 }
 0xbe9   : > { %4859 = vrot.lane.b32.xlu1 %v13283_v30, %s8873_s25 }
 0xbea   : > { %4837 = vrot.lane.b32.xlu0 %v13285_v10, %s8873_s25 }
 0xbeb   : > { %v13291_v18 = vpop.permute.xlu0 %4911  ;;  %v13293_v46 = vpop.permute.xlu1 %4913 }
 0xbed   : > { %5199 = vrot.lane.b32.xlu1 %v13051_v39, %s8872_s18 }
 0xbee   : > { %5169 = vrot.lane.b32.xlu0 %v12955_v17, %s8872_s18 }
 0xbef   : > { %v13299_v63 = vpop.permute.xlu0 %4933  ;;  %v13301_v51 = vpop.permute.xlu1 %4935 }
 0xbf1   : > { %5181 = vrot.lane.b32.xlu1 %v13095_v35, %s8872_s18 }
 0xbf2   : > { %5171 = vrot.lane.b32.xlu0 %v12967_v62, %s8872_s18 }
 0xbf3   : > { %v13307_v23 = vpop.permute.xlu0 %5087  ;;  %v13309_v12 = vpop.permute.xlu1 %5089 }
 0xbf4   : > { %15421 = vst [vmem:[#allocation75_spill] sm:$0xff] %v13307_v23  ;;  %15422 = vst [vmem:[#allocation77_spill] sm:$0xff] %v13309_v12 }
 0xbf5   : > { %5203 = vrot.lane.b32.xlu1 %v13103_v9, %s8872_s18 }
 0xbf6   : > { %5193 = vrot.lane.b32.xlu0 %v12974_v61, %s8872_s18 }
 0xbf7   : > { %v13315_v54 = vpop.permute.xlu0 %5109  ;;  %v13317_v50 = vpop.permute.xlu1 %5111 }
 0xbf8   : > { %15423 = vst [vmem:[#allocation57_spill] sm:$0xff] %v13315_v54  ;;  %15424 = vst [vmem:[#allocation65_spill] sm:$0xff] %v13317_v50 }
 0xbf9   : > { %4925 = vrot.lane.b32.xlu1 %v13285_v10, %s8870_s13 }
 0xbfa   : > { %5175 = vrot.lane.b32.xlu0 %v13017_v40, %s8872_s18 }
 0xbfb   : > { %v4826_v44 = vpop.permute.xlu0 %4825  ;;  %v4828_v20 = vpop.permute.xlu1 %4827 }
 0xbfd   : > { %4947 = vrot.lane.b32.xlu1 %v13283_v30, %s8870_s13  ;;  %s15515_s13 = sld [smem:[#allocation93_spill]] }
 0xbfe   : > { %5197 = vrot.lane.b32.xlu0 %v13025_v0, %s8872_s18 }
 0xbff   : > { %v4848_v24 = vpop.permute.xlu0 %4847  ;;  %v4850_v43 = vpop.permute.xlu1 %4849 }
 0xc00   : > { %v4865_v57 = vsel %vm724_vm4, %v4826_v44, %v4848_v24  ;;  %v4876_v49 = vsel %vm724_vm4, %v4848_v24, %v4826_v44  ;;  %v4866_v41 = vsel %vm724_vm4, %v4828_v20, %v4850_v43  ;;  %v4877_v45 = vsel %vm724_vm4, %v4850_v43, %v4828_v20 }
 0xc01   : > { %v4891_v12 = vmul.f32 %v4876_v49, %v15279_v52  ;;  %v4892_v50 = vmul.f32 %v4865_v57, %v15280_v15  ;;  %v4893_v23 = vmul.f32 %v4877_v45, %v15279_v52  ;;  %v4894_v54 = vmul.f32 %v4866_v41, %v15280_v15  ;;  %5185 = vrot.lane.b32.xlu1 %v13153_v33, %s8872_s18 }
 0xc02   : > { %5179 = vrot.lane.b32.xlu0 %v13069_v31, %s8872_s18 }
 0xc03   : > { %v8100_v44 = vpack.c.bf16 %v4893_v23, %v4891_v12  ;;  %v13343_v24 = vpop.permute.xlu0 %5001  ;;  %v13345_v5 = vpop.permute.xlu1 %5003  ;;  %v8098_v20 = vpack.c.bf16 %v4894_v54, %v4892_v50  ;;  %v5522_v54 = vld [vmem:[#allocation7 + $0x8] sm:$0xff] }
 0xc04   : > { %15425 = vst [vmem:[#allocation89_spill] sm:$0xff] %v13343_v24  ;;  %15426 = vst [vmem:[#allocation87_spill] sm:$0xff] %v13345_v5  ;;  %5695 = vmatprep.mubr.f32.mxu1 %v5522_v54 }
 0xc05   : > { %5207 = vrot.lane.b32.xlu1 %v13163_v16, %s8872_s18  ;;  %8099 = vmatprep.subr.bf16.mxu1 %v8098_v20 }
 0xc06   : > { %5201 = vrot.lane.b32.xlu0 %v13077_v13, %s8872_s18  ;;  %8101 = vmatpush1.bf16.msra.mxu1 %v8100_v44 }
 0xc07   : > { %v13351_v43 = vpop.permute.xlu0 %5023  ;;  %v13353_v57 = vpop.permute.xlu1 %5025 }
 0xc08   : > { %15427 = vst [vmem:[#allocation47_spill] sm:$0xff] %v13351_v43  ;;  %15428 = vst [vmem:[#allocation61_spill] sm:$0xff] %v13353_v57 }
 0xc09   : > { %5259 = vrot.lane.b32.xlu1 %v12967_v62, %s8875_s16 }
 0xc0a   : > { %5183 = vrot.lane.b32.xlu0 %v13121_v55, %s8872_s18 }
 0xc0b   : > { %v13359_v23 = vpop.permute.xlu0 %4915  ;;  %v13361_v12 = vpop.permute.xlu1 %4917 }
 0xc0d   : > { %5281 = vrot.lane.b32.xlu1 %v12974_v61, %s8875_s16 }
 0xc0e   : > { %5205 = vrot.lane.b32.xlu0 %v13129_v47, %s8872_s18 }
 0xc0f   : > { %v13367_v50 = vpop.permute.xlu0 %4937  ;;  %v13369_v49 = vpop.permute.xlu1 %4939 }
 0xc11   : > { %5263 = vrot.lane.b32.xlu1 %v13017_v40, %s8875_s16 }
 0xc12   : > { %5187 = vrot.lane.b32.xlu0 %v13203_v56, %s8872_s18 }
 0xc13   : > { %v13375_v41 = vpop.permute.xlu0 %5091  ;;  %v13377_v45 = vpop.permute.xlu1 %5093 }
 0xc14   : > { %15429 = vst [vmem:[#allocation52_spill] sm:$0xff] %v13375_v41  ;;  %15430 = vst [vmem:[#allocation29_spill] sm:$0xff] %v13377_v45 }
 0xc15   : > { %5035 = vrot.lane.b32.xlu1 %v13283_v30, %s8874_s23 }
 0xc16   : > { %5013 = vrot.lane.b32.xlu0 %v13285_v10, %s8874_s23 }
 0xc17   : > { %v13383_v44 = vpop.permute.xlu0 %5113  ;;  %v13385_v20 = vpop.permute.xlu1 %5115 }
 0xc18   : > { %15431 = vst [vmem:[#allocation50_spill] sm:$0xff] %v13383_v44  ;;  %15432 = vst [vmem:[#allocation67_spill] sm:$0xff] %v13385_v20 }
 0xc19   : > { %5285 = vrot.lane.b32.xlu1 %v13025_v0, %s8875_s16 }
 0xc1a   : > { %5209 = vrot.lane.b32.xlu0 %v13213_v37, %s8872_s18 }
 0xc1b   : > { %v4830_v54 = vpop.permute.xlu0 %4829  ;;  %v4832_v41 = vpop.permute.xlu1 %4831 }
 0xc1d   : > { %5267 = vrot.lane.b32.xlu1 %v13069_v31, %s8875_s16 }
 0xc1e   : > { %5257 = vrot.lane.b32.xlu0 %v12955_v17, %s8875_s16 }
 0xc1f   : > { %v4852_v45 = vpop.permute.xlu0 %4851  ;;  %v4854_v38 = vpop.permute.xlu1 %4853 }
 0xc20   : > { %v4867_v44 = vsel %vm724_vm4, %v4830_v54, %v4852_v45  ;;  %v4878_v20 = vsel %vm724_vm4, %v4852_v45, %v4830_v54  ;;  %v4868_v59 = vsel %vm724_vm4, %v4832_v41, %v4854_v38  ;;  %v4879_v14 = vsel %vm724_vm4, %v4854_v38, %v4832_v41 }
 0xc21   : > { %v4895_v11 = vmul.f32 %v4878_v20, %v15279_v52  ;;  %v4896_v22 = vmul.f32 %v4867_v44, %v15280_v15  ;;  %v4897_v5 = vmul.f32 %v4879_v14, %v15279_v52  ;;  %v4898_v57 = vmul.f32 %v4868_v59, %v15280_v15  ;;  %5289 = vrot.lane.b32.xlu1 %v13077_v13, %s8875_s16 }
 0xc22   : > { %5279 = vrot.lane.b32.xlu0 %v12957_v42, %s8875_s16 }
 0xc23   : > { %v8104_v45 = vpack.c.bf16 %v4897_v5, %v4895_v11  ;;  %v13411_v54 = vpop.permute.xlu0 %5005  ;;  %v13413_v24 = vpop.permute.xlu1 %5007  ;;  %v8102_v38 = vpack.c.bf16 %v4898_v57, %v4896_v22 }
 0xc24   : > { %15433 = vst [vmem:[#allocation53_spill] sm:$0xff] %v13411_v54  ;;  %15434 = vst [vmem:[#allocation54_spill] sm:$0xff] %v13413_v24 }
 0xc25   : > { %5101 = vrot.lane.b32.xlu1 %v13285_v10, %s8869_s14  ;;  %8103 = vmatprep.subr.bf16.mxu1 %v8102_v38 }
 0xc26   : > { %5261 = vrot.lane.b32.xlu0 %v12991_v48, %s8875_s16  ;;  %8105 = vmatpush1.bf16.msra.mxu1 %v8104_v45 }
 0xc27   : > { %v13419_v59 = vpop.permute.xlu0 %5027  ;;  %v13421_v14 = vpop.permute.xlu1 %5029 }
 0xc28   : > { %15435 = vst [vmem:[#allocation55_spill] sm:$0xff] %v13419_v59  ;;  %15436 = vst [vmem:[#allocation56_spill] sm:$0xff] %v13421_v14 }
 0xc29   : > { %5123 = vrot.lane.b32.xlu1 %v13283_v30, %s8869_s14  ;;  %s15447_s14 = smov 111  }
 0xc2a   : > { %5283 = vrot.lane.b32.xlu0 %v12999_v1, %s8875_s16 }
 0xc2b   : > { %v13427_v11 = vpop.permute.xlu0 %4919  ;;  %v13429_v22 = vpop.permute.xlu1 %4921 }
 0xc2d   : > { %5271 = vrot.lane.b32.xlu1 %v13121_v55, %s8875_s16 }
 0xc2e   : > { %5265 = vrot.lane.b32.xlu0 %v13043_v29, %s8875_s16 }
 0xc2f   : > { %v13435_v5 = vpop.permute.xlu0 %4941  ;;  %v13437_v57 = vpop.permute.xlu1 %4943 }
 0xc31   : > { %5293 = vrot.lane.b32.xlu1 %v13129_v47, %s8875_s16 }
 0xc32   : > { %5287 = vrot.lane.b32.xlu0 %v13051_v39, %s8875_s16 }
 0xc33   : > { %v13443_v41 = vpop.permute.xlu0 %5095  ;;  %v13445_v44 = vpop.permute.xlu1 %5097 }
 0xc34   : > { %15437 = vst [vmem:[#allocation39_spill] sm:$0xff] %v13443_v41  ;;  %15438 = vst [vmem:[#allocation73_spill] sm:$0xff] %v13445_v44 }
 0xc35   : > { %5275 = vrot.lane.b32.xlu1 %v13203_v56, %s8875_s16 }
 0xc36   : > { %5269 = vrot.lane.b32.xlu0 %v13095_v35, %s8875_s16 }
 0xc37   : > { %v13451_v20 = vpop.permute.xlu0 %5117  ;;  %v13453_v45 = vpop.permute.xlu1 %5119 }
 0xc38   : > { %15439 = vst [vmem:[#allocation72_spill] sm:$0xff] %v13451_v20  ;;  %15440 = vst [vmem:[#allocation74_spill] sm:$0xff] %v13453_v45 }
 0xc39   : > { %5297 = vrot.lane.b32.xlu1 %v13213_v37, %s8875_s16 }
 0xc3a   : > { %5291 = vrot.lane.b32.xlu0 %v13103_v9, %s8875_s16 }
 0xc3b   : > { %v4836_v38 = vpop.permute.xlu1 %4835  ;;  %v4834_v41 = vpop.permute.xlu0 %4833 }
 0xc3d   : > { %5367 = vrot.lane.b32.xlu1 %v12957_v42, %s8871_s28 }
 0xc3e   : > { %5273 = vrot.lane.b32.xlu0 %v13153_v33, %s8875_s16 }
 0xc3f   : > { %v4858_v44 = vpop.permute.xlu1 %4857  ;;  %v4856_v24 = vpop.permute.xlu0 %4855 }
 0xc40   : > { %v4870_v20 = vsel %vm724_vm4, %v4836_v38, %v4858_v44  ;;  %v4881_v45 = vsel %vm724_vm4, %v4858_v44, %v4836_v38  ;;  %v4869_v14 = vsel %vm724_vm4, %v4834_v41, %v4856_v24  ;;  %v4880_v54 = vsel %vm724_vm4, %v4856_v24, %v4834_v41 }
 0xc41   : > { %v4901_v59 = vmul.f32 %v4881_v45, %v15279_v52  ;;  %v4902_v42 = vmul.f32 %v4870_v20, %v15280_v15  ;;  %5349 = vrot.lane.b32.xlu1 %v12991_v48, %s8871_s28  ;;  %v4899_v43 = vmul.f32 %v4880_v54, %v15279_v52  ;;  %v4900_v37 = vmul.f32 %v4869_v14, %v15280_v15 }
 0xc42   : > { %5295 = vrot.lane.b32.xlu0 %v13163_v16, %s8875_s16 }
 0xc43   : > { %v13479_v44 = vpop.permute.xlu1 %5011  ;;  %v8108_v38 = vpack.c.bf16 %v4901_v59, %v4899_v43  ;;  %v13481_v8 = vpop.permute.xlu0 %5009  ;;  %v8106_v24 = vpack.c.bf16 %v4902_v42, %v4900_v37 }
 0xc45   : > { %5371 = vrot.lane.b32.xlu1 %v12999_v1, %s8871_s28  ;;  %8107 = vmatprep.subr.bf16.mxu1 %v8106_v24  ;;  %v4949_v24 = vsel %vm520_vm0, %v13161_v32, %v13144_v60 }
 0xc46   : > { %5345 = vrot.lane.b32.xlu0 %v12955_v17, %s8871_s28  ;;  %8109 = vmatpush1.bf16.msra.mxu1 %v8108_v38 }
 0xc47   : > { %v13487_v54 = vpop.permute.xlu1 %5033  ;;  %v13489_v14 = vpop.permute.xlu0 %5031 }
 0xc49   : > { %5353 = vrot.lane.b32.xlu1 %v13043_v29, %s8871_s28 }
 0xc4a   : > { %5347 = vrot.lane.b32.xlu0 %v12967_v62, %s8871_s28 }
 0xc4b   : > { %v13495_v43 = vpop.permute.xlu1 %5191  ;;  %v13497_v42 = vpop.permute.xlu0 %4923 }
 0xc4c   : > { %15441 = vst [vmem:[#allocation84_spill] sm:$0xff] %v13495_v43 }
 0xc4d   : > { %5375 = vrot.lane.b32.xlu1 %v13051_v39, %s8871_s28 }
 0xc4e   : > { %5369 = vrot.lane.b32.xlu0 %v12974_v61, %s8871_s28 }
 0xc4f   : > { %v13503_v37 = vpop.permute.xlu1 %5173  ;;  %v13505_v59 = vpop.permute.xlu0 %4945 }
 0xc50   : > { %15442 = vst [vmem:[#allocation86_spill] sm:$0xff] %v13503_v37  ;;  %v4951_v37 = vsel %vm520_vm0, %v13211_v3, %v13221_v53 }
 0xc51   : > { %5189 = vrot.lane.b32.xlu1 %v13285_v10, %s8872_s18  ;;  %v4976_v29 = vmul.f32 %v4951_v37, %v15402_v36 }
 0xc52   : > { %5351 = vrot.lane.b32.xlu0 %v13017_v40, %s8871_s28 }
 0xc53   : > { %v13511_v41 = vpop.permute.xlu1 %5195 }
 0xc54   : > { %15443 = vst [vmem:[#allocation83_spill] sm:$0xff] %v13511_v41  ;;  %v13513_v20 = vpop.permute.xlu0 %5099  ;;  %v4960_v41 = vsel %vm520_vm0, %v13144_v60, %v13161_v32  ;;  %v4972_v60 = vmul.f32 %v4949_v24, %v15402_v36  ;;  %v4961_v32 = vsel %vm520_vm0, %v13219_v25, %v13209_v26 }
 0xc55   : > { %15444 = vst [vmem:[#allocation85_spill] sm:$0xff] %v13513_v20  ;;  %5211 = vrot.lane.b32.xlu1 %v13283_v30, %s8872_s18  ;;  %v4971_v20 = vmul.f32 %v4960_v41, %v15401_v27  ;;  %s475_s18 = sand.u32 1, %s8854_s26  }
 0xc56   : > { %5373 = vrot.lane.b32.xlu0 %v13025_v0, %s8871_s28  ;;  %s7059_s25 = sshll.u32 %s475_s18, 4  ;;  %s6945_s21 = scalar_lea.sflag [#allocation4], %s475_s18 }
 0xc57   : > { %v13519_v45 = vpop.permute.xlu1 %5177  ;;  %s477_s23 = scalar_lea.vmem [#allocation8], %s7059_s25 }
 0xc58   : > { %15445 = vst [vmem:[#allocation28_spill] sm:$0xff] %v13519_v45  ;;  %v13521_v38 = vpop.permute.xlu0 %5121  ;;  %v4950_v45 = vsel %vm520_vm0, %v13209_v26, %v13219_v25  ;;  %v4952_v26 = vsel %vm520_vm0, %v13291_v18, %v13299_v63 }
 0xc59   : > { %15446 = vst [vmem:[#allocation63_spill] sm:$0xff] %v13521_v38  ;;  %5357 = vrot.lane.b32.xlu1 %v13095_v35, %s8871_s28  ;;  %v4962_v38 = vsel %vm520_vm0, %v13221_v53, %v13211_v3  ;;  %v4974_v39 = vmul.f32 %v4950_v45, %v15402_v36  ;;  %v4953_v3 = vsel %vm520_vm0, %v13293_v46, %v13301_v51 }
 0xc5a   : > { %5355 = vrot.lane.b32.xlu0 %v13069_v31, %s8871_s28  ;;  %v4975_v37 = vmul.f32 %v4962_v38, %v15401_v27 }
 0xc5b   : > { %v4860_v43 = vpop.permute.xlu1 %4859 }
 0xc5c   : > { %v4838_v35 = vpop.permute.xlu0 %4837 }
 0xc5d   : > { %v4871_v41 = vsel %vm724_vm4, %v4838_v35, %v4860_v43  ;;  %v4882_v24 = vsel %vm724_vm4, %v4860_v43, %v4838_v35  ;;  %5379 = vrot.lane.b32.xlu1 %v13103_v9, %s8871_s28  ;;  %v4973_v43 = vmul.f32 %v4961_v32, %v15401_v27  ;;  %v4980_v32 = vmul.f32 %v4953_v3, %v15402_v36 }
 0xc5e   : > { %v4903_v25 = vmul.f32 %v4882_v24, %v15279_v52  ;;  %v4904_v53 = vmul.f32 %v4871_v41, %v15280_v15  ;;  %5377 = vrot.lane.b32.xlu0 %v13077_v13, %s8871_s28  ;;  %v4963_v52 = vsel %vm520_vm0, %v13299_v63, %v13291_v18  ;;  %v4978_v15 = vmul.f32 %v4952_v26, %v15402_v36 }
 0xc5f   : > { %v13573_v35 = vpop.permute.xlu1 %5199  ;;  %v4964_v41 = vsel %vm520_vm0, %v13301_v51, %v13293_v46  ;;  %v4954_v18 = vsel %vm520_vm0, %v13359_v23, %v13367_v50  ;;  %v4955_v46 = vsel %vm520_vm0, %v13361_v12, %v13369_v49  ;;  %v4977_v51 = vmul.f32 %v4963_v52, %v15401_v27 }
 0xc60   : > { %v8112_v45 = vpack.c.bf16 %v4971_v20, %v4903_v25  ;;  %v13577_v9 = vpop.permute.xlu0 %5169  ;;  %v8110_v31 = vpack.c.bf16 %v4972_v60, %v4904_v53  ;;  %v8114_v20 = vpack.c.bf16 %v4976_v29, %v4974_v39  ;;  %v4979_v38 = vmul.f32 %v4964_v41, %v15401_v27 }
 0xc61   : > { %5361 = vrot.lane.b32.xlu1 %v13153_v33, %s8871_s28  ;;  %v8116_v29 = vpack.c.bf16 %v4975_v37, %v4973_v43  ;;  %v8118_v39 = vpack.c.bf16 %v4980_v32, %v4978_v15  ;;  %v4982_v24 = vmul.f32 %v4954_v18, %v15402_v36  ;;  %v4966_v26 = vsel %vm520_vm0, %v13369_v49, %v13361_v12 }
 0xc62   : > { %5359 = vrot.lane.b32.xlu0 %v13121_v55, %s8871_s28  ;;  %8111 = vmatprep.subr.bf16.mxu1 %v8110_v31  ;;  %v4965_v31 = vsel %vm520_vm0, %v13367_v50, %v13359_v23  ;;  %v4984_v3 = vmul.f32 %v4955_v46, %v15402_v36  ;;  %v4956_v25 = vsel %vm520_vm0, %v13427_v11, %v13435_v5 }
 0xc63   : > { %8113 = vmatpush1.bf16.msra.mxu1 %v8112_v45  ;;  %v13601_v63 = vpop.permute.xlu1 %5181  ;;  %v4957_v23 = vsel %vm520_vm0, %v13429_v22, %v13437_v57  ;;  %v8120_v53 = vpack.c.bf16 %v4979_v38, %v4977_v51  ;;  %v4981_v49 = vmul.f32 %v4965_v31, %v15401_v27  ;;  %v4983_v43 = vmul.f32 %v4966_v26, %v15401_v27 }
 0xc64   : > { %v13605_v60 = vpop.permute.xlu0 %5171  ;;  %8115 = vmatprep.subr.bf16.mxu1 %v8114_v20  ;;  %v4967_v37 = vsel %vm520_vm0, %v13435_v5, %v13427_v11  ;;  %v4968_v45 = vsel %vm520_vm0, %v13437_v57, %v13429_v22  ;;  %v4986_v52 = vmul.f32 %v4956_v25, %v15402_v36  ;;  %v4988_v15 = vmul.f32 %v4957_v23, %v15402_v36 }
 0xc65   : > { %5383 = vrot.lane.b32.xlu1 %v13163_v16, %s8871_s28  ;;  %v8122_v41 = vpack.c.bf16 %v4984_v3, %v4982_v24  ;;  %v4985_v11 = vmul.f32 %v4967_v37, %v15401_v27  ;;  %v4987_v5 = vmul.f32 %v4968_v45, %v15401_v27  ;;  %v8124_v22 = vpack.c.bf16 %v4983_v43, %v4981_v49  ;;  %v15449_v43 = vld [vmem:[#allocation33_spill] sm:$0xff] }
 0xc66   : > { %5381 = vrot.lane.b32.xlu0 %v13129_v47, %s8871_s28  ;;  %v4958_v57 = vsel %vm520_vm0, %v13497_v42, %v13505_v59  ;;  %v4969_v18 = vsel %vm520_vm0, %v13505_v59, %v13497_v42  ;;  %v8126_v46 = vpack.c.bf16 %v4988_v15, %v4986_v52  ;;  %v5037_v51 = vsel %vm904_vm5, %v13175_v58, %v13190_v28  ;;  %v15450_v15 = vld [vmem:[#allocation71_spill] sm:$0xff] }
 0xc67   : > { %8117 = vmatpush1.bf16.msra.mxu1 %v8116_v29  ;;  %v13629_v50 = vpop.permute.xlu1 %5203  ;;  %v5038_v38 = vsel %vm904_vm5, %v13192_v19, %v13201_v34  ;;  %v5049_v42 = vsel %vm904_vm5, %v13201_v34, %v13192_v19  ;;  %v8128_v59 = vpack.c.bf16 %v4987_v5, %v4985_v11  ;;  %v4989_v26 = vmul.f32 %v4969_v18, %v15401_v27 }
 0xc68   : > { %v13631_v12 = vpop.permute.xlu0 %5193  ;;  %8119 = vmatprep.subr.bf16.mxu1 %v8118_v39  ;;  %v4990_v3 = vmul.f32 %v4958_v57, %v15402_v36  ;;  %v5062_v19 = vmul.f32 %v5038_v38, %v15403_v6  ;;  %v5039_v34 = vsel %vm904_vm5, %v13271_v21, %v13279_v7  ;;  %v5048_v45 = vsel %vm904_vm5, %v13190_v28, %v13175_v58  ;;  %v15452_v57 = vld [vmem:[#allocation89_spill] sm:$0xff] }
 0xc69   : > { %5435 = vrot.lane.b32.xlu1 %v12967_v62, %s15447_s14  ;;  %v5060_v52 = vmul.f32 %v5037_v51, %v15403_v6  ;;  %v5064_v5 = vmul.f32 %v5039_v34, %v15403_v6  ;;  %v15454_v51 = vld [vmem:[#allocation87_spill] sm:$0xff]  ;;  %v15456_v34 = vld [vmem:[#allocation53_spill] sm:$0xff] }
 0xc6a   : > { %5363 = vrot.lane.b32.xlu0 %v13203_v56, %s8871_s28 }
 0xc6b   : > { %8121 = vmatpush1.bf16.msra.mxu1 %v8120_v53  ;;  %v4926_v32 = vpop.permute.xlu1 %4925  ;;  %v15448_v53 = vld [vmem:[#allocation78_spill] sm:$0xff]  ;;  %v8134_v28 = vpack.c.bf16 %v5062_v19, %v5060_v52  ;;  %v15455_v19 = vld [vmem:[#allocation55_spill] sm:$0xff] }
 0xc6c   : > { %v13651_v20 = vpop.permute.xlu0 %5175  ;;  %8123 = vmatprep.subr.bf16.mxu1 %v8122_v41  ;;  %v5040_v49 = vsel %vm904_vm5, %v15448_v53, %v13281_v2  ;;  %v5061_v41 = vmul.f32 %v5049_v42, %v15450_v15 }
 0xc6d   : > { %5299 = vrot.lane.b32.xlu1 %v13283_v30, %s8875_s16  ;;  %v5066_v58 = vmul.f32 %v5040_v49, %v15403_v6  ;;  %v15457_v49 = vld [vmem:[#allocation56_spill] sm:$0xff] }
 0xc6e   : > { %5277 = vrot.lane.b32.xlu0 %v13285_v10, %s8875_s16  ;;  %s6959_s16 = sshll.u32 %s477_s23, 4  ;;  %s14862_s16 = int_to_ptr.vmem [resolvable:$true] %s6959_s16 }
 0xc6f   : > { %8125 = vmatpush1.bf16.msra.mxu1 %v8124_v22  ;;  %v4948_v29 = vpop.permute.xlu1 %4947  ;;  %v5051_v22 = vsel %vm904_vm5, %v13281_v2, %v15448_v53  ;;  %v5043_v53 = vsel %vm904_vm5, %v15456_v34, %v15455_v19  ;;  %s8792_s15 = scalar_lea.vmem %s14862_s16, 256  ;;  %p8799_p13 = scmp.lt.s32.totalorder %s14862_s16, %s8797_s27 }
 0xc70   : > { %v13677_v39 = vpop.permute.xlu0 %5197  ;;  %8127 = vmatprep.subr.bf16.mxu1 %v8126_v46  ;;  %v4959_v31 = vsel %vm520_vm0, %v4926_v32, %v4948_v29  ;;  %v4970_v24 = vsel %vm520_vm0, %v4948_v29, %v4926_v32  ;;  %v5050_v32 = vsel %vm904_vm5, %v13279_v7, %v13271_v21  ;;  %v5059_v21 = vmul.f32 %v5048_v45, %v15450_v15  ;;  %v15451_v7 = vld [vmem:[#allocation47_spill] sm:$0xff]  ;;  %v15453_v46 = vld [vmem:[#allocation61_spill] sm:$0xff]  ;;  %p8793_p12 = scmp.ne.s32.totalorder %s14862_s16, %s8792_s15  ;;  %p8800_p1 = scmp.lt.s32.totalorder %s8798_s22, %s8792_s15 }
 0xc71   : > { %v4991_v25 = vmul.f32 %v4970_v24, %v15401_v27  ;;  %v4992_v23 = vmul.f32 %v4959_v31, %v15402_v36  ;;  %5457 = vrot.lane.b32.xlu1 %v12974_v61, %s15447_s14  ;;  %v5041_v18 = vsel %vm904_vm5, %v15452_v57, %v15451_v7  ;;  %v5042_v2 = vsel %vm904_vm5, %v15454_v51, %v15453_v46  ;;  %v15459_v45 = vld [vmem:[#allocation59_spill] sm:$0xff] }
 0xc72   : > { %5385 = vrot.lane.b32.xlu0 %v15449_v43, %s8871_s28  ;;  %v5063_v29 = vmul.f32 %v5050_v32, %v15450_v15  ;;  %v5065_v42 = vmul.f32 %v5051_v22, %v15450_v15  ;;  %v8136_v31 = vpack.c.bf16 %v5061_v41, %v5059_v21  ;;  %v5052_v24 = vsel %vm904_vm5, %v15451_v7, %v15452_v57  ;;  %p8801_p6 = por %p8800_p1, %p8799_p13 }
 0xc73   : > { %v8132_v27 = vpack.c.bf16 %v4991_v25, %v4989_v26  ;;  %8129 = vmatpush1.bf16.msra.mxu1 %v8128_v59  ;;  %v13700_v36 = vpop.permute.xlu1 %5185  ;;  %v8130_v37 = vpack.c.bf16 %v4992_v23, %v4990_v3  ;;  %v5053_v26 = vsel %vm904_vm5, %v15453_v46, %v15454_v51  ;;  %v8138_v3 = vpack.c.bf16 %v5066_v58, %v5064_v5 }
 0xc74   : > { %v13712_v11 = vpop.permute.xlu0 %5179  ;;  %v5068_v25 = vmul.f32 %v5041_v18, %v15403_v6  ;;  %v5070_v23 = vmul.f32 %v5042_v2, %v15403_v6  ;;  %v8140_v41 = vpack.c.bf16 %v5065_v42, %v5063_v29  ;;  %v5067_v5 = vmul.f32 %v5052_v24, %v15450_v15 }
 0xc75   : > { %5439 = vrot.lane.b32.xlu1 %v13017_v40, %s15447_s14  ;;  %8131 = vmatprep.subr.bf16.mxu1 %v8130_v37  ;;  %v5069_v22 = vmul.f32 %v5053_v26, %v15450_v15  ;;  %v5072_v58 = vmul.f32 %v5043_v53, %v15403_v6  ;;  %v5054_v21 = vsel %vm904_vm5, %v15455_v19, %v15456_v34  ;;  %v15463_v34 = vld [vmem:[#allocation38_spill] sm:$0xff]  ;;  %v15464_v53 = vld [vmem:[#allocation69_spill] sm:$0xff] }
 0xc76   : > { %5433 = vrot.lane.b32.xlu0 %v12955_v17, %s15447_s14  ;;  %v8142_v57 = vpack.c.bf16 %v5070_v23, %v5068_v25  ;;  %v5045_v18 = vsel %vm904_vm5, %v13481_v8, %v13489_v14  ;;  %v5046_v46 = vsel %vm904_vm5, %v13479_v44, %v13487_v54  ;;  %v5071_v42 = vmul.f32 %v5054_v21, %v15450_v15  ;;  %v15469_v21 = vld [vmem:[#allocation76_spill] sm:$0xff] }
 0xc77   : > { %8133 = vmatpush1.bf16.msra.mxu1 %v8132_v27  ;;  %v13733_v38 = vpop.permute.xlu1 %5207  ;;  %v15458_v27 = vld [vmem:[#allocation54_spill] sm:$0xff]  ;;  %v8144_v29 = vpack.c.bf16 %v5069_v22, %v5067_v5  ;;  %v5056_v26 = vsel %vm904_vm5, %v13489_v14, %v13481_v8  ;;  %v5057_v25 = vsel %vm904_vm5, %v13487_v54, %v13479_v44  ;;  %v5078_v23 = vmul.f32 %v5046_v46, %v15403_v6  ;;  %v15471_v46 = vld [vmem:[#allocation21_spill] sm:$0xff] }
 0xc78   : > { %v13737_v59 = vpop.permute.xlu0 %5201  ;;  %8135 = vmatprep.subr.bf16.mxu1 %v8134_v28  ;;  %v5044_v37 = vsel %vm904_vm5, %v15458_v27, %v15457_v49  ;;  %v5055_v7 = vsel %vm904_vm5, %v15457_v49, %v15458_v27  ;;  %v5125_v8 = vsel %vm564_vm1, %v15464_v53, %v15463_v34  ;;  %v5136_v44 = vsel %vm564_vm1, %v15463_v34, %v15464_v53  ;;  %v15467_v22 = vld [vmem:[#allocation42_spill] sm:$0xff] }
 0xc79   : > { %5461 = vrot.lane.b32.xlu1 %v13025_v0, %s15447_s14  ;;  %v5074_v28 = vmul.f32 %v5044_v37, %v15403_v6  ;;  %v5075_v49 = vmul.f32 %v5056_v26, %v15450_v15  ;;  %v5077_v27 = vmul.f32 %v5057_v25, %v15450_v15  ;;  %v15465_v37 = vld [vmem:[#allocation36_spill] sm:$0xff] }
 0xc7a   : > { %5455 = vrot.lane.b32.xlu0 %v15459_v45, %s15447_s14 }
 0xc7b   : > { %8137 = vmatpush1.bf16.msra.mxu1 %v8136_v31  ;;  %v13761_v52 = vpop.permute.xlu1 %5259  ;;  %v5073_v31 = vmul.f32 %v5055_v7, %v15450_v15  ;;  %v8146_v24 = vpack.c.bf16 %v5074_v28, %v5072_v58  ;;  %v15468_v58 = vld [vmem:[#allocation43_spill] sm:$0xff]  ;;  %v15470_v7 = vld [vmem:[#allocation41_spill] sm:$0xff]  ;;  %v8152_v25 = vpack.c.bf16 %v5077_v27, %v5075_v49 }
 0xc7c   : > { %15460 = vst [vmem:[#allocation35_spill] sm:$0xff] %v13761_v52  ;;  %v13763_v32 = vpop.permute.xlu0 %5183  ;;  %8139 = vmatprep.subr.bf16.mxu1 %v8138_v3  ;;  %v5076_v3 = vmul.f32 %v5045_v18, %v15403_v6  ;;  %v5126_v28 = vsel %vm564_vm1, %v15468_v58, %v15467_v22  ;;  %v15475_v27 = vld [vmem:[#allocation57_spill] sm:$0xff] }
 0xc7d   : > { %5365 = vrot.lane.b32.xlu1 %v13285_v10, %s8871_s28  ;;  %v8148_v54 = vpack.c.bf16 %v5073_v31, %v5071_v42  ;;  %v15472_v42 = vld [vmem:[#allocation22_spill] sm:$0xff] }
 0xc7e   : > { %5437 = vrot.lane.b32.xlu0 %v12991_v48, %s15447_s14  ;;  %v8150_v5 = vpack.c.bf16 %v5078_v23, %v5076_v3  ;;  %v5148_v31 = vmul.f32 %v5125_v8, %v15472_v42  ;;  %v5138_v3 = vsel %vm564_vm1, %v15469_v21, %v15470_v7  ;;  %v5150_v53 = vmul.f32 %v5126_v28, %v15472_v42 }
 0xc7f   : > { %8141 = vmatpush1.bf16.msra.mxu1 %v8140_v41  ;;  %v13789_v51 = vpop.permute.xlu1 %5281  ;;  %v15466_v41 = vld [vmem:[#allocation45_spill] sm:$0xff] }
 0xc80   : > { %15461 = vst [vmem:[#allocation51_spill] sm:$0xff] %v13789_v51  ;;  %v13791_v2 = vpop.permute.xlu0 %5205  ;;  %8143 = vmatprep.subr.bf16.mxu1 %v8142_v57  ;;  %v5127_v57 = vsel %vm564_vm1, %v15470_v7, %v15469_v21  ;;  %v15477_v21 = vld [vmem:[#allocation65_spill] sm:$0xff] }
 0xc81   : > { %5387 = vrot.lane.b32.xlu1 %v13283_v30, %s8871_s28  ;;  %v5152_v8 = vmul.f32 %v5127_v57, %v15472_v42  ;;  %v15478_v7 = vld [vmem:[#allocation77_spill] sm:$0xff]  ;;  %s15516_s28 = sld [smem:[#allocation17_spill]] }
 0xc82   : > { %5459 = vrot.lane.b32.xlu0 %v12999_v1, %s15447_s14  ;;  %v5129_v28 = vsel %vm564_vm1, %v15478_v7, %v15477_v21 }
 0xc83   : > { %8145 = vmatpush1.bf16.msra.mxu1 %v8144_v29  ;;  %v13809_v19 = vpop.permute.xlu1 %5263  ;;  %v5147_v29 = vmul.f32 %v5136_v44, %v15471_v46 }
 0xc84   : > { %15462 = vst [vmem:[#allocation32_spill] sm:$0xff] %v13809_v19  ;;  %v13815_v14 = vpop.permute.xlu0 %5187  ;;  %8147 = vmatprep.subr.bf16.mxu1 %v8146_v24  ;;  %v5137_v24 = vsel %vm564_vm1, %v15467_v22, %v15468_v58  ;;  %v15476_v22 = vld [vmem:[#allocation75_spill] sm:$0xff] }
 0xc85   : > { %5443 = vrot.lane.b32.xlu1 %v15465_v37, %s15447_s14  ;;  %v5128_v58 = vsel %vm564_vm1, %v15476_v22, %v15475_v27 }
 0xc86   : > { %5441 = vrot.lane.b32.xlu0 %v15466_v41, %s15447_s14 }
 0xc87   : > { %8149 = vmatpush1.bf16.msra.mxu1 %v8148_v54  ;;  %v5036_v18 = vpop.permute.xlu1 %5035  ;;  %p15518_p7 = scmp.ne.s32.totalorder %s15516_s28, 0 }
 0xc88   : > { %v5014_v26 = vpop.permute.xlu0 %5013  ;;  %8151 = vmatprep.subr.bf16.mxu1 %v8150_v5  ;;  %v15473_v5 = vld [vmem:[#allocation60_spill] sm:$0xff] }
 0xc89   : > { %v5047_v23 = vsel %vm904_vm5, %v5014_v26, %v5036_v18  ;;  %v5058_v34 = vsel %vm904_vm5, %v5036_v18, %v5014_v26  ;;  %5465 = vrot.lane.b32.xlu1 %v13077_v13, %s15447_s14  ;;  %v5521_v18 = vld [vmem:[#allocation7] sm:$0xff]  ;;  %v5149_v26 = vmul.f32 %v5137_v24, %v15471_v46  ;;  %v8158_v24 = vpack.c.bf16 %v5152_v8, %v5150_v53  ;;  %v5528_v53 = vld [vmem:[#allocation7 + $0x38] sm:$0xff]  ;;  %p8794_p8 = pnand %p8793_p12, %p15518_p7 }
 0xc8a   : > { %v5079_v44 = vmul.f32 %v5058_v34, %v15450_v15  ;;  %v5080_v54 = vmul.f32 %v5047_v23, %v15403_v6  ;;  %5463 = vrot.lane.b32.xlu0 %v15473_v5, %s15447_s14  ;;  %v5529_v23 = vld [vmem:[#allocation7 + $0x40] sm:$0xff]  ;;  %v5139_v34 = vsel %vm564_vm1, %v15475_v27, %v15476_v22  ;;  %v15482_v27 = vld [vmem:[#allocation67_spill] sm:$0xff]  ;;  %v15483_v22 = vld [vmem:[#allocation29_spill] sm:$0xff] }
 0xc8b   : > { %8153 = vmatpush1.bf16.msra.mxu1 %v8152_v25  ;;  %v13857_v49 = vpop.permute.xlu1 %5285  ;;  %v5151_v25 = vmul.f32 %v5138_v3, %v15471_v46  ;;  %v5154_v3 = vmul.f32 %v5128_v58, %v15472_v42  ;;  %v5131_v51 = vsel %vm564_vm1, %v15483_v22, %v15482_v27  ;;  %v5153_v58 = vmul.f32 %v5139_v34, %v15471_v46  ;;  %p8795_p11 = pneg %p8794_p8 }
 0xc8c   : > { %15474 = vst [vmem:[#allocation49_spill] sm:$0xff] %v13857_v49  ;;  %v8156_v57 = vpack.c.bf16 %v5147_v29, %v5079_v44  ;;  %v13867_v15 = vpop.permute.xlu0 %5209  ;;  %v8154_v6 = vpack.c.bf16 %v5148_v31, %v5080_v54  ;;  %v5140_v29 = vsel %vm564_vm1, %v15477_v21, %v15478_v7  ;;  %v15479_v31 = vld [vmem:[#allocation62_spill] sm:$0xff]  ;;  %v5156_v44 = vmul.f32 %v5129_v28, %v15472_v42  ;;  %v15481_v49 = vld [vmem:[#allocation52_spill] sm:$0xff] }
 0xc8d   : > { %5447 = vrot.lane.b32.xlu1 %v13121_v55, %s15447_s14  ;;  %v15480_v54 = vld [vmem:[#allocation50_spill] sm:$0xff]  ;;  %v8160_v8 = vpack.c.bf16 %v5151_v25, %v5149_v26  ;;  %v5155_v28 = vmul.f32 %v5140_v29, %v15471_v46  ;;  %v5142_v26 = vsel %vm564_vm1, %v15482_v27, %v15483_v22  ;;  %v5160_v25 = vmul.f32 %v5131_v51, %v15472_v42  ;;  %v5535_v51 = vld [vmem:[#allocation7 + $0x70] sm:$0xff]  ;;  %p8802_p9 = pnand %p8801_p6, %p8795_p11 }
 0xc8e   : > { %5445 = vrot.lane.b32.xlu0 %v15479_v31, %s15447_s14  ;;  %8155 = vmatprep.subr.bf16.mxu1 %v8154_v6  ;;  %v5130_v19 = vsel %vm564_vm1, %v15481_v49, %v15480_v54  ;;  %v5536_v6 = vld [vmem:[#allocation7 + $0x78] sm:$0xff]  ;;  %v8162_v34 = vpack.c.bf16 %v5156_v44, %v5154_v3  ;;  %v5159_v44 = vmul.f32 %v5142_v26, %v15471_v46  ;;  %v5543_v22 = vld [vmem:[#allocation7 + $0xb0] sm:$0xff] }
 0xc8f   : > { %5696 = vmatmul.mubr.f32.vlgmr.msra.gmra.mrb[66].mxu1 %v5521_v18  ;;  %v13893_v21 = vpop.permute.xlu1 %5267  ;;  %v5141_v18 = vsel %vm564_vm1, %v15480_v54, %v15481_v49  ;;  %v15490_v54 = vld [vmem:[#allocation73_spill] sm:$0xff] }
 0xc90   : > { %15484 = vst [vmem:[#allocation37_spill] sm:$0xff] %v13893_v21  ;;  %8157 = vmatpush1.bf16.msra.mxu1 %v8156_v57  ;;  %v13895_v7 = vpop.permute.xlu0 %5257  ;;  %5701 = vmatprep.mubr.f32.mxu1 %v5529_v23  ;;  %v5158_v57 = vmul.f32 %v5130_v19, %v15472_v42  ;;  %v15485_v23 = vld [vmem:[#allocation68_spill] sm:$0xff]  ;;  %v15488_v21 = vld [vmem:[#allocation39_spill] sm:$0xff]  ;;  %v15489_v19 = vld [vmem:[#allocation74_spill] sm:$0xff]  ;;  %v5157_v3 = vmul.f32 %v5141_v18, %v15471_v46 }
 0xc91   : > { %8159 = vmatprep.subr.bf16.mxu1 %v8158_v24  ;;  %5469 = vrot.lane.b32.xlu1 %v13129_v47, %s15447_s14  ;;  %v15487_v24 = vld [vmem:[#allocation72_spill] sm:$0xff]  ;;  %v5133_v52 = vsel %vm564_vm1, %v15490_v54, %v15489_v19  ;;  %v5144_v18 = vsel %vm564_vm1, %v15489_v19, %v15490_v54 }
 0xc92   : > { %5467 = vrot.lane.b32.xlu0 %v15485_v23, %s15447_s14  ;;  %v5132_v49 = vsel %vm564_vm1, %v15488_v21, %v15487_v24 }
 0xc93   : > { %v13913_v29 = vpop.permute.xlu1 %5289  ;;  %5702 = vmatmul.mubr.f32.gmra.mrb[68].mxu1 %v5528_v53  ;;  %v8164_v53 = vpack.c.bf16 %v5155_v28, %v5153_v58  ;;  %v5164_v58 = vmul.f32 %v5133_v52, %v15472_v42 }
 0xc94   : > { %15486 = vst [vmem:[#allocation66_spill] sm:$0xff] %v13913_v29  ;;  %8161 = vmatpush1.bf16.msra.mxu1 %v8160_v8  ;;  %v13923_v27 = vpop.permute.xlu0 %5279  ;;  %5707 = vmatprep.mubr.f32.mxu1 %v5536_v6  ;;  %v8166_v29 = vpack.c.bf16 %v5160_v25, %v5158_v57  ;;  %v5143_v8 = vsel %vm564_vm1, %v15487_v24, %v15488_v21  ;;  %v5542_v57 = vld [vmem:[#allocation7 + $0xa8] sm:$0xff] }
 0xc95   : > { %15491 = vst [vmem:[#allocation64_spill] sm:$0xff] %v13923_v27  ;;  %8163 = vmatprep.subr.bf16.mxu1 %v8162_v34  ;;  %5451 = vrot.lane.b32.xlu1 %v13203_v56, %s15447_s14  ;;  %v5162_v6 = vmul.f32 %v5132_v49, %v15472_v42  ;;  %v8168_v25 = vpack.c.bf16 %v5159_v44, %v5157_v3  ;;  %v5550_v34 = vld [vmem:[#allocation7 + $0xe8] sm:$0xff]  ;;  %v15493_v27 = vld [vmem:[#allocation85_spill] sm:$0xff] }
 0xc96   : > { %5449 = vrot.lane.b32.xlu0 %v13153_v33, %s15447_s14  ;;  %v5161_v21 = vmul.f32 %v5143_v8, %v15471_v46  ;;  %v5163_v24 = vmul.f32 %v5144_v18, %v15471_v46  ;;  %v15492_v49 = vld [vmem:[#allocation63_spill] sm:$0xff] }
 0xc97   : > { %v5102_v28 = vpop.permute.xlu1 %5101  ;;  %5708 = vmatmul.mubr.f32.gmra.mrb[70].mxu1 %v5535_v51  ;;  %v5134_v19 = vsel %vm564_vm1, %v15493_v27, %v15492_v49  ;;  %v5145_v52 = vsel %vm564_vm1, %v15492_v49, %v15493_v27 }
 0xc98   : > { %8165 = vmatpush1.bf16.msra.mxu1 %v8164_v53  ;;  %v13941_v26 = vpop.permute.xlu0 %5261  ;;  %5713 = vmatprep.mubr.f32.mxu1 %v5543_v22  ;;  %v5549_v22 = vld [vmem:[#allocation7 + $0xe0] sm:$0xff]  ;;  %v5166_v53 = vmul.f32 %v5134_v19, %v15472_v42  ;;  %v8172_v18 = vpack.c.bf16 %v5163_v24, %v5161_v21  ;;  %v5564_v21 = vld [vmem:[#allocation7 + $0x158] sm:$0xff]  ;;  %v5563_v19 = vld [vmem:[#allocation7 + $0x150] sm:$0xff] }
 0xc99   : > { %8167 = vmatprep.subr.bf16.mxu1 %v8166_v29  ;;  %5473 = vrot.lane.b32.xlu1 %v15449_v43, %s15447_s14  ;;  %v8170_v29 = vpack.c.bf16 %v5164_v58, %v5162_v6  ;;  %v5557_v6 = vld [vmem:[#allocation7 + $0x120] sm:$0xff]  ;;  %v5165_v58 = vmul.f32 %v5145_v52, %v15471_v46  ;;  %v5571_v52 = vld [vmem:[#allocation7 + $0x190] sm:$0xff] }
 0xc9a   : > { %5471 = vrot.lane.b32.xlu0 %v13163_v16, %s15447_s14 }
 0xc9b   : > { %v5124_v54 = vpop.permute.xlu1 %5123  ;;  %5714 = vmatmul.mubr.f32.gmra.mrb[72].mxu1 %v5542_v57 }
 0xc9c   : > { %8169 = vmatpush1.bf16.msra.mxu1 %v8168_v25  ;;  %v13957_v51 = vpop.permute.xlu0 %5283  ;;  %v5135_v3 = vsel %vm564_vm1, %v5102_v28, %v5124_v54  ;;  %v5146_v44 = vsel %vm564_vm1, %v5124_v54, %v5102_v28  ;;  %5719 = vmatprep.mubr.f32.mxu1 %v5550_v34  ;;  %v8182_v54 = vpack.c.bf16 %v13025_v0, %v12999_v1  ;;  %v5577_v1 = vld [vmem:[#allocation7 + $0x1c0] sm:$0xff] }
 0xc9d   : > { %8171 = vmatprep.subr.bf16.mxu1 %v8170_v29  ;;  %v5167_v8 = vmul.f32 %v5146_v44, %v15471_v46  ;;  %v5168_v27 = vmul.f32 %v5135_v3, %v15472_v42  ;;  %5475 = vrot.lane.b32.xlu1 %v13283_v30, %s15447_s14  ;;  %v5556_v42 = vld [vmem:[#allocation7 + $0x118] sm:$0xff]  ;;  %v8178_v46 = vpack.c.bf16 %v12974_v61, %v15459_v45  ;;  %v5570_v45 = vld [vmem:[#allocation7 + $0x188] sm:$0xff]  ;;  %v5585_v0 = vld [vmem:[#allocation7 + $0x200] sm:$0xff] }
 0xc9e   : > { %5453 = vrot.lane.b32.xlu0 %v13285_v10, %s15447_s14  ;;  %v8180_v29 = vpack.c.bf16 %v12967_v62, %v12955_v17  ;;  %v5578_v44 = vld [vmem:[#allocation7 + $0x1c8] sm:$0xff] }
 0xc9f   : > { %v13971_v28 = vpop.permute.xlu1 %5271  ;;  %v8174_v57 = vpack.c.bf16 %v5168_v27, %v5166_v53  ;;  %5720 = vmatmul.mubr.f32.gmra.mrb[74].mxu1 %v5549_v22  ;;  %v8176_v25 = vpack.c.bf16 %v5167_v8, %v5165_v58  ;;  %v8184_v22 = vpack.c.bf16 %v13017_v40, %v12991_v48  ;;  %v8186_v53 = vpack.c.bf16 %v13077_v13, %v15473_v5  ;;  %v15494_v40 = vld [vmem:[#allocation84_spill] sm:$0xff] }
 0xca0   : > { %8173 = vmatpush1.bf16.msra.mxu1 %v8172_v18  ;;  %v13973_v34 = vpop.permute.xlu0 %5265  ;;  %5725 = vmatprep.mubr.f32.mxu1 %v5557_v6  ;;  %v8188_v8 = vpack.c.bf16 %v15465_v37, %v15466_v41  ;;  %v8190_v27 = vpack.c.bf16 %v13129_v47, %v15485_v23  ;;  %v5224_v13 = vsel %vm586_vm3, %v15494_v40, %v13577_v9  ;;  %v5584_v6 = vld [vmem:[#allocation7 + $0x1f8] sm:$0xff]  ;;  %v15495_v41 = vld [vmem:[#allocation26_spill] sm:$0xff] }
 0xca1   : > { %8175 = vmatprep.subr.bf16.mxu1 %v8174_v57  ;;  %v5592_v18 = vld [vmem:[#allocation7 + $0x238] sm:$0xff]  ;;  %v8192_v37 = vpack.c.bf16 %v13121_v55, %v15479_v31  ;;  %v5213_v47 = vsel %vm586_vm3, %v13577_v9, %v15494_v40  ;;  %v5236_v23 = vmul.f32 %v5224_v13, %v15495_v41  ;;  %v8194_v58 = vpack.c.bf16 %v15449_v43, %v13163_v16  ;;  %v5591_v31 = vld [vmem:[#allocation7 + $0x230] sm:$0xff] }
 0xca2   : > { %v5524_v9 = vld [vmem:[#allocation7 + $0x18] sm:$0xff] }
 0xca3   : > { %v13977_v24 = vpop.permute.xlu1 %5293  ;;  %5726 = vmatmul.mubr.f32.gmra.mrb[76].mxu1 %v5556_v42  ;;  %v15496_v42 = vld [vmem:[#allocation86_spill] sm:$0xff]  ;;  %v15498_v43 = vld [vmem:[#allocation25_spill] sm:$0xff] }
 0xca4   : > { %8177 = vmatpush1.bf16.msra.mxu1 %v8176_v25  ;;  %v13979_v49 = vpop.permute.xlu0 %5287  ;;  %5731 = vmatprep.mubr.f32.mxu1 %v5564_v21  ;;  %v5225_v25 = vsel %vm586_vm3, %v13631_v12, %v13605_v60  ;;  %v15497_v21 = vld [vmem:[#allocation83_spill] sm:$0xff] }
 0xca5   : > { %8179 = vmatprep.subr.bf16.mxu1 %v8178_v46  ;;  %v5226_v16 = vsel %vm586_vm3, %v15497_v21, %v15496_v42  ;;  %v5235_v46 = vmul.f32 %v5213_v47, %v15498_v43  ;;  %v5218_v47 = vsel %vm586_vm3, %v13712_v11, %v13737_v59 }
 0xca7   : > { %v13985_v3 = vpop.permute.xlu1 %5275  ;;  %5732 = vmatmul.mubr.f32.gmra.mrb[78].mxu1 %v5563_v19  ;;  %v8196_v19 = vpack.c.bf16 %v13203_v56, %v13153_v33  ;;  %v5215_v33 = vsel %vm586_vm3, %v15496_v42, %v15497_v21  ;;  %v5240_v56 = vmul.f32 %v5226_v16, %v15495_v41  ;;  %v5245_v21 = vmul.f32 %v5218_v47, %v15498_v43 }
 0xca8   : > { %8181 = vmatpush1.bf16.msra.mxu1 %v8180_v29  ;;  %v13987_v61 = vpop.permute.xlu0 %5269  ;;  %5737 = vmatprep.mubr.f32.mxu1 %v5571_v52  ;;  %v5214_v52 = vsel %vm586_vm3, %v13605_v60, %v13631_v12  ;;  %v5238_v29 = vmul.f32 %v5225_v25, %v15495_v41  ;;  %v15499_v60 = vld [vmem:[#allocation28_spill] sm:$0xff]  ;;  %v5239_v40 = vmul.f32 %v5215_v33, %v15498_v43 }
 0xca9   : > { %8183 = vmatprep.subr.bf16.mxu1 %v8182_v54  ;;  %v8198_v54 = vpack.c.bf16 %v5236_v23, %v13283_v30  ;;  %v8200_v30 = vpack.c.bf16 %v5235_v46, %v13285_v10  ;;  %v5228_v12 = vsel %vm586_vm3, %v13573_v35, %v15499_v60  ;;  %v5229_v10 = vsel %vm586_vm3, %v13737_v59, %v13712_v11 }
 0xcaa   : > { %v5246_v23 = vmul.f32 %v5229_v10, %v15495_v41  ;;  %v5219_v11 = vsel %vm586_vm3, %v13601_v63, %v13629_v50  ;;  %v5232_v16 = vsel %vm586_vm3, %v13733_v38, %v13700_v36  ;;  %v5220_v46 = vsel %vm586_vm3, %v13763_v32, %v13791_v2  ;;  %v15501_v10 = vld [vmem:[#allocation35_spill] sm:$0xff] }
 0xcab   : > { %v13993_v17 = vpop.permute.xlu1 %5297  ;;  %5738 = vmatmul.mubr.f32.gmra.mrb[80].mxu1 %v5570_v45 }
 0xcac   : > { %8185 = vmatpush1.bf16.msra.mxu1 %v8184_v22  ;;  %v13995_v62 = vpop.permute.xlu0 %5291  ;;  %5743 = vmatprep.mubr.f32.mxu1 %v5578_v44  ;;  %v5227_v44 = vsel %vm586_vm3, %v13677_v39, %v13651_v20 }
 0xcad   : > { %8187 = vmatprep.subr.bf16.mxu1 %v8186_v53  ;;  %v5237_v53 = vmul.f32 %v5214_v52, %v15498_v43 }
 0xcaf   : > { %v14001_v48 = vpop.permute.xlu1 %5367  ;;  %5744 = vmatmul.mubr.f32.gmra.mrb[82].mxu1 %v5577_v1  ;;  %v5216_v1 = vsel %vm586_vm3, %v13651_v20, %v13677_v39  ;;  %v5217_v20 = vsel %vm586_vm3, %v15499_v60, %v13573_v35  ;;  %v5244_v39 = vmul.f32 %v5228_v12, %v15495_v41 }
 0xcb0   : > { %8189 = vmatpush1.bf16.msra.mxu1 %v8188_v8  ;;  %v14007_v5 = vpop.permute.xlu0 %5273  ;;  %5749 = vmatprep.mubr.f32.mxu1 %v5585_v0  ;;  %v5242_v0 = vmul.f32 %v5227_v44, %v15495_v41  ;;  %v8202_v8 = vpack.c.bf16 %v5240_v56, %v5238_v29  ;;  %v5243_v25 = vmul.f32 %v5217_v20, %v15498_v43  ;;  %v15502_v20 = vld [vmem:[#allocation51_spill] sm:$0xff] }
 0xcb1   : > { %8191 = vmatprep.subr.bf16.mxu1 %v8190_v27  ;;  %v5252_v44 = vmul.f32 %v5232_v16, %v15495_v41  ;;  %v5222_v56 = vsel %vm586_vm3, %v13815_v14, %v13867_v15 }
 0xcb3   : > { %v14018_v57 = vpop.permute.xlu1 %5349  ;;  %5750 = vmatmul.mubr.f32.gmra.mrb[84].mxu1 %v5584_v6  ;;  %v8204_v6 = vpack.c.bf16 %v5239_v40, %v5237_v53 }
 0xcb4   : > { %8193 = vmatpush1.bf16.msra.mxu1 %v8192_v37  ;;  %v14024_v55 = vpop.permute.xlu0 %5295  ;;  %5755 = vmatprep.mubr.f32.mxu1 %v5592_v18  ;;  %v5230_v18 = vsel %vm586_vm3, %v13629_v50, %v13601_v63  ;;  %v5241_v37 = vmul.f32 %v5216_v1, %v15498_v43  ;;  %v5247_v50 = vmul.f32 %v5219_v11, %v15498_v43 }
 0xcb5   : > { %8195 = vmatprep.subr.bf16.mxu1 %v8194_v58  ;;  %v8206_v58 = vpack.c.bf16 %v5244_v39, %v5242_v0  ;;  %v5248_v59 = vmul.f32 %v5230_v18, %v15495_v41  ;;  %v5313_v39 = vsel %vm1148_vm6, %v15502_v20, %v15501_v10 }
 0xcb6   : > { %v8208_v42 = vpack.c.bf16 %v5243_v25, %v5241_v37  ;;  %v8212_v33 = vpack.c.bf16 %v5247_v50, %v5245_v21  ;;  %v15503_v37 = vld [vmem:[#allocation58_spill] sm:$0xff]  ;;  %v15505_v21 = vld [vmem:[#allocation49_spill] sm:$0xff] }
 0xcb7   : > { %v14039_v45 = vpop.permute.xlu1 %5371  ;;  %5756 = vmatmul.mubr.f32.gmra.mrb[86].mxu1 %v5591_v31  ;;  %v5231_v31 = vsel %vm586_vm3, %v13791_v2, %v13763_v32  ;;  %v8210_v52 = vpack.c.bf16 %v5248_v59, %v5246_v23  ;;  %v5249_v32 = vmul.f32 %v5220_v46, %v15498_v43  ;;  %v5233_v2 = vsel %vm586_vm3, %v13867_v15, %v13815_v14  ;;  %v5531_v59 = vld [vmem:[#allocation7 + $0x50] sm:$0xff]  ;;  %v15506_v46 = vld [vmem:[#allocation27_spill] sm:$0xff] }
 0xcb8   : > { %8197 = vmatpush1.bf16.msra.mxu1 %v8196_v19  ;;  %v14045_v22 = vpop.permute.xlu0 %5345  ;;  %5826 = vmatprep.mubr.f32.mxu1 %v5524_v9  ;;  %v5250_v19 = vmul.f32 %v5231_v31, %v15495_v41  ;;  %v5254_v14 = vmul.f32 %v5233_v2, %v15495_v41  ;;  %v5326_v11 = vmul.f32 %v5313_v39, %v15503_v37  ;;  %v5530_v2 = vld [vmem:[#allocation7 + $0x48] sm:$0xff]  ;;  %v5545_v39 = vld [vmem:[#allocation7 + $0xc0] sm:$0xff] }
 0xcb9   : > { %8199 = vmatprep.subr.bf16.mxu1 %v8198_v54  ;;  %v5221_v54 = vsel %vm586_vm3, %v13700_v36, %v13733_v38  ;;  %v15500_v38 = vld [vmem:[#allocation64_spill] sm:$0xff] }
 0xcba   : > { %v5251_v36 = vmul.f32 %v5221_v54, %v15498_v43  ;;  %v5312_v12 = vsel %vm1148_vm6, %v15500_v38, %v13895_v7  ;;  %v5301_v18 = vsel %vm1148_vm6, %v13895_v7, %v15500_v38  ;;  %v5302_v7 = vsel %vm1148_vm6, %v15501_v10, %v15502_v20  ;;  %v5537_v20 = vld [vmem:[#allocation7 + $0x80] sm:$0xff] }
 0xcbb   : > { %v14063_v27 = vpop.permute.xlu1 %5353  ;;  %v5324_v47 = vmul.f32 %v5312_v12, %v15503_v37 }
 0xcbc   : > { %8201 = vmatpush1.bf16.msra.mxu1 %v8200_v30  ;;  %v14070_v13 = vpop.permute.xlu0 %5347  ;;  %v8214_v30 = vpack.c.bf16 %v5252_v44, %v5250_v19  ;;  %v8216_v40 = vpack.c.bf16 %v5251_v36, %v5249_v32  ;;  %v5323_v19 = vmul.f32 %v5301_v18, %v15506_v46  ;;  %v5325_v44 = vmul.f32 %v5302_v7, %v15506_v46  ;;  %v15508_v36 = vld [vmem:[#allocation66_spill] sm:$0xff] }
 0xcbd   : > { %8203 = vmatprep.subr.bf16.mxu1 %v8202_v8  ;;  %v8222_v50 = vpack.c.bf16 %v5326_v11, %v5324_v47  ;;  %v5319_v47 = vsel %vm1148_vm6, %v13977_v24, %v13971_v28  ;;  %v5320_v11 = vsel %vm1148_vm6, %v14024_v55, %v14007_v5 }
 0xcbf   : > { %v14087_v35 = vpop.permute.xlu1 %5375 }
 0xcc0   : > { %8205 = vmatpush1.bf16.msra.mxu1 %v8204_v6  ;;  %v14094_v9 = vpop.permute.xlu0 %5369  ;;  %v5253_v6 = vmul.f32 %v5222_v56, %v15498_v43  ;;  %v5538_v56 = vld [vmem:[#allocation7 + $0x88] sm:$0xff] }
 0xcc1   : > { %8207 = vmatprep.subr.bf16.mxu1 %v8206_v58 }
 0xcc3   : > { %v5190_v63 = vpop.permute.xlu1 %5189 }
 0xcc4   : > { %8209 = vmatpush1.bf16.msra.mxu1 %v8208_v42  ;;  %v14112_v29 = vpop.permute.xlu0 %5351  ;;  %v15504_v42 = vld [vmem:[#allocation32_spill] sm:$0xff] }
 0xcc5   : > { %8211 = vmatprep.subr.bf16.mxu1 %v8210_v52  ;;  %v5315_v16 = vsel %vm1148_vm6, %v15505_v21, %v15504_v42  ;;  %v5303_v52 = vsel %vm1148_vm6, %v13941_v26, %v13957_v51 }
 0xcc6   : > { %v5327_v12 = vmul.f32 %v5303_v52, %v15506_v46 }
 0xcc7   : > { %v5212_v60 = vpop.permute.xlu1 %5211 }
 0xcc8   : > { %8213 = vmatpush1.bf16.msra.mxu1 %v8212_v33  ;;  %v14133_v53 = vpop.permute.xlu0 %5373  ;;  %v5223_v1 = vsel %vm586_vm3, %v5190_v63, %v5212_v60  ;;  %v5234_v0 = vsel %vm586_vm3, %v5212_v60, %v5190_v63  ;;  %v5316_v33 = vsel %vm1148_vm6, %v13979_v49, %v13973_v34  ;;  %v15507_v60 = vld [vmem:[#allocation37_spill] sm:$0xff] }
 0xcc9   : > { %8215 = vmatprep.subr.bf16.mxu1 %v8214_v30  ;;  %v5255_v15 = vmul.f32 %v5223_v1, %v15498_v43  ;;  %v5256_v8 = vmul.f32 %v5234_v0, %v15495_v41  ;;  %v5314_v41 = vsel %vm1148_vm6, %v13957_v51, %v13941_v26  ;;  %v5523_v43 = vld [vmem:[#allocation7 + $0x10] sm:$0xff]  ;;  %v5304_v26 = vsel %vm1148_vm6, %v15504_v42, %v15505_v21  ;;  %v5544_v42 = vld [vmem:[#allocation7 + $0xb8] sm:$0xff] }
 0xcca   : > { %v5328_v63 = vmul.f32 %v5314_v41, %v15503_v37  ;;  %v5330_v51 = vmul.f32 %v5315_v16, %v15503_v37  ;;  %v8224_v30 = vpack.c.bf16 %v5325_v44, %v5323_v19  ;;  %v5317_v38 = vsel %vm1148_vm6, %v15508_v36, %v15507_v60  ;;  %v5552_v16 = vld [vmem:[#allocation7 + $0xf8] sm:$0xff] }
 0xccb   : > { %v14152_v23 = vpop.permute.xlu1 %5357  ;;  %v8218_v58 = vpack.c.bf16 %v5256_v8, %v5254_v14  ;;  %v8220_v25 = vpack.c.bf16 %v5255_v15, %v5253_v6  ;;  %v5305_v1 = vsel %vm1148_vm6, %v13973_v34, %v13979_v49  ;;  %v5332_v0 = vmul.f32 %v5316_v33, %v15503_v37 }
 0xccc   : > { %8217 = vmatpush1.bf16.msra.mxu1 %v8216_v40  ;;  %v14158_v31 = vpop.permute.xlu0 %5355  ;;  %v8226_v14 = vpack.c.bf16 %v5330_v51, %v5328_v63  ;;  %v5329_v8 = vmul.f32 %v5304_v26, %v15506_v46  ;;  %v5318_v40 = vsel %vm1148_vm6, %v13995_v62, %v13987_v61  ;;  %v5306_v34 = vsel %vm1148_vm6, %v15507_v60, %v15508_v36  ;;  %v5559_v51 = vld [vmem:[#allocation7 + $0x130] sm:$0xff] }
 0xccd   : > { %8219 = vmatprep.subr.bf16.mxu1 %v8218_v58  ;;  %v5334_v49 = vmul.f32 %v5317_v38, %v15503_v37  ;;  %v5331_v18 = vmul.f32 %v5305_v1, %v15506_v46  ;;  %v5307_v58 = vsel %vm1148_vm6, %v13987_v61, %v13995_v62  ;;  %v5336_v41 = vmul.f32 %v5318_v40, %v15503_v37 }
 0xcce   : > { %v8228_v6 = vpack.c.bf16 %v5329_v8, %v5327_v12  ;;  %v5333_v7 = vmul.f32 %v5306_v34, %v15506_v46  ;;  %v5308_v61 = vsel %vm1148_vm6, %v13971_v28, %v13977_v24  ;;  %v5338_v62 = vmul.f32 %v5319_v47, %v15503_v37 }
 0xccf   : > { %5827 = vmatmul.mubr.f32.vlgmr.msra.gmra.mrb[66].mxu1 %v5523_v43  ;;  %v14175_v54 = vpop.permute.xlu1 %5379  ;;  %v5309_v21 = vsel %vm1148_vm6, %v14007_v5, %v14024_v55  ;;  %v5335_v52 = vmul.f32 %v5307_v58, %v15506_v46  ;;  %v5321_v63 = vsel %vm1148_vm6, %v13993_v17, %v13985_v3  ;;  %v5310_v28 = vsel %vm1148_vm6, %v13985_v3, %v13993_v17 }
 0xcd0   : > { %8221 = vmatpush1.bf16.msra.mxu1 %v8220_v25  ;;  %v14182_v32 = vpop.permute.xlu0 %5377  ;;  %5832 = vmatprep.mubr.f32.mxu1 %v5531_v59  ;;  %v8230_v25 = vpack.c.bf16 %v5334_v49, %v5332_v0  ;;  %v8232_v19 = vpack.c.bf16 %v5333_v7, %v5331_v18  ;;  %v5340_v24 = vmul.f32 %v5320_v11, %v15503_v37  ;;  %v5558_v0 = vld [vmem:[#allocation7 + $0x128] sm:$0xff]  ;;  %v5565_v11 = vld [vmem:[#allocation7 + $0x160] sm:$0xff] }
 0xcd1   : > { %8223 = vmatprep.subr.bf16.mxu1 %v8222_v50  ;;  %v8234_v50 = vpack.c.bf16 %v5338_v62, %v5336_v41  ;;  %v5337_v5 = vmul.f32 %v5308_v61, %v15506_v46  ;;  %v5339_v55 = vmul.f32 %v5309_v21, %v15506_v46  ;;  %v5342_v26 = vmul.f32 %v5321_v63, %v15503_v37  ;;  %v5566_v18 = vld [vmem:[#allocation7 + $0x168] sm:$0xff] }
 0xcd2   : > { %v5341_v17 = vmul.f32 %v5310_v28, %v15506_v46  ;;  %v5401_v60 = vsel %vm542_vm2, %v14094_v9, %v14070_v13  ;;  %v5390_v47 = vsel %vm542_vm2, %v14070_v13, %v14094_v9  ;;  %v5391_v13 = vsel %vm542_vm2, %v14018_v57, %v14039_v45  ;;  %v5573_v9 = vld [vmem:[#allocation7 + $0x1a0] sm:$0xff] }
 0xcd3   : > { %v14199_v15 = vpop.permute.xlu1 %5361  ;;  %5833 = vmatmul.mubr.f32.gmra.mrb[68].mxu1 %v5530_v2  ;;  %v5551_v2 = vld [vmem:[#allocation7 + $0xf0] sm:$0xff]  ;;  %v8236_v3 = vpack.c.bf16 %v5337_v5, %v5335_v52  ;;  %v8238_v36 = vpack.c.bf16 %v5342_v26, %v5340_v24  ;;  %v5404_v61 = vsel %vm542_vm2, %v14087_v35, %v14063_v27  ;;  %v5392_v21 = vsel %vm542_vm2, %v14112_v29, %v14133_v53  ;;  %v5580_v24 = vld [vmem:[#allocation7 + $0x1d8] sm:$0xff] }
 0xcd4   : > { %8225 = vmatpush1.bf16.msra.mxu1 %v8224_v30  ;;  %v14206_v10 = vpop.permute.xlu0 %5359  ;;  %5838 = vmatprep.mubr.f32.mxu1 %v5538_v56  ;;  %v5389_v56 = vsel %vm542_vm2, %v14045_v22, %v14001_v48  ;;  %v5400_v30 = vsel %vm542_vm2, %v14001_v48, %v14045_v22  ;;  %v8240_v12 = vpack.c.bf16 %v5341_v17, %v5339_v55 }
 0xcd5   : > { %8227 = vmatprep.subr.bf16.mxu1 %v8226_v14  ;;  %v15509_v14 = vld [vmem:[#allocation23_spill] sm:$0xff]  ;;  %v5402_v48 = vsel %vm542_vm2, %v14039_v45, %v14018_v57  ;;  %v5405_v57 = vsel %vm542_vm2, %v14182_v32, %v14158_v31  ;;  %v5406_v45 = vsel %vm542_vm2, %v14175_v54, %v14152_v23  ;;  %v5394_v26 = vsel %vm542_vm2, %v14158_v31, %v14182_v32 }
 0xcd6   : > { %v5411_v8 = vmul.f32 %v5389_v56, %v15509_v14  ;;  %v5415_v52 = vmul.f32 %v5391_v13, %v15509_v14  ;;  %v5417_v5 = vmul.f32 %v5392_v21, %v15509_v14 }
 0xcd7   : > { %v14223_v43 = vpop.permute.xlu1 %5383  ;;  %5839 = vmatmul.mubr.f32.gmra.mrb[70].mxu1 %v5537_v20  ;;  %v15510_v20 = vld [vmem:[#allocation24_spill] sm:$0xff] }
 0xcd8   : > { %8229 = vmatpush1.bf16.msra.mxu1 %v8228_v6  ;;  %v14230_v59 = vpop.permute.xlu0 %5381  ;;  %5844 = vmatprep.mubr.f32.mxu1 %v5545_v39  ;;  %v5412_v34 = vmul.f32 %v5400_v30, %v15510_v20  ;;  %v5414_v49 = vmul.f32 %v5401_v60, %v15510_v20  ;;  %v5416_v41 = vmul.f32 %v5402_v48, %v15510_v20 }
 0xcd9   : > { %8231 = vmatprep.subr.bf16.mxu1 %v8230_v25  ;;  %v5403_v25 = vsel %vm542_vm2, %v14133_v53, %v14112_v29  ;;  %v5572_v29 = vld [vmem:[#allocation7 + $0x198] sm:$0xff]  ;;  %v5393_v53 = vsel %vm542_vm2, %v14063_v27, %v14087_v35  ;;  %v5420_v28 = vmul.f32 %v5404_v61, %v15510_v20  ;;  %v5422_v55 = vmul.f32 %v5405_v57, %v15510_v20  ;;  %v15511_v61 = vld [vmem:[#allocation48_spill] sm:$0xff] }
 0xcda   : > { %v8246_v62 = vpack.c.bf16 %v5416_v41, %v5414_v49  ;;  %v5395_v27 = vsel %vm542_vm2, %v14152_v23, %v14175_v54  ;;  %v5407_v17 = vsel %vm542_vm2, %v14230_v59, %v14206_v10  ;;  %v5408_v31 = vsel %vm542_vm2, %v14223_v43, %v14199_v15  ;;  %v5579_v23 = vld [vmem:[#allocation7 + $0x1d0] sm:$0xff] }
 0xcdb   : > { %v14251_v44 = vpop.permute.xlu1 %5435  ;;  %5845 = vmatmul.mubr.f32.gmra.mrb[72].mxu1 %v5544_v42  ;;  %v5413_v42 = vmul.f32 %v5390_v47, %v15509_v14  ;;  %v5587_v54 = vld [vmem:[#allocation7 + $0x210] sm:$0xff]  ;;  %v5421_v30 = vmul.f32 %v5394_v26, %v15509_v14  ;;  %v5423_v60 = vmul.f32 %v5395_v27, %v15509_v14 }
 0xcdc   : > { %8233 = vmatpush1.bf16.msra.mxu1 %v8232_v19  ;;  %v14255_v33 = vpop.permute.xlu0 %5363  ;;  %5850 = vmatprep.mubr.f32.mxu1 %v5552_v16  ;;  %v5418_v16 = vmul.f32 %v5403_v25, %v15510_v20  ;;  %v5593_v25 = vld [vmem:[#allocation7 + $0x240] sm:$0xff] }
 0xcdd   : > { %8235 = vmatprep.subr.bf16.mxu1 %v8234_v50  ;;  %v8248_v50 = vpack.c.bf16 %v5415_v52, %v5413_v42 }
 0xcde   : > { %v8250_v35 = vpack.c.bf16 %v5420_v28, %v5418_v16 }
 0xcdf   : > { %v5300_v38 = vpop.permute.xlu1 %5299  ;;  %5851 = vmatmul.mubr.f32.gmra.mrb[74].mxu1 %v5551_v2  ;;  %v5424_v2 = vmul.f32 %v5406_v45, %v15510_v20 }
 0xce0   : > { %8237 = vmatpush1.bf16.msra.mxu1 %v8236_v3  ;;  %v5278_v1 = vpop.permute.xlu0 %5277  ;;  %5856 = vmatprep.mubr.f32.mxu1 %v5559_v51  ;;  %v5419_v3 = vmul.f32 %v5393_v53, %v15509_v14 }
 0xce1   : > { %8239 = vmatprep.subr.bf16.mxu1 %v8238_v36  ;;  %v5311_v22 = vsel %vm1148_vm6, %v5278_v1, %v5300_v38  ;;  %v5322_v40 = vsel %vm1148_vm6, %v5300_v38, %v5278_v1  ;;  %v8254_v36 = vpack.c.bf16 %v5424_v2, %v5422_v55  ;;  %v5396_v38 = vsel %vm542_vm2, %v14206_v10, %v14230_v59 }
 0xce2   : > { %v5343_v39 = vmul.f32 %v5311_v22, %v15506_v46  ;;  %v5344_v6 = vmul.f32 %v5322_v40, %v15503_v37  ;;  %v8252_v56 = vpack.c.bf16 %v5419_v3, %v5417_v5  ;;  %v5397_v1 = vsel %vm542_vm2, %v14199_v15, %v14223_v43  ;;  %v5586_v22 = vld [vmem:[#allocation7 + $0x208] sm:$0xff] }
 0xce3   : > { %v14288_v58 = vpop.permute.xlu1 %5457  ;;  %5857 = vmatmul.mubr.f32.gmra.mrb[76].mxu1 %v5558_v0  ;;  %v5428_v0 = vmul.f32 %v5408_v31, %v15510_v20  ;;  %v5594_v40 = vld [vmem:[#allocation7 + $0x248] sm:$0xff]  ;;  %v5425_v10 = vmul.f32 %v5396_v38, %v15509_v14  ;;  %v5427_v59 = vmul.f32 %v5397_v1, %v15509_v14 }
 0xce4   : > { %v8244_v7 = vpack.c.bf16 %v5411_v8, %v5343_v39  ;;  %8241 = vmatpush1.bf16.msra.mxu1 %v8240_v12  ;;  %v14295_v46 = vpop.permute.xlu0 %5385  ;;  %v8242_v37 = vpack.c.bf16 %v5412_v34, %v5344_v6  ;;  %5862 = vmatprep.mubr.f32.mxu1 %v5566_v18  ;;  %v5426_v12 = vmul.f32 %v5407_v17, %v15510_v20 }
 0xce5   : > { %v8256_v34 = vpack.c.bf16 %v5423_v60, %v5421_v30  ;;  %v5409_v15 = vsel %vm542_vm2, %v14295_v46, %v14255_v33  ;;  %v5398_v43 = vsel %vm542_vm2, %v14255_v33, %v14295_v46  ;;  %v5478_v45 = vsel %vm1328_vm7, %v14251_v44, %v14288_v58 }
 0xce6   : > { %8243 = vmatprep.subr.bf16.mxu1 %v8242_v37  ;;  %v8258_v49 = vpack.c.bf16 %v5428_v0, %v5426_v12  ;;  %v5526_v37 = vld [vmem:[#allocation7 + $0x28] sm:$0xff]  ;;  %v5429_v13 = vmul.f32 %v5398_v43, %v15509_v14 }
 0xce7   : > { %v14319_v19 = vpop.permute.xlu1 %5439  ;;  %5863 = vmatmul.mubr.f32.gmra.mrb[78].mxu1 %v5565_v11  ;;  %v8260_v11 = vpack.c.bf16 %v5427_v59, %v5425_v10 }
 0xce8   : > { %8245 = vmatpush1.bf16.msra.mxu1 %v8244_v7  ;;  %v14322_v63 = vpop.permute.xlu0 %5433  ;;  %5868 = vmatprep.mubr.f32.mxu1 %v5573_v9  ;;  %v5430_v7 = vmul.f32 %v5409_v15, %v15510_v20  ;;  %v5489_v9 = vsel %vm1328_vm7, %v14288_v58, %v14251_v44 }
 0xce9   : > { %8247 = vmatprep.subr.bf16.mxu1 %v8246_v62  ;;  %v5502_v52 = vmul.f32 %v5489_v9, %v15511_v61 }
 0xceb   : > { %v14340_v51 = vpop.permute.xlu1 %5461  ;;  %5869 = vmatmul.mubr.f32.gmra.mrb[80].mxu1 %v5572_v29  ;;  %v15512_v29 = vld [vmem:[#allocation46_spill] sm:$0xff] }
 0xcec   : > { %8249 = vmatpush1.bf16.msra.mxu1 %v8248_v50  ;;  %v5456_v32 = vpop.permute.xlu0 %5455  ;;  %5874 = vmatprep.mubr.f32.mxu1 %v5580_v24  ;;  %v5501_v55 = vmul.f32 %v5478_v45, %v15512_v29  ;;  %v5480_v26 = vsel %vm1328_vm7, %v14319_v19, %v14340_v51  ;;  %v5540_v45 = vld [vmem:[#allocation7 + $0x98] sm:$0xff] }
 0xced   : > { %8251 = vmatprep.subr.bf16.mxu1 %v8250_v35  ;;  %v5488_v6 = vsel %vm1328_vm7, %v5456_v32, %v14322_v63  ;;  %v5477_v42 = vsel %vm1328_vm7, %v14322_v63, %v5456_v32  ;;  %v5491_v63 = vsel %vm1328_vm7, %v14340_v51, %v14319_v19  ;;  %v5505_v19 = vmul.f32 %v5480_v26, %v15512_v29  ;;  %v5582_v26 = vld [vmem:[#allocation7 + $0x1e8] sm:$0xff] }
 0xcee   : > { %v5500_v62 = vmul.f32 %v5488_v6, %v15511_v61  ;;  %v5499_v53 = vmul.f32 %v5477_v42, %v15512_v29  ;;  %v5506_v44 = vmul.f32 %v5491_v63, %v15511_v61 }
 0xcef   : > { %v5366_v8 = vpop.permute.xlu1 %5365  ;;  %5875 = vmatmul.mubr.f32.gmra.mrb[82].mxu1 %v5579_v23 }
 0xcf0   : > { %8253 = vmatpush1.bf16.msra.mxu1 %v8252_v56  ;;  %v5438_v48 = vpop.permute.xlu0 %5437  ;;  %5880 = vmatprep.mubr.f32.mxu1 %v5587_v54  ;;  %v8266_v50 = vpack.c.bf16 %v5502_v52, %v5500_v62  ;;  %v8268_v35 = vpack.c.bf16 %v5501_v55, %v5499_v53  ;;  %v5539_v53 = vld [vmem:[#allocation7 + $0x90] sm:$0xff]  ;;  %v5561_v55 = vld [vmem:[#allocation7 + $0x140] sm:$0xff] }
 0xcf1   : > { %8255 = vmatprep.subr.bf16.mxu1 %v8254_v36 }
 0xcf3   : > { %v5388_v39 = vpop.permute.xlu1 %5387  ;;  %5881 = vmatmul.mubr.f32.gmra.mrb[84].mxu1 %v5586_v22 }
 0xcf4   : > { %8257 = vmatpush1.bf16.msra.mxu1 %v8256_v34  ;;  %v5460_v18 = vpop.permute.xlu0 %5459  ;;  %v5399_v47 = vsel %vm542_vm2, %v5366_v8, %v5388_v39  ;;  %v5410_v41 = vsel %vm542_vm2, %v5388_v39, %v5366_v8  ;;  %5886 = vmatprep.mubr.f32.mxu1 %v5594_v40 }
 0xcf5   : > { %8259 = vmatprep.subr.bf16.mxu1 %v8258_v49  ;;  %v5431_v33 = vmul.f32 %v5399_v47, %v15509_v14  ;;  %v5432_v46 = vmul.f32 %v5410_v41, %v15510_v20  ;;  %v5490_v21 = vsel %vm1328_vm7, %v5460_v18, %v5438_v48  ;;  %v5479_v24 = vsel %vm1328_vm7, %v5438_v48, %v5460_v18  ;;  %v5525_v41 = vld [vmem:[#allocation7 + $0x20] sm:$0xff] }
 0xcf6   : > { %v5504_v28 = vmul.f32 %v5490_v21, %v15511_v61  ;;  %v5503_v3 = vmul.f32 %v5479_v24, %v15512_v29 }
 0xcf7   : > { %v5444_v16 = vpop.permute.xlu1 %5443  ;;  %v8262_v20 = vpack.c.bf16 %v5432_v46, %v5430_v7  ;;  %5887 = vmatmul.mubr.f32.gmra.mrb[86].mxu1 %v5593_v25  ;;  %v8264_v57 = vpack.c.bf16 %v5431_v33, %v5429_v13 }
 0xcf8   : > { %8261 = vmatpush1.bf16.msra.mxu1 %v8260_v11  ;;  %v5442_v14 = vpop.permute.xlu0 %5441  ;;  %5957 = vmatprep.mubr.f32.mxu1 %v5526_v37  ;;  %v8270_v17 = vpack.c.bf16 %v5506_v44, %v5504_v28  ;;  %v8272_v30 = vpack.c.bf16 %v5505_v19, %v5503_v3  ;;  %v5533_v37 = vld [vmem:[#allocation7 + $0x60] sm:$0xff]  ;;  %v5547_v28 = vld [vmem:[#allocation7 + $0xd0] sm:$0xff]  ;;  %v5568_v44 = vld [vmem:[#allocation7 + $0x178] sm:$0xff] }
 0xcf9   : > { %8263 = vmatprep.subr.bf16.mxu1 %v8262_v20  ;;  %v5532_v20 = vld [vmem:[#allocation7 + $0x58] sm:$0xff] }
 0xcfa   : > { %v5588_v3 = vld [vmem:[#allocation7 + $0x218] sm:$0xff] }
 0xcfb   : > { %v5466_v5 = vpop.permute.xlu1 %5465  ;;  %v5548_v19 = vld [vmem:[#allocation7 + $0xd8] sm:$0xff] }
 0xcfc   : > { %8265 = vmatpush1.bf16.msra.mxu1 %v8264_v57  ;;  %v5464_v58 = vpop.permute.xlu0 %5463  ;;  %v5493_v2 = vsel %vm1328_vm7, %v5466_v5, %v5444_v16  ;;  %v5482_v23 = vsel %vm1328_vm7, %v5444_v16, %v5466_v5  ;;  %v5554_v5 = vld [vmem:[#allocation7 + $0x108] sm:$0xff] }
 0xcfd   : > { %v5492_v27 = vsel %vm1328_vm7, %v5464_v58, %v5442_v14  ;;  %8267 = vmatprep.subr.bf16.mxu1 %v8266_v50  ;;  %v5481_v31 = vsel %vm1328_vm7, %v5442_v14, %v5464_v58  ;;  %v5510_v54 = vmul.f32 %v5493_v2, %v15511_v61  ;;  %v5509_v36 = vmul.f32 %v5482_v23, %v15512_v29  ;;  %v5546_v50 = vld [vmem:[#allocation7 + $0xc8] sm:$0xff]  ;;  %v5567_v58 = vld [vmem:[#allocation7 + $0x170] sm:$0xff] }
 0xcfe   : > { %v5508_v32 = vmul.f32 %v5492_v27, %v15511_v61  ;;  %v5507_v60 = vmul.f32 %v5481_v31, %v15512_v29  ;;  %v5575_v2 = vld [vmem:[#allocation7 + $0x1b0] sm:$0xff]  ;;  %v5581_v27 = vld [vmem:[#allocation7 + $0x1e0] sm:$0xff] }
 0xcff   : > { %v5448_v56 = vpop.permute.xlu1 %5447  ;;  %v5595_v31 = vld [vmem:[#allocation7 + $0x250] sm:$0xff] }
 0xd00   : > { %8269 = vmatpush1.bf16.msra.mxu1 %v8268_v35  ;;  %v5446_v51 = vpop.permute.xlu0 %5445  ;;  %v8274_v38 = vpack.c.bf16 %v5510_v54, %v5508_v32  ;;  %v8276_v10 = vpack.c.bf16 %v5509_v36, %v5507_v60  ;;  %v5589_v35 = vld [vmem:[#allocation7 + $0x220] sm:$0xff]  ;;  %v15513_v32 = vmov 0.0   ;;  %v5527_v23 = vld [vmem:[#allocation7 + $0x30] sm:$0xff]  ;;  %v5534_v54 = vld [vmem:[#allocation7 + $0x68] sm:$0xff] }
 0xd01   : > { %8271 = vmatprep.subr.bf16.mxu1 %v8270_v17  ;;  %v5596_v17 = vld [vmem:[#allocation7 + $0x258] sm:$0xff]  ;;  %v5569_v60 = vld [vmem:[#allocation7 + $0x180] sm:$0xff] }
 0xd02   : > { %v5576_v36 = vld [vmem:[#allocation7 + $0x1b8] sm:$0xff] }
 0xd03   : > { %v5470_v12 = vpop.permute.xlu1 %5469 }
 0xd04   : > { %8273 = vmatpush1.bf16.msra.mxu1 %v8272_v30  ;;  %v5468_v1 = vpop.permute.xlu0 %5467  ;;  %v5484_v0 = vsel %vm1328_vm7, %v5448_v56, %v5470_v12  ;;  %v5495_v8 = vsel %vm1328_vm7, %v5470_v12, %v5448_v56  ;;  %v5541_v56 = vld [vmem:[#allocation7 + $0xa0] sm:$0xff]  ;;  %v5562_v30 = vld [vmem:[#allocation7 + $0x148] sm:$0xff] }
 0xd05   : > { %v5483_v48 = vsel %vm1328_vm7, %v5446_v51, %v5468_v1  ;;  %v5494_v22 = vsel %vm1328_vm7, %v5468_v1, %v5446_v51  ;;  %8275 = vmatprep.subr.bf16.mxu1 %v8274_v38  ;;  %v5513_v40 = vmul.f32 %v5484_v0, %v15512_v29  ;;  %v5514_v34 = vmul.f32 %v5495_v8, %v15511_v61  ;;  %v5555_v51 = vld [vmem:[#allocation7 + $0x110] sm:$0xff]  ;;  %v5590_v12 = vld [vmem:[#allocation7 + $0x228] sm:$0xff]  ;;  %v5597_v1 = vld [vmem:[#allocation7 + $0x260] sm:$0xff] }
 0xd06   : > { %v5511_v59 = vmul.f32 %v5483_v48, %v15512_v29  ;;  %v5512_v15 = vmul.f32 %v5494_v22, %v15511_v61  ;;  %v5583_v38 = vld [vmem:[#allocation7 + $0x1f0] sm:$0xff] }
 0xd07   : > { %v5452_v39 = vpop.permute.xlu1 %5451 }
 0xd08   : > { %v8280_v43 = vpack.c.bf16 %v5513_v40, %v5511_v59  ;;  %8277 = vmatpush1.bf16.msra.mxu1 %v8276_v10  ;;  %v5450_v49 = vpop.permute.xlu0 %5449  ;;  %v8278_v6 = vpack.c.bf16 %v5514_v34, %v5512_v15 }
 0xd0a   : > { %8279 = vmatprep.subr.bf16.mxu1 %v8278_v6 }
 0xd0b   : > { %v5474_v47 = vpop.permute.xlu1 %5473 }
 0xd0c   : > { %8281 = vmatpush1.bf16.msra.mxu1 %v8280_v43  ;;  %v5472_v18 = vpop.permute.xlu0 %5471  ;;  %v5486_v33 = vsel %vm1328_vm7, %v5452_v39, %v5474_v47  ;;  %v5497_v46 = vsel %vm1328_vm7, %v5474_v47, %v5452_v39 }
 0xd0d   : > { %v5485_v25 = vsel %vm1328_vm7, %v5450_v49, %v5472_v18  ;;  %v5496_v7 = vsel %vm1328_vm7, %v5472_v18, %v5450_v49  ;;  %v5517_v9 = vmul.f32 %v5486_v33, %v15512_v29  ;;  %v5518_v42 = vmul.f32 %v5497_v46, %v15511_v61 }
 0xd0e   : > { %v5515_v11 = vmul.f32 %v5485_v25, %v15512_v29  ;;  %v5516_v13 = vmul.f32 %v5496_v7, %v15511_v61 }
 0xd0f   : > { %5958 = vmatmul.mubr.f32.vlgmr.msra.gmra.mrb[66].mxu1 %v5525_v41  ;;  %v5476_v16 = vpop.permute.xlu1 %5475 }
 0xd10   : > { %v8284_v62 = vpack.c.bf16 %v5517_v9, %v5515_v11  ;;  %v5454_v21 = vpop.permute.xlu0 %5453  ;;  %5963 = vmatprep.mubr.f32.mxu1 %v5533_v37  ;;  %v8282_v57 = vpack.c.bf16 %v5518_v42, %v5516_v13 }
 0xd11   : > { %v5498_v14 = vsel %vm1328_vm7, %v5476_v16, %v5454_v21  ;;  %v5487_v63 = vsel %vm1328_vm7, %v5454_v21, %v5476_v16 }
 0xd12   : > { %v5520_v52 = vmul.f32 %v5498_v14, %v15511_v61  ;;  %8283 = vmatprep.subr.bf16.mxu1 %v8282_v57  ;;  %v5519_v24 = vmul.f32 %v5487_v63, %v15512_v29  ;;  %v5553_v61 = vld [vmem:[#allocation7 + $0x100] sm:$0xff]  ;;  %v5574_v29 = vld [vmem:[#allocation7 + $0x1a8] sm:$0xff] }
 0xd13   : > { %5964 = vmatmul.mubr.f32.gmra.mrb[68].mxu1 %v5532_v20 }
 0xd14   : > { %8285 = vmatpush1.bf16.msra.mxu1 %v8284_v62  ;;  %5969 = vmatprep.mubr.f32.mxu1 %v5540_v45 }
 0xd15   : > { %6028 = vmatprep.subr.mxu1 %v5520_v52 }
 0xd17   : > { %5970 = vmatmul.mubr.f32.gmra.mrb[70].mxu1 %v5539_v53 }
 0xd18   : > { %6029 = vmatpush1.msra.mxu1 %v5519_v24  ;;  %5975 = vmatprep.mubr.f32.mxu1 %v5547_v28 }
 0xd1b   : > { %5976 = vmatmul.mubr.f32.gmra.mrb[72].mxu1 %v5546_v50 }
 0xd1c   : > { %5981 = vmatprep.mubr.f32.mxu1 %v5554_v5 }
 0xd1f   : > { %5982 = vmatmul.mubr.f32.gmra.mrb[74].mxu1 %v5553_v61 }
 0xd20   : > { %5987 = vmatprep.mubr.f32.mxu1 %v5561_v55 }
 0xd23   : > { %5988 = vmatmul.mubr.f32.gmra.mrb[76].mxu1 %v5560_v4 }
 0xd24   : > { %5993 = vmatprep.mubr.f32.mxu1 %v5568_v44 }
 0xd27   : > { %5994 = vmatmul.mubr.f32.gmra.mrb[78].mxu1 %v5567_v58 }
 0xd28   : > { %5999 = vmatprep.mubr.f32.mxu1 %v5575_v2 }
 0xd2b   : > { %6000 = vmatmul.mubr.f32.gmra.mrb[80].mxu1 %v5574_v29 }
 0xd2c   : > { %6005 = vmatprep.mubr.f32.mxu1 %v5582_v26 }
 0xd2f   : > { %6006 = vmatmul.mubr.f32.gmra.mrb[82].mxu1 %v5581_v27 }
 0xd30   : > { %6011 = vmatprep.mubr.f32.mxu1 %v5589_v35 }
 0xd33   : > { %6012 = vmatmul.mubr.f32.gmra.mrb[84].mxu1 %v5588_v3 }
 0xd34   : > { %6017 = vmatprep.mubr.f32.mxu1 %v5596_v17 }
 0xd37   : > { %6018 = vmatmul.mubr.f32.gmra.mrb[86].mxu1 %v5595_v31 }
 0xd38   : > { %6088 = vmatprep.mubr.f32.mxu1 %v15513_v32 }
 0xd3b   : > { %7135 = vmatmul.mubr.msk.f32.vlgmr.msra.gmra.mrb[66].mxu1 %vm1461_vm8, %v5527_v23 }
 0xd3c   : > { %6094 = vmatprep.mubr.f32.mxu1 %v15513_v32 }
 0xd3f   : > { %7136 = vmatmul.mubr.msk.f32.gmra.mrb[68].mxu1 %vm1461_vm8, %v5534_v54 }
 0xd40   : > { %6100 = vmatprep.mubr.f32.mxu1 %v15513_v32 }
 0xd43   : > { %7137 = vmatmul.mubr.msk.f32.gmra.mrb[70].mxu1 %vm1461_vm8, %v5541_v56 }
 0xd44   : > { %6106 = vmatprep.mubr.f32.mxu1 %v15513_v32 }
 0xd47   : > { %7138 = vmatmul.mubr.msk.f32.gmra.mrb[72].mxu1 %vm1461_vm8, %v5548_v19 }
 0xd48   : > { %6112 = vmatprep.mubr.f32.mxu1 %v15513_v32 }
 0xd4b   : > { %7139 = vmatmul.mubr.msk.f32.gmra.mrb[74].mxu1 %vm1461_vm8, %v5555_v51 }
 0xd4c   : > { %6118 = vmatprep.mubr.f32.mxu1 %v15513_v32 }
 0xd4f   : > { %7140 = vmatmul.mubr.msk.f32.gmra.mrb[76].mxu1 %vm1461_vm8, %v5562_v30 }
 0xd50   : > { %6124 = vmatprep.mubr.f32.mxu1 %v15513_v32 }
 0xd53   : > { %7141 = vmatmul.mubr.msk.f32.gmra.mrb[78].mxu1 %vm1461_vm8, %v5569_v60 }
 0xd54   : > { %6130 = vmatprep.mubr.f32.mxu1 %v15513_v32 }
 0xd57   : > { %7142 = vmatmul.mubr.msk.f32.gmra.mrb[80].mxu1 %vm1461_vm8, %v5576_v36 }
 0xd58   : > { %6136 = vmatprep.mubr.f32.mxu1 %v15513_v32 }
 0xd5b   : > { %7143 = vmatmul.mubr.msk.f32.gmra.mrb[82].mxu1 %vm1461_vm8, %v5583_v38 }
 0xd5c   : > { %6142 = vmatprep.mubr.f32.mxu1 %v15513_v32 }
 0xd5f   : > { %7144 = vmatmul.mubr.msk.f32.gmra.mrb[84].mxu1 %vm1461_vm8, %v5590_v12 }
 0xd60   : > { %6148 = vmatprep.mubr.f32.mxu1 %v15513_v32 }
 0xd63   : > { %7145 = vmatmul.mubr.msk.f32.gmra.mrb[86].mxu1 %vm1461_vm8, %v5597_v1 }
 0xd64   : > { %6935 = vmatprep.mubr.f32.mxu1 %v15513_v32 }
 0xe0e   : > { %v14480_v0 = vpop.f32.mrb[66].mxu1 }
 0xe0f   : > { %v6210_v8 = vmul.f32 %v14480_v0, %v14480_v0  ;;  %v14484_v48 = vpop.f32.mrb[67].mxu1 }
 0xe10   : > { %v6177_v22 = vadd.f32 %v14484_v48, %v14480_v0  ;;  %v6211_v40 = vmul.f32 %v14484_v48, %v14484_v48 }
 0xe12   : > { %6178 = vadd.xlane.f32.xlu0 %v6177_v22  ;;  %v14490_v34 = vpop.f32.mrb[68].mxu1  ;;  %v14492_v10 = vadd.f32 %v6211_v40, %v6210_v8 }
 0xe13   : > { %v6212_v59 = vmul.f32 %v14490_v34, %v14490_v34  ;;  %v14496_v15 = vpop.f32.mrb[69].mxu1 }
 0xe14   : > { %v6180_v43 = vadd.f32 %v14496_v15, %v14490_v34  ;;  %v6213_v49 = vmul.f32 %v14496_v15, %v14496_v15 }
 0xe16   : > { %6181 = vadd.xlane.f32.xlu1 %v6180_v43  ;;  %v14502_v39 = vpop.f32.mrb[70].mxu1  ;;  %v14504_v6 = vadd.f32 %v6213_v49, %v6212_v59  ;;  %v6167_v59 = vld [vmem:[%s14919_s12 + $0x8] sm:$0xff]  ;;  %v6166_v43 = vld [vmem:[%s14919_s12] sm:$0xff] }
 0xe17   : > { %v6214_v18 = vmul.f32 %v14502_v39, %v14502_v39  ;;  %v14508_v47 = vpop.f32.mrb[71].mxu1  ;;  %v6171_v49 = vld [vmem:[%s14919_s12 + $0x28] sm:$0xff] }
 0xe18   : > { %v6183_v41 = vadd.f32 %v14508_v47, %v14502_v39  ;;  %v6215_v25 = vmul.f32 %v14508_v47, %v14508_v47 }
 0xe1a   : > { %6184 = vadd.xlane.f32.xlu0 %v6183_v41  ;;  %v14514_v7 = vpop.f32.mrb[72].mxu1  ;;  %v6238_v33 = vadd.f32 %v6215_v25, %v6214_v18  ;;  %v6173_v18 = vld [vmem:[%s14919_s12 + $0x38] sm:$0xff]  ;;  %v6170_v41 = vld [vmem:[%s14919_s12 + $0x20] sm:$0xff]  ;;  %v6172_v25 = vld [vmem:[%s14919_s12 + $0x30] sm:$0xff] }
 0xe1b   : > { %v6216_v46 = vmul.f32 %v14514_v7, %v14514_v7  ;;  %v14518_v37 = vpop.f32.mrb[73].mxu1 }
 0xe1c   : > { %v6186_v11 = vadd.f32 %v14518_v37, %v14514_v7  ;;  %v6217_v13 = vmul.f32 %v14518_v37, %v14518_v37 }
 0xe1e   : > { %6187 = vadd.xlane.f32.xlu0 %v6186_v11  ;;  %v14524_v9 = vpop.f32.mrb[74].mxu1  ;;  %v6241_v42 = vadd.f32 %v6217_v13, %v6216_v46 }
 0xe1f   : > { %v6218_v62 = vmul.f32 %v14524_v9, %v14524_v9  ;;  %v14528_v21 = vpop.f32.mrb[75].mxu1 }
 0xe20   : > { %v6189_v16 = vadd.f32 %v14528_v21, %v14524_v9  ;;  %v6219_v20 = vmul.f32 %v14528_v21, %v14528_v21 }
 0xe22   : > { %6190 = vadd.xlane.f32.xlu1 %v6189_v16  ;;  %v14534_v57 = vpop.f32.mrb[76].mxu1  ;;  %v6244_v14 = vadd.f32 %v6219_v20, %v6218_v62  ;;  %v15514_v62 = vmov 0.0|0.0  }
 0xe23   : > { %v6220_v45 = vmul.f32 %v14534_v57, %v14534_v57  ;;  %v14538_v52 = vpop.f32.mrb[77].mxu1 }
 0xe24   : > { %v6192_v63 = vadd.f32 %v14538_v52, %v14534_v57  ;;  %v6221_v53 = vmul.f32 %v14538_v52, %v14538_v52 }
 0xe26   : > { %6193 = vadd.xlane.f32.xlu0 %v6192_v63  ;;  %v14544_v28 = vpop.f32.mrb[78].mxu1  ;;  %v6247_v24 = vadd.f32 %v6221_v53, %v6220_v45 }
 0xe27   : > { %v6222_v50 = vmul.f32 %v14544_v28, %v14544_v28  ;;  %v14548_v5 = vpop.f32.mrb[79].mxu1 }
 0xe28   : > { %v6195_v61 = vadd.f32 %v14548_v5, %v14544_v28  ;;  %v6223_v55 = vmul.f32 %v14548_v5, %v14548_v5 }
 0xe2a   : > { %6196 = vadd.xlane.f32.xlu1 %v6195_v61  ;;  %v14554_v4 = vpop.f32.mrb[80].mxu1  ;;  %v6250_v44 = vadd.f32 %v6223_v55, %v6222_v50 }
 0xe2b   : > { %v6224_v58 = vmul.f32 %v14554_v4, %v14554_v4  ;;  %v14558_v2 = vpop.f32.mrb[81].mxu1 }
 0xe2c   : > { %v6198_v29 = vadd.f32 %v14558_v2, %v14554_v4  ;;  %v6225_v26 = vmul.f32 %v14558_v2, %v14558_v2 }
 0xe2e   : > { %6199 = vadd.xlane.f32.xlu0 %v6198_v29  ;;  %v14564_v27 = vpop.f32.mrb[82].mxu1  ;;  %v6253_v35 = vadd.f32 %v6225_v26, %v6224_v58 }
 0xe2f   : > { %v6226_v3 = vmul.f32 %v14564_v27, %v14564_v27  ;;  %v14568_v17 = vpop.f32.mrb[83].mxu1 }
 0xe30   : > { %v6201_v31 = vadd.f32 %v14568_v17, %v14564_v27  ;;  %v6227_v23 = vmul.f32 %v14568_v17, %v14568_v17 }
 0xe32   : > { %6202 = vadd.xlane.f32.xlu1 %v6201_v31  ;;  %v14574_v54 = vpop.f32.mrb[84].mxu1  ;;  %v6256_v56 = vadd.f32 %v6227_v23, %v6226_v3 }
 0xe33   : > { %v6228_v19 = vmul.f32 %v14574_v54, %v14574_v54  ;;  %v14578_v51 = vpop.f32.mrb[85].mxu1 }
 0xe34   : > { %v6204_v30 = vadd.f32 %v14578_v51, %v14574_v54  ;;  %v6229_v60 = vmul.f32 %v14578_v51, %v14578_v51 }
 0xe36   : > { %6205 = vadd.xlane.f32.xlu0 %v6204_v30  ;;  %v14584_v36 = vpop.f32.mrb[86].mxu1  ;;  %v6259_v38 = vadd.f32 %v6229_v60, %v6228_v19  ;;  %v8699_v60 = vld [vmem:[%s14913_s6 + $0x10] sm:$0xff] }
 0xe37   : > { %v6230_v12 = vmul.f32 %v14584_v36, %v14584_v36  ;;  %v14588_v1 = vpop.f32.mrb[87].mxu1 }
 0xe38   : > { %v6207_v8 = vadd.f32 %v14588_v1, %v14584_v36  ;;  %v6231_v22 = vmul.f32 %v14588_v1, %v14588_v1 }
 0xe3a   : > { %6233 = vadd.xlane.f32.xlu0 %v14492_v10  ;;  %6208 = vadd.xlane.f32.xlu1 %v6207_v8  ;;  %v6262_v40 = vadd.f32 %v6231_v22, %v6230_v12  ;;  %v6169_v10 = vld [vmem:[%s14919_s12 + $0x18] sm:$0xff] }
 0xe3b   : > { %v8700_v22 = vld [vmem:[%s14913_s6 + $0x18] sm:$0xff] }
 0xe3e   : > { %6239 = vadd.xlane.f32.xlu0 %v6238_v33  ;;  %6236 = vadd.xlane.f32.xlu1 %v14504_v6  ;;  %v6168_v6 = vld [vmem:[%s14919_s12 + $0x10] sm:$0xff]  ;;  %v6174_v33 = vld [vmem:[%s14919_s12 + $0x40] sm:$0xff] }
 0xe42   : > { %6245 = vadd.xlane.f32.xlu0 %v6244_v14  ;;  %6242 = vadd.xlane.f32.xlu1 %v6241_v42 }
 0xe46   : > { %6251 = vadd.xlane.f32.xlu0 %v6250_v44  ;;  %6248 = vadd.xlane.f32.xlu1 %v6247_v24 }
 0xe4a   : > { %6257 = vadd.xlane.f32.xlu0 %v6256_v56  ;;  %6254 = vadd.xlane.f32.xlu1 %v6253_v35  ;;  %v8697_v35 = vld [vmem:[%s14913_s6] sm:$0xff]  ;;  %v8698_v56 = vld [vmem:[%s14913_s6 + $0x8] sm:$0xff] }
 0xe4e   : > { %6263 = vadd.xlane.f32.xlu0 %v6262_v40  ;;  %6260 = vadd.xlane.f32.xlu1 %v6259_v38 }
 0xe5f   : > { %6732 = vperm.xlu1 %8618, %v6167_v59  }
 0xe63   : > { %6742 = vperm.xlu1 %8618, %v6169_v10  }
 0xe64   : > { %6727 = vperm.xlu0 %8619, %v6166_v43   ;;  %v8701_v43 = vld [vmem:[%s14913_s6 + $0x20] sm:$0xff] }
 0xe67   : > { %6752 = vperm.xlu1 %8618, %v6171_v49  }
 0xe68   : > { %6737 = vperm.xlu0 %8619, %v6168_v6  }
 0xe6b   : > { %6762 = vperm.xlu1 %8618, %v6173_v18   ;;  %v8702_v18 = vld [vmem:[%s14913_s6 + $0x28] sm:$0xff] }
 0xe6c   : > { %6747 = vperm.xlu0 %8619, %v6170_v41  }
 0xe70   : > { %6757 = vperm.xlu0 %8619, %v6172_v25   ;;  %v8703_v25 = vld [vmem:[%s14913_s6 + $0x30] sm:$0xff] }
 0xe74   : > { %6767 = vperm.xlu0 %8619, %v6174_v33   ;;  %v8704_v33 = vld [vmem:[%s14913_s6 + $0x38] sm:$0xff] }
 0xe9f   : > { %v6179_v46 = vpop.xlane.xlu0 %6178 }
 0xea3   : > { %v6182_v11 = vpop.xlane.xlu1 %6181 }
 0xea4   : > { %v8287_v13 = vpack.c.bf16 %v6182_v11, %v6179_v46  ;;  %v8705_v46 = vld [vmem:[%s14913_s6 + $0x40] sm:$0xff]  ;;  %v8706_v11 = vld [vmem:[%s14913_s6 + $0x48] sm:$0xff] }
 0xea6   : > { %8288 = vmatpush3.bf16.msra.mxu0 %v8287_v13  ;;  %v8707_v13 = vld [vmem:[%s14913_s6 + $0x50] sm:$0xff] }
 0xea7   : > { %v6185_v42 = vpop.xlane.xlu0 %6184  ;;  %8289 = vmatprep.subr.bf16.mxu0 %v15514_v62 }
 0xeab   : > { %v6188_v16 = vpop.xlane.xlu0 %6187 }
 0xeac   : > { %v8290_v20 = vpack.c.bf16 %v6188_v16, %v6185_v42 }
 0xeae   : > { %8291 = vmatpush3.bf16.msra.mxu0 %v8290_v20 }
 0xeaf   : > { %8292 = vmatprep.subr.bf16.mxu0 %v15514_v62  ;;  %v6191_v14 = vpop.xlane.xlu1 %6190 }
 0xeb3   : > { %v6194_v45 = vpop.xlane.xlu0 %6193 }
 0xeb4   : > { %v8293_v63 = vpack.c.bf16 %v6194_v45, %v6191_v14 }
 0xeb6   : > { %8294 = vmatpush3.bf16.msra.mxu0 %v8293_v63 }
 0xeb7   : > { %8295 = vmatprep.subr.bf16.mxu0 %v15514_v62  ;;  %v6197_v53 = vpop.xlane.xlu1 %6196 }
 0xebb   : > { %v6200_v24 = vpop.xlane.xlu0 %6199 }
 0xebc   : > { %v8296_v50 = vpack.c.bf16 %v6200_v24, %v6197_v53 }
 0xebe   : > { %8297 = vmatpush3.bf16.msra.mxu0 %v8296_v50 }
 0xebf   : > { %8298 = vmatprep.subr.bf16.mxu0 %v15514_v62  ;;  %v6203_v61 = vpop.xlane.xlu1 %6202 }
 0xec3   : > { %v6206_v55 = vpop.xlane.xlu0 %6205 }
 0xec4   : > { %v8299_v44 = vpack.c.bf16 %v6206_v55, %v6203_v61 }
 0xec6   : > { %8300 = vmatpush3.bf16.msra.mxu0 %v8299_v44 }
 0xec7   : > { %v6234_v58 = vpop.xlane.xlu0 %6233  ;;  %v6209_v29 = vpop.xlane.xlu1 %6208  ;;  %7548 = vmatprep.subr.mxu0 %v15513_v32 }
 0xeca   : > { %7549 = vmatpush3.msra.mxu0 %v6209_v29 }
 0xecb   : > { %v6240_v26 = vpop.xlane.xlu0 %6239  ;;  %7551 = vmatmul.mubr.msk.f32.vlgmr.msra.gmra.mrb[88].mxu0 %vm2129_vm10, %v8697_v35  ;;  %v6237_v3 = vpop.xlane.xlu1 %6236  ;;  %8301 = vmatprep.subr.bf16.mxu0 %v15514_v62 }
 0xecc   : > { %v8302_v31 = vpack.c.bf16 %v6237_v3, %v6234_v58  ;;  %7553 = vmatprep.mubr.msk.f32.mxu0 %vm8879_vm9, %v15513_v32 }
 0xece   : > { %8303 = vmatpush3.bf16.msra.mxu0 %v8302_v31 }
 0xecf   : > { %v6246_v23 = vpop.xlane.xlu0 %6245  ;;  %7554 = vmatmul.mubr.msk.f32.gmra.mrb[90].mxu0 %vm2129_vm10, %v8698_v56  ;;  %v6243_v19 = vpop.xlane.xlu1 %6242  ;;  %8304 = vmatprep.subr.bf16.mxu0 %v15514_v62 }
 0xed0   : > { %v8305_v30 = vpack.c.bf16 %v6243_v19, %v6240_v26  ;;  %7556 = vmatprep.mubr.msk.f32.mxu0 %vm8879_vm9, %v15513_v32 }
 0xed2   : > { %8306 = vmatpush3.bf16.msra.mxu0 %v8305_v30 }
 0xed3   : > { %7557 = vmatmul.mubr.msk.f32.gmra.mrb[92].mxu0 %vm2129_vm10, %v8699_v60  ;;  %v6249_v38 = vpop.xlane.xlu1 %6248  ;;  %8307 = vmatprep.subr.bf16.mxu0 %v15514_v62  ;;  %v6252_v8 = vpop.xlane.xlu0 %6251 }
 0xed4   : > { %v8308_v12 = vpack.c.bf16 %v6249_v38, %v6246_v23  ;;  %7559 = vmatprep.mubr.msk.f32.mxu0 %vm8879_vm9, %v15513_v32 }
 0xed6   : > { %8309 = vmatpush3.bf16.msra.mxu0 %v8308_v12 }
 0xed7   : > { %7560 = vmatmul.mubr.msk.f32.gmra.mrb[94].mxu0 %vm2129_vm10, %v8700_v22  ;;  %v6255_v40 = vpop.xlane.xlu1 %6254  ;;  %8310 = vmatprep.subr.bf16.mxu0 %v15514_v62  ;;  %v6258_v10 = vpop.xlane.xlu0 %6257 }
 0xed8   : > { %v8311_v59 = vpack.c.bf16 %v6255_v40, %v6252_v8  ;;  %7562 = vmatprep.mubr.msk.f32.mxu0 %vm8879_vm9, %v15513_v32 }
 0xeda   : > { %8312 = vmatpush3.bf16.msra.mxu0 %v8311_v59 }
 0xedb   : > { %7563 = vmatmul.mubr.msk.f32.gmra.mrb[96].mxu0 %vm2129_vm10, %v8701_v43  ;;  %v6261_v49 = vpop.xlane.xlu1 %6260  ;;  %8313 = vmatprep.subr.bf16.mxu0 %v15514_v62  ;;  %v6264_v41 = vpop.xlane.xlu0 %6263 }
 0xedc   : > { %v8314_v6 = vpack.c.bf16 %v6261_v49, %v6258_v10  ;;  %7565 = vmatprep.mubr.msk.f32.mxu0 %vm8879_vm9, %v15513_v32 }
 0xede   : > { %8315 = vmatpush3.bf16.msra.mxu0 %v8314_v6 }
 0xedf   : > { %7566 = vmatmul.mubr.msk.f32.gmra.mrb[98].mxu0 %vm2129_vm10, %v8702_v18  ;;  %7603 = vmatprep.subr.mxu0 %v15513_v32 }
 0xee0   : > { %7568 = vmatprep.mubr.msk.f32.mxu0 %vm8879_vm9, %v15513_v32 }
 0xee2   : > { %7604 = vmatpush3.msra.mxu0 %v6264_v41 }
 0xee3   : > { %7569 = vmatmul.mubr.msk.f32.gmra.mrb[100].mxu0 %vm2129_vm10, %v8703_v25 }
 0xee4   : > { %7571 = vmatprep.mubr.msk.f32.mxu0 %vm8879_vm9, %v15513_v32 }
 0xee7   : > { %7572 = vmatmul.mubr.msk.f32.gmra.mrb[102].mxu0 %vm2129_vm10, %v8704_v33 }
 0xee8   : > { %7574 = vmatprep.mubr.msk.f32.mxu0 %vm8879_vm9, %v15513_v32 }
 0xeeb   : > { %7575 = vmatmul.mubr.msk.f32.gmra.mrb[104].mxu0 %vm2129_vm10, %v8705_v46 }
 0xeec   : > { %7577 = vmatprep.mubr.msk.f32.mxu0 %vm8879_vm9, %v15513_v32 }
 0xeef   : > { %7578 = vmatmul.mubr.msk.f32.gmra.mrb[106].mxu0 %vm2129_vm10, %v8706_v11 }
 0xef0   : > { %7580 = vmatprep.mubr.msk.f32.mxu0 %vm8879_vm9, %v15513_v32 }
 0xef3   : > { %7581 = vmatmul.mubr.msk.f32.gmra.mrb[108].mxu0 %vm2129_vm10, %v8707_v13 }
 0xef4   : > { %7605 = vmatprep.mubr.msk.f32.mxu0 %vm8879_vm9, %v15513_v32 }
 0xef7   : > { %7606 = vmatmul.mubr.msk.f32.vlgmr.msra.gmra.mrb[110].mxu0 %vm2129_vm10, %v8697_v35 }
 0xef8   : > { %7608 = vmatprep.mubr.msk.f32.mxu0 %vm8879_vm9, %v15513_v32 }
 0xefb   : > { %7609 = vmatmul.mubr.msk.f32.gmra.mrb[112].mxu0 %vm2129_vm10, %v8698_v56 }
 0xefc   : > { %7611 = vmatprep.mubr.msk.f32.mxu0 %vm8879_vm9, %v15513_v32 }
 0xeff   : > { %7612 = vmatmul.mubr.msk.f32.gmra.mrb[114].mxu0 %vm2129_vm10, %v8699_v60 }
 0xf00   : > { %7614 = vmatprep.mubr.msk.f32.mxu0 %vm8879_vm9, %v15513_v32 }
 0xf03   : > { %7615 = vmatmul.mubr.msk.f32.gmra.mrb[116].mxu0 %vm2129_vm10, %v8700_v22 }
 0xf04   : > { %7617 = vmatprep.mubr.msk.f32.mxu0 %vm8879_vm9, %v15513_v32 }
 0xf07   : > { %7618 = vmatmul.mubr.msk.f32.gmra.mrb[118].mxu0 %vm2129_vm10, %v8701_v43 }
 0xf08   : > { %7620 = vmatprep.mubr.msk.f32.mxu0 %vm8879_vm9, %v15513_v32 }
 0xf0b   : > { %7621 = vmatmul.mubr.msk.f32.gmra.mrb[120].mxu0 %vm2129_vm10, %v8702_v18 }
 0xf0c   : > { %7623 = vmatprep.mubr.msk.f32.mxu0 %vm8879_vm9, %v15513_v32 }
 0xf0f   : > { %7624 = vmatmul.mubr.msk.f32.gmra.mrb[122].mxu0 %vm2129_vm10, %v8703_v25 }
 0xf10   : > { %7626 = vmatprep.mubr.msk.f32.mxu0 %vm8879_vm9, %v15513_v32 }
 0xf13   : > { %7627 = vmatmul.mubr.msk.f32.gmra.mrb[124].mxu0 %vm2129_vm10, %v8704_v33 }
 0xf14   : > { %7629 = vmatprep.mubr.msk.f32.mxu0 %vm8879_vm9, %v15513_v32 }
 0xf17   : > { %7630 = vmatmul.mubr.msk.f32.gmra.mrb[126].mxu0 %vm2129_vm10, %v8705_v46 }
 0xf18   : > { %7632 = vmatprep.mubr.msk.f32.mxu0 %vm8879_vm9, %v15513_v32 }
 0xf1b   : > { %7633 = vmatmul.mubr.msk.f32.gmra.mrb[128].mxu0 %vm2129_vm10, %v8706_v11 }
 0xf1c   : > { %7635 = vmatprep.mubr.msk.f32.mxu0 %vm8879_vm9, %v15513_v32 }
 0xf1f   : > { %7636 = vmatmul.mubr.msk.f32.gmra.mrb[130].mxu0 %vm2129_vm10, %v8707_v13 }
 0xf9e   : > { %v6331_v42 = vpop.f32.mrb[88].mxu0 }
 0xf9f   : > { %6573 = vperm.xlu1 %8618, %v6331_v42   ;;  %v7552_v62 = vpop.f32.mrb[89].mxu0  ;;  %v6505_v19 = vmul.f32 %v6331_v42, %v6331_v42 }
 0xfa2   : > { %v6336_v16 = vpop.f32.mrb[90].mxu0 }
 0xfa3   : > { %6578 = vperm.xlu0 %8619, %v6336_v16   ;;  %v7555_v20 = vpop.f32.mrb[91].mxu0  ;;  %v6506_v12 = vmul.f32 %v6336_v16, %v6336_v16 }
 0xfa6   : > { %v6341_v14 = vpop.f32.mrb[92].mxu0 }
 0xfa7   : > { %6583 = vperm.xlu0 %8619, %v6341_v14   ;;  %v7558_v45 = vpop.f32.mrb[93].mxu0  ;;  %v6507_v43 = vmul.f32 %v6341_v14, %v6341_v14  ;;  %v6155_v14 = vld [vmem:[%s14918_s11] sm:$0xff] }
 0xfaa   : > { %v6346_v63 = vpop.f32.mrb[94].mxu0 }
 0xfab   : > { %6588 = vperm.xlu1 %8618, %v6346_v63   ;;  %v7561_v53 = vpop.f32.mrb[95].mxu0  ;;  %v6508_v33 = vmul.f32 %v6346_v63, %v6346_v63 }
 0xfae   : > { %v6351_v24 = vpop.f32.mrb[96].mxu0 }
 0xfaf   : > { %6593 = vperm.xlu0 %8619, %v6351_v24   ;;  %v7564_v50 = vpop.f32.mrb[97].mxu0  ;;  %v6509_v16 = vmul.f32 %v6351_v24, %v6351_v24 }
 0xfb2   : > { %v6356_v61 = vpop.f32.mrb[98].mxu0 }
 0xfb3   : > { %6598 = vperm.xlu1 %8618, %v6356_v61   ;;  %v7567_v32 = vpop.f32.mrb[99].mxu0  ;;  %v6510_v63 = vmul.f32 %v6356_v61, %v6356_v61  ;;  %v6157_v61 = vld [vmem:[%s14918_s11 + $0x10] sm:$0xff] }
 0xfb6   : > { %v6361_v55 = vpop.f32.mrb[100].mxu0 }
 0xfb7   : > { %6603 = vperm.xlu0 %8619, %v6361_v55   ;;  %v7570_v44 = vpop.f32.mrb[101].mxu0 }
 0xfba   : > { %v14731_v58 = vpop.f32.mrb[102].mxu0 }
 0xfbb   : > { %6608 = vperm.xlu1 %8618, %v14731_v58   ;;  %v7573_v29 = vpop.f32.mrb[103].mxu0 }
 0xfbe   : > { %v14734_v26 = vpop.f32.mrb[104].mxu0 }
 0xfbf   : > { %6613 = vperm.xlu0 %8619, %v14734_v26   ;;  %v7576_v35 = vpop.f32.mrb[105].mxu0 }
 0xfc2   : > { %v14737_v3 = vpop.f32.mrb[106].mxu0 }
 0xfc3   : > { %6618 = vperm.xlu1 %8618, %v14737_v3   ;;  %v7579_v31 = vpop.f32.mrb[107].mxu0 }
 0xfc4   : > { %v6156_v31 = vld [vmem:[%s14918_s11 + $0x8] sm:$0xff] }
 0xfc6   : > { %v14740_v23 = vpop.f32.mrb[108].mxu0 }
 0xfc7   : > { %v7582_v56 = vpop.f32.mrb[109].mxu0 }
 0xfca   : > { %v6451_v30 = vpop.f32.mrb[110].mxu0 }
 0xfcb   : > { %v6516_v60 = vsub.f32 %v6451_v30, %v6505_v19  ;;  %v7607_v38 = vpop.f32.mrb[111].mxu0 }
 0xfcd   : > { %v6527_v8 = vmax.f32 %v6516_v60, 0.0 }
 0xfce   : > { %v6456_v22 = vpop.f32.mrb[112].mxu0 }
 0xfcf   : > { %v6538_v40 = vadd.f32 1e-05, %v6527_v8  ;;  %v6517_v59 = vsub.f32 %v6456_v22, %v6506_v12  ;;  %v7610_v10 = vpop.f32.mrb[113].mxu0  ;;  %v6511_v12 = vmul.f32 %v6361_v55, %v6361_v55  ;;  %v6158_v55 = vld [vmem:[%s14918_s11 + $0x18] sm:$0xff] }
 0xfd1   : > { %8664 = vrsqrt.f32 %v6538_v40  ;;  %v6528_v49 = vmax.f32 %v6517_v59, 0.0 }
 0xfd2   : > { %v6461_v6 = vpop.f32.mrb[114].mxu0 }
 0xfd3   : > { %v6539_v18 = vadd.f32 1e-05, %v6528_v49  ;;  %v6518_v41 = vsub.f32 %v6461_v6, %v6507_v43  ;;  %v7613_v25 = vpop.f32.mrb[115].mxu0  ;;  %v6512_v6 = vmul.f32 %v14731_v58, %v14731_v58  ;;  %v6159_v58 = vld [vmem:[%s14918_s11 + $0x20] sm:$0xff] }
 0xfd5   : > { %8666 = vrsqrt.f32 %v6539_v18  ;;  %v6529_v46 = vmax.f32 %v6518_v41, 0.0 }
 0xfd6   : > { %v6466_v11 = vpop.f32.mrb[116].mxu0 }
 0xfd7   : > { %v6540_v13 = vadd.f32 1e-05, %v6529_v46  ;;  %v6519_v42 = vsub.f32 %v6466_v11, %v6508_v33  ;;  %v7616_v62 = vpop.f32.mrb[117].mxu0 }
 0xfd9   : > { %8668 = vrsqrt.f32 %v6540_v13  ;;  %v6530_v20 = vmax.f32 %v6519_v42, 0.0  ;;  %v6513_v42 = vmul.f32 %v14734_v26, %v14734_v26  ;;  %v6160_v26 = vld [vmem:[%s14918_s11 + $0x28] sm:$0xff] }
 0xfda   : > { %v6471_v45 = vpop.f32.mrb[118].mxu0 }
 0xfdb   : > { %v8665_v53 = vpop.eup %8664  ;;  %v6541_v50 = vadd.f32 1e-05, %v6530_v20  ;;  %v6520_v32 = vsub.f32 %v6471_v45, %v6509_v16  ;;  %v7619_v44 = vpop.f32.mrb[119].mxu0 }
 0xfdc   : > { %v6560_v29 = vmul.f32 %v8665_v53, %v6155_v14 }
 0xfdd   : > { %8670 = vrsqrt.f32 %v6541_v50  ;;  %v6531_v35 = vmax.f32 %v6520_v32, 0.0  ;;  %v6514_v32 = vmul.f32 %v14737_v3, %v14737_v3  ;;  %v6161_v3 = vld [vmem:[%s14918_s11 + $0x30] sm:$0xff] }
 0xfde   : > { %6650 = vperm.xlu1 %8618, %v6560_v29   ;;  %v6476_v24 = vpop.f32.mrb[120].mxu0 }
 0xfdf   : > { %v8667_v56 = vpop.eup %8666  ;;  %v6542_v19 = vadd.f32 1e-05, %v6531_v35  ;;  %v6521_v30 = vsub.f32 %v6476_v24, %v6510_v63  ;;  %v7622_v60 = vpop.f32.mrb[121].mxu0 }
 0xfe0   : > { %v6561_v38 = vmul.f32 %v8667_v56, %v6156_v31 }
 0xfe1   : > { %8672 = vrsqrt.f32 %v6542_v19  ;;  %v6532_v8 = vmax.f32 %v6521_v30, 0.0  ;;  %v6515_v19 = vmul.f32 %v14740_v23, %v14740_v23 }
 0xfe2   : > { %6655 = vperm.xlu1 %8618, %v6561_v38   ;;  %v6481_v22 = vpop.f32.mrb[122].mxu0 }
 0xfe3   : > { %v8669_v40 = vpop.eup %8668  ;;  %v6543_v59 = vadd.f32 1e-05, %v6532_v8  ;;  %v6522_v10 = vsub.f32 %v6481_v22, %v6511_v12  ;;  %v7625_v43 = vpop.f32.mrb[123].mxu0 }
 0xfe4   : > { %v6562_v49 = vmul.f32 %v8669_v40, %v6157_v61 }
 0xfe5   : > { %8674 = vrsqrt.f32 %v6543_v59  ;;  %v6533_v18 = vmax.f32 %v6522_v10, 0.0  ;;  %v6162_v59 = vld [vmem:[%s14918_s11 + $0x38] sm:$0xff] }
 0xfe6   : > { %6660 = vperm.xlu0 %8619, %v6562_v49   ;;  %v6486_v41 = vpop.f32.mrb[124].mxu0 }
 0xfe7   : > { %v8671_v25 = vpop.eup %8670  ;;  %v6544_v33 = vadd.f32 1e-05, %v6533_v18  ;;  %v6523_v46 = vsub.f32 %v6486_v41, %v6512_v6  ;;  %v7628_v11 = vpop.f32.mrb[125].mxu0  ;;  %v6163_v6 = vld [vmem:[%s14918_s11 + $0x40] sm:$0xff]  ;;  %v6164_v41 = vld [vmem:[%s14918_s11 + $0x48] sm:$0xff] }
 0xfe8   : > { %v6563_v13 = vmul.f32 %v8671_v25, %v6158_v55  ;;  %v6175_v11 = vld [vmem:[%s14919_s12 + $0x48] sm:$0xff] }
 0xfe9   : > { %8676 = vrsqrt.f32 %v6544_v33  ;;  %v6534_v62 = vmax.f32 %v6523_v46, 0.0  ;;  %v6176_v46 = vld [vmem:[%s14919_s12 + $0x50] sm:$0xff] }
 0xfea   : > { %6665 = vperm.xlu1 %8618, %v6563_v13   ;;  %v6491_v16 = vpop.f32.mrb[126].mxu0 }
 0xfeb   : > { %v8673_v20 = vpop.eup %8672  ;;  %v6545_v14 = vadd.f32 1e-05, %v6534_v62  ;;  %v6524_v45 = vsub.f32 %v6491_v16, %v6513_v42  ;;  %v7631_v53 = vpop.f32.mrb[127].mxu0  ;;  %v6165_v42 = vld [vmem:[%s14918_s11 + $0x50] sm:$0xff] }
 0xfec   : > { %v6564_v50 = vmul.f32 %v8673_v20, %v6159_v58  ;;  %v6733_v58 = vpop.permute.xlu1 %6732 }
 0xfed   : > { %8678 = vrsqrt.f32 %v6545_v14  ;;  %v6535_v44 = vmax.f32 %v6524_v45, 0.0 }
 0xfee   : > { %6670 = vperm.xlu0 %8619, %v6564_v50   ;;  %v6496_v29 = vpop.f32.mrb[128].mxu0 }
 0xfef   : > { %v8675_v63 = vpop.eup %8674  ;;  %v6546_v35 = vadd.f32 1e-05, %v6535_v44  ;;  %v6525_v31 = vsub.f32 %v6496_v29, %v6514_v32  ;;  %v7634_v24 = vpop.f32.mrb[129].mxu0 }
 0xff0   : > { %v6565_v56 = vmul.f32 %v8675_v63, %v6160_v26  ;;  %v14790_v16 = vpop.permute.xlu1 %6742 }
 0xff1   : > { %8680 = vrsqrt.f32 %v6546_v35  ;;  %v6536_v30 = vmax.f32 %v6525_v31, 0.0 }
 0xff2   : > { %6675 = vperm.xlu1 %8618, %v6565_v56   ;;  %v6501_v60 = vpop.f32.mrb[130].mxu0 }
 0xff3   : > { %v8677_v38 = vpop.eup %8676  ;;  %v6547_v12 = vadd.f32 1e-05, %v6536_v30  ;;  %v6526_v8 = vsub.f32 %v6501_v60, %v6515_v19  ;;  %v7637_v61 = vpop.f32.mrb[131].mxu0 }
 0xff4   : > { %v6566_v22 = vmul.f32 %v8677_v38, %v6161_v3  ;;  %v14792_v14 = vpop.permute.xlu1 %6752 }
 0xff5   : > { %8682 = vrsqrt.f32 %v6547_v12  ;;  %v6537_v40 = vmax.f32 %v6526_v8, 0.0 }
 0xff6   : > { %6680 = vperm.xlu0 %8619, %v6566_v22  }
 0xff7   : > { %v8679_v10 = vpop.eup %8678  ;;  %v6548_v43 = vadd.f32 1e-05, %v6537_v40 }
 0xff8   : > { %v6567_v49 = vmul.f32 %v8679_v10, %v6162_v59  ;;  %v14796_v53 = vpop.permute.xlu1 %6762 }
 0xff9   : > { %8684 = vrsqrt.f32 %v6548_v43 }
 0xffa   : > { %6685 = vperm.xlu1 %8618, %v6567_v49  }
 0xffb   : > { %v8681_v18 = vpop.eup %8680 }
 0xffc   : > { %v6568_v55 = vmul.f32 %v8681_v18, %v6163_v6 }
 0xffe   : > { %6690 = vperm.xlu0 %8619, %v6568_v55  }
 0xfff   : > { %v8683_v25 = vpop.eup %8682 }
0x1000   : > { %v6569_v33 = vmul.f32 %v8683_v25, %v6164_v41 }
0x1002   : > { %6623 = vperm.xlu0 %8619, %v14740_v23   ;;  %6695 = vperm.xlu1 %8618, %v6569_v33   ;;  %v6728_v23 = vpop.permute.xlu0 %6727 }
0x1003   : > { %v8685_v13 = vpop.eup %8684 }
0x1004   : > { %v6570_v62 = vmul.f32 %v8685_v13, %v6165_v42 }
0x1006   : > { %6777 = vperm.xlu0 %8619, %v6176_v46   ;;  %6772 = vperm.xlu1 %8618, %v6175_v11   ;;  %v6738_v20 = vpop.permute.xlu0 %6737 }
0x100a   : > { %6700 = vperm.xlu1 %8618, %v6570_v62   ;;  %v14794_v45 = vpop.permute.xlu0 %6747 }
0x100e   : > { %v14798_v50 = vpop.permute.xlu0 %6757 }
0x1012   : > { %v14800_v44 = vpop.permute.xlu0 %6767 }
0x101e   : > { %v6574_v32 = vpop.permute.xlu1 %6573 }
0x101f   : > { %v6626_v19 = vsub.f32 %v14480_v0, %v6574_v32  ;;  %v6627_v30 = vsub.f32 %v14484_v48, %v6574_v32 }
0x1022   : > { %v6579_v29 = vpop.permute.xlu0 %6578 }
0x1023   : > { %v6628_v8 = vsub.f32 %v14490_v34, %v6579_v29  ;;  %v6629_v22 = vsub.f32 %v14496_v15, %v6579_v29 }
0x1026   : > { %v6584_v35 = vpop.permute.xlu0 %6583 }
0x1027   : > { %v6630_v0 = vsub.f32 %v14502_v39, %v6584_v35  ;;  %v6631_v48 = vsub.f32 %v14508_v47, %v6584_v35 }
0x102a   : > { %v6589_v26 = vpop.permute.xlu1 %6588 }
0x102b   : > { %v6632_v11 = vsub.f32 %v14514_v7, %v6589_v26  ;;  %v6633_v47 = vsub.f32 %v14518_v37, %v6589_v26 }
0x102e   : > { %v6594_v24 = vpop.permute.xlu0 %6593 }
0x1032   : > { %v14802_v63 = vpop.permute.xlu1 %6598 }
0x1036   : > { %v14810_v3 = vpop.permute.xlu0 %6603 }
0x103a   : > { %v14804_v31 = vpop.permute.xlu1 %6608 }
0x103e   : > { %v14814_v40 = vpop.permute.xlu0 %6613 }
0x1042   : > { %v14806_v56 = vpop.permute.xlu1 %6618 }
0x105d   : > { %v6651_v60 = vpop.permute.xlu1 %6650 }
0x105e   : > { %v6703_v38 = vmul.f32 %v6651_v60, %v6626_v19  ;;  %v6704_v12 = vmul.f32 %v6651_v60, %v6627_v30  ;;  %v6634_v60 = vsub.f32 %v14524_v9, %v6594_v24  ;;  %v6636_v9 = vsub.f32 %v14534_v57, %v14802_v63 }
0x105f   : > { %v6639_v57 = vsub.f32 %v14548_v5, %v14810_v3 }
0x1060   : > { %v6780_v61 = vadd.f32 %v6728_v23, %v6703_v38  ;;  %v6781_v59 = vadd.f32 %v6728_v23, %v6704_v12  ;;  %v6635_v38 = vsub.f32 %v14528_v21, %v6594_v24 }
0x1061   : > { %v6656_v10 = vpop.permute.xlu1 %6655 }
0x1062   : > { %v6705_v43 = vmul.f32 %v6656_v10, %v6628_v8  ;;  %v6706_v49 = vmul.f32 %v6656_v10, %v6629_v22  ;;  %v6824_v6 = vmul.f32 0.01, %v6780_v61  ;;  %vm6802_vm0 = vcmp.ge.f32.partialorder %v6780_v61, 0.0 }
0x1063   : > { %v6825_v55 = vmul.f32 0.01, %v6781_v59  ;;  %vm6803_vm2 = vcmp.ge.f32.partialorder %v6781_v59, 0.0 }
0x1064   : > { %v6782_v18 = vadd.f32 %v6733_v58, %v6705_v43  ;;  %v6783_v41 = vadd.f32 %v6733_v58, %v6706_v49  ;;  %v6846_v13 = vsel %vm6802_vm0, %v6780_v61, %v6824_v6 }
0x1065   : > { %v6661_v25 = vpop.permute.xlu0 %6660  ;;  %v6847_v35 = vsel %vm6803_vm2, %v6781_v59, %v6825_v55 }
0x1066   : > { %vm6804_vm1 = vcmp.ge.f32.partialorder %v6782_v18, 0.0  ;;  %v6826_v34 = vmul.f32 0.01, %v6782_v18  ;;  %v6707_v33 = vmul.f32 %v6661_v25, %v6630_v0  ;;  %v6708_v15 = vmul.f32 %v6661_v25, %v6631_v48 }
0x1067   : > { %v6827_v46 = vmul.f32 0.01, %v6783_v41  ;;  %vm6805_vm3 = vcmp.ge.f32.partialorder %v6783_v41, 0.0  ;;  %v6638_v25 = vsub.f32 %v14544_v28, %v14810_v3  ;;  %v6640_v28 = vsub.f32 %v14554_v4, %v14804_v31 }
0x1068   : > { %v6848_v42 = vsel %vm6804_vm1, %v6782_v18, %v6826_v34  ;;  %v6784_v39 = vadd.f32 %v6738_v20, %v6707_v33  ;;  %v6785_v62 = vadd.f32 %v6738_v20, %v6708_v15  ;;  %v6643_v4 = vsub.f32 %v14568_v17, %v14814_v40 }
0x1069   : > { %v6666_v23 = vpop.permute.xlu1 %6665  ;;  %v6849_v32 = vsel %vm6805_vm3, %v6783_v41, %v6827_v46  ;;  %v8318_v29 = vpack.c.bf16 %v6848_v42, %v6846_v13 }
0x106a   : > { %v6709_v58 = vmul.f32 %v6666_v23, %v6632_v11  ;;  %v6710_v19 = vmul.f32 %v6666_v23, %v6633_v47  ;;  %v8316_v30 = vpack.c.bf16 %v6849_v32, %v6847_v35  ;;  %v6828_v12 = vmul.f32 0.01, %v6784_v39 }
0x106b   : > { %vm6806_vm4 = vcmp.ge.f32.partialorder %v6784_v39, 0.0  ;;  %v6829_v8 = vmul.f32 0.01, %v6785_v62  ;;  %vm6807_vm6 = vcmp.ge.f32.partialorder %v6785_v62, 0.0 }
0x106c   : > { %v6786_v7 = vadd.f32 %v14790_v16, %v6709_v58  ;;  %v6787_v61 = vadd.f32 %v14790_v16, %v6710_v19  ;;  %8317 = vmatprep.subr.bf16.mxu1 %v8316_v30  ;;  %v6850_v21 = vsel %vm6806_vm4, %v6784_v39, %v6828_v12  ;;  %v6637_v16 = vsub.f32 %v14538_v52, %v14802_v63 }
0x106d   : > { %v6671_v37 = vpop.permute.xlu0 %6670  ;;  %8319 = vmatpush1.bf16.msra.mxu1 %v8318_v29  ;;  %v6851_v18 = vsel %vm6807_vm6, %v6785_v62, %v6829_v8  ;;  %v6642_v19 = vsub.f32 %v14564_v27, %v14814_v40 }
0x106e   : > { %vm6808_vm5 = vcmp.ge.f32.partialorder %v6786_v7, 0.0  ;;  %v6830_v20 = vmul.f32 0.01, %v6786_v7  ;;  %v6711_v26 = vmul.f32 %v6671_v37, %v6634_v60  ;;  %v6712_v22 = vmul.f32 %v6671_v37, %v6635_v38 }
0x106f   : > { %v6831_v59 = vmul.f32 0.01, %v6787_v61  ;;  %vm6809_vm7 = vcmp.ge.f32.partialorder %v6787_v61, 0.0 }
0x1070   : > { %v6852_v24 = vsel %vm6808_vm5, %v6786_v7, %v6830_v20  ;;  %v6788_v10 = vadd.f32 %v14794_v45, %v6711_v26  ;;  %v6789_v43 = vadd.f32 %v14794_v45, %v6712_v22  ;;  %v6645_v22 = vsub.f32 %v14578_v51, %v14806_v56 }
0x1071   : > { %v6676_v49 = vpop.permute.xlu1 %6675  ;;  %v6853_v0 = vsel %vm6809_vm7, %v6787_v61, %v6831_v59  ;;  %v8322_v48 = vpack.c.bf16 %v6852_v24, %v6850_v21 }
0x1072   : > { %v6713_v6 = vmul.f32 %v6676_v49, %v6636_v9  ;;  %v6714_v55 = vmul.f32 %v6676_v49, %v6637_v16  ;;  %v8320_v41 = vpack.c.bf16 %v6853_v0, %v6851_v18  ;;  %v6832_v34 = vmul.f32 0.01, %v6788_v10 }
0x1073   : > { %vm6810_vm8 = vcmp.ge.f32.partialorder %v6788_v10, 0.0  ;;  %v6833_v52 = vmul.f32 0.01, %v6789_v43  ;;  %vm6811_vm15 = vcmp.ge.f32.partialorder %v6789_v43, 0.0 }
0x1074   : > { %v6790_v33 = vadd.f32 %v14792_v14, %v6713_v6  ;;  %v6791_v45 = vadd.f32 %v14792_v14, %v6714_v55  ;;  %8321 = vmatprep.subr.bf16.mxu1 %v8320_v41  ;;  %v6854_v5 = vsel %vm6810_vm8, %v6788_v10, %v6832_v34  ;;  %v6641_v14 = vsub.f32 %v14558_v2, %v14804_v31 }
0x1075   : > { %v6681_v63 = vpop.permute.xlu0 %6680  ;;  %8323 = vmatpush1.bf16.msra.mxu1 %v8322_v48  ;;  %v6855_v29 = vsel %vm6811_vm15, %v6789_v43, %v6833_v52 }
0x1076   : > { %vm6812_vm9 = vcmp.ge.f32.partialorder %v6790_v33, 0.0  ;;  %v6834_v15 = vmul.f32 0.01, %v6790_v33  ;;  %v6715_v46 = vmul.f32 %v6681_v63, %v6638_v25  ;;  %v6716_v11 = vmul.f32 %v6681_v63, %v6639_v57 }
0x1077   : > { %v6835_v13 = vmul.f32 0.01, %v6791_v45  ;;  %vm6813_vm11 = vcmp.ge.f32.partialorder %v6791_v45, 0.0 }
0x1078   : > { %v6856_v3 = vsel %vm6812_vm9, %v6790_v33, %v6834_v15  ;;  %v6792_v42 = vadd.f32 %v14798_v50, %v6715_v46  ;;  %v6793_v39 = vadd.f32 %v14798_v50, %v6716_v11 }
0x1079   : > { %v6686_v47 = vpop.permute.xlu1 %6685  ;;  %v6857_v62 = vsel %vm6813_vm11, %v6791_v45, %v6835_v13  ;;  %v8326_v23 = vpack.c.bf16 %v6856_v3, %v6854_v5  ;;  %v509_v13 = vld [vmem:[%s15515_s13] sm:$0xff] }
0x107a   : > { %v6717_v32 = vmul.f32 %v6686_v47, %v6640_v28  ;;  %v6718_v58 = vmul.f32 %v6686_v47, %v6641_v14  ;;  %v8324_v35 = vpack.c.bf16 %v6857_v62, %v6855_v29  ;;  %v6836_v30 = vmul.f32 0.01, %v6792_v42 }
0x107b   : > { %vm6814_vm12 = vcmp.ge.f32.partialorder %v6792_v42, 0.0  ;;  %v6837_v2 = vmul.f32 0.01, %v6793_v39  ;;  %vm6815_vm14 = vcmp.ge.f32.partialorder %v6793_v39, 0.0 }
0x107c   : > { %v6794_v60 = vadd.f32 %v14796_v53, %v6717_v32  ;;  %v6795_v50 = vadd.f32 %v14796_v53, %v6718_v58  ;;  %8325 = vmatprep.subr.bf16.mxu1 %v8324_v35  ;;  %v6858_v27 = vsel %vm6814_vm12, %v6792_v42, %v6836_v30  ;;  %v6644_v53 = vsub.f32 %v14574_v54, %v14806_v56 }
0x107d   : > { %v6691_v31 = vpop.permute.xlu0 %6690  ;;  %8327 = vmatpush1.bf16.msra.mxu1 %v8326_v23  ;;  %v6859_v59 = vsel %vm6815_vm14, %v6793_v39, %v6837_v2 }
0x107e   : > { %vm6816_vm13 = vcmp.ge.f32.partialorder %v6794_v60, 0.0  ;;  %v6838_v38 = vmul.f32 0.01, %v6794_v60  ;;  %v6719_v12 = vmul.f32 %v6691_v31, %v6642_v19  ;;  %v6720_v7 = vmul.f32 %v6691_v31, %v6643_v4 }
0x107f   : > { %v6839_v8 = vmul.f32 0.01, %v6795_v50  ;;  %vm6817_vm0 = vcmp.ge.f32.partialorder %v6795_v50, 0.0 }
0x1080   : > { %v6860_v61 = vsel %vm6816_vm13, %v6794_v60, %v6838_v38  ;;  %v6796_v17 = vadd.f32 %v14800_v44, %v6719_v12  ;;  %v6797_v40 = vadd.f32 %v14800_v44, %v6720_v7 }
0x1081   : > { %v6696_v37 = vpop.permute.xlu1 %6695  ;;  %v6861_v20 = vsel %vm6817_vm0, %v6795_v50, %v6839_v8  ;;  %v8330_v26 = vpack.c.bf16 %v6860_v61, %v6858_v27  ;;  %v6624_v21 = vpop.permute.xlu0 %6623 }
0x1082   : > { %v8328_v9 = vpack.c.bf16 %v6861_v20, %v6859_v59  ;;  %v6721_v24 = vmul.f32 %v6696_v37, %v6644_v53  ;;  %v6722_v10 = vmul.f32 %v6696_v37, %v6645_v22  ;;  %v6840_v16 = vmul.f32 0.01, %v6796_v17 }
0x1083   : > { %v6841_v43 = vmul.f32 0.01, %v6797_v40  ;;  %vm6818_vm1 = vcmp.ge.f32.partialorder %v6796_v17, 0.0  ;;  %vm6819_vm2 = vcmp.ge.f32.partialorder %v6797_v40, 0.0  ;;  %v6646_v48 = vsub.f32 %v14584_v36, %v6624_v21 }
0x1084   : > { %8329 = vmatprep.subr.bf16.mxu1 %v8328_v9  ;;  %v6647_v54 = vsub.f32 %v14588_v1, %v6624_v21  ;;  %v6862_v6 = vsel %vm6818_vm1, %v6796_v17, %v6840_v16 }
0x1085   : > { %v6773_v49 = vpop.permute.xlu1 %6772  ;;  %8331 = vmatpush1.bf16.msra.mxu1 %v8330_v26  ;;  %v6863_v55 = vsel %vm6819_vm2, %v6797_v40, %v6841_v43  ;;  %v6778_v33 = vpop.permute.xlu0 %6777 }
0x1086   : > { %v6798_v44 = vadd.f32 %v6773_v49, %v6721_v24  ;;  %v6799_v0 = vadd.f32 %v6773_v49, %v6722_v10 }
0x1088   : > { %vm6820_vm3 = vcmp.ge.f32.partialorder %v6798_v44, 0.0  ;;  %vm6821_vm4 = vcmp.ge.f32.partialorder %v6799_v0, 0.0  ;;  %v6842_v51 = vmul.f32 0.01, %v6798_v44  ;;  %v6843_v56 = vmul.f32 0.01, %v6799_v0 }
0x1089   : > { %v6701_v18 = vpop.permute.xlu1 %6700 }
0x108a   : > { %v6864_v41 = vsel %vm6820_vm3, %v6798_v44, %v6842_v51  ;;  %v6723_v25 = vmul.f32 %v6701_v18, %v6646_v48  ;;  %v6724_v57 = vmul.f32 %v6701_v18, %v6647_v54  ;;  %v6865_v34 = vsel %vm6821_vm4, %v6799_v0, %v6843_v56 }
0x108b   : > { %v8334_v52 = vpack.c.bf16 %v6864_v41, %v6862_v6  ;;  %v8332_v45 = vpack.c.bf16 %v6865_v34, %v6863_v55 }
0x108c   : > { %v6800_v63 = vadd.f32 %v6778_v33, %v6723_v25  ;;  %v6801_v15 = vadd.f32 %v6778_v33, %v6724_v57 }
0x108d   : > { %8333 = vmatprep.subr.bf16.mxu1 %v8332_v45 }
0x108e   : > { %v6844_v36 = vmul.f32 0.01, %v6800_v63  ;;  %8335 = vmatpush1.bf16.msra.mxu1 %v8334_v52  ;;  %vm6823_vm5 = vcmp.ge.f32.partialorder %v6801_v15, 0.0  ;;  %v6845_v1 = vmul.f32 0.01, %v6801_v15  ;;  %vm6822_vm6 = vcmp.ge.f32.partialorder %v6800_v63, 0.0 }
0x1090   : > { %v6867_v46 = vsel %vm6823_vm5, %v6801_v15, %v6845_v1  ;;  %v6866_v11 = vsel %vm6822_vm6, %v6800_v63, %v6844_v36 }
0x1091   : > { %6891 = vmatprep.subr.mxu1 %v6867_v46 }
0x1092   : > { %6892 = vmatpush1.msra.mxu1 %v6866_v11 }
0x1093   : > { %7168 = vmatmul.mubr.msk.f32.vlgmr.msra.gmra.mrb[88].mxu1 %vm2129_vm10, %v509_v13 }
0x1166   : > { %v6937_v28 = vpop.f32.mrb[88].mxu1 }
0x1167   : > { %6942 = vst [vmem:[%s477_s23] sm:$0xff] %v6937_v28  ;;  %v6939_v5 = vpop.f32.mrb[89].mxu1 }
0x1168   : > { %6943 = vst [vmem:[%s477_s23 + $0x8] sm:$0xff] %v6939_v5 }
0x1169   : > { %8805 = shalt.err (!%p8802_p9)
}
0x116a   : > { %s8806_s30 = scalar_lea.hbm %s14867_s19, 256  ;;  %s8810_s18 = scalar_lea.hbm %s15517_s17, 512 }
0x116b   : > { %p8807_p2 = scmp.ne.s32.totalorder %s14867_s19, %s8806_s30  ;;  %p8811_p5 = scmp.lt.u32.totalorder %s14867_s19, %s15517_s17 }
0x116c   : > { %p8812_p10 = scmp.lt.u32.totalorder %s8810_s18, %s8806_s30  ;;  %p8814_p12 = scmp.lt.u32.totalorder %s8806_s30, %s14867_s19 }
0x116d   : > { %p8808_p0 = pnand %p8807_p2, %p15518_p7 }
0x116e   : > { %p8813_p4 = por %p8812_p10, %p8811_p5 }
0x116f   : > { %p8809_p3 = pneg %p8808_p0 }
0x1170   : > { %p8815_p8 = por %p8814_p12, %p8813_p4 }
0x1172   : > { %p8816_p11 = pnand %p8815_p8, %p8809_p3 }
0x1174   : > { %8819 = shalt.err (!%p8816_p11)
}
0x1175   : > { %8546 = dma.vmem_to_hbm [thread:$0]  (%p15518_p7), %s14862_s16, 256, %s14867_s19, %s6945_s21  }
0x1176 PF: > { %s15519_s5 = sld [smem:[#allocation14_spill]]  ;;  %s15520_s20 = sld [smem:[#allocation12_spill]] }
0x1177   : > { %s15521_s24 = sld [smem:[#allocation18_spill]] }
0x117c   : > { %p8568_p13 = scmp.ge.s32.totalorder %s15519_s5, 2  ;;  %s6971_s15 = sand.u32 1, %s15520_s20  }
0x117d   : > { %p15522_p1 = scmp.ne.s32.totalorder %s15521_s24, 0  ;;  %s6972_s29 = scalar_lea.sflag [#allocation4], %s6971_s15 }
0x117f   : > { %p8559_p6 = pnand %p8568_p13, %p15522_p1 }
0x1181   : > { %8845 = dma.done.wait (!%p8559_p6), %s6972_s29, 256  }
0x1182   : > { %8847 = vsyncadd (!%p8559_p6), %s6972_s29, 4294967040  ;;  %s15523_s28 = sld [smem:[#allocation15_spill]]  ;;  %s15524_s27 = sld [smem:[#allocation13_spill]] }
0x1183   : > { %s15525_s22 = sld [smem:[#allocation16_spill]]  ;;  %s15526_s25 = smov %s8854_s26 }
0x1188   : > { %p25_p9 = scmp.ge.s32.totalorder %s15523_s28, 4   ;;  %s15527_s26 = smov %s15524_s27 }
0x1189   : > { %s15528_s27 = smov %s15525_s22 }
0x118a   :  { %27 = sbr.rel (!%p25_p9) target bundleno = 8 (0x8), region = 127 }
0x1191   :  { %6977 = vsyncpa [#allocation3], 1 }
0x1192   :  { %6979 = vsyncpa [#allocation3 + $0x1], 1 }
0x1193   :  { %6980 = vsyncpa [#allocation6], 1 }
0x1194   :  { %6981 = vsyncpa [#allocation4], 1 }
0x1195   :  { %6983 = vsyncpa [#allocation4 + $0x1], 1 }

</bundles_post_ra>
